<compile_context>
chip_gen: v5e
topology: v5e:2x2
jax: 0.10.0
libtpu: 0.0.40
codegen_flags: <defaults>
</compile_context>

<pallas_src>
import functools

import jax
import jax.numpy as jnp
from jax.experimental import pallas as pl
from jax.experimental.pallas import tpu as pltpu

EPS = 1e-5


# ----------------------------------------------------------------------------
# Fused cell kernel: one grid step == one node, everything resident in VMEM.
# ----------------------------------------------------------------------------
def _cell_kernel(s0_ref, s1_ref, p0_ref, p1_ref, w1_ref, w2_ref, o_ref):
    """
    s0_ref/s1_ref : (N, H, W, Cpp)/(N, H, W, Cp)  cell inputs (NHWC)
    p0_ref/p1_ref : (Cpp, C)/(Cp, C)              preproc 1x1-conv weights
    w1_ref/w2_ref : (1, 2, 9C, C)  merged depthwise*pointwise weights for this
                                   node's two edges (DilConv block 1 / block 2)
    o_ref         : (1, N, H, W, C) this node's channel slice of the cell output
    """

    def bn(y):
        # BatchNorm2d(affine=False), training-mode (biased) batch statistics,
        # fused right after the producing matmul; stats over all N*H*W rows.
        mean = jnp.mean(y, axis=0, keepdims=True)
        var = jnp.mean(jnp.square(y - mean), axis=0, keepdims=True)
        return (y - mean) * jax.lax.rsqrt(var + EPS)

    def std_conv(x, w):
        # ops.StdConv: ReLU -> 1x1 conv (plain matmul) -> BN.
        n, h, ww, cin = x.shape
        xf = jnp.maximum(x, 0.0).reshape(n * h * ww, cin)
        y = bn(jnp.dot(xf, w, preferred_element_type=jnp.float32))
        return y.reshape(n, h, ww, w.shape[-1])

    def conv3x3_bn(x, wmat):
        # One DilConv block with depthwise 3x3 + pointwise 1x1 folded into a
        # single dense 3x3 conv: ReLU -> im2col (K = 9*C) MXU matmul -> BN.
        n, h, ww, c = x.shape
        xr = jnp.maximum(x, 0.0)
        # In-VMEM zero padding.  The W halo uses 8-wide (sublane-aligned) zero
        # slabs so every concat piece is tile aligned; H is an untiled dim.
        zw = jnp.zeros((n, h, 8, c), jnp.float32)
        xp = jnp.concatenate([zw, xr, zw], axis=2)            # (n, h, ww+16, c)
        zh = jnp.zeros((n, 1, ww + 16, c), jnp.float32)
        xp = jnp.concatenate([zh, xp, zh], axis=1)            # (n, h+2, ww+16, c)
        # im2col: interior starts at padded column 8, so tap (dh, dw) reads
        # columns 7+dw .. 7+dw+ww-1 and rows dh .. dh+h-1.
        cols = [xp[:, dh:dh + h, 7 + dw:7 + dw + ww, :]
                for dh in range(3) for dw in range(3)]
        patches = jnp.concatenate(cols, axis=-1).reshape(n * h * ww, 9 * c)
        y = bn(jnp.dot(patches, wmat, preferred_element_type=jnp.float32))
        return y.reshape(n, h, ww, wmat.shape[-1])

    # Preprocessing (StdConv on both cell inputs).  Recomputed per node: two
    # tiny K<=Cin matmuls, much cheaper than an extra launch + HBM round trip.
    t0 = std_conv(s0_ref[...], p0_ref[...])
    t1 = std_conv(s1_ref[...], p1_ref[...])

    w1 = w1_ref[...]   # (1, 2, 9C, C)
    w2 = w2_ref[...]

    # Node: LayerChoice fixed to SepConv(3,1,1); InputChoice fixed to the first
    # two candidate inputs (t0, t1); node output = sum of the two edge outputs.
    acc = None
    for e, x in enumerate((t0, t1)):
        y = conv3x3_bn(x, w1[0, e])     # DilConv block 1
        y = conv3x3_bn(y, w2[0, e])     # DilConv block 2
        acc = y if acc is None else acc + y

    o_ref[...] = acc[None]


# ----------------------------------------------------------------------------
# Wrapper: weight folding + single pallas_call + NCHW boundary transposes.
# ----------------------------------------------------------------------------
def _merge_dw_pw(dw, pw):
    """Fold depthwise (3,3,C) and pointwise (C,Cout) into one im2col weight
    (9*C, Cout):  W[kh,kw,ci,co] = dw[kh,kw,ci] * pw[ci,co]."""
    c, cout = pw.shape
    w = dw[:, :, :, None] * pw[None, None, :, :]
    return w.reshape(9 * c, cout)


def cell_forward(s0_nchw, s1_nchw, params, n_nodes):
    # NCHW (PyTorch convention) -> NHWC (channels on the lane axis) for the kernel.
    s0 = jnp.transpose(s0_nchw, (0, 2, 3, 1)).astype(jnp.float32)
    s1 = jnp.transpose(s1_nchw, (0, 2, 3, 1)).astype(jnp.float32)
    N, H, W, Cpp = s0.shape
    Cp = s1.shape[-1]
    C = params["pre0_w"].shape[1]

    # Merged dw*pw weights, stacked (n_nodes, 2 edges, 9C, C).  Tiny (9*C*C per
    # edge) so building them in the XLA wrapper costs nothing.
    w1 = jnp.stack([jnp.stack([_merge_dw_pw(params["nodes"][n][e]["dw1"],
                                            params["nodes"][n][e]["pw1"])
                               for e in range(2)]) for n in range(n_nodes)])
    w2 = jnp.stack([jnp.stack([_merge_dw_pw(params["nodes"][n][e]["dw2"],
                                            params["nodes"][n][e]["pw2"])
                               for e in range(2)]) for n in range(n_nodes)])

    out = pl.pallas_call(
        _cell_kernel,
        out_shape=jax.ShapeDtypeStruct((n_nodes, N, H, W, C), jnp.float32),
        grid=(n_nodes,),
        in_specs=[
            pl.BlockSpec((N, H, W, Cpp), lambda i: (0, 0, 0, 0)),
            pl.BlockSpec((N, H, W, Cp), lambda i: (0, 0, 0, 0)),
            pl.BlockSpec((Cpp, C), lambda i: (0, 0)),
            pl.BlockSpec((Cp, C), lambda i: (0, 0)),
            pl.BlockSpec((1, 2, 9 * C, C), lambda i: (i, 0, 0, 0)),
            pl.BlockSpec((1, 2, 9 * C, C), lambda i: (i, 0, 0, 0)),
        ],
        out_specs=pl.BlockSpec((1, N, H, W, C), lambda i: (i, 0, 0, 0, 0)),
        compiler_params=pltpu.CompilerParams(
            dimension_semantics=("parallel",)),   # v7x: nodes across TensorCores
    )(s0, s1, params["pre0_w"], params["pre1_w"], w1, w2)

    # (n_nodes, N, H, W, C) -> channel concat in NCHW: (N, n_nodes*C, H, W)
    return jnp.transpose(out, (1, 0, 4, 2, 3)).reshape(N, n_nodes * C, H, W)


# ----------------------------------------------------------------------------
# Pure-JAX reference (mirrors the PyTorch module op-by-op; no Pallas)
# ----------------------------------------------------------------------------
def _bn_ref(x):
    mean = jnp.mean(x, axis=(0, 1, 2), keepdims=True)
    var = jnp.mean(jnp.square(x - mean), axis=(0, 1, 2), keepdims=True)
    return (x - mean) * jax.lax.rsqrt(var + EPS)


def _std_conv_ref(x, w):
    return _bn_ref(jnp.einsum("nhwc,cd->nhwd", jnp.maximum(x, 0.0), w))


def _dil_block_ref(x, dw, pw):
    N, H, W, _ = x.shape
    y = jnp.maximum(x, 0.0)
    yp = jnp.pad(y, ((0, 0), (1, 1), (1, 1), (0, 0)))
    dwout = jnp.zeros_like(y)
    for kh in range(3):
        for kw in range(3):
            dwout = dwout + yp[:, kh:kh + H, kw:kw + W, :] * dw[kh, kw]
    return _bn_ref(jnp.einsum("nhwc,cd->nhwd", dwout, pw))


def _sep_conv_ref(x, p):
    y = _dil_block_ref(x, p["dw1"], p["pw1"])
    return _dil_block_ref(y, p["dw2"], p["pw2"])


def cell_forward_ref(s0_nchw, s1_nchw, params, n_nodes):
    s0 = jnp.transpose(s0_nchw, (0, 2, 3, 1)).astype(jnp.float32)
    s1 = jnp.transpose(s1_nchw, (0, 2, 3, 1)).astype(jnp.float32)
    t0 = _std_conv_ref(s0, params["pre0_w"])
    t1 = _std_conv_ref(s1, params["pre1_w"])
    outs = []
    for n in range(n_nodes):
        a = _sep_conv_ref(t0, params["nodes"][n][0])
        b = _sep_conv_ref(t1, params["nodes"][n][1])
        outs.append(a + b)
    return jnp.transpose(jnp.concatenate(outs, axis=-1), (0, 3, 1, 2))


# ----------------------------------------------------------------------------
# Deterministic parameter construction
# ----------------------------------------------------------------------------
def make_params(key, channels_pp, channels_p, channels, n_nodes):
    ks = iter(jax.random.split(key, 2 + 8 * n_nodes))

    def nrm(shape, scale):
        return scale * jax.random.normal(next(ks), shape, dtype=jnp.float32)

    params = {
        "pre0_w": nrm((channels_pp, channels), 0.3),
        "pre1_w": nrm((channels_p, channels), 0.3),
        "nodes": [],
    }
    for _ in range(n_nodes):
        edges = []
        for _ in range(2):  # the two chosen input edges per node
            edges.append({
                "dw1": nrm((3, 3, channels), 0.3),
                "pw1": nrm((channels, channels), 0.3),
                "dw2": nrm((3, 3, channels), 0.3),
                "pw2": nrm((channels, channels), 0.3),
            })
        params["nodes"].append(edges)
    return params


# ----------------------------------------------------------------------------
# Demo
# ----------------------------------------------------------------------------
if __name__ == "__main__":
    # Normal cell config (reduction_p=False, reduction=False).
    N, H, W = 2, 8, 8
    channels_pp, channels_p, channels = 8, 8, 16
    n_nodes = 2

    key = jax.random.PRNGKey(0)
    k0, k1, kp = jax.random.split(key, 3)
    s0 = jax.random.normal(k0, (N, channels_pp, H, W), dtype=jnp.float32)  # NCHW
    s1 = jax.random.normal(k1, (N, channels_p, H, W), dtype=jnp.float32)   # NCHW
    params = make_params(kp, channels_pp, channels_p, channels, n_nodes)

    fwd = jax.jit(functools.partial(cell_forward, n_nodes=n_nodes))
    out = jax.block_until_ready(fwd(s0, s1, params))

    expected = (N, n_nodes * channels, H, W)
    assert out.shape == expected, (out.shape, expected)
    assert bool(jnp.all(jnp.isfinite(out)))

    ref = jax.block_until_ready(
        jax.jit(functools.partial(cell_forward_ref, n_nodes=n_nodes))(s0, s1, params))
    max_err = float(jnp.max(jnp.abs(out - ref)))
    assert max_err < 5e-3, max_err

    print("KERNEL_OK")
</pallas_src>

<mosaic_0001>
module attributes {stable_mosaic.version = 11 : i64} {
  func.func @_cell_kernel(%arg0: i32, %arg1: memref<2x8x8x8xf32, #tpu.memory_space<vmem>>, %arg2: memref<2x8x8x8xf32, #tpu.memory_space<vmem>>, %arg3: memref<8x16xf32, #tpu.memory_space<vmem>>, %arg4: memref<8x16xf32, #tpu.memory_space<vmem>>, %arg5: memref<1x2x144x16xf32, #tpu.memory_space<vmem>>, %arg6: memref<1x2x144x16xf32, #tpu.memory_space<vmem>>, %arg7: memref<1x2x8x8x16xf32, #tpu.memory_space<vmem>>) attributes {dimension_semantics = [#tpu.dimension_semantics<parallel>], iteration_bounds = array<i64: 2>, scalar_prefetch = 0 : i64, scratch_operands = 0 : i64, tpu.core_type = #tpu.core_type<tc>, window_params = [{pipeline_mode = #tpu.pipeline_mode<synchronous>, transform_indices = @transform_0, window_bounds = array<i64: 2, 8, 8, 8>}, {pipeline_mode = #tpu.pipeline_mode<synchronous>, transform_indices = @transform_1, window_bounds = array<i64: 2, 8, 8, 8>}, {pipeline_mode = #tpu.pipeline_mode<synchronous>, transform_indices = @transform_2, window_bounds = array<i64: 8, 16>}, {pipeline_mode = #tpu.pipeline_mode<synchronous>, transform_indices = @transform_3, window_bounds = array<i64: 8, 16>}, {transform_indices = @transform_4, window_bounds = array<i64: 1, 2, 144, 16>}, {transform_indices = @transform_5, window_bounds = array<i64: 1, 2, 144, 16>}, {transform_indices = @transform_6, window_bounds = array<i64: 1, 2, 8, 8, 16>}]} {
    %c0 = arith.constant 0 : index
    %c0_0 = arith.constant 0 : index
    %c0_1 = arith.constant 0 : index
    %c0_2 = arith.constant 0 : index
    %0 = vector.load %arg1[%c0, %c0_0, %c0_1, %c0_2] : memref<2x8x8x8xf32, #tpu.memory_space<vmem>>, vector<2x8x8x8xf32>
    %c0_3 = arith.constant 0 : index
    %c0_4 = arith.constant 0 : index
    %1 = vector.load %arg3[%c0_3, %c0_4] : memref<8x16xf32, #tpu.memory_space<vmem>>, vector<8x16xf32>
    %cst = arith.constant 0.000000e+00 : f32
    %2 = vector.broadcast %cst : f32 to vector<2x8x8x8xf32>
    %3 = arith.maximumf %0, %2 : vector<2x8x8x8xf32>
    %4 = vector.shape_cast %3 : vector<2x8x8x8xf32> to vector<128x8xf32>
    %cst_5 = arith.constant dense<0.000000e+00> : vector<128x16xf32>
    %5 = tpu.matmul %4, %1, %cst_5 {dimension_numbers = #tpu.dot_dimension_numbers<[1], [0], [0], [1], [0, 0, 1, 1], [], []>} : vector<128x8xf32>, vector<8x16xf32>, vector<128x16xf32> -> vector<128x16xf32>
    %cst_6 = arith.constant dense<0.000000e+00> : vector<16xf32>
    %6 = vector.multi_reduction <add>, %5, %cst_6 [0] : vector<128x16xf32> to vector<16xf32>
    %7 = vector.shape_cast %6 : vector<16xf32> to vector<1x16xf32>
    %cst_7 = arith.constant 1.280000e+02 : f32
    %8 = vector.broadcast %cst_7 : f32 to vector<1x16xf32>
    %9 = arith.divf %7, %8 : vector<1x16xf32>
    %10 = vector.broadcast %9 : vector<1x16xf32> to vector<128x16xf32>
    %11 = arith.subf %5, %10 : vector<128x16xf32>
    %12 = arith.mulf %11, %11 : vector<128x16xf32>
    %cst_8 = arith.constant dense<0.000000e+00> : vector<16xf32>
    %13 = vector.multi_reduction <add>, %12, %cst_8 [0] : vector<128x16xf32> to vector<16xf32>
    %14 = vector.shape_cast %13 : vector<16xf32> to vector<1x16xf32>
    %cst_9 = arith.constant 1.280000e+02 : f32
    %15 = vector.broadcast %cst_9 : f32 to vector<1x16xf32>
    %16 = arith.divf %14, %15 : vector<1x16xf32>
    %17 = vector.broadcast %9 : vector<1x16xf32> to vector<128x16xf32>
    %18 = arith.subf %5, %17 : vector<128x16xf32>
    %cst_10 = arith.constant 9.99999974E-6 : f32
    %19 = vector.broadcast %cst_10 : f32 to vector<1x16xf32>
    %20 = arith.addf %16, %19 : vector<1x16xf32>
    %21 = math.rsqrt %20 : vector<1x16xf32>
    %22 = vector.broadcast %21 : vector<1x16xf32> to vector<128x16xf32>
    %23 = arith.mulf %18, %22 : vector<128x16xf32>
    %24 = vector.shape_cast %23 : vector<128x16xf32> to vector<2x8x8x16xf32>
    %c0_11 = arith.constant 0 : index
    %c0_12 = arith.constant 0 : index
    %c0_13 = arith.constant 0 : index
    %c0_14 = arith.constant 0 : index
    %25 = vector.load %arg2[%c0_11, %c0_12, %c0_13, %c0_14] : memref<2x8x8x8xf32, #tpu.memory_space<vmem>>, vector<2x8x8x8xf32>
    %c0_15 = arith.constant 0 : index
    %c0_16 = arith.constant 0 : index
    %26 = vector.load %arg4[%c0_15, %c0_16] : memref<8x16xf32, #tpu.memory_space<vmem>>, vector<8x16xf32>
    %cst_17 = arith.constant 0.000000e+00 : f32
    %27 = vector.broadcast %cst_17 : f32 to vector<2x8x8x8xf32>
    %28 = arith.maximumf %25, %27 : vector<2x8x8x8xf32>
    %29 = vector.shape_cast %28 : vector<2x8x8x8xf32> to vector<128x8xf32>
    %cst_18 = arith.constant dense<0.000000e+00> : vector<128x16xf32>
    %30 = tpu.matmul %29, %26, %cst_18 {dimension_numbers = #tpu.dot_dimension_numbers<[1], [0], [0], [1], [0, 0, 1, 1], [], []>} : vector<128x8xf32>, vector<8x16xf32>, vector<128x16xf32> -> vector<128x16xf32>
    %cst_19 = arith.constant dense<0.000000e+00> : vector<16xf32>
    %31 = vector.multi_reduction <add>, %30, %cst_19 [0] : vector<128x16xf32> to vector<16xf32>
    %32 = vector.shape_cast %31 : vector<16xf32> to vector<1x16xf32>
    %cst_20 = arith.constant 1.280000e+02 : f32
    %33 = vector.broadcast %cst_20 : f32 to vector<1x16xf32>
    %34 = arith.divf %32, %33 : vector<1x16xf32>
    %35 = vector.broadcast %34 : vector<1x16xf32> to vector<128x16xf32>
    %36 = arith.subf %30, %35 : vector<128x16xf32>
    %37 = arith.mulf %36, %36 : vector<128x16xf32>
    %cst_21 = arith.constant dense<0.000000e+00> : vector<16xf32>
    %38 = vector.multi_reduction <add>, %37, %cst_21 [0] : vector<128x16xf32> to vector<16xf32>
    %39 = vector.shape_cast %38 : vector<16xf32> to vector<1x16xf32>
    %cst_22 = arith.constant 1.280000e+02 : f32
    %40 = vector.broadcast %cst_22 : f32 to vector<1x16xf32>
    %41 = arith.divf %39, %40 : vector<1x16xf32>
    %42 = vector.broadcast %34 : vector<1x16xf32> to vector<128x16xf32>
    %43 = arith.subf %30, %42 : vector<128x16xf32>
    %cst_23 = arith.constant 9.99999974E-6 : f32
    %44 = vector.broadcast %cst_23 : f32 to vector<1x16xf32>
    %45 = arith.addf %41, %44 : vector<1x16xf32>
    %46 = math.rsqrt %45 : vector<1x16xf32>
    %47 = vector.broadcast %46 : vector<1x16xf32> to vector<128x16xf32>
    %48 = arith.mulf %43, %47 : vector<128x16xf32>
    %49 = vector.shape_cast %48 : vector<128x16xf32> to vector<2x8x8x16xf32>
    %c0_24 = arith.constant 0 : index
    %c0_25 = arith.constant 0 : index
    %c0_26 = arith.constant 0 : index
    %c0_27 = arith.constant 0 : index
    %50 = vector.load %arg5[%c0_24, %c0_25, %c0_26, %c0_27] : memref<1x2x144x16xf32, #tpu.memory_space<vmem>>, vector<1x2x144x16xf32>
    %c0_28 = arith.constant 0 : index
    %c0_29 = arith.constant 0 : index
    %c0_30 = arith.constant 0 : index
    %c0_31 = arith.constant 0 : index
    %51 = vector.load %arg6[%c0_28, %c0_29, %c0_30, %c0_31] : memref<1x2x144x16xf32, #tpu.memory_space<vmem>>, vector<1x2x144x16xf32>
    %52 = vector.extract_strided_slice %50 {offsets = [0, 0, 0, 0], sizes = [1, 1, 144, 16], strides = [1, 1, 1, 1]} : vector<1x2x144x16xf32> to vector<1x1x144x16xf32>
    %53 = vector.shape_cast %52 : vector<1x1x144x16xf32> to vector<144x16xf32>
    %cst_32 = arith.constant 0.000000e+00 : f32
    %54 = vector.broadcast %cst_32 : f32 to vector<2x8x8x16xf32>
    %55 = arith.maximumf %24, %54 : vector<2x8x8x16xf32>
    %cst_33 = arith.constant 0.000000e+00 : f32
    %56 = vector.broadcast %cst_33 : f32 to vector<2x8x8x16xf32>
    %57 = tpu.concatenate %56, %55, %56 in 2 : vector<2x8x8x16xf32>, vector<2x8x8x16xf32>, vector<2x8x8x16xf32> -> vector<2x8x24x16xf32>
    %cst_34 = arith.constant 0.000000e+00 : f32
    %58 = vector.broadcast %cst_34 : f32 to vector<2x1x24x16xf32>
    %59 = tpu.concatenate %58, %57, %58 in 1 : vector<2x1x24x16xf32>, vector<2x8x24x16xf32>, vector<2x1x24x16xf32> -> vector<2x10x24x16xf32>
    %60 = vector.extract_strided_slice %59 {offsets = [0, 0, 7, 0], sizes = [2, 8, 8, 16], strides = [1, 1, 1, 1]} : vector<2x10x24x16xf32> to vector<2x8x8x16xf32>
    %61 = vector.extract_strided_slice %59 {offsets = [0, 0, 8, 0], sizes = [2, 8, 8, 16], strides = [1, 1, 1, 1]} : vector<2x10x24x16xf32> to vector<2x8x8x16xf32>
    %62 = vector.extract_strided_slice %59 {offsets = [0, 0, 9, 0], sizes = [2, 8, 8, 16], strides = [1, 1, 1, 1]} : vector<2x10x24x16xf32> to vector<2x8x8x16xf32>
    %63 = vector.extract_strided_slice %59 {offsets = [0, 1, 7, 0], sizes = [2, 8, 8, 16], strides = [1, 1, 1, 1]} : vector<2x10x24x16xf32> to vector<2x8x8x16xf32>
    %64 = vector.extract_strided_slice %59 {offsets = [0, 1, 8, 0], sizes = [2, 8, 8, 16], strides = [1, 1, 1, 1]} : vector<2x10x24x16xf32> to vector<2x8x8x16xf32>
    %65 = vector.extract_strided_slice %59 {offsets = [0, 1, 9, 0], sizes = [2, 8, 8, 16], strides = [1, 1, 1, 1]} : vector<2x10x24x16xf32> to vector<2x8x8x16xf32>
    %66 = vector.extract_strided_slice %59 {offsets = [0, 2, 7, 0], sizes = [2, 8, 8, 16], strides = [1, 1, 1, 1]} : vector<2x10x24x16xf32> to vector<2x8x8x16xf32>
    %67 = vector.extract_strided_slice %59 {offsets = [0, 2, 8, 0], sizes = [2, 8, 8, 16], strides = [1, 1, 1, 1]} : vector<2x10x24x16xf32> to vector<2x8x8x16xf32>
    %68 = vector.extract_strided_slice %59 {offsets = [0, 2, 9, 0], sizes = [2, 8, 8, 16], strides = [1, 1, 1, 1]} : vector<2x10x24x16xf32> to vector<2x8x8x16xf32>
    %69 = tpu.concatenate %60, %61, %62, %63, %64, %65, %66, %67, %68 in 3 : vector<2x8x8x16xf32>, vector<2x8x8x16xf32>, vector<2x8x8x16xf32>, vector<2x8x8x16xf32>, vector<2x8x8x16xf32>, vector<2x8x8x16xf32>, vector<2x8x8x16xf32>, vector<2x8x8x16xf32>, vector<2x8x8x16xf32> -> vector<2x8x8x144xf32>
    %70 = vector.shape_cast %69 : vector<2x8x8x144xf32> to vector<128x144xf32>
    %cst_35 = arith.constant dense<0.000000e+00> : vector<128x16xf32>
    %71 = tpu.matmul %70, %53, %cst_35 {dimension_numbers = #tpu.dot_dimension_numbers<[1], [0], [0], [1], [0, 0, 1, 1], [], []>} : vector<128x144xf32>, vector<144x16xf32>, vector<128x16xf32> -> vector<128x16xf32>
    %cst_36 = arith.constant dense<0.000000e+00> : vector<16xf32>
    %72 = vector.multi_reduction <add>, %71, %cst_36 [0] : vector<128x16xf32> to vector<16xf32>
    %73 = vector.shape_cast %72 : vector<16xf32> to vector<1x16xf32>
    %cst_37 = arith.constant 1.280000e+02 : f32
    %74 = vector.broadcast %cst_37 : f32 to vector<1x16xf32>
    %75 = arith.divf %73, %74 : vector<1x16xf32>
    %76 = vector.broadcast %75 : vector<1x16xf32> to vector<128x16xf32>
    %77 = arith.subf %71, %76 : vector<128x16xf32>
    %78 = arith.mulf %77, %77 : vector<128x16xf32>
    %cst_38 = arith.constant dense<0.000000e+00> : vector<16xf32>
    %79 = vector.multi_reduction <add>, %78, %cst_38 [0] : vector<128x16xf32> to vector<16xf32>
    %80 = vector.shape_cast %79 : vector<16xf32> to vector<1x16xf32>
    %cst_39 = arith.constant 1.280000e+02 : f32
    %81 = vector.broadcast %cst_39 : f32 to vector<1x16xf32>
    %82 = arith.divf %80, %81 : vector<1x16xf32>
    %83 = vector.broadcast %75 : vector<1x16xf32> to vector<128x16xf32>
    %84 = arith.subf %71, %83 : vector<128x16xf32>
    %cst_40 = arith.constant 9.99999974E-6 : f32
    %85 = vector.broadcast %cst_40 : f32 to vector<1x16xf32>
    %86 = arith.addf %82, %85 : vector<1x16xf32>
    %87 = math.rsqrt %86 : vector<1x16xf32>
    %88 = vector.broadcast %87 : vector<1x16xf32> to vector<128x16xf32>
    %89 = arith.mulf %84, %88 : vector<128x16xf32>
    %90 = vector.shape_cast %89 : vector<128x16xf32> to vector<2x8x8x16xf32>
    %91 = vector.extract_strided_slice %51 {offsets = [0, 0, 0, 0], sizes = [1, 1, 144, 16], strides = [1, 1, 1, 1]} : vector<1x2x144x16xf32> to vector<1x1x144x16xf32>
    %92 = vector.shape_cast %91 : vector<1x1x144x16xf32> to vector<144x16xf32>
    %cst_41 = arith.constant 0.000000e+00 : f32
    %93 = vector.broadcast %cst_41 : f32 to vector<2x8x8x16xf32>
    %94 = arith.maximumf %90, %93 : vector<2x8x8x16xf32>
    %cst_42 = arith.constant 0.000000e+00 : f32
    %95 = vector.broadcast %cst_42 : f32 to vector<2x8x8x16xf32>
    %96 = tpu.concatenate %95, %94, %95 in 2 : vector<2x8x8x16xf32>, vector<2x8x8x16xf32>, vector<2x8x8x16xf32> -> vector<2x8x24x16xf32>
    %cst_43 = arith.constant 0.000000e+00 : f32
    %97 = vector.broadcast %cst_43 : f32 to vector<2x1x24x16xf32>
    %98 = tpu.concatenate %97, %96, %97 in 1 : vector<2x1x24x16xf32>, vector<2x8x24x16xf32>, vector<2x1x24x16xf32> -> vector<2x10x24x16xf32>
    %99 = vector.extract_strided_slice %98 {offsets = [0, 0, 7, 0], sizes = [2, 8, 8, 16], strides = [1, 1, 1, 1]} : vector<2x10x24x16xf32> to vector<2x8x8x16xf32>
    %100 = vector.extract_strided_slice %98 {offsets = [0, 0, 8, 0], sizes = [2, 8, 8, 16], strides = [1, 1, 1, 1]} : vector<2x10x24x16xf32> to vector<2x8x8x16xf32>
    %101 = vector.extract_strided_slice %98 {offsets = [0, 0, 9, 0], sizes = [2, 8, 8, 16], strides = [1, 1, 1, 1]} : vector<2x10x24x16xf32> to vector<2x8x8x16xf32>
    %102 = vector.extract_strided_slice %98 {offsets = [0, 1, 7, 0], sizes = [2, 8, 8, 16], strides = [1, 1, 1, 1]} : vector<2x10x24x16xf32> to vector<2x8x8x16xf32>
    %103 = vector.extract_strided_slice %98 {offsets = [0, 1, 8, 0], sizes = [2, 8, 8, 16], strides = [1, 1, 1, 1]} : vector<2x10x24x16xf32> to vector<2x8x8x16xf32>
    %104 = vector.extract_strided_slice %98 {offsets = [0, 1, 9, 0], sizes = [2, 8, 8, 16], strides = [1, 1, 1, 1]} : vector<2x10x24x16xf32> to vector<2x8x8x16xf32>
    %105 = vector.extract_strided_slice %98 {offsets = [0, 2, 7, 0], sizes = [2, 8, 8, 16], strides = [1, 1, 1, 1]} : vector<2x10x24x16xf32> to vector<2x8x8x16xf32>
    %106 = vector.extract_strided_slice %98 {offsets = [0, 2, 8, 0], sizes = [2, 8, 8, 16], strides = [1, 1, 1, 1]} : vector<2x10x24x16xf32> to vector<2x8x8x16xf32>
    %107 = vector.extract_strided_slice %98 {offsets = [0, 2, 9, 0], sizes = [2, 8, 8, 16], strides = [1, 1, 1, 1]} : vector<2x10x24x16xf32> to vector<2x8x8x16xf32>
    %108 = tpu.concatenate %99, %100, %101, %102, %103, %104, %105, %106, %107 in 3 : vector<2x8x8x16xf32>, vector<2x8x8x16xf32>, vector<2x8x8x16xf32>, vector<2x8x8x16xf32>, vector<2x8x8x16xf32>, vector<2x8x8x16xf32>, vector<2x8x8x16xf32>, vector<2x8x8x16xf32>, vector<2x8x8x16xf32> -> vector<2x8x8x144xf32>
    %109 = vector.shape_cast %108 : vector<2x8x8x144xf32> to vector<128x144xf32>
    %cst_44 = arith.constant dense<0.000000e+00> : vector<128x16xf32>
    %110 = tpu.matmul %109, %92, %cst_44 {dimension_numbers = #tpu.dot_dimension_numbers<[1], [0], [0], [1], [0, 0, 1, 1], [], []>} : vector<128x144xf32>, vector<144x16xf32>, vector<128x16xf32> -> vector<128x16xf32>
    %cst_45 = arith.constant dense<0.000000e+00> : vector<16xf32>
    %111 = vector.multi_reduction <add>, %110, %cst_45 [0] : vector<128x16xf32> to vector<16xf32>
    %112 = vector.shape_cast %111 : vector<16xf32> to vector<1x16xf32>
    %cst_46 = arith.constant 1.280000e+02 : f32
    %113 = vector.broadcast %cst_46 : f32 to vector<1x16xf32>
    %114 = arith.divf %112, %113 : vector<1x16xf32>
    %115 = vector.broadcast %114 : vector<1x16xf32> to vector<128x16xf32>
    %116 = arith.subf %110, %115 : vector<128x16xf32>
    %117 = arith.mulf %116, %116 : vector<128x16xf32>
    %cst_47 = arith.constant dense<0.000000e+00> : vector<16xf32>
    %118 = vector.multi_reduction <add>, %117, %cst_47 [0] : vector<128x16xf32> to vector<16xf32>
    %119 = vector.shape_cast %118 : vector<16xf32> to vector<1x16xf32>
    %cst_48 = arith.constant 1.280000e+02 : f32
    %120 = vector.broadcast %cst_48 : f32 to vector<1x16xf32>
    %121 = arith.divf %119, %120 : vector<1x16xf32>
    %122 = vector.broadcast %114 : vector<1x16xf32> to vector<128x16xf32>
    %123 = arith.subf %110, %122 : vector<128x16xf32>
    %cst_49 = arith.constant 9.99999974E-6 : f32
    %124 = vector.broadcast %cst_49 : f32 to vector<1x16xf32>
    %125 = arith.addf %121, %124 : vector<1x16xf32>
    %126 = math.rsqrt %125 : vector<1x16xf32>
    %127 = vector.broadcast %126 : vector<1x16xf32> to vector<128x16xf32>
    %128 = arith.mulf %123, %127 : vector<128x16xf32>
    %129 = vector.shape_cast %128 : vector<128x16xf32> to vector<2x8x8x16xf32>
    %130 = vector.extract_strided_slice %50 {offsets = [0, 1, 0, 0], sizes = [1, 1, 144, 16], strides = [1, 1, 1, 1]} : vector<1x2x144x16xf32> to vector<1x1x144x16xf32>
    %131 = vector.shape_cast %130 : vector<1x1x144x16xf32> to vector<144x16xf32>
    %cst_50 = arith.constant 0.000000e+00 : f32
    %132 = vector.broadcast %cst_50 : f32 to vector<2x8x8x16xf32>
    %133 = arith.maximumf %49, %132 : vector<2x8x8x16xf32>
    %cst_51 = arith.constant 0.000000e+00 : f32
    %134 = vector.broadcast %cst_51 : f32 to vector<2x8x8x16xf32>
    %135 = tpu.concatenate %134, %133, %134 in 2 : vector<2x8x8x16xf32>, vector<2x8x8x16xf32>, vector<2x8x8x16xf32> -> vector<2x8x24x16xf32>
    %cst_52 = arith.constant 0.000000e+00 : f32
    %136 = vector.broadcast %cst_52 : f32 to vector<2x1x24x16xf32>
    %137 = tpu.concatenate %136, %135, %136 in 1 : vector<2x1x24x16xf32>, vector<2x8x24x16xf32>, vector<2x1x24x16xf32> -> vector<2x10x24x16xf32>
    %138 = vector.extract_strided_slice %137 {offsets = [0, 0, 7, 0], sizes = [2, 8, 8, 16], strides = [1, 1, 1, 1]} : vector<2x10x24x16xf32> to vector<2x8x8x16xf32>
    %139 = vector.extract_strided_slice %137 {offsets = [0, 0, 8, 0], sizes = [2, 8, 8, 16], strides = [1, 1, 1, 1]} : vector<2x10x24x16xf32> to vector<2x8x8x16xf32>
    %140 = vector.extract_strided_slice %137 {offsets = [0, 0, 9, 0], sizes = [2, 8, 8, 16], strides = [1, 1, 1, 1]} : vector<2x10x24x16xf32> to vector<2x8x8x16xf32>
    %141 = vector.extract_strided_slice %137 {offsets = [0, 1, 7, 0], sizes = [2, 8, 8, 16], strides = [1, 1, 1, 1]} : vector<2x10x24x16xf32> to vector<2x8x8x16xf32>
    %142 = vector.extract_strided_slice %137 {offsets = [0, 1, 8, 0], sizes = [2, 8, 8, 16], strides = [1, 1, 1, 1]} : vector<2x10x24x16xf32> to vector<2x8x8x16xf32>
    %143 = vector.extract_strided_slice %137 {offsets = [0, 1, 9, 0], sizes = [2, 8, 8, 16], strides = [1, 1, 1, 1]} : vector<2x10x24x16xf32> to vector<2x8x8x16xf32>
    %144 = vector.extract_strided_slice %137 {offsets = [0, 2, 7, 0], sizes = [2, 8, 8, 16], strides = [1, 1, 1, 1]} : vector<2x10x24x16xf32> to vector<2x8x8x16xf32>
    %145 = vector.extract_strided_slice %137 {offsets = [0, 2, 8, 0], sizes = [2, 8, 8, 16], strides = [1, 1, 1, 1]} : vector<2x10x24x16xf32> to vector<2x8x8x16xf32>
    %146 = vector.extract_strided_slice %137 {offsets = [0, 2, 9, 0], sizes = [2, 8, 8, 16], strides = [1, 1, 1, 1]} : vector<2x10x24x16xf32> to vector<2x8x8x16xf32>
    %147 = tpu.concatenate %138, %139, %140, %141, %142, %143, %144, %145, %146 in 3 : vector<2x8x8x16xf32>, vector<2x8x8x16xf32>, vector<2x8x8x16xf32>, vector<2x8x8x16xf32>, vector<2x8x8x16xf32>, vector<2x8x8x16xf32>, vector<2x8x8x16xf32>, vector<2x8x8x16xf32>, vector<2x8x8x16xf32> -> vector<2x8x8x144xf32>
    %148 = vector.shape_cast %147 : vector<2x8x8x144xf32> to vector<128x144xf32>
    %cst_53 = arith.constant dense<0.000000e+00> : vector<128x16xf32>
    %149 = tpu.matmul %148, %131, %cst_53 {dimension_numbers = #tpu.dot_dimension_numbers<[1], [0], [0], [1], [0, 0, 1, 1], [], []>} : vector<128x144xf32>, vector<144x16xf32>, vector<128x16xf32> -> vector<128x16xf32>
    %cst_54 = arith.constant dense<0.000000e+00> : vector<16xf32>
    %150 = vector.multi_reduction <add>, %149, %cst_54 [0] : vector<128x16xf32> to vector<16xf32>
    %151 = vector.shape_cast %150 : vector<16xf32> to vector<1x16xf32>
    %cst_55 = arith.constant 1.280000e+02 : f32
    %152 = vector.broadcast %cst_55 : f32 to vector<1x16xf32>
    %153 = arith.divf %151, %152 : vector<1x16xf32>
    %154 = vector.broadcast %153 : vector<1x16xf32> to vector<128x16xf32>
    %155 = arith.subf %149, %154 : vector<128x16xf32>
    %156 = arith.mulf %155, %155 : vector<128x16xf32>
    %cst_56 = arith.constant dense<0.000000e+00> : vector<16xf32>
    %157 = vector.multi_reduction <add>, %156, %cst_56 [0] : vector<128x16xf32> to vector<16xf32>
    %158 = vector.shape_cast %157 : vector<16xf32> to vector<1x16xf32>
    %cst_57 = arith.constant 1.280000e+02 : f32
    %159 = vector.broadcast %cst_57 : f32 to vector<1x16xf32>
    %160 = arith.divf %158, %159 : vector<1x16xf32>
    %161 = vector.broadcast %153 : vector<1x16xf32> to vector<128x16xf32>
    %162 = arith.subf %149, %161 : vector<128x16xf32>
    %cst_58 = arith.constant 9.99999974E-6 : f32
    %163 = vector.broadcast %cst_58 : f32 to vector<1x16xf32>
    %164 = arith.addf %160, %163 : vector<1x16xf32>
    %165 = math.rsqrt %164 : vector<1x16xf32>
    %166 = vector.broadcast %165 : vector<1x16xf32> to vector<128x16xf32>
    %167 = arith.mulf %162, %166 : vector<128x16xf32>
    %168 = vector.shape_cast %167 : vector<128x16xf32> to vector<2x8x8x16xf32>
    %169 = vector.extract_strided_slice %51 {offsets = [0, 1, 0, 0], sizes = [1, 1, 144, 16], strides = [1, 1, 1, 1]} : vector<1x2x144x16xf32> to vector<1x1x144x16xf32>
    %170 = vector.shape_cast %169 : vector<1x1x144x16xf32> to vector<144x16xf32>
    %cst_59 = arith.constant 0.000000e+00 : f32
    %171 = vector.broadcast %cst_59 : f32 to vector<2x8x8x16xf32>
    %172 = arith.maximumf %168, %171 : vector<2x8x8x16xf32>
    %cst_60 = arith.constant 0.000000e+00 : f32
    %173 = vector.broadcast %cst_60 : f32 to vector<2x8x8x16xf32>
    %174 = tpu.concatenate %173, %172, %173 in 2 : vector<2x8x8x16xf32>, vector<2x8x8x16xf32>, vector<2x8x8x16xf32> -> vector<2x8x24x16xf32>
    %cst_61 = arith.constant 0.000000e+00 : f32
    %175 = vector.broadcast %cst_61 : f32 to vector<2x1x24x16xf32>
    %176 = tpu.concatenate %175, %174, %175 in 1 : vector<2x1x24x16xf32>, vector<2x8x24x16xf32>, vector<2x1x24x16xf32> -> vector<2x10x24x16xf32>
    %177 = vector.extract_strided_slice %176 {offsets = [0, 0, 7, 0], sizes = [2, 8, 8, 16], strides = [1, 1, 1, 1]} : vector<2x10x24x16xf32> to vector<2x8x8x16xf32>
    %178 = vector.extract_strided_slice %176 {offsets = [0, 0, 8, 0], sizes = [2, 8, 8, 16], strides = [1, 1, 1, 1]} : vector<2x10x24x16xf32> to vector<2x8x8x16xf32>
    %179 = vector.extract_strided_slice %176 {offsets = [0, 0, 9, 0], sizes = [2, 8, 8, 16], strides = [1, 1, 1, 1]} : vector<2x10x24x16xf32> to vector<2x8x8x16xf32>
    %180 = vector.extract_strided_slice %176 {offsets = [0, 1, 7, 0], sizes = [2, 8, 8, 16], strides = [1, 1, 1, 1]} : vector<2x10x24x16xf32> to vector<2x8x8x16xf32>
    %181 = vector.extract_strided_slice %176 {offsets = [0, 1, 8, 0], sizes = [2, 8, 8, 16], strides = [1, 1, 1, 1]} : vector<2x10x24x16xf32> to vector<2x8x8x16xf32>
    %182 = vector.extract_strided_slice %176 {offsets = [0, 1, 9, 0], sizes = [2, 8, 8, 16], strides = [1, 1, 1, 1]} : vector<2x10x24x16xf32> to vector<2x8x8x16xf32>
    %183 = vector.extract_strided_slice %176 {offsets = [0, 2, 7, 0], sizes = [2, 8, 8, 16], strides = [1, 1, 1, 1]} : vector<2x10x24x16xf32> to vector<2x8x8x16xf32>
    %184 = vector.extract_strided_slice %176 {offsets = [0, 2, 8, 0], sizes = [2, 8, 8, 16], strides = [1, 1, 1, 1]} : vector<2x10x24x16xf32> to vector<2x8x8x16xf32>
    %185 = vector.extract_strided_slice %176 {offsets = [0, 2, 9, 0], sizes = [2, 8, 8, 16], strides = [1, 1, 1, 1]} : vector<2x10x24x16xf32> to vector<2x8x8x16xf32>
    %186 = tpu.concatenate %177, %178, %179, %180, %181, %182, %183, %184, %185 in 3 : vector<2x8x8x16xf32>, vector<2x8x8x16xf32>, vector<2x8x8x16xf32>, vector<2x8x8x16xf32>, vector<2x8x8x16xf32>, vector<2x8x8x16xf32>, vector<2x8x8x16xf32>, vector<2x8x8x16xf32>, vector<2x8x8x16xf32> -> vector<2x8x8x144xf32>
    %187 = vector.shape_cast %186 : vector<2x8x8x144xf32> to vector<128x144xf32>
    %cst_62 = arith.constant dense<0.000000e+00> : vector<128x16xf32>
    %188 = tpu.matmul %187, %170, %cst_62 {dimension_numbers = #tpu.dot_dimension_numbers<[1], [0], [0], [1], [0, 0, 1, 1], [], []>} : vector<128x144xf32>, vector<144x16xf32>, vector<128x16xf32> -> vector<128x16xf32>
    %cst_63 = arith.constant dense<0.000000e+00> : vector<16xf32>
    %189 = vector.multi_reduction <add>, %188, %cst_63 [0] : vector<128x16xf32> to vector<16xf32>
    %190 = vector.shape_cast %189 : vector<16xf32> to vector<1x16xf32>
    %cst_64 = arith.constant 1.280000e+02 : f32
    %191 = vector.broadcast %cst_64 : f32 to vector<1x16xf32>
    %192 = arith.divf %190, %191 : vector<1x16xf32>
    %193 = vector.broadcast %192 : vector<1x16xf32> to vector<128x16xf32>
    %194 = arith.subf %188, %193 : vector<128x16xf32>
    %195 = arith.mulf %194, %194 : vector<128x16xf32>
    %cst_65 = arith.constant dense<0.000000e+00> : vector<16xf32>
    %196 = vector.multi_reduction <add>, %195, %cst_65 [0] : vector<128x16xf32> to vector<16xf32>
    %197 = vector.shape_cast %196 : vector<16xf32> to vector<1x16xf32>
    %cst_66 = arith.constant 1.280000e+02 : f32
    %198 = vector.broadcast %cst_66 : f32 to vector<1x16xf32>
    %199 = arith.divf %197, %198 : vector<1x16xf32>
    %200 = vector.broadcast %192 : vector<1x16xf32> to vector<128x16xf32>
    %201 = arith.subf %188, %200 : vector<128x16xf32>
    %cst_67 = arith.constant 9.99999974E-6 : f32
    %202 = vector.broadcast %cst_67 : f32 to vector<1x16xf32>
    %203 = arith.addf %199, %202 : vector<1x16xf32>
    %204 = math.rsqrt %203 : vector<1x16xf32>
    %205 = vector.broadcast %204 : vector<1x16xf32> to vector<128x16xf32>
    %206 = arith.mulf %201, %205 : vector<128x16xf32>
    %207 = vector.shape_cast %206 : vector<128x16xf32> to vector<2x8x8x16xf32>
    %208 = arith.addf %129, %207 : vector<2x8x8x16xf32>
    %209 = vector.shape_cast %208 : vector<2x8x8x16xf32> to vector<1x2x8x8x16xf32>
    %c0_68 = arith.constant 0 : index
    %c0_69 = arith.constant 0 : index
    %c0_70 = arith.constant 0 : index
    %c0_71 = arith.constant 0 : index
    %c0_72 = arith.constant 0 : index
    %210 = vector.load %arg7[%c0_68, %c0_69, %c0_70, %c0_71, %c0_72] : memref<1x2x8x8x16xf32, #tpu.memory_space<vmem>>, vector<1x2x8x8x16xf32>
    tpu.vector_store %arg7[%c0_68, %c0_69, %c0_70, %c0_71, %c0_72], %209 {strides = array<i32>} : memref<1x2x8x8x16xf32, #tpu.memory_space<vmem>>, vector<1x2x8x8x16xf32>,
    return
  }
  func.func @transform_0(%arg0: i32) -> (i32, i32, i32, i32) {
    %c0_i32 = arith.constant 0 : i32
    %c0_i32_0 = arith.constant 0 : i32
    %c0_i32_1 = arith.constant 0 : i32
    %c0_i32_2 = arith.constant 0 : i32
    %c0_i32_3 = arith.constant 0 : i32
    return %c0_i32, %c0_i32_0, %c0_i32_1, %c0_i32_2 : i32, i32, i32, i32
  }
  func.func @transform_1(%arg0: i32) -> (i32, i32, i32, i32) {
    %c0_i32 = arith.constant 0 : i32
    %c0_i32_0 = arith.constant 0 : i32
    %c0_i32_1 = arith.constant 0 : i32
    %c0_i32_2 = arith.constant 0 : i32
    %c0_i32_3 = arith.constant 0 : i32
    return %c0_i32, %c0_i32_0, %c0_i32_1, %c0_i32_2 : i32, i32, i32, i32
  }
  func.func @transform_2(%arg0: i32) -> (i32, i32) {
    %c0_i32 = arith.constant 0 : i32
    %c0_i32_0 = arith.constant 0 : i32
    %c0_i32_1 = arith.constant 0 : i32
    return %c0_i32, %c0_i32_0 : i32, i32
  }
  func.func @transform_3(%arg0: i32) -> (i32, i32) {
    %c0_i32 = arith.constant 0 : i32
    %c0_i32_0 = arith.constant 0 : i32
    %c0_i32_1 = arith.constant 0 : i32
    return %c0_i32, %c0_i32_0 : i32, i32
  }
  func.func @transform_4(%arg0: i32) -> (i32, i32, i32, i32) {
    %c0_i32 = arith.constant 0 : i32
    %c0_i32_0 = arith.constant 0 : i32
    %c0_i32_1 = arith.constant 0 : i32
    %c0_i32_2 = arith.constant 0 : i32
    return %arg0, %c0_i32, %c0_i32_0, %c0_i32_1 : i32, i32, i32, i32
  }
  func.func @transform_5(%arg0: i32) -> (i32, i32, i32, i32) {
    %c0_i32 = arith.constant 0 : i32
    %c0_i32_0 = arith.constant 0 : i32
    %c0_i32_1 = arith.constant 0 : i32
    %c0_i32_2 = arith.constant 0 : i32
    return %arg0, %c0_i32, %c0_i32_0, %c0_i32_1 : i32, i32, i32, i32
  }
  func.func @transform_6(%arg0: i32) -> (i32, i32, i32, i32, i32) {
    %c0_i32 = arith.constant 0 : i32
    %c0_i32_0 = arith.constant 0 : i32
    %c0_i32_1 = arith.constant 0 : i32
    %c0_i32_2 = arith.constant 0 : i32
    %c0_i32_3 = arith.constant 0 : i32
    return %arg0, %c0_i32, %c0_i32_0, %c0_i32_1, %c0_i32_2 : i32, i32, i32, i32, i32
  }
}

</mosaic_0001>

<bundles_post_ra>
// kernel: cell_forward.1
= control target key start
LH: loop header
LB: loop body
LE: loop exit
PB: predicated region body
PF: predicated region fallthrough
CT: control target
= control target key end

     0   :  { %s7095_s21 = smov 0   ;;  %s12937_s0 = inlined_call_operand.vmem [shape: f32[2,8,8,8], index: 0, kind: input, shape index: {}]   ;;  %s12938_s1 = inlined_call_operand.vmem [shape: f32[2,8,8,8], index: 1, kind: input, shape index: {}]   ;;  %s12939_s2 = inlined_call_operand.vmem [shape: f32[8,16], index: 2, kind: input, shape index: {}]   ;;  %s12940_s3 = inlined_call_operand.vmem [shape: f32[8,16], index: 3, kind: input, shape index: {}]   ;;  %s12941_s4 = inlined_call_operand.vmem [shape: f32[2,2,144,16], index: 4, kind: input, shape index: {}]   ;;  %s12942_s5 = inlined_call_operand.vmem [shape: f32[2,2,144,16], index: 5, kind: input, shape index: {}]   ;;  %s12943_s6 = inlined_call_operand.vmem [shape: f32[2,2,8,8,16], index: 6, kind: output, shape index: {}]  }
   0x1 LB: > { %s5561_s22 = sadd.s32 4294967295, %s7049_s21   ;;  %p5565_p0 = scmp.ge.s32.totalorder %s7049_s21, 1  ;;  %s7049_s21 = sphi %s7095_s21, %s16_s21  }
   0x2   : > { %p222_p1 = scmp.lt.s32.totalorder %s7049_s21, 3 }
   0x4   : > { %p223_p2 = pnand %p5565_p0, %p222_p1 }
   0x6   : > { %226 = sbr.rel (%p223_p2) target bundleno = 2078 (0x81e), region = 44 }
   0xb   : > { %v288_v0 = vld [vmem:[%s12939_s2] sm:$0xff]  ;;  %vm305_vm0 = vcmask 64512   ;;  %v273_v10 = vld [vmem:[%s12937_s0 + $0x8] sm:$0xff]  ;;  %v274_v18 = vld [vmem:[%s12937_s0 + $0x10] sm:$0xff]  ;;  %vm419_vm1 = vcmask 130048   ;;  %p257_p3 = scmp.lt.s32.totalorder %s5561_s22, 1 }
   0xc   : > { %v578_v1 = vld [vmem:[%s12940_s3] sm:$0xff]  ;;  %369 = vmatpush.msra.mxu0 %v288_v0  ;;  %5669 = vmatpush.msra.mxu3 %v288_v0  ;;  %v563_v11 = vld [vmem:[%s12938_s1 + $0x8] sm:$0xff]  ;;  %v290_v14 = vmax.f32 %v273_v10, 0.0  ;;  %v564_v19 = vld [vmem:[%s12938_s1 + $0x10] sm:$0xff]  ;;  %v291_v22 = vmax.f32 %v274_v18, 0.0  ;;  %s7053_s29 = smov 32  }
   0xd   : > { %v272_v2 = vld [vmem:[%s12937_s0] sm:$0xff]  ;;  %658 = vmatpush.msra.mxu1 %v578_v1  ;;  %5670 = vmatpush.msra.mxu2 %v578_v1  ;;  %v281_v12 = vld [vmem:[%s12937_s0 + $0x48] sm:$0xff]  ;;  %v580_v15 = vmax.f32 %v563_v11, 0.0  ;;  %v282_v20 = vld [vmem:[%s12937_s0 + $0x50] sm:$0xff]  ;;  %v581_v23 = vmax.f32 %v564_v19, 0.0  ;;  %s13831_s22 = smov (!%p257_p3, %s5561_s22), 1 }
   0xe   : > { %v289_v3 = vmax.f32 %v272_v2, 0.0  ;;  %v562_v4 = vld [vmem:[%s12938_s1] sm:$0xff]  ;;  %v571_v13 = vld [vmem:[%s12938_s1 + $0x48] sm:$0xff]  ;;  %v298_v16 = vmax.f32 %v281_v12, 0.0  ;;  %v572_v21 = vld [vmem:[%s12938_s1 + $0x50] sm:$0xff]  ;;  %v299_v24 = vmax.f32 %v282_v20, 0.0 }
   0xf   : > { %v579_v5 = vmax.f32 %v562_v4, 0.0  ;;  %v280_v6 = vld [vmem:[%s12937_s0 + $0x40] sm:$0xff]  ;;  %v588_v17 = vmax.f32 %v571_v13, 0.0  ;;  %v589_v25 = vmax.f32 %v572_v21, 0.0  ;;  %v275_v26 = vld [vmem:[%s12937_s0 + $0x18] sm:$0xff]  ;;  %v277_v42 = vld [vmem:[%s12937_s0 + $0x28] sm:$0xff] }
  0x10   : > { %v570_v7 = vld [vmem:[%s12938_s1 + $0x40] sm:$0xff]  ;;  %5570 = vmatmul.msk.f32.vlgmr.msra.gmra.mxu0 %vm305_vm0, %v289_v3  ;;  %v297_v8 = vmax.f32 %v280_v6, 0.0  ;;  %v565_v27 = vld [vmem:[%s12938_s1 + $0x18] sm:$0xff]  ;;  %v292_v30 = vmax.f32 %v275_v26, 0.0  ;;  %v567_v43 = vld [vmem:[%s12938_s1 + $0x28] sm:$0xff]  ;;  %v294_v46 = vmax.f32 %v277_v42, 0.0 }
  0x11   : > { %v587_v9 = vmax.f32 %v570_v7, 0.0  ;;  %5586 = vmatmul.msk.f32.vlgmr.msra.gmra.mxu1 %vm305_vm0, %v579_v5  ;;  %v283_v28 = vld [vmem:[%s12937_s0 + $0x58] sm:$0xff]  ;;  %v582_v31 = vmax.f32 %v565_v27, 0.0  ;;  %v276_v34 = vld [vmem:[%s12937_s0 + $0x20] sm:$0xff]  ;;  %v285_v44 = vld [vmem:[%s12937_s0 + $0x68] sm:$0xff]  ;;  %v584_v47 = vmax.f32 %v567_v43, 0.0 }
  0x12   : > { %5578 = vmatmul.msk.f32.vlgmr.msra.gmra.mxu3 %vm305_vm0, %v297_v8  ;;  %v573_v29 = vld [vmem:[%s12938_s1 + $0x58] sm:$0xff]  ;;  %v300_v32 = vmax.f32 %v283_v28, 0.0  ;;  %v566_v35 = vld [vmem:[%s12938_s1 + $0x20] sm:$0xff]  ;;  %v293_v38 = vmax.f32 %v276_v34, 0.0  ;;  %v575_v45 = vld [vmem:[%s12938_s1 + $0x68] sm:$0xff]  ;;  %v302_v48 = vmax.f32 %v285_v44, 0.0 }
  0x13   : > { %5594 = vmatmul.msk.f32.vlgmr.msra.gmra.mxu2 %vm305_vm0, %v587_v9  ;;  %v590_v33 = vmax.f32 %v573_v29, 0.0  ;;  %v284_v36 = vld [vmem:[%s12937_s0 + $0x60] sm:$0xff]  ;;  %v583_v39 = vmax.f32 %v566_v35, 0.0  ;;  %v592_v49 = vmax.f32 %v575_v45, 0.0  ;;  %v278_v50 = vld [vmem:[%s12937_s0 + $0x30] sm:$0xff]  ;;  %v279_v58 = vld [vmem:[%s12937_s0 + $0x38] sm:$0xff] }
  0x14   : > { %v574_v37 = vld [vmem:[%s12938_s1 + $0x60] sm:$0xff]  ;;  %v301_v40 = vmax.f32 %v284_v36, 0.0  ;;  %v568_v51 = vld [vmem:[%s12938_s1 + $0x30] sm:$0xff]  ;;  %v295_v54 = vmax.f32 %v278_v50, 0.0  ;;  %v569_v59 = vld [vmem:[%s12938_s1 + $0x38] sm:$0xff]  ;;  %v296_v62 = vmax.f32 %v279_v58, 0.0 }
  0x15   : > { %v591_v41 = vmax.f32 %v574_v37, 0.0  ;;  %v286_v52 = vld [vmem:[%s12937_s0 + $0x70] sm:$0xff]  ;;  %v585_v55 = vmax.f32 %v568_v51, 0.0  ;;  %v287_v60 = vld [vmem:[%s12937_s0 + $0x78] sm:$0xff]  ;;  %v586_v63 = vmax.f32 %v569_v59, 0.0  ;;  %s5671_s25 = smul.u32 288, %s13831_s22 }
  0x16   : > { %v576_v53 = vld [vmem:[%s12938_s1 + $0x70] sm:$0xff]  ;;  %v303_v56 = vmax.f32 %v286_v52, 0.0  ;;  %v577_v61 = vld [vmem:[%s12938_s1 + $0x78] sm:$0xff]  ;;  %v304_v0 = vmax.f32 %v287_v60, 0.0  ;;  %vm1006_vm6 = vcmask 1045504   ;;  %s7054_s30 = smov 48  }
  0x17   : > { %v593_v57 = vmax.f32 %v576_v53, 0.0  ;;  %v594_v1 = vmax.f32 %v577_v61, 0.0  ;;  %s7613_s28 = scalar_lea.vmem %s12941_s4, %s5671_s25  ;;  %vm1676_vm7 = vcmask 1040384   ;;  %s7055_s7 = smov 96   ;;  %vm1449_vm11 = vcmask 261120  }
  0x18   : > { %5571 = vmatmul.msk.f32.gmra.mxu0 %vm305_vm0, %v290_v14  ;;  %s7056_s8 = smov 16   ;;  %s7057_s9 = smov 64   ;;  %vm1480_vm12 = vcmask 392192   ;;  %vm1512_vm13 = vcmask 523264   ;;  %vm1545_vm14 = vcmask 654336   ;;  %vm1578_vm15 = vcmask 785408  }
  0x19   : > { %5587 = vmatmul.msk.f32.gmra.mxu1 %vm305_vm0, %v580_v15  ;;  %s7058_s10 = smov 112   ;;  %s7059_s11 = smov 80  }
  0x1a   : > { %5579 = vmatmul.msk.f32.gmra.mxu3 %vm305_vm0, %v298_v16  ;;  %s10301_s14 = scalar_lea.vmem %s12942_s5, %s5671_s25  ;;  %s5668_s15 = sshll.u32 %s13831_s22, 7 }
  0x1b   : > { %5595 = vmatmul.msk.f32.gmra.mxu2 %vm305_vm0, %v588_v17  ;;  %s12888_s17 = scalar_lea.vmem %s12943_s6, %s5668_s15 }
  0x20   : > { %5572 = vmatmul.msk.f32.gmra.mxu0 %vm305_vm0, %v291_v22 }
  0x21   : > { %5588 = vmatmul.msk.f32.gmra.mxu1 %vm305_vm0, %v581_v23 }
  0x22   : > { %5580 = vmatmul.msk.f32.gmra.mxu3 %vm305_vm0, %v299_v24 }
  0x23   : > { %5596 = vmatmul.msk.f32.gmra.mxu2 %vm305_vm0, %v589_v25 }
  0x28   : > { %5573 = vmatmul.msk.f32.gmra.mxu0 %vm305_vm0, %v292_v30 }
  0x29   : > { %5589 = vmatmul.msk.f32.gmra.mxu1 %vm305_vm0, %v582_v31 }
  0x2a   : > { %5581 = vmatmul.msk.f32.gmra.mxu3 %vm305_vm0, %v300_v32 }
  0x2b   : > { %5597 = vmatmul.msk.f32.gmra.mxu2 %vm305_vm0, %v590_v33 }
  0x30   : > { %5574 = vmatmul.msk.f32.gmra.mxu0 %vm305_vm0, %v293_v38 }
  0x31   : > { %5590 = vmatmul.msk.f32.gmra.mxu1 %vm305_vm0, %v583_v39 }
  0x32   : > { %5582 = vmatmul.msk.f32.gmra.mxu3 %vm305_vm0, %v301_v40 }
  0x33   : > { %5598 = vmatmul.msk.f32.gmra.mxu2 %vm305_vm0, %v591_v41 }
  0x38   : > { %5575 = vmatmul.msk.f32.gmra.mxu0 %vm305_vm0, %v294_v46 }
  0x39   : > { %5591 = vmatmul.msk.f32.gmra.mxu1 %vm305_vm0, %v584_v47 }
  0x3a   : > { %5583 = vmatmul.msk.f32.gmra.mxu3 %vm305_vm0, %v302_v48 }
  0x3b   : > { %5599 = vmatmul.msk.f32.gmra.mxu2 %vm305_vm0, %v592_v49 }
  0x40   : > { %5576 = vmatmul.msk.f32.gmra.mxu0 %vm305_vm0, %v295_v54 }
  0x41   : > { %5592 = vmatmul.msk.f32.gmra.mxu1 %vm305_vm0, %v585_v55 }
  0x42   : > { %5584 = vmatmul.msk.f32.gmra.mxu3 %vm305_vm0, %v303_v56 }
  0x43   : > { %5600 = vmatmul.msk.f32.gmra.mxu2 %vm305_vm0, %v593_v57 }
  0x48   : > { %5577 = vmatmul.msk.f32.gmra.mxu0 %vm305_vm0, %v296_v62 }
  0x49   : > { %5593 = vmatmul.msk.f32.gmra.mxu1 %vm305_vm0, %v586_v63 }
  0x4a   : > { %5585 = vmatmul.msk.f32.gmra.mxu3 %vm305_vm0, %v304_v0 }
  0x4b   : > { %5601 = vmatmul.msk.f32.gmra.mxu2 %vm305_vm0, %v594_v1  ;;  %vm1611_vm0 = vcmask 916480  }
  0x8d   : > { %v7237_v2 = vpop.f32.mrf.mxu0 }
  0x8e   : > { %v7239_v3 = vpop.f32.mrf.mxu1  ;;  %v420_v31 = vsel %vm419_vm1, %v7237_v2, 0.0 }
  0x8f   : > { %v708_v20 = vsel %vm419_vm1, %v7239_v3, 0.0 }
  0x95   : > { %v7241_v4 = vpop.f32.mrf.mxu0  ;;  %v7243_v5 = vpop.f32.mrf.mxu3 }
  0x96   : > { %v7245_v6 = vpop.f32.mrf.mxu1  ;;  %v7247_v7 = vpop.f32.mrf.mxu2  ;;  %v421_v30 = vsel %vm419_vm1, %v7241_v4, 0.0  ;;  %v435_v60 = vsel %vm419_vm1, %v7243_v5, 0.0 }
  0x97   : > { %v709_v21 = vsel %vm419_vm1, %v7245_v6, 0.0  ;;  %v422_v34 = vadd.f32 %v421_v30, %v420_v31  ;;  %v723_v63 = vsel %vm419_vm1, %v7247_v7, 0.0 }
  0x98   : > { %v710_v22 = vadd.f32 %v709_v21, %v708_v20  ;;  %v7051_v20 = vmov 128.0  }
  0x99   : > { %7029 = vrcp.f32 %v7051_v20 }
  0x9d   : > { %v7249_v8 = vpop.f32.mrf.mxu0  ;;  %v7251_v9 = vpop.f32.mrf.mxu3 }
  0x9e   : > { %v7253_v10 = vpop.f32.mrf.mxu1  ;;  %v7255_v11 = vpop.f32.mrf.mxu2  ;;  %v423_v32 = vsel %vm419_vm1, %v7249_v8, 0.0  ;;  %v437_v21 = vsel %vm419_vm1, %v7251_v9, 0.0 }
  0x9f   : > { %v711_v23 = vsel %vm419_vm1, %v7253_v10, 0.0  ;;  %v424_v37 = vadd.f32 %v423_v32, %v422_v34  ;;  %v725_v0 = vsel %vm419_vm1, %v7255_v11, 0.0 }
  0xa0   : > { %v712_v26 = vadd.f32 %v711_v23, %v710_v22 }
  0xa5   : > { %v7257_v12 = vpop.f32.mrf.mxu0  ;;  %v7259_v13 = vpop.f32.mrf.mxu3 }
  0xa6   : > { %v7261_v14 = vpop.f32.mrf.mxu1  ;;  %v7263_v15 = vpop.f32.mrf.mxu2  ;;  %v425_v36 = vsel %vm419_vm1, %v7257_v12, 0.0 }
  0xa7   : > { %v713_v29 = vsel %vm419_vm1, %v7261_v14, 0.0  ;;  %v426_v44 = vadd.f32 %v425_v36, %v424_v37  ;;  %v727_v23 = vsel %vm419_vm1, %v7263_v15, 0.0 }
  0xa8   : > { %v714_v33 = vadd.f32 %v713_v29, %v712_v26  ;;  %v439_v29 = vsel %vm419_vm1, %v7259_v13, 0.0 }
  0xad   : > { %v7265_v16 = vpop.f32.mrf.mxu0  ;;  %v7267_v17 = vpop.f32.mrf.mxu3 }
  0xae   : > { %v7269_v18 = vpop.f32.mrf.mxu1  ;;  %v7271_v19 = vpop.f32.mrf.mxu2  ;;  %v427_v40 = vsel %vm419_vm1, %v7265_v16, 0.0 }
  0xaf   : > { %v715_v35 = vsel %vm419_vm1, %v7269_v18, 0.0  ;;  %v428_v47 = vadd.f32 %v427_v40, %v426_v44  ;;  %v729_v31 = vsel %vm419_vm1, %v7271_v19, 0.0 }
  0xb0   : > { %v716_v41 = vadd.f32 %v715_v35, %v714_v33  ;;  %v441_v33 = vsel %vm419_vm1, %v7267_v17, 0.0  ;;  %v7030_v35 = vpop.eup %7029 }
  0xb1   : > { %vm462_vm2 = vweird.f32 %v7030_v35 }
  0xb5   : > { %v7279_v24 = vpop.f32.mrf.mxu0  ;;  %v7281_v25 = vpop.f32.mrf.mxu3 }
  0xb6   : > { %v7283_v27 = vpop.f32.mrf.mxu1  ;;  %v7285_v28 = vpop.f32.mrf.mxu2  ;;  %v429_v46 = vsel %vm419_vm1, %v7279_v24, 0.0  ;;  %v443_v40 = vsel %vm419_vm1, %v7281_v25, 0.0 }
  0xb7   : > { %v717_v45 = vsel %vm419_vm1, %v7283_v27, 0.0  ;;  %v430_v50 = vadd.f32 %v429_v46, %v428_v47  ;;  %v731_v36 = vsel %vm419_vm1, %v7285_v28, 0.0 }
  0xb8   : > { %v718_v48 = vadd.f32 %v717_v45, %v716_v41 }
  0xbd   : > { %v7299_v38 = vpop.f32.mrf.mxu0  ;;  %v7301_v39 = vpop.f32.mrf.mxu3 }
  0xbe   : > { %v7305_v42 = vpop.f32.mrf.mxu1  ;;  %v7307_v43 = vpop.f32.mrf.mxu2  ;;  %v431_v49 = vsel %vm419_vm1, %v7299_v38, 0.0  ;;  %v445_v47 = vsel %vm419_vm1, %v7301_v39, 0.0 }
  0xbf   : > { %v719_v51 = vsel %vm419_vm1, %v7305_v42, 0.0  ;;  %v432_v52 = vadd.f32 %v431_v49, %v430_v50  ;;  %v733_v45 = vsel %vm419_vm1, %v7307_v43, 0.0  ;;  %v458_v49 = vmul.f32 128.0, %v7030_v35 }
  0xc0   : > { %v720_v54 = vadd.f32 %v719_v51, %v718_v48 }
  0xc5   : > { %v7317_v53 = vpop.f32.mrf.mxu0  ;;  %v7325_v59 = vpop.f32.mrf.mxu3 }
  0xc6   : > { %v433_v55 = vsel %vm419_vm1, %v7317_v53, 0.0  ;;  %v7321_v56 = vpop.f32.mrf.mxu1  ;;  %v7329_v62 = vpop.f32.mrf.mxu2 }
  0xc7   : > { %v434_v57 = vadd.f32 %v433_v55, %v432_v52  ;;  %v721_v58 = vsel %vm419_vm1, %v7321_v56, 0.0  ;;  %v735_v52 = vsel %vm419_vm1, %v7329_v62, 0.0  ;;  %v447_v55 = vsel %vm419_vm1, %v7325_v59, 0.0 }
  0xc8   : > { %v722_v61 = vadd.f32 %v721_v58, %v720_v54 }
  0xc9   : > { %v436_v1 = vadd.f32 %v435_v60, %v434_v57 }
  0xca   : > { %v724_v22 = vadd.f32 %v723_v63, %v722_v61  ;;  %v459_v63 = vsub.f32 1.0, %v458_v49 }
  0xcb   : > { %v438_v26 = vadd.f32 %v437_v21, %v436_v1 }
  0xcc   : > { %v726_v30 = vadd.f32 %v725_v0, %v724_v22  ;;  %v460_v21 = vmul.f32 %v7030_v35, %v459_v63 }
  0xcd   : > { %v440_v32 = vadd.f32 %v439_v29, %v438_v26  ;;  %v7351_v46 = vpop.f32.mrf.mxu3 }
  0xce   : > { %v728_v34 = vadd.f32 %v727_v23, %v726_v30  ;;  %v7355_v50 = vpop.f32.mrf.mxu2  ;;  %v449_v57 = vsel %vm419_vm1, %v7351_v46, 0.0  ;;  %v461_v30 = vadd.f32 %v7030_v35, %v460_v21 }
  0xcf   : > { %v442_v37 = vadd.f32 %v441_v33, %v440_v32  ;;  %v737_v60 = vsel %vm419_vm1, %v7355_v50, 0.0 }
  0xd0   : > { %v730_v41 = vadd.f32 %v729_v31, %v728_v34  ;;  %v7365_v34 = vsel %vm462_vm2, %v7030_v35, %v461_v30 }
  0xd1   : > { %v444_v44 = vadd.f32 %v443_v40, %v442_v37  ;;  %13169 = vst [vmem:[#allocation2_spill] sm:$0xff] %v7365_v34 }
  0xd2   : > { %v732_v48 = vadd.f32 %v731_v36, %v730_v41 }
  0xd3   : > { %v446_v51 = vadd.f32 %v445_v47, %v444_v44 }
  0xd4   : > { %v734_v54 = vadd.f32 %v733_v45, %v732_v48 }
  0xd5   : > { %v448_v58 = vadd.f32 %v447_v55, %v446_v51 }
  0xd6   : > { %v736_v61 = vadd.f32 %v735_v52, %v734_v54 }
  0xd7   : > { %v450_v0 = vadd.f32 %v449_v57, %v448_v58 }
  0xd8   : > { %v738_v1 = vadd.f32 %v737_v60, %v736_v61 }
  0xd9   : > { %v451_v20 = vrot.slane %v450_v0, 4 }
  0xda   : > { %v739_v22 = vrot.slane %v738_v1, 4 }
  0xdb   : > { %v452_v23 = vadd.f32 %v451_v20, %v450_v0 }
  0xdc   : > { %v740_v26 = vadd.f32 %v739_v22, %v738_v1 }
  0xdd   : > { %v453_v29 = vrot.slane %v452_v23, 2 }
  0xde   : > { %v741_v32 = vrot.slane %v740_v26, 2 }
  0xdf   : > { %v454_v31 = vadd.f32 %v453_v29, %v452_v23 }
  0xe0   : > { %v742_v37 = vadd.f32 %v741_v32, %v740_v26 }
  0xe1   : > { %v455_v33 = vrot.slane %v454_v31, 1 }
  0xe2   : > { %v743_v45 = vrot.slane %v742_v37, 1 }
  0xe3   : > { %v456_v36 = vadd.f32 %v455_v33, %v454_v31 }
  0xe4   : > { %v744_v49 = vadd.f32 %v743_v45, %v742_v37 }
  0xe5   : > { %v7368_v40 = vmul.f32 %v7365_v34, %v456_v36 }
  0xe6   : > { %v7405_v57 = vmul.f32 %v744_v49, %v7365_v34 }
  0xe7   : > { %v7372_v41 = vsub.f32 %v7237_v2, %v7368_v40  ;;  %v7376_v44 = vsub.f32 %v7241_v4, %v7368_v40  ;;  %v7380_v47 = vsub.f32 %v7249_v8, %v7368_v40  ;;  %v7384_v35 = vsub.f32 %v7257_v12, %v7368_v40 }
  0xe8   : > { %v7392_v4 = vsub.f32 %v7265_v16, %v7368_v40  ;;  %v7398_v8 = vsub.f32 %v7279_v24, %v7368_v40  ;;  %v7409_v16 = vsub.f32 %v7299_v38, %v7368_v40  ;;  %v7416_v61 = vsub.f32 %v7317_v53, %v7368_v40 }
  0xe9   : > { %v481_v48 = vmul.f32 %v7372_v41, %v7372_v41  ;;  %v482_v2 = vmul.f32 %v7376_v44, %v7376_v44  ;;  %v483_v51 = vmul.f32 %v7380_v47, %v7380_v47  ;;  %v484_v12 = vmul.f32 %v7384_v35, %v7384_v35 }
  0xea   : > { %v485_v58 = vmul.f32 %v7392_v4, %v7392_v4  ;;  %v486_v63 = vmul.f32 %v7398_v8, %v7398_v8  ;;  %v7423_v38 = vsub.f32 %v7239_v3, %v7405_v57  ;;  %v7427_v20 = vsub.f32 %v7243_v5, %v7368_v40 }
  0xeb   : > { %v497_v52 = vsel %vm419_vm1, %v481_v48, 0.0  ;;  %v498_v54 = vsel %vm419_vm1, %v482_v2, 0.0  ;;  %v500_v24 = vsel %vm419_vm1, %v483_v51, 0.0  ;;  %v502_v0 = vsel %vm419_vm1, %v484_v12, 0.0 }
  0xec   : > { %v499_v55 = vadd.f32 %v498_v54, %v497_v52  ;;  %v487_v21 = vmul.f32 %v7409_v16, %v7409_v16  ;;  %v504_v53 = vsel %vm419_vm1, %v485_v58, 0.0  ;;  %v7434_v22 = vsub.f32 %v7245_v6, %v7405_v57 }
  0xed   : > { %v7438_v26 = vsub.f32 %v7251_v9, %v7368_v40  ;;  %v488_v3 = vmul.f32 %v7416_v61, %v7416_v61  ;;  %v506_v5 = vsel %vm419_vm1, %v486_v63, 0.0  ;;  %v7445_v29 = vsub.f32 %v7253_v10, %v7405_v57 }
  0xee   : > { %v501_v60 = vadd.f32 %v500_v24, %v499_v55  ;;  %v7449_v30 = vsub.f32 %v7259_v13, %v7368_v40  ;;  %v762_v31 = vmul.f32 %v7423_v38, %v7423_v38  ;;  %v489_v9 = vmul.f32 %v7427_v20, %v7427_v20 }
  0xef   : > { %v508_v32 = vsel %vm419_vm1, %v487_v21, 0.0  ;;  %v7458_v33 = vsub.f32 %v7261_v14, %v7405_v57  ;;  %v763_v10 = vmul.f32 %v7434_v22, %v7434_v22  ;;  %v7464_v13 = vsub.f32 %v7267_v17, %v7368_v40 }
  0xf0   : > { %v503_v1 = vadd.f32 %v502_v0, %v501_v60  ;;  %v490_v37 = vmul.f32 %v7438_v26, %v7438_v26  ;;  %v510_v45 = vsel %vm419_vm1, %v488_v3, 0.0  ;;  %v7471_v48 = vsub.f32 %v7269_v18, %v7405_v57 }
  0xf1   : > { %v764_v14 = vmul.f32 %v7445_v29, %v7445_v29  ;;  %v7477_v2 = vsub.f32 %v7281_v25, %v7368_v40  ;;  %v491_v17 = vmul.f32 %v7449_v30, %v7449_v30  ;;  %v778_v51 = vsel %vm419_vm1, %v762_v31, 0.0 }
  0xf2   : > { %v505_v23 = vadd.f32 %v504_v53, %v503_v1  ;;  %v512_v12 = vsel %vm419_vm1, %v489_v9, 0.0  ;;  %v7485_v52 = vsub.f32 %v7283_v27, %v7405_v57  ;;  %v765_v18 = vmul.f32 %v7458_v33, %v7458_v33 }
  0xf3   : > { %v779_v54 = vsel %vm419_vm1, %v763_v10, 0.0  ;;  %v7492_v25 = vsub.f32 %v7301_v39, %v7368_v40  ;;  %v492_v55 = vmul.f32 %v7464_v13, %v7464_v13  ;;  %v514_v60 = vsel %vm419_vm1, %v490_v37, 0.0 }
  0xf4   : > { %v507_v6 = vadd.f32 %v506_v5, %v505_v23  ;;  %v780_v24 = vadd.f32 %v779_v54, %v778_v51  ;;  %v7499_v27 = vsub.f32 %v7305_v42, %v7405_v57  ;;  %v766_v63 = vmul.f32 %v7471_v48, %v7471_v48 }
  0xf5   : > { %v781_v0 = vsel %vm419_vm1, %v764_v14, 0.0  ;;  %v7506_v39 = vsub.f32 %v7325_v59, %v7368_v40  ;;  %v493_v1 = vmul.f32 %v7477_v2, %v7477_v2  ;;  %v516_v23 = vsel %vm419_vm1, %v491_v17, 0.0 }
  0xf6   : > { %v509_v36 = vadd.f32 %v508_v32, %v507_v6  ;;  %v782_v53 = vadd.f32 %v781_v0, %v780_v24  ;;  %v7513_v42 = vsub.f32 %v7321_v56, %v7405_v57  ;;  %v767_v3 = vmul.f32 %v7485_v52, %v7485_v52 }
  0xf7   : > { %v783_v5 = vsel %vm419_vm1, %v765_v18, 0.0  ;;  %v7520_v59 = vsub.f32 %v7351_v46, %v7368_v40  ;;  %v494_v6 = vmul.f32 %v7492_v25, %v7492_v25  ;;  %v518_v32 = vsel %vm419_vm1, %v492_v55, 0.0 }
  0xf8   : > { %v511_v49 = vadd.f32 %v510_v45, %v509_v36  ;;  %v784_v9 = vadd.f32 %v783_v5, %v782_v53  ;;  %v7527_v56 = vsub.f32 %v7247_v7, %v7405_v57  ;;  %v768_v10 = vmul.f32 %v7499_v27, %v7499_v27 }
  0xf9   : > { %v785_v36 = vsel %vm419_vm1, %v766_v63, 0.0  ;;  %v495_v46 = vmul.f32 %v7506_v39, %v7506_v39  ;;  %v520_v45 = vsel %vm419_vm1, %v493_v1, 0.0  ;;  %v7537_v14 = vsub.f32 %v7255_v11, %v7405_v57 }
  0xfa   : > { %v513_v58 = vadd.f32 %v512_v12, %v511_v49  ;;  %v786_v37 = vadd.f32 %v785_v36, %v784_v9  ;;  %v769_v7 = vmul.f32 %v7513_v42, %v7513_v42  ;;  %v787_v17 = vsel %vm419_vm1, %v767_v3, 0.0 }
  0xfb   : > { %v496_v49 = vmul.f32 %v7520_v59, %v7520_v59  ;;  %v522_v18 = vsel %vm419_vm1, %v494_v6, 0.0  ;;  %v7547_v54 = vsub.f32 %v7263_v15, %v7405_v57  ;;  %v770_v11 = vmul.f32 %v7527_v56, %v7527_v56 }
  0xfc   : > { %v515_v21 = vadd.f32 %v514_v60, %v513_v58  ;;  %v788_v12 = vadd.f32 %v787_v17, %v786_v37  ;;  %v789_v55 = vsel %vm419_vm1, %v768_v10, 0.0  ;;  %v524_v60 = vsel %vm419_vm1, %v495_v46, 0.0 }
  0xfd   : > { %v7555_v63 = vsub.f32 %v7271_v19, %v7405_v57  ;;  %v771_v0 = vmul.f32 %v7537_v14, %v7537_v14  ;;  %v791_v1 = vsel %vm419_vm1, %v769_v7, 0.0  ;;  %v526_v53 = vsel %vm419_vm1, %v496_v49, 0.0 }
  0xfe   : > { %v517_v31 = vadd.f32 %v516_v23, %v515_v21  ;;  %v790_v24 = vadd.f32 %v789_v55, %v788_v12  ;;  %v7563_v23 = vsub.f32 %v7285_v28, %v7405_v57  ;;  %v772_v3 = vmul.f32 %v7547_v54, %v7547_v54 }
  0xff   : > { %v793_v5 = vsel %vm419_vm1, %v770_v11, 0.0  ;;  %v773_v9 = vmul.f32 %v7555_v63, %v7555_v63  ;;  %v7577_v36 = vsub.f32 %v7329_v62, %v7405_v57 }
 0x100   : > { %v519_v40 = vadd.f32 %v518_v32, %v517_v31  ;;  %v792_v21 = vadd.f32 %v791_v1, %v790_v24  ;;  %v7570_v31 = vsub.f32 %v7307_v43, %v7405_v57  ;;  %v795_v32 = vsel %vm419_vm1, %v771_v0, 0.0 }
 0x101   : > { %v774_v46 = vmul.f32 %v7563_v23, %v7563_v23  ;;  %v799_v17 = vsel %vm419_vm1, %v773_v9, 0.0 }
 0x102   : > { %v521_v51 = vadd.f32 %v520_v45, %v519_v40  ;;  %v794_v6 = vadd.f32 %v793_v5, %v792_v21  ;;  %v797_v40 = vsel %vm419_vm1, %v772_v3, 0.0  ;;  %v7584_v45 = vsub.f32 %v7355_v50, %v7405_v57 }
 0x103   : > { %v775_v7 = vmul.f32 %v7570_v31, %v7570_v31  ;;  %v801_v12 = vsel %vm419_vm1, %v774_v46, 0.0  ;;  %v7052_v5 = vmov 0.0  }
 0x104   : > { %v523_v58 = vadd.f32 %v522_v18, %v521_v51  ;;  %v796_v28 = vadd.f32 %v795_v32, %v794_v6  ;;  %v776_v51 = vmul.f32 %v7577_v36, %v7577_v36  ;;  %v777_v50 = vmul.f32 %v7584_v45, %v7584_v45 }
 0x105   : > { %v803_v57 = vsel %vm419_vm1, %v775_v7, 0.0 }
 0x106   : > { %v525_v15 = vadd.f32 %v524_v60, %v523_v58  ;;  %v798_v43 = vadd.f32 %v797_v40, %v796_v28  ;;  %v805_v24 = vsel %vm419_vm1, %v776_v51, 0.0  ;;  %v807_v1 = vsel %vm419_vm1, %v777_v50, 0.0  ;;  %v859_v28 = vld [vmem:[%s7613_s28 + $0x80] sm:$0xff] }
 0x108   : > { %v527_v19 = vadd.f32 %v526_v53, %v525_v15  ;;  %v800_v49 = vadd.f32 %v799_v17, %v798_v43 }
 0x10a   : > { %v528_v10 = vrot.slane %v527_v19, 4  ;;  %v802_v11 = vadd.f32 %v801_v12, %v800_v49 }
 0x10c   : > { %v529_v37 = vadd.f32 %v528_v10, %v527_v19  ;;  %v804_v58 = vadd.f32 %v803_v57, %v802_v11  ;;  %v7606_v19 = vrot.slane %v7052_v5, 2  ;;  %v860_v10 = vld [vmem:[%s7613_s28 + $0x88] sm:$0xff] }
 0x10d   : > { %1895 = vmatpush.msrb.mxu3 %v860_v10 }
 0x10e   : > { %v530_v62 = vrot.slane %v529_v37, 2  ;;  %v806_v0 = vadd.f32 %v805_v24, %v804_v58  ;;  %13170 = vst [vmem:[#allocation3_spill] sm:$0xff] %v7606_v19  ;;  %v5689_v9 = vpack.i.bf16 %v7606_v19, %v7606_v19 }
 0x10f   : > { %1896 = vmatpush.msrb.mxu3 %v859_v28 }
 0x110   : > { %v531_v18 = vadd.f32 %v530_v62, %v529_v37  ;;  %v808_v21 = vadd.f32 %v807_v1, %v806_v0  ;;  %5690 = vrot.lane.b32.xlu2 %v5689_v9, %s7053_s29 }
 0x112   : > { %v532_v55 = vrot.slane %v531_v18, 1  ;;  %v809_v3 = vrot.slane %v808_v21, 4 }
 0x114   : > { %v533_v60 = vadd.f32 %v532_v55, %v531_v18  ;;  %v810_v6 = vadd.f32 %v809_v3, %v808_v21 }
 0x116   : > { %v534_v15 = vmul.f32 %v533_v60, %v7365_v34  ;;  %v811_v32 = vrot.slane %v810_v6, 2 }
 0x118   : > { %v535_v53 = vadd.f32 1e-05, %v534_v15  ;;  %v812_v46 = vadd.f32 %v811_v32, %v810_v6 }
 0x11a   : > { %7031 = vrsqrt.f32 %v535_v53  ;;  %v813_v37 = vrot.slane %v812_v46, 1  ;;  %vm542_vm4 = vweird.f32 %v535_v53 }
 0x11c   : > { %v814_v7 = vadd.f32 %v813_v37, %v812_v46 }
 0x11e   : > { %v815_v49 = vmul.f32 %v814_v7, %v7365_v34 }
 0x120   : > { %v7032_v40 = vpop.eup %7031  ;;  %v7621_v18 = vadd.f32 1e-05, %v815_v49 }
 0x121   : > { %v537_v43 = vmul.f32 %v7032_v40, %v535_v53  ;;  %vm543_vm3 = vweird.f32 %v7032_v40 }
 0x122   : > { %vm544_vm5 = vmor %vm542_vm4, %vm543_vm3  ;;  %7033 = vrsqrt.f32 %v7621_v18  ;;  %vm823_vm9 = vweird.f32 %v7621_v18 }
 0x123   : > { %v538_v17 = vmul.f32 %v7032_v40, %v537_v43 }
 0x125   : > { %v539_v62 = vmul.f32 0.5, %v538_v17 }
 0x127   : > { %v540_v51 = vsub.f32 1.5, %v539_v62 }
 0x128   : > { %v7034_v28 = vpop.eup %7033 }
 0x129   : > { %v541_v12 = vmul.f32 %v7032_v40, %v540_v51  ;;  %v818_v62 = vmul.f32 %v7034_v28, %v7621_v18  ;;  %vm824_vm8 = vweird.f32 %v7034_v28 }
 0x12a   : > { %vm825_vm10 = vmor %vm823_vm9, %vm824_vm8 }
 0x12b   : > { %v545_v11 = vsel %vm544_vm5, %v7032_v40, %v541_v12 }
 0x12c   : > { %v549_v50 = vmul.f32 %v545_v11, %v7384_v35  ;;  %v550_v57 = vmul.f32 %v545_v11, %v7392_v4  ;;  %v547_v55 = vmul.f32 %v545_v11, %v7376_v44  ;;  %v548_v58 = vmul.f32 %v545_v11, %v7380_v47 }
 0x12d   : > { %v546_v24 = vmul.f32 %v545_v11, %v7372_v41  ;;  %v555_v4 = vmul.f32 %v545_v11, %v7438_v26  ;;  %v556_v44 = vmul.f32 %v545_v11, %v7449_v30  ;;  %v553_v3 = vmul.f32 %v545_v11, %v7416_v61 }
 0x12e   : > { %v7629_v60 = vmax.f32 %v549_v50, 0.0  ;;  %v7631_v0 = vmax.f32 %v550_v57, 0.0  ;;  %v7633_v1 = vmax.f32 %v547_v55, 0.0  ;;  %v7635_v15 = vmax.f32 %v548_v58, 0.0 }
 0x12f   : > { %v7637_v35 = vmax.f32 %v546_v24, 0.0  ;;  %v554_v6 = vmul.f32 %v545_v11, %v7427_v20  ;;  %v7662_v61 = vmax.f32 %v555_v4, 0.0  ;;  %v7664_v32 = vmax.f32 %v556_v44, 0.0 }
 0x130   : > { %13171 = vst [vmem:[#allocation4_spill] sm:$0xff] %v7629_v60  ;;  %v5704_v41 = vpack.i.bf16 %v7631_v0, %v7629_v60  ;;  %v7644_v47 = vrot.slane %v7633_v1, 2  ;;  %v5699_v21 = vpack.i.bf16 %v7635_v15, %v7633_v1  ;;  %v551_v10 = vmul.f32 %v545_v11, %v7398_v8 }
 0x131   : > { %13172 = vst [vmem:[#allocation5_spill] sm:$0xff] %v7631_v0  ;;  %v5694_v53 = vpack.i.bf16 %v7637_v35, %v7052_v5  ;;  %v7667_v46 = vmax.f32 %v553_v3, 0.0  ;;  %v7669_v40 = vmax.f32 %v554_v6, 0.0  ;;  %v552_v37 = vmul.f32 %v545_v11, %v7409_v16 }
 0x132   : > { %13173 = vst [vmem:[#allocation6_spill] sm:$0xff] %v7633_v1  ;;  %5705 = vrot.lane.b32.xlu1 %v5704_v41, %s7054_s30  ;;  %v7655_v26 = vsel %vm1006_vm6, %v7644_v47, %v7606_v19  ;;  %v1680_v30 = vrot.slane %v7644_v47, 7  ;;  %5700 = vrot.lane.b32.xlu0 %v5699_v21, %s7054_s30  ;;  %v7673_v20 = vrot.slane %v7635_v15, 2  ;;  %v7676_v7 = vmax.f32 %v551_v10, 0.0 }
 0x133   : > { %13174 = vst [vmem:[#allocation7_spill] sm:$0xff] %v7635_v15  ;;  %5695 = vrot.lane.b32.xlu2 %v5694_v53, %s7054_s30  ;;  %v1681_v9 = vrot.slane %v7655_v26, 7  ;;  %v7679_v17 = vmax.f32 %v552_v37, 0.0  ;;  %v5719_v16 = vpack.i.bf16 %v7664_v32, %v7662_v61  ;;  %v5714_v49 = vpack.i.bf16 %v7669_v40, %v7667_v46 }
 0x134   : > { %13175 = vst [vmem:[#allocation8_spill] sm:$0xff] %v7637_v35  ;;  %v7684_v8 = vsel %vm1006_vm6, %v7673_v20, %v7606_v19  ;;  %v1686_v51 = vrot.slane %v7673_v20, 7  ;;  %v559_v12 = vmul.f32 %v545_v11, %v7492_v25  ;;  %v560_v50 = vmul.f32 %v545_v11, %v7506_v39 }
 0x135   : > { %13176 = vst [vmem:[#allocation9_spill] sm:$0xff] %v7662_v61  ;;  %v1682_v43 = vsel %vm1676_vm7, %v1680_v30, %v1681_v9  ;;  %v5709_v57 = vpack.i.bf16 %v7679_v17, %v7676_v7  ;;  %v1687_v55 = vrot.slane %v7684_v8, 7  ;;  %v557_v58 = vmul.f32 %v545_v11, %v7464_v13 }
 0x136   : > { %13177 = vst [vmem:[#allocation10_spill] sm:$0xff] %v7664_v32  ;;  %5602 = vmatmul.msk.f32.vlgmr.msrb.gmra.mxu3 %vm419_vm1, %v1682_v43  ;;  %v558_v24 = vmul.f32 %v545_v11, %v7477_v2  ;;  %v7701_v4 = vrot.slane %v7629_v60, 2  ;;  %v561_v25 = vmul.f32 %v545_v11, %v7520_v59  ;;  %v819_v39 = vmul.f32 %v7034_v28, %v818_v62 }
 0x137   : > { %13178 = vst [vmem:[#allocation11_spill] sm:$0xff] %v7669_v40  ;;  %v7706_v44 = vmax.f32 %v559_v12, 0.0  ;;  %v1688_v41 = vsel %vm1676_vm7, %v1686_v51, %v1687_v55  ;;  %v7709_v21 = vmax.f32 %v560_v50, 0.0  ;;  %v7711_v13 = vmax.f32 %v557_v58, 0.0 }
 0x138   : > { %13179 = vst [vmem:[#allocation12_spill] sm:$0xff] %v7676_v7  ;;  %v7713_v2 = vmax.f32 %v558_v24, 0.0  ;;  %v7719_v53 = vsel %vm1006_vm6, %v7701_v4, %v7606_v19  ;;  %v7721_v3 = vmax.f32 %v561_v25, 0.0  ;;  %v820_v59 = vmul.f32 0.5, %v819_v39 }
 0x139   : > { %13180 = vst [vmem:[#allocation13_spill] sm:$0xff] %v7679_v17  ;;  %v5729_v11 = vpack.i.bf16 %v7709_v21, %v7706_v44  ;;  %v1692_v6 = vrot.slane %v7701_v4, 7  ;;  %v1693_v9 = vrot.slane %v7719_v53, 7  ;;  %v7732_v10 = vrot.slane %v7631_v0, 2 }
 0x13a   : > { %5720 = vrot.lane.b32.xlu1 %v5719_v16, %s7054_s30  ;;  %5715 = vrot.lane.b32.xlu0 %v5714_v49, %s7054_s30  ;;  %13181 = vst [vmem:[#allocation14_spill] sm:$0xff] %v7706_v44  ;;  %v5724_v30 = vpack.i.bf16 %v7713_v2, %v7711_v13  ;;  %v821_v37 = vsub.f32 1.5, %v820_v59  ;;  %v5744_v51 = vpack.i.bf16 %v7676_v7, %v7631_v0  ;;  %v7753_v58 = vrot.slane %v7676_v7, 2 }
 0x13b   : > { %5710 = vrot.lane.b32.xlu2 %v5709_v57, %s7054_s30  ;;  %13182 = vst [vmem:[#allocation15_spill] sm:$0xff] %v7709_v21  ;;  %v1694_v43 = vsel %vm1676_vm7, %v1692_v6, %v1693_v9  ;;  %v7741_v62 = vsel %vm1006_vm6, %v7732_v10, %v7606_v19  ;;  %v5739_v12 = vpack.i.bf16 %v7629_v60, %v7635_v15  ;;  %v1698_v57 = vrot.slane %v7732_v10, 7 }
 0x13c   : > { %13183 = vst [vmem:[#allocation16_spill] sm:$0xff] %v7711_v13  ;;  %v822_v49 = vmul.f32 %v7034_v28, %v821_v37  ;;  %v5734_v50 = vpack.i.bf16 %v7633_v1, %v7052_v5  ;;  %v1699_v55 = vrot.slane %v7741_v62, 7  ;;  %v7765_v39 = vsel %vm1006_vm6, %v7753_v58, %v7606_v19 }
 0x13d   : > { %13184 = vst [vmem:[#allocation17_spill] sm:$0xff] %v7713_v2  ;;  %v5749_v59 = vpack.i.bf16 %v7667_v46, %v7679_v17  ;;  %v1705_v6 = vrot.slane %v7765_v39, 7  ;;  %v7777_v9 = vrot.slane %v7679_v17, 2 }
 0x13e   : > { %5603 = vmatmul.msk.f32.gmra.mxu3 %vm419_vm1, %v1688_v41  ;;  %v7758_v24 = vsel %vm825_vm10, %v7034_v28, %v822_v49  ;;  %v1700_v25 = vsel %vm1676_vm7, %v1698_v57, %v1699_v55  ;;  %v1704_v28 = vrot.slane %v7753_v58, 7 }
 0x13f   : > { %v831_v41 = vmul.f32 %v7758_v24, %v7471_v48  ;;  %v832_v18 = vmul.f32 %v7758_v24, %v7485_v52  ;;  %v7786_v52 = vrot.slane %v7052_v5, 1 }
 0x140   : > { %v1706_v49 = vsel %vm1676_vm7, %v1704_v28, %v1705_v6 }
 0x141   : > { %v7781_v48 = vmax.f32 %v831_v41, 0.0  ;;  %v7783_v37 = vmax.f32 %v832_v18, 0.0 }
 0x142   : > { %1161 = vrot.lane.b32.xlu1 %v7721_v3, %s7054_s30  ;;  %5730 = vrot.lane.b32.xlu0 %v5729_v11, %s7054_s30 }
 0x143   : > { %5725 = vrot.lane.b32.xlu2 %v5724_v30, %s7054_s30  ;;  %13185 = vst [vmem:[#allocation18_spill] sm:$0xff] %v7781_v48  ;;  %v5789_v5 = vpack.i.bf16 %v7783_v37, %v7781_v48 }
 0x144   : > { %13186 = vst [vmem:[#allocation19_spill] sm:$0xff] %v7783_v37 }
 0x146   : > { %5604 = vmatmul.msk.f32.gmra.mxu3 %vm419_vm1, %v1694_v43  ;;  %v12944_v43 = vrot.slane %v7667_v46, 1 }
 0x148   : > { %v7806_v57 = vpack.i.bf16 %v7786_v52, %v12944_v43  ;;  %v7870_v43 = vpack.i.bf16 %v7684_v8, %v7673_v20 }
 0x14a   : > { %5745 = vrot.lane.b32.xlu1 %v5744_v51, %s7055_s7  ;;  %5740 = vrot.lane.b32.xlu0 %v5739_v12, %s7055_s7  ;;  %v827_v51 = vmul.f32 %v7758_v24, %v7423_v38  ;;  %v1710_v12 = vrot.slane %v7777_v9, 7  ;;  %13187 = vst [vmem:[#allocation20_spill] sm:$0xff] %v7806_v57  ;;  %v830_v38 = vmul.f32 %v7758_v24, %v7458_v33 }
 0x14b   : > { %5735 = vrot.lane.b32.xlu2 %v5734_v50, %s7055_s7  ;;  %v828_v50 = vmul.f32 %v7758_v24, %v7434_v22  ;;  %13196 = vst [vmem:[#allocation29_spill] sm:$0xff] %v7870_v43  ;;  %v7907_v57 = vpack.i.bf16 %v7655_v26, %v7644_v47 }
 0x14c   : > { %v7821_v41 = vmax.f32 %v827_v51, 0.0  ;;  %v7830_v28 = vmax.f32 %v830_v38, 0.0  ;;  %v836_v51 = vmul.f32 %v7758_v24, %v7537_v14 }
 0x14d   : > { %v7823_v18 = vmax.f32 %v828_v50, 0.0  ;;  %13198 = vst [vmem:[#allocation31_spill] sm:$0xff] %v7907_v57 }
 0x14e   : > { %5605 = vmatmul.msk.f32.gmra.mxu3 %vm419_vm1, %v1700_v25  ;;  %v7813_v25 = vrot.slane %v7667_v46, 2  ;;  %13190 = vst [vmem:[#allocation23_spill] sm:$0xff] %v7821_v41  ;;  %v7893_v8 = vmax.f32 %v836_v51, 0.0  ;;  %v7914_v51 = vpack.i.bf16 %v7765_v39, %v7753_v58 }
 0x14f   : > { %13191 = vst [vmem:[#allocation24_spill] sm:$0xff] %v7823_v18 }
 0x150   : > { %13188 = vst [vmem:[#allocation21_spill] sm:$0xff] %v7813_v25  ;;  %v7835_v6 = vsel %vm1006_vm6, %v7813_v25, %v7606_v19 }
 0x151   : > { %13193 = vst [vmem:[#allocation26_spill] sm:$0xff] %v7830_v28 }
 0x152   : > { %5760 = vrot.lane.b32.xlu1 %v5724_v30, %s7055_s7  ;;  %5755 = vrot.lane.b32.xlu0 %v5719_v16, %s7055_s7  ;;  %v1022_v30 = vsel %vm1006_vm6, %v7777_v9, %v7606_v19  ;;  %v833_v16 = vmul.f32 %v7758_v24, %v7499_v27  ;;  %v829_v27 = vmul.f32 %v7758_v24, %v7445_v29 }
 0x153   : > { %5750 = vrot.lane.b32.xlu2 %v5749_v59, %s7055_s7  ;;  %v1711_v55 = vrot.slane %v1022_v30, 7  ;;  %v835_v29 = vmul.f32 %v7758_v24, %v7527_v56  ;;  %13194 = vst [vmem:[#allocation27_spill] sm:$0xff] %v7835_v6  ;;  %v7845_v56 = vrot.slane %v7711_v13, 2  ;;  %v7931_v57 = vpack.i.bf16 %v1022_v30, %v7777_v9 }
 0x154   : > { %v7819_v22 = vmax.f32 %v833_v16, 0.0  ;;  %v7828_v59 = vmax.f32 %v829_v27, 0.0  ;;  %v7848_v16 = vrot.slane %v7713_v2, 2  ;;  %v1716_v27 = vrot.slane %v7813_v25, 7  ;;  %13197 = vst [vmem:[#allocation30_spill] sm:$0xff] %v7893_v8 }
 0x155   : > { %v1712_v33 = vsel %vm1676_vm7, %v1710_v12, %v1711_v55  ;;  %v7856_v12 = vrot.slane %v7709_v21, 2  ;;  %v5769_v55 = vpack.i.bf16 %v7823_v18, %v7821_v41  ;;  %v7866_v14 = vmax.f32 %v835_v29, 0.0  ;;  %13199 = vst [vmem:[#allocation32_spill] sm:$0xff] %v7914_v51 }
 0x156   : > { %5606 = vmatmul.msk.f32.gmra.mxu3 %vm419_vm1, %v1706_v49  ;;  %13189 = vst [vmem:[#allocation22_spill] sm:$0xff] %v7819_v22  ;;  %v7842_v49 = vrot.slane %v7664_v32, 2  ;;  %v5794_v50 = vpack.i.bf16 %v7819_v22, %v7783_v37  ;;  %v5779_v38 = vpack.i.bf16 %v7830_v28, %v7828_v59  ;;  %v7884_v29 = vsel %vm1006_vm6, %v7845_v56, %v7606_v19 }
 0x157   : > { %13192 = vst [vmem:[#allocation25_spill] sm:$0xff] %v7828_v59  ;;  %v7889_v20 = vsel %vm1006_vm6, %v7848_v16, %v7606_v19  ;;  %v7903_v43 = vsel %vm1006_vm6, %v7856_v12, %v7606_v19  ;;  %v5774_v47 = vpack.i.bf16 %v7828_v59, %v7823_v18  ;;  %v5809_v58 = vpack.i.bf16 %v7893_v8, %v7866_v14 }
 0x158   : > { %13195 = vst [vmem:[#allocation28_spill] sm:$0xff] %v7866_v14  ;;  %v7879_v41 = vsel %vm1006_vm6, %v7842_v49, %v7606_v19  ;;  %v7956_v39 = vpack.i.bf16 %v7903_v43, %v7856_v12  ;;  %v834_v9 = vmul.f32 %v7758_v24, %v7513_v42  ;;  %v951_v42 = vrot.slane %v7631_v0, 1 }
 0x159   : > { %13203 = vst [vmem:[#allocation36_spill] sm:$0xff] %v7931_v57  ;;  %v13211_v0 = vrot.slane %v7629_v60, 1  ;;  %v838_v57 = vmul.f32 %v7758_v24, %v7555_v63  ;;  %v8038_v63 = vrot.slane %v7823_v18, 2 }
 0x15a   : > { %5790 = vrot.lane.b32.xlu1 %v5789_v5, %s7054_s30  ;;  %1358 = vrot.lane.b32.xlu0 %v7721_v3, %s7055_s7  ;;  %v7853_v5 = vrot.slane %v7706_v44, 2  ;;  %v7922_v44 = vpack.i.bf16 %v7741_v62, %v7732_v10  ;;  %v7942_v10 = vpack.i.bf16 %v7879_v41, %v7842_v49  ;;  %v7946_v62 = vpack.i.bf16 %v7884_v29, %v7845_v56 }
 0x15b   : > { %5765 = vrot.lane.b32.xlu2 %v5729_v11, %s7055_s7  ;;  %v7839_v11 = vrot.slane %v7662_v61, 2  ;;  %13208 = vst [vmem:[#allocation41_spill] sm:$0xff] %v7956_v39  ;;  %v953_v39 = vrot.slane %v7679_v17, 1  ;;  %v7989_v25 = vpack.i.bf16 %v951_v42, %v13211_v0  ;;  %v1741_v17 = vrot.slane %v7884_v29, 7 }
 0x15c   : > { %13201 = vst [vmem:[#allocation34_spill] sm:$0xff] %v7922_v44 }
 0x15d   : > { %v1026_v34 = vsel %vm1006_vm6, %v7839_v11, %v7606_v19  ;;  %13205 = vst [vmem:[#allocation38_spill] sm:$0xff] %v7942_v10 }
 0x15e   : > { %5607 = vmatmul.msk.f32.gmra.mxu3 %vm419_vm1, %v1712_v33  ;;  %v1717_v33 = vrot.slane %v7835_v6, 7  ;;  %v7928_v26 = vpack.i.bf16 %v1026_v34, %v7839_v11  ;;  %13206 = vst [vmem:[#allocation39_spill] sm:$0xff] %v7946_v62  ;;  %v7977_v62 = vmax.f32 %v834_v9, 0.0  ;;  %v1728_v9 = vrot.slane %v7839_v11, 7 }
 0x15f   : > { %v13212_v6 = vrot.slane %v7662_v61, 1  ;;  %v948_v11 = vrot.slane %v7633_v1, 1  ;;  %13215 = vst [vmem:[#allocation44_spill] sm:$0xff] %v8038_v63 }
 0x160   : > { %v1718_v2 = vsel %vm1676_vm7, %v1716_v27, %v1717_v33  ;;  %13202 = vst [vmem:[#allocation35_spill] sm:$0xff] %v7928_v26  ;;  %v7969_v33 = vrot.slane %v7606_v19, 7  ;;  %v954_v27 = vrot.slane %v7669_v40, 1  ;;  %v8057_v26 = vmax.f32 %v838_v57, 0.0 }
 0x161   : > { %13210 = vst [vmem:[#allocation43_spill] sm:$0xff] %v7977_v62  ;;  %v8078_v57 = vsel %vm1006_vm6, %v8038_v63, %v7606_v19 }
 0x162   : > { %5795 = vrot.lane.b32.xlu1 %v5794_v50, %s7055_s7  ;;  %5770 = vrot.lane.b32.xlu0 %v5769_v55, %s7054_s30  ;;  %v7898_v50 = vsel %vm1006_vm6, %v7853_v5, %v7606_v19  ;;  %v7910_v55 = vrot.slane %v7721_v3, 2  ;;  %13209 = vst [vmem:[#allocation42_spill] sm:$0xff] %v7969_v33  ;;  %v7996_v10 = vpack.i.bf16 %v13212_v6, %v954_v27  ;;  %v947_v6 = vrot.slane %v7637_v35, 1 }
 0x163   : > { %5780 = vrot.lane.b32.xlu2 %v5779_v38, %s7054_s30  ;;  %v7918_v38 = vpack.i.bf16 %v7719_v53, %v7701_v4  ;;  %v5784_v4 = vpack.i.bf16 %v7781_v48, %v7830_v28  ;;  %v7938_v53 = vpack.i.bf16 %v7889_v20, %v7848_v16  ;;  %13220 = vst [vmem:[#allocation48_spill] sm:$0xff] %v8057_v26 }
 0x164   : > { %v7963_v30 = vsel %vm1006_vm6, %v7910_v55, %v7606_v19  ;;  %v5814_v29 = vpack.i.bf16 %v947_v6, %v7786_v52  ;;  %13223 = vst [vmem:[#allocation51_spill] sm:$0xff] %v8078_v57 }
 0x165   : > { %13200 = vst [vmem:[#allocation33_spill] sm:$0xff] %v7918_v38  ;;  %v3939_v38 = vrot.slane %v8038_v63, 7 }
 0x166   : > { %5608 = vmatmul.msk.f32.gmra.mxu3 %vm419_vm1, %v1718_v2  ;;  %13204 = vst [vmem:[#allocation37_spill] sm:$0xff] %v7938_v53  ;;  %v7952_v2 = vpack.i.bf16 %v7898_v50, %v7853_v5  ;;  %v837_v53 = vmul.f32 %v7758_v24, %v7547_v54  ;;  %v5849_v54 = vpack.i.bf16 %v948_v11, %v947_v6  ;;  %v8055_v6 = vrot.slane %v7977_v62, 2 }
 0x168   : > { %13207 = vst [vmem:[#allocation40_spill] sm:$0xff] %v7952_v2  ;;  %v1729_v2 = vrot.slane %v1026_v34, 7  ;;  %v8052_v52 = vmax.f32 %v837_v53, 0.0  ;;  %v8081_v53 = vrot.slane %v7819_v22, 2  ;;  %v8102_v44 = vsel %vm1006_vm6, %v8055_v6, %v7606_v19 }
 0x169   : > { %13219 = vst [vmem:[#allocation47_spill] sm:$0xff] %v8055_v6 }
 0x16a   : > { %5810 = vrot.lane.b32.xlu1 %v5809_v58, %s7054_s30  ;;  %5775 = vrot.lane.b32.xlu0 %v5774_v47, %s7055_s7  ;;  %v842_v47 = vmul.f32 %v7758_v24, %v7584_v45  ;;  %v5799_v58 = vpack.i.bf16 %v7977_v62, %v7819_v22  ;;  %v1730_v27 = vsel %vm1676_vm7, %v1728_v9, %v1729_v2  ;;  %v13213_v2 = vrot.slane %v7664_v32, 1 }
 0x16b   : > { %5785 = vrot.lane.b32.xlu2 %v5784_v4, %s7055_s7  ;;  %v952_v4 = vrot.slane %v7676_v7, 1  ;;  %v5804_v45 = vpack.i.bf16 %v7893_v8, %v7977_v62  ;;  %v1734_v7 = vrot.slane %v7842_v49, 7  ;;  %v13214_v9 = vrot.slane %v7711_v13, 1  ;;  %13218 = vst [vmem:[#allocation46_spill] sm:$0xff] %v8052_v52 }
 0x16c   : > { %v8002_v0 = vmax.f32 %v842_v47, 0.0  ;;  %v1735_v47 = vrot.slane %v7879_v41, 7  ;;  %v8030_v41 = vrot.slane %v7709_v21, 1  ;;  %13224 = vst [vmem:[#allocation52_spill] sm:$0xff] %v8081_v53 }
 0x16d   : > { %v8007_v34 = vpack.i.bf16 %v953_v39, %v952_v4  ;;  %v8027_v1 = vpack.i.bf16 %v13214_v9, %v13213_v2  ;;  %v8032_v49 = vpack.i.bf16 %v952_v4, %v951_v42  ;;  %v13216_v9 = vrot.slane %v7667_v46, 1  ;;  %13227 = vst [vmem:[#allocation55_spill] sm:$0xff] %v8102_v44 }
 0x16e   : > { %5609 = vmatmul.msk.f32.gmra.mxu3 %vm419_vm1, %v7969_v33  ;;  %v1736_v2 = vsel %vm1676_vm7, %v1734_v7, %v1735_v47  ;;  %v12970_v42 = vrot.slane %v7635_v15, 1  ;;  %v8049_v4 = vrot.slane %v7828_v59, 2  ;;  %v8065_v46 = vrot.slane %v7783_v37, 2 }
 0x16f   : > { %v8045_v21 = vpack.i.bf16 %v13216_v9, %v953_v39  ;;  %v8068_v7 = vrot.slane %v7781_v48, 2  ;;  %v8084_v39 = vrot.slane %v7893_v8, 2 }
 0x170   : > { %13217 = vst [vmem:[#allocation45_spill] sm:$0xff] %v8049_v4  ;;  %v8097_v9 = vsel %vm1006_vm6, %v8049_v4, %v7606_v19  ;;  %v8122_v40 = vsel %vm1006_vm6, %v8065_v46, %v7606_v19  ;;  %v3945_v51 = vrot.slane %v8049_v4, 7  ;;  %v3963_v8 = vrot.slane %v8065_v46, 7 }
 0x171   : > { %13226 = vst [vmem:[#allocation54_spill] sm:$0xff] %v8097_v9  ;;  %v3946_v35 = vrot.slane %v8097_v9, 7  ;;  %v3957_v13 = vrot.slane %v8068_v7, 7 }
 0x172   : > { %5825 = vrot.lane.b32.xlu1 %v7989_v25, %s7056_s8  ;;  %5800 = vrot.lane.b32.xlu0 %v5799_v58, %s7054_s30  ;;  %v1740_v58 = vrot.slane %v7845_v56, 7  ;;  %v839_v56 = vmul.f32 %v7758_v24, %v7563_v23 }
 0x173   : > { %5835 = vrot.lane.b32.xlu2 %v7996_v10, %s7056_s8 }
 0x174   : > { %v1742_v23 = vsel %vm1676_vm7, %v1740_v58, %v1741_v17  ;;  %v8070_v17 = vmax.f32 %v839_v56, 0.0  ;;  %v8090_v58 = vpack.i.bf16 %v12970_v42, %v948_v11  ;;  %v8108_v11 = vrot.slane %v8057_v26, 2 }
 0x175   : > { %v841_v42 = vmul.f32 %v7758_v24, %v7577_v36  ;;  %v8130_v36 = vsel %vm1006_vm6, %v8068_v7, %v7606_v19 }
 0x176   : > { %5610 = vmatmul.msk.f32.gmra.mxu3 %vm419_vm1, %v1730_v27  ;;  %v840_v27 = vmul.f32 %v7758_v24, %v7570_v31  ;;  %v8062_v31 = vrot.slane %v7830_v28, 2  ;;  %13222 = vst [vmem:[#allocation50_spill] sm:$0xff] %v8070_v17  ;;  %v8125_v26 = vrot.slane %v8070_v17, 2  ;;  %v8135_v24 = vsel %vm1006_vm6, %v8081_v53, %v7606_v19 }
 0x177   : > { %v3976_v17 = vrot.slane %v8102_v44, 7  ;;  %v8157_v37 = vsel %vm1006_vm6, %v8108_v11, %v7606_v19 }
 0x178   : > { %13221 = vst [vmem:[#allocation49_spill] sm:$0xff] %v8062_v31  ;;  %v8086_v47 = vmax.f32 %v840_v27, 0.0  ;;  %v8105_v27 = vrot.slane %v8052_v52, 2  ;;  %v8117_v56 = vsel %vm1006_vm6, %v8062_v31, %v7606_v19  ;;  %v3951_v44 = vrot.slane %v8062_v31, 7  ;;  %v8182_v31 = vpop.permute.xlu2 %5690 }
 0x179   : > { %v8167_v9 = vsel %vm1006_vm6, %v8125_v26, %v7606_v19  ;;  %13231 = vst [vmem:[#allocation59_spill] sm:$0xff] %v8182_v31  ;;  %v3952_v48 = vrot.slane %v8117_v56, 7  ;;  %v3958_v52 = vrot.slane %v8130_v36, 7 }
 0x17a   : > { %5830 = vrot.lane.b32.xlu1 %v8007_v34, %s7056_s8  ;;  %5805 = vrot.lane.b32.xlu0 %v5804_v45, %s7055_s7  ;;  %13225 = vst [vmem:[#allocation53_spill] sm:$0xff] %v8086_v47  ;;  %v3940_v45 = vrot.slane %v8078_v57, 7  ;;  %v8143_v57 = vrot.slane %v8086_v47, 2  ;;  %v8152_v62 = vsel %vm1006_vm6, %v8105_v27, %v7606_v19  ;;  %v8159_v47 = vmax.f32 %v841_v42, 0.0 }
 0x17b   : > { %5840 = vrot.lane.b32.xlu2 %v8027_v1, %s7056_s8  ;;  %v8178_v42 = vsel %vm1676_vm7, %v3945_v51, %v3946_v35  ;;  %v3969_v35 = vrot.slane %v8081_v53, 7  ;;  %v3970_v51 = vrot.slane %v8135_v24, 7 }
 0x17c   : > { %13228 = vst [vmem:[#allocation56_spill] sm:$0xff] %v8159_v47  ;;  %v8172_v4 = vsel %vm1006_vm6, %v8143_v57, %v7606_v19  ;;  %v8175_v63 = vsel %vm1676_vm7, %v3939_v38, %v3940_v45  ;;  %v3964_v38 = vrot.slane %v8122_v40, 7  ;;  %v8196_v45 = vsel %vm1676_vm7, %v3957_v13, %v3958_v52 }
 0x17d   : > { %13229 = vst [vmem:[#allocation57_spill] sm:$0xff] %v8175_v63  ;;  %v8205_v53 = vsel %vm1676_vm7, %v3969_v35, %v3970_v51  ;;  %v3996_v52 = vrot.slane %v8108_v11, 7  ;;  %v4008_v35 = vrot.slane %v8143_v57, 7 }
 0x17e   : > { %5611 = vmatmul.msk.f32.gmra.mxu3 %vm419_vm1, %v1736_v2  ;;  %v8140_v2 = vsel %vm1006_vm6, %v8084_v39, %v7606_v19  ;;  %13230 = vst [vmem:[#allocation58_spill] sm:$0xff] %v8178_v42  ;;  %v3984_v42 = vrot.slane %v8084_v39, 7  ;;  %v8202_v31 = vsel %vm1676_vm7, %v3963_v8, %v3964_v38  ;;  %v4002_v8 = vrot.slane %v8125_v26, 7 }
 0x17f   : > { %13233 = vst [vmem:[#allocation61_spill] sm:$0xff] %v8196_v45  ;;  %v3985_v63 = vrot.slane %v8140_v2, 7  ;;  %v4003_v38 = vrot.slane %v8167_v9, 7 }
 0x180   : > { %13234 = vst [vmem:[#allocation62_spill] sm:$0xff] %v8202_v31 }
 0x181   : > { %13235 = vst [vmem:[#allocation63_spill] sm:$0xff] %v8205_v53  ;;  %v8212_v13 = vsel %vm1676_vm7, %v3984_v42, %v3985_v63  ;;  %v8228_v42 = vrot.slane %v8159_v47, 2  ;;  %v13266_v53 = vld [vmem:[#allocation16_spill] sm:$0xff] }
 0x182   : > { %989 = vrot.lane.b32.xlu1 %v8030_v41, %s7056_s8  ;;  %5815 = vrot.lane.b32.xlu0 %v5814_v29, %s7056_s8  ;;  %v8193_v29 = vsel %vm1676_vm7, %v3951_v44, %v3952_v48  ;;  %v3990_v44 = vrot.slane %v8105_v27, 7  ;;  %13237 = vst [vmem:[#allocation65_spill] sm:$0xff] %v8212_v13  ;;  %v3991_v48 = vrot.slane %v8152_v62, 7  ;;  %v8236_v13 = vsel %vm1676_vm7, %v4002_v8, %v4003_v38 }
 0x183   : > { %5850 = vrot.lane.b32.xlu2 %v5849_v54, %s7057_s9  ;;  %v3975_v54 = vrot.slane %v8055_v6, 7  ;;  %13232 = vst [vmem:[#allocation60_spill] sm:$0xff] %v8193_v29  ;;  %v13248_v8 = vrot.slane %v7848_v16, 7 }
 0x184   : > { %v8222_v51 = vsel %vm1676_vm7, %v3990_v44, %v3991_v48  ;;  %13240 = vst [vmem:[#allocation68_spill] sm:$0xff] %v8228_v42  ;;  %v8248_v44 = vsel %vm1006_vm6, %v8228_v42, %v7606_v19  ;;  %v1752_v48 = vrot.slane %v7853_v5, 7 }
 0x185   : > { %v8208_v6 = vsel %vm1676_vm7, %v3975_v54, %v3976_v17  ;;  %v4009_v17 = vrot.slane %v8172_v4, 7  ;;  %13238 = vst [vmem:[#allocation66_spill] sm:$0xff] %v8222_v51  ;;  %v8231_v54 = vrot.slane %v8002_v0, 2 }
 0x186   : > { %5612 = vmatmul.msk.f32.gmra.mxu3 %vm419_vm1, %v1742_v23  ;;  %13236 = vst [vmem:[#allocation64_spill] sm:$0xff] %v8208_v6  ;;  %v3997_v23 = vrot.slane %v8157_v37, 7 }
 0x187   : > { %13241 = vst [vmem:[#allocation69_spill] sm:$0xff] %v8231_v54  ;;  %v8239_v6 = vsel %vm1676_vm7, %v4008_v35, %v4009_v17  ;;  %v13249_v35 = vld [vmem:[#allocation17_spill] sm:$0xff] }
 0x188   : > { %v8225_v63 = vsel %vm1676_vm7, %v3996_v52, %v3997_v23  ;;  %13242 = vst [vmem:[#allocation70_spill] sm:$0xff] %v8236_v13  ;;  %v8259_v52 = vpack.i.bf16 %v8248_v44, %v8228_v42  ;;  %v13247_v23 = vrot.slane %v7889_v20, 7  ;;  %v958_v17 = vrot.slane %v13249_v35, 1 }
 0x189   : > { %13239 = vst [vmem:[#allocation67_spill] sm:$0xff] %v8225_v63 }
 0x18a   : > { %5860 = vrot.lane.b32.xlu1 %v8032_v49, %s7057_s9  ;;  %13243 = vst [vmem:[#allocation71_spill] sm:$0xff] %v8239_v6  ;;  %5820 = vrot.lane.b32.xlu0 %v8090_v58, %s7056_s8  ;;  %v8253_v49 = vsel %vm1006_vm6, %v8231_v54, %v7606_v19  ;;  %v1748_v38 = vsel %vm1676_vm7, %v13248_v8, %v13247_v23  ;;  %v13250_v6 = vld [vmem:[#allocation14_spill] sm:$0xff]  ;;  %v13251_v23 = vrot.slane %v7635_v15, 1  ;;  %v13252_v8 = vrot.slane %v7629_v60, 1  ;;  %v13293_v60 = vld [vmem:[#allocation35_spill] sm:$0xff] }
 0x18b   : > { %5865 = vrot.lane.b32.xlu2 %v8045_v21, %s7057_s9  ;;  %13244 = vst [vmem:[#allocation72_spill] sm:$0xff] %v8248_v44  ;;  %v959_v13 = vrot.slane %v13250_v6, 1  ;;  %v13264_v54 = vld [vmem:[#allocation30_spill] sm:$0xff] }
 0x18c   : > { %13245 = vst [vmem:[#allocation73_spill] sm:$0xff] %v8253_v49  ;;  %v1753_v49 = vrot.slane %v7898_v50, 7  ;;  %v5854_v5 = vpack.i.bf16 %v13252_v8, %v13251_v23  ;;  %v1758_v50 = vrot.slane %v7856_v12, 7  ;;  %v13255_v12 = vrot.slane %v7664_v32, 1  ;;  %v13265_v44 = vld [vmem:[#allocation46_spill] sm:$0xff]  ;;  %v13298_v32 = vld [vmem:[#allocation37_spill] sm:$0xff] }
 0x18d   : > { %13246 = vst [vmem:[#allocation74_spill] sm:$0xff] %v8259_v52  ;;  %v8261_v21 = vpop.permute.xlu2 %5695  ;;  %v5879_v63 = vpack.i.bf16 %v959_v13, %v958_v17  ;;  %v13015_v42 = vrot.slane %v13265_v44, 1 }
 0x18e   : > { %5613 = vmatmul.msk.f32.gmra.mxu3 %vm419_vm1, %v1748_v38  ;;  %v1754_v20 = vsel %vm1676_vm7, %v1752_v48, %v1753_v49  ;;  %v1759_v38 = vrot.slane %v7903_v43, 7  ;;  %v13254_v49 = vrot.slane %v7662_v61, 1  ;;  %v1764_v48 = vrot.slane %v7910_v55, 7 }
 0x190   : > { %v5909_v43 = vpack.i.bf16 %v13255_v12, %v13254_v49  ;;  %v13258_v49 = vld [vmem:[#allocation23_spill] sm:$0xff] }
 0x191   : > { %v3238_v12 = vrot.slane %v13258_v49, 1 }
 0x192   : > { %5875 = vrot.lane.b32.xlu1 %v8027_v1, %s7057_s9  ;;  %5845 = vrot.lane.b32.xlu0 %v5879_v63, %s7056_s8 }
 0x193   : > { %5880 = vrot.lane.b32.xlu2 %v5879_v63, %s7057_s9  ;;  %v1760_v63 = vsel %vm1676_vm7, %v1758_v50, %v1759_v38  ;;  %v1181_v50 = vrot.slane %v7721_v3, 1  ;;  %v5919_v38 = vpack.i.bf16 %v8030_v41, %v959_v13  ;;  %v3240_v13 = vrot.slane %v7828_v59, 1 }
 0x195   : > { %v8277_v16 = vpop.permute.xlu2 %5710 }
 0x196   : > { %5614 = vmatmul.msk.f32.gmra.mxu3 %vm419_vm1, %v1754_v20  ;;  %v13256_v20 = vld [vmem:[#allocation20_spill] sm:$0xff] }
 0x19a   : > { %5890 = vrot.lane.b32.xlu1 %v8090_v58, %s7058_s10  ;;  %5855 = vrot.lane.b32.xlu0 %v5854_v5, %s7057_s9  ;;  %v1765_v58 = vrot.slane %v7963_v30, 7 }
 0x19b   : > { %5895 = vrot.lane.b32.xlu2 %v7989_v25, %s7058_s10 }
 0x19c   : > { %v1766_v5 = vsel %vm1676_vm7, %v1764_v48, %v1765_v58 }
 0x19d   : > { %v8292_v1 = vpop.permute.xlu2 %5725 }
 0x19e   : > { %13253 = vst [vmem:[#allocation75_spill] sm:$0xff] %v8292_v1  ;;  %5615 = vmatmul.msk.f32.gmra.mxu3 %vm419_vm1, %v1760_v63  ;;  %v5884_v63 = vpack.i.bf16 %v1181_v50, %v8030_v41  ;;  %v3241_v41 = vrot.slane %v7830_v28, 1 }
 0x1a2   : > { %5905 = vrot.lane.b32.xlu1 %v13256_v20, %s7058_s10  ;;  %5870 = vrot.lane.b32.xlu0 %v7996_v10, %s7057_s9  ;;  %v5929_v20 = vpack.i.bf16 %v3241_v41, %v3240_v13 }
 0x1a3   : > { %5910 = vrot.lane.b32.xlu2 %v5909_v43, %s7058_s10  ;;  %v3239_v43 = vrot.slane %v7823_v18, 1 }
 0x1a4   : > { %v8307_v25 = vpop.permute.xlu1 %5705  ;;  %v8309_v23 = vpop.permute.xlu0 %5700 }
 0x1a5   : > { %v8311_v8 = vpop.permute.xlu2 %5735  ;;  %v5924_v58 = vpack.i.bf16 %v3239_v43, %v3238_v12  ;;  %v3246_v12 = vrot.slane %v13264_v54, 1  ;;  %v13271_v54 = vld [vmem:[#allocation19_spill] sm:$0xff] }
 0x1a6   : > { %5616 = vmatmul.msk.f32.gmra.mxu3 %vm419_vm1, %v1766_v5  ;;  %v3243_v59 = vrot.slane %v13271_v54, 1 }
 0x1aa   : > { %5920 = vrot.lane.b32.xlu1 %v5919_v38, %s7058_s10  ;;  %5885 = vrot.lane.b32.xlu0 %v5884_v63, %s7057_s9  ;;  %v3245_v38 = vrot.slane %v7866_v14, 1 }
 0x1ab   : > { %1403 = vrot.lane.b32.xlu2 %v1181_v50, %s7058_s10  ;;  %v3244_v50 = vrot.slane %v7819_v22, 1  ;;  %v13270_v22 = vld [vmem:[#allocation18_spill] sm:$0xff] }
 0x1ac   : > { %v8321_v10 = vpop.permute.xlu1 %5720  ;;  %v8325_v48 = vpop.permute.xlu0 %5715  ;;  %v3242_v18 = vrot.slane %v13270_v22, 1  ;;  %v5989_v6 = vpack.i.bf16 %v3246_v12, %v3245_v38 }
 0x1ad   : > { %13257 = vst [vmem:[#allocation20_spill] sm:$0xff] %v8321_v10  ;;  %v8327_v3 = vpop.permute.xlu2 %5750  ;;  %v5939_v51 = vpack.i.bf16 %v3245_v38, %v3244_v50 }
 0x1ae   : > { %13259 = vst [vmem:[#allocation76_spill] sm:$0xff] %v8325_v48  ;;  %5617 = vmatmul.msk.f32.gmra.mxu3 %vm419_vm1, %v7969_v33  ;;  %v5944_v33 = vpack.i.bf16 %v13015_v42, %v3246_v12  ;;  %v5969_v42 = vpack.i.bf16 %v3243_v59, %v3242_v18  ;;  %v5964_v15 = vpack.i.bf16 %v3242_v18, %v3241_v41  ;;  %v13281_v18 = vld [vmem:[#allocation29_spill] sm:$0xff]  ;;  %v13285_v41 = vld [vmem:[#allocation31_spill] sm:$0xff] }
 0x1af   : > { %13260 = vst [vmem:[#allocation77_spill] sm:$0xff] %v8327_v3 }
 0x1b2   : > { %5925 = vrot.lane.b32.xlu1 %v5924_v58, %s7056_s8  ;;  %5900 = vrot.lane.b32.xlu0 %v8007_v34, %s7058_s10  ;;  %v13267_v34 = vrot.slane %v13266_v53, 1  ;;  %v13299_v53 = vld [vmem:[#allocation38_spill] sm:$0xff] }
 0x1b3   : > { %5930 = vrot.lane.b32.xlu2 %v5929_v20, %s7056_s8 }
 0x1b4   : > { %v8337_v5 = vpop.permute.xlu1 %1161  ;;  %v8341_v63 = vpop.permute.xlu0 %5730  ;;  %v5914_v31 = vpack.i.bf16 %v958_v17, %v13267_v34  ;;  %v5954_v17 = vpack.i.bf16 %v3240_v13, %v3239_v43  ;;  %v5974_v34 = vpack.i.bf16 %v3244_v50, %v3243_v59  ;;  %v13278_v59 = vld [vmem:[#allocation8_spill] sm:$0xff] }
 0x1b5   : > { %13261 = vst [vmem:[#allocation78_spill] sm:$0xff] %v8337_v5  ;;  %v8343_v52 = vpop.permute.xlu2 %5765  ;;  %v1009_v43 = vrot.slane %v13278_v59, 2  ;;  %v13292_v59 = vld [vmem:[#allocation34_spill] sm:$0xff] }
 0x1b6   : > { %13262 = vst [vmem:[#allocation79_spill] sm:$0xff] %v8341_v63 }
 0x1b7   : > { %13263 = vst [vmem:[#allocation80_spill] sm:$0xff] %v8343_v52 }
 0x1ba   : > { %5940 = vrot.lane.b32.xlu1 %v5939_v51, %s7056_s8  ;;  %5915 = vrot.lane.b32.xlu0 %v5914_v31, %s7058_s10 }
 0x1bb   : > { %5945 = vrot.lane.b32.xlu2 %v5944_v33, %s7056_s8 }
 0x1bc   : > { %v8354_v45 = vpop.permute.xlu1 %5745  ;;  %v8356_v29 = vpop.permute.xlu0 %5740 }
 0x1bd   : > { %13268 = vst [vmem:[#allocation46_spill] sm:$0xff] %v8354_v45  ;;  %v8358_v5 = vpop.permute.xlu2 %5780  ;;  %v13376_v45 = vld [vmem:[#allocation4_spill] sm:$0xff] }
 0x1be   : > { %13269 = vst [vmem:[#allocation81_spill] sm:$0xff] %v8358_v5 }
 0x1c2   : > { %5950 = vrot.lane.b32.xlu1 %v5924_v58, %s7057_s9  ;;  %5935 = vrot.lane.b32.xlu0 %v5969_v42, %s7056_s8  ;;  %v13276_v58 = vld [vmem:[#allocation43_spill] sm:$0xff] }
 0x1c3   : > { %5970 = vrot.lane.b32.xlu2 %v5969_v42, %s7057_s9  ;;  %v3456_v54 = vrot.slane %v13276_v58, 1  ;;  %v13286_v58 = vld [vmem:[#allocation32_spill] sm:$0xff] }
 0x1c4   : > { %v8365_v33 = vpop.permute.xlu1 %5760  ;;  %v8367_v31 = vpop.permute.xlu0 %5755 }
 0x1c5   : > { %13272 = vst [vmem:[#allocation82_spill] sm:$0xff] %v8365_v33  ;;  %v8369_v51 = vpop.permute.xlu2 %5785  ;;  %v5979_v35 = vpack.i.bf16 %v3456_v54, %v3244_v50  ;;  %v5984_v50 = vpack.i.bf16 %v3246_v12, %v3456_v54  ;;  %v13287_v54 = vld [vmem:[#allocation33_spill] sm:$0xff] }
 0x1c6   : > { %13273 = vst [vmem:[#allocation83_spill] sm:$0xff] %v8367_v31 }
 0x1c7   : > { %13274 = vst [vmem:[#allocation84_spill] sm:$0xff] %v8369_v51 }
 0x1ca   : > { %5955 = vrot.lane.b32.xlu1 %v5954_v17, %s7058_s10  ;;  %5960 = vrot.lane.b32.xlu0 %v5929_v20, %s7057_s9 }
 0x1cb   : > { %5975 = vrot.lane.b32.xlu2 %v5974_v34, %s7058_s10  ;;  %v1010_v34 = vsel %vm1006_vm6, %v1009_v43, %v7606_v19 }
 0x1cc   : > { %v8374_v22 = vpop.permute.xlu1 %5790  ;;  %v8377_v28 = vpop.permute.xlu0 %1358  ;;  %v5994_v38 = vpack.i.bf16 %v1010_v34, %v1009_v43 }
 0x1cd   : > { %13275 = vst [vmem:[#allocation85_spill] sm:$0xff] %v8374_v22  ;;  %v8379_v42 = vpop.permute.xlu2 %5835 }
 0x1ce   : > { %13277 = vst [vmem:[#allocation43_spill] sm:$0xff] %v8377_v28 }
 0x1d2   : > { %5980 = vrot.lane.b32.xlu1 %v5979_v35, %s7057_s9  ;;  %5965 = vrot.lane.b32.xlu0 %v5964_v15, %s7058_s10 }
 0x1d3   : > { %5990 = vrot.lane.b32.xlu2 %v5989_v6, %s7057_s9 }
 0x1d4   : > { %v8385_v13 = vpop.permute.xlu1 %5795  ;;  %v8387_v20 = vpop.permute.xlu0 %5770 }
 0x1d5   : > { %13279 = vst [vmem:[#allocation86_spill] sm:$0xff] %v8385_v13  ;;  %v8389_v17 = vpop.permute.xlu2 %5840 }
 0x1d6   : > { %13280 = vst [vmem:[#allocation87_spill] sm:$0xff] %v8387_v20  ;;  %v5843_v1 = vunpack.i.h.bf16 %v8389_v17 }
 0x1da   : > { %5985 = vrot.lane.b32.xlu1 %v5984_v50, %s7058_s10  ;;  %5995 = vrot.lane.b32.xlu0 %v5994_v38, %s7053_s29  ;;  %v13291_v50 = vld [vmem:[#allocation11_spill] sm:$0xff] }
 0x1db   : > { %6005 = vrot.lane.b32.xlu2 %v13281_v18, %s7053_s29  ;;  %v1023_v28 = vrot.slane %v13291_v50, 2 }
 0x1dc   : > { %v8397_v6 = vpop.permute.xlu1 %5810  ;;  %v8399_v15 = vpop.permute.xlu0 %5775 }
 0x1dd   : > { %13282 = vst [vmem:[#allocation29_spill] sm:$0xff] %v8397_v6  ;;  %v8401_v35 = vpop.permute.xlu2 %5850  ;;  %v13354_v22 = vld [vmem:[#allocation87_spill] sm:$0xff] }
 0x1de   : > { %13283 = vst [vmem:[#allocation88_spill] sm:$0xff] %v8399_v15 }
 0x1df   : > { %13284 = vst [vmem:[#allocation89_spill] sm:$0xff] %v8401_v35  ;;  %v13294_v35 = vld [vmem:[#allocation36_spill] sm:$0xff] }
 0x1e2   : > { %6000 = vrot.lane.b32.xlu1 %v13285_v41, %s7053_s29  ;;  %6010 = vrot.lane.b32.xlu0 %v13287_v54, %s7053_s29 }
 0x1e3   : > { %6020 = vrot.lane.b32.xlu2 %v13286_v58, %s7053_s29 }
 0x1e4   : > { %v8409_v12 = vpop.permute.xlu1 %5825  ;;  %v8411_v43 = vpop.permute.xlu0 %5800 }
 0x1e5   : > { %13288 = vst [vmem:[#allocation31_spill] sm:$0xff] %v8409_v12  ;;  %v8413_v34 = vpop.permute.xlu2 %5865 }
 0x1e6   : > { %13289 = vst [vmem:[#allocation32_spill] sm:$0xff] %v8411_v43 }
 0x1e7   : > { %13290 = vst [vmem:[#allocation33_spill] sm:$0xff] %v8413_v34  ;;  %v1024_v34 = vsel %vm1006_vm6, %v1023_v28, %v7606_v19 }
 0x1e8   : > { %v6029_v43 = vpack.i.bf16 %v1024_v34, %v1023_v28  ;;  %v13304_v28 = vld [vmem:[#allocation40_spill] sm:$0xff] }
 0x1ea   : > { %6015 = vrot.lane.b32.xlu1 %v13292_v59, %s7053_s29  ;;  %6025 = vrot.lane.b32.xlu0 %v13294_v35, %s7053_s29 }
 0x1eb   : > { %6035 = vrot.lane.b32.xlu2 %v13293_v60, %s7053_s29 }
 0x1ec   : > { %v8422_v15 = vpop.permute.xlu1 %5830  ;;  %v8424_v6 = vpop.permute.xlu0 %5805 }
 0x1ed   : > { %13295 = vst [vmem:[#allocation34_spill] sm:$0xff] %v8422_v15  ;;  %v8426_v12 = vpop.permute.xlu2 %5880 }
 0x1ee   : > { %13296 = vst [vmem:[#allocation35_spill] sm:$0xff] %v8424_v6 }
 0x1ef   : > { %13297 = vst [vmem:[#allocation36_spill] sm:$0xff] %v8426_v12  ;;  %v13303_v12 = vld [vmem:[#allocation39_spill] sm:$0xff] }
 0x1f2   : > { %6030 = vrot.lane.b32.xlu1 %v6029_v43, %s7053_s29  ;;  %6040 = vrot.lane.b32.xlu0 %v13299_v53, %s7053_s29 }
 0x1f3   : > { %6050 = vrot.lane.b32.xlu2 %v13298_v32, %s7053_s29 }
 0x1f4   : > { %v8435_v20 = vpop.permute.xlu1 %989  ;;  %v8439_v15 = vpop.permute.xlu0 %5815 }
 0x1f5   : > { %13300 = vst [vmem:[#allocation37_spill] sm:$0xff] %v8435_v20  ;;  %v8437_v13 = vpop.permute.xlu2 %5895 }
 0x1f6   : > { %13301 = vst [vmem:[#allocation38_spill] sm:$0xff] %v8437_v13  ;;  %v13308_v13 = vld [vmem:[#allocation41_spill] sm:$0xff] }
 0x1f7   : > { %13302 = vst [vmem:[#allocation90_spill] sm:$0xff] %v8439_v15 }
 0x1fa   : > { %6045 = vrot.lane.b32.xlu1 %v13303_v12, %s7053_s29  ;;  %6055 = vrot.lane.b32.xlu0 %v13304_v28, %s7053_s29 }
 0x1fb   : > { %6070 = vrot.lane.b32.xlu2 %v13285_v41, %s7059_s11 }
 0x1fc   : > { %v8447_v34 = vpop.permute.xlu1 %5860  ;;  %v8451_v50 = vpop.permute.xlu0 %5820 }
 0x1fd   : > { %13305 = vst [vmem:[#allocation39_spill] sm:$0xff] %v8447_v34  ;;  %v8449_v6 = vpop.permute.xlu2 %5910  ;;  %v13312_v34 = vld [vmem:[#allocation21_spill] sm:$0xff] }
 0x1fe   : > { %13306 = vst [vmem:[#allocation40_spill] sm:$0xff] %v8449_v6  ;;  %v13311_v6 = vld [vmem:[#allocation27_spill] sm:$0xff] }
 0x1ff   : > { %13307 = vst [vmem:[#allocation91_spill] sm:$0xff] %v8451_v50  ;;  %v13313_v50 = vpack.i.bf16 %v13311_v6, %v13312_v34 }
 0x202   : > { %6060 = vrot.lane.b32.xlu1 %v13308_v13, %s7053_s29  ;;  %6075 = vrot.lane.b32.xlu0 %v13281_v18, %s7059_s11 }
 0x203   : > { %6085 = vrot.lane.b32.xlu2 %v13292_v59, %s7059_s11 }
 0x204   : > { %v8459_v20 = vpop.permute.xlu1 %5875  ;;  %v8463_v15 = vpop.permute.xlu0 %5845 }
 0x205   : > { %13309 = vst [vmem:[#allocation41_spill] sm:$0xff] %v8459_v20  ;;  %v8461_v41 = vpop.permute.xlu2 %1403  ;;  %v861_v20 = vld [vmem:[%s7613_s28 + $0x90] sm:$0xff] }
 0x206   : > { %13310 = vst [vmem:[#allocation92_spill] sm:$0xff] %v8461_v41 }
 0x20a   : > { %6065 = vrot.lane.b32.xlu1 %v5994_v38, %s7059_s11  ;;  %6090 = vrot.lane.b32.xlu0 %v13286_v58, %s7059_s11  ;;  %v3294_v58 = vrot.slane %v13258_v49, 2  ;;  %v13321_v49 = vld [vmem:[#allocation44_spill] sm:$0xff] }
 0x20b   : > { %6100 = vrot.lane.b32.xlu2 %v13313_v50, %s7059_s11 }
 0x20c   : > { %v8472_v59 = vpop.permute.xlu1 %5890  ;;  %v8476_v18 = vpop.permute.xlu0 %5855  ;;  %v3295_v34 = vsel %vm1006_vm6, %v3294_v58, %v7606_v19 }
 0x20d   : > { %v8474_v61 = vpop.permute.xlu2 %5930 }
 0x212   : > { %6080 = vrot.lane.b32.xlu1 %v13287_v54, %s7059_s11  ;;  %6105 = vrot.lane.b32.xlu0 %v6029_v43, %s7059_s11 }
 0x213   : > { %6115 = vrot.lane.b32.xlu2 %v13299_v53, %s7059_s11 }
 0x214   : > { %v8483_v38 = vpop.permute.xlu1 %5905  ;;  %v8487_v50 = vpop.permute.xlu0 %5870 }
 0x215   : > { %v8485_v6 = vpop.permute.xlu2 %5945  ;;  %13314 = vst [vmem:[#allocation27_spill] sm:$0xff] %v8487_v50 }
 0x21a   : > { %6095 = vrot.lane.b32.xlu1 %v13294_v35, %s7059_s11  ;;  %6120 = vrot.lane.b32.xlu0 %v13303_v12, %s7059_s11  ;;  %v6144_v35 = vpack.i.bf16 %v3295_v34, %v3294_v58  ;;  %v858_v58 = vld [vmem:[%s7613_s28 + $0x78] sm:$0xff]  ;;  %v857_v34 = vld [vmem:[%s7613_s28 + $0x70] sm:$0xff] }
 0x21b   : > { %6130 = vrot.lane.b32.xlu2 %v13304_v28, %s7059_s11  ;;  %1816 = vmatpush.msrb.mxu2 %v858_v58 }
 0x21c   : > { %v8496_v53 = vpop.permute.xlu1 %5920  ;;  %v8500_v43 = vpop.permute.xlu0 %5885 }
 0x21d   : > { %13315 = vst [vmem:[#allocation21_spill] sm:$0xff] %v8496_v53  ;;  %v8498_v54 = vpop.permute.xlu2 %5970  ;;  %1817 = vmatpush.msrb.mxu2 %v857_v34 }
 0x21e   : > { %13316 = vst [vmem:[#allocation93_spill] sm:$0xff] %v8498_v54 }
 0x21f   : > { %13317 = vst [vmem:[#allocation94_spill] sm:$0xff] %v8500_v43  ;;  %v13322_v43 = vld [vmem:[#allocation51_spill] sm:$0xff] }
 0x220   : > { %v6154_v54 = vpack.i.bf16 %v13322_v43, %v13321_v49  ;;  %v856_v43 = vld [vmem:[%s7613_s28 + $0x68] sm:$0xff] }
 0x221   : > { %1818 = vmatpush.msrb.mxu2 %v856_v43  ;;  %v13335_v43 = vld [vmem:[#allocation52_spill] sm:$0xff] }
 0x222   : > { %6110 = vrot.lane.b32.xlu1 %v13293_v60, %s7059_s11  ;;  %6135 = vrot.lane.b32.xlu0 %v13308_v13, %s7059_s11 }
 0x223   : > { %6145 = vrot.lane.b32.xlu2 %v6144_v35, %s7059_s11 }
 0x224   : > { %v8509_v12 = vpop.permute.xlu1 %5925  ;;  %v8513_v41 = vpop.permute.xlu0 %5900 }
 0x225   : > { %13318 = vst [vmem:[#allocation95_spill] sm:$0xff] %v8509_v12  ;;  %v8511_v28 = vpop.permute.xlu2 %5975  ;;  %v855_v12 = vld [vmem:[%s7613_s28 + $0x60] sm:$0xff] }
 0x226   : > { %13319 = vst [vmem:[#allocation96_spill] sm:$0xff] %v8511_v28  ;;  %v13325_v28 = vld [vmem:[#allocation49_spill] sm:$0xff]  ;;  %1819 = vmatpush.msrb.mxu2 %v855_v12  ;;  %v853_v12 = vld [vmem:[%s7613_s28 + $0x50] sm:$0xff] }
 0x227   : > { %13320 = vst [vmem:[#allocation97_spill] sm:$0xff] %v8513_v41  ;;  %v6174_v49 = vpack.i.bf16 %v8117_v56, %v13325_v28  ;;  %v8547_v56 = vpack.i.bf16 %v8122_v40, %v8065_v46  ;;  %v3308_v46 = vrot.slane %v7866_v14, 2  ;;  %v13343_v14 = vld [vmem:[#allocation53_spill] sm:$0xff] }
 0x22a   : > { %6125 = vrot.lane.b32.xlu1 %v13298_v32, %s7059_s11  ;;  %6155 = vrot.lane.b32.xlu0 %v6154_v54, %s7059_s11  ;;  %v13326_v32 = vpack.i.bf16 %v7963_v30, %v7910_v55  ;;  %v6184_v55 = vpack.i.bf16 %v8130_v36, %v8068_v7  ;;  %v854_v30 = vld [vmem:[%s7613_s28 + $0x58] sm:$0xff]  ;;  %v13334_v36 = vld [vmem:[#allocation54_spill] sm:$0xff] }
 0x22b   : > { %6150 = vrot.lane.b32.xlu2 %v6144_v35, %s7053_s29  ;;  %1820 = vmatpush.msrb.mxu2 %v854_v30  ;;  %v13333_v7 = vld [vmem:[#allocation45_spill] sm:$0xff]  ;;  %v851_v30 = vld [vmem:[%s7613_s28 + $0x40] sm:$0xff] }
 0x22c   : > { %v8523_v60 = vpop.permute.xlu1 %5940  ;;  %v8527_v41 = vpop.permute.xlu0 %5915 }
 0x22d   : > { %v8525_v13 = vpop.permute.xlu2 %5990  ;;  %13324 = vst [vmem:[#allocation51_spill] sm:$0xff] %v8527_v41  ;;  %1821 = vmatpush.msrb.mxu2 %v853_v12  ;;  %v13337_v12 = vld [vmem:[#allocation47_spill] sm:$0xff]  ;;  %v3250_v41 = vrot.slane %v13343_v14, 1 }
 0x22e   : > { %13323 = vst [vmem:[#allocation44_spill] sm:$0xff] %v8525_v13 }
 0x232   : > { %6140 = vrot.lane.b32.xlu1 %v13326_v32, %s7059_s11  ;;  %6180 = vrot.lane.b32.xlu0 %v6174_v49, %s7053_s29  ;;  %v6204_v32 = vpack.i.bf16 %v8135_v24, %v13335_v43 }
 0x233   : > { %6175 = vrot.lane.b32.xlu2 %v6174_v49, %s7059_s11 }
 0x234   : > { %v8539_v35 = vpop.permute.xlu1 %5950  ;;  %v8543_v34 = vpop.permute.xlu0 %5935 }
 0x235   : > { %13327 = vst [vmem:[#allocation49_spill] sm:$0xff] %v8539_v35  ;;  %v8541_v58 = vpop.permute.xlu2 %6005 }
 0x236   : > { %13328 = vst [vmem:[#allocation98_spill] sm:$0xff] %v8541_v58 }
 0x237   : > { %13329 = vst [vmem:[#allocation99_spill] sm:$0xff] %v8543_v34  ;;  %v3309_v34 = vsel %vm1006_vm6, %v3308_v46, %v7606_v19  ;;  %v8586_v19 = vpack.i.bf16 %v8140_v2, %v8084_v39  ;;  %v3251_v39 = vrot.slane %v8159_v47, 1  ;;  %v3457_v2 = vrot.slane %v8002_v0, 1 }
 0x238   : > { %v8588_v35 = vpack.i.bf16 %v3309_v34, %v3308_v46  ;;  %v13344_v34 = vrot.slane %v13265_v44, 1 }
 0x23a   : > { %6160 = vrot.lane.b32.xlu1 %v6154_v54, %s7053_s29  ;;  %6185 = vrot.lane.b32.xlu0 %v6184_v55, %s7059_s11  ;;  %v6164_v54 = vpack.i.bf16 %v13334_v36, %v13333_v7  ;;  %v13339_v7 = vld [vmem:[#allocation48_spill] sm:$0xff] }
 0x23b   : > { %6200 = vrot.lane.b32.xlu2 %v8547_v56, %s7053_s29  ;;  %v3248_v36 = vrot.slane %v13339_v7, 1 }
 0x23c   : > { %v8557_v28 = vpop.permute.xlu1 %5955  ;;  %v8561_v40 = vpop.permute.xlu0 %5960 }
 0x23d   : > { %13330 = vst [vmem:[#allocation100_spill] sm:$0xff] %v8557_v28  ;;  %v8559_v49 = vpop.permute.xlu2 %6020  ;;  %v852_v28 = vld [vmem:[%s7613_s28 + $0x48] sm:$0xff]  ;;  %v8604_v46 = vpack.i.bf16 %v3248_v36, %v13344_v34  ;;  %v850_v34 = vld [vmem:[%s7613_s28 + $0x38] sm:$0xff] }
 0x23e   : > { %13331 = vst [vmem:[#allocation101_spill] sm:$0xff] %v8559_v49  ;;  %v13338_v49 = vld [vmem:[#allocation55_spill] sm:$0xff]  ;;  %1822 = vmatpush.msrb.mxu2 %v852_v28  ;;  %v8594_v28 = vpack.i.bf16 %v8152_v62, %v8105_v27  ;;  %v8612_v62 = vpack.i.bf16 %v8157_v37, %v8108_v11  ;;  %v875_v37 = vld [vmem:[%s7613_s28 + $0x100] sm:$0xff]  ;;  %v849_v11 = vld [vmem:[%s7613_s28 + $0x30] sm:$0xff] }
 0x23f   : > { %13332 = vst [vmem:[#allocation102_spill] sm:$0xff] %v8561_v40  ;;  %v6214_v58 = vpack.i.bf16 %v13338_v49, %v13337_v12  ;;  %v8598_v49 = vpack.i.bf16 %v13339_v7, %v13265_v44  ;;  %v8620_v7 = vpack.i.bf16 %v8002_v0, %v8159_v47  ;;  %v8636_v0 = vpack.i.bf16 %v3251_v39, %v3250_v41 }
 0x240   : > { %1823 = vmatpush.msrb.mxu2 %v851_v30 }
 0x241   : > { %13346 = vst [vmem:[#allocation47_spill] sm:$0xff] %v8636_v0  ;;  %v844_v0 = vld [vmem:[%s7613_s28 + $0x8] sm:$0xff] }
 0x242   : > { %6165 = vrot.lane.b32.xlu1 %v6164_v54, %s7059_s11  ;;  %6190 = vrot.lane.b32.xlu0 %v6184_v55, %s7053_s29  ;;  %v13342_v55 = vld [vmem:[#allocation50_spill] sm:$0xff] }
 0x243   : > { %6205 = vrot.lane.b32.xlu2 %v6204_v32, %s7059_s11  ;;  %v8608_v30 = vpack.i.bf16 %v13343_v14, %v13342_v55  ;;  %v8627_v14 = vpack.i.bf16 %v8167_v9, %v8125_v26  ;;  %1824 = vmatpush.msrb.mxu2 %v850_v34  ;;  %v8643_v26 = vpack.i.bf16 %v8172_v4, %v8143_v57  ;;  %v5838_v57 = vunpack.i.h.bf16 %v8379_v42  ;;  %v871_v4 = vld [vmem:[%s7613_s28 + $0xe0] sm:$0xff] }
 0x244   : > { %v8575_v40 = vpop.permute.xlu1 %5980  ;;  %v8582_v43 = vpop.permute.xlu0 %5965 }
 0x245   : > { %13336 = vst [vmem:[#allocation45_spill] sm:$0xff] %v8575_v40  ;;  %v8580_v24 = vpop.permute.xlu2 %6035  ;;  %v3249_v40 = vrot.slane %v13342_v55, 1  ;;  %v13345_v55 = vld [vmem:[#allocation59_spill] sm:$0xff]  ;;  %1825 = vmatpush.msrb.mxu2 %v849_v11  ;;  %v8712_v52 = vsel %vm419_vm1, 0.0, %v5838_v57 }
 0x246   : > { %13340 = vst [vmem:[#allocation54_spill] sm:$0xff] %v8580_v24  ;;  %v874_v24 = vld [vmem:[%s7613_s28 + $0xf8] sm:$0xff]  ;;  %v848_v11 = vld [vmem:[%s7613_s28 + $0x28] sm:$0xff] }
 0x247   : > { %13341 = vst [vmem:[#allocation52_spill] sm:$0xff] %v8582_v43  ;;  %v8614_v27 = vpack.i.bf16 %v3250_v41, %v3249_v40  ;;  %v8616_v12 = vpack.i.bf16 %v3249_v40, %v3248_v36  ;;  %v876_v43 = vld [vmem:[%s7613_s28 + $0x108] sm:$0xff]  ;;  %v8634_v40 = vpack.i.bf16 %v3457_v2, %v3251_v39  ;;  %v5837_v41 = vunpack.i.l.bf16 %v8379_v42  ;;  %1826 = vmatpush.msrb.mxu2 %v848_v11  ;;  %v13349_v42 = vld [vmem:[#allocation9_spill] sm:$0xff] }
 0x248   : > { %4070 = vmatpush.msra.mxu3 %v876_v43  ;;  %v847_v43 = vld [vmem:[%s7613_s28 + $0x20] sm:$0xff]  ;;  %v8716_v47 = vsel %vm419_vm1, %v13349_v42, %v5838_v57  ;;  %v870_v11 = vld [vmem:[%s7613_s28 + $0xd8] sm:$0xff]  ;;  %v8731_v57 = vsel %vm419_vm1, 0.0, %v5843_v1  ;;  %v13356_v42 = vld [vmem:[#allocation16_spill] sm:$0xff] }
 0x249   : > { %1827 = vmatpush.msrb.mxu2 %v847_v43  ;;  %v8719_v31 = vsel %vm419_vm1, 0.0, %v5837_v41  ;;  %13355 = vst [vmem:[#allocation87_spill] sm:$0xff] %v8731_v57  ;;  %v13359_v43 = vld [vmem:[#allocation10_spill] sm:$0xff] }
 0x24a   : > { %6170 = vrot.lane.b32.xlu1 %v6164_v54, %s7053_s29  ;;  %6215 = vrot.lane.b32.xlu0 %v6214_v58, %s7059_s11  ;;  %v8647_v58 = vunpack.i.l.bf16 %v8261_v21  ;;  %v8664_v54 = vunpack.i.l.bf16 %v8311_v8  ;;  %13350 = vst [vmem:[#allocation9_spill] sm:$0xff] %v8719_v31  ;;  %v8735_v31 = vsel %vm419_vm1, %v13356_v42, %v5843_v1  ;;  %v13363_v1 = vld [vmem:[#allocation29_spill] sm:$0xff]  ;;  %v867_v42 = vld [vmem:[%s7613_s28 + $0xc0] sm:$0xff] }
 0x24b   : > { %6210 = vrot.lane.b32.xlu2 %v6204_v32, %s7053_s29  ;;  %4071 = vmatpush.msra.mxu3 %v875_v37  ;;  %v872_v32 = vld [vmem:[%s7613_s28 + $0xe8] sm:$0xff]  ;;  %13357 = vst [vmem:[#allocation16_spill] sm:$0xff] %v8735_v31  ;;  %v13366_v31 = vld [vmem:[#allocation34_spill] sm:$0xff] }
 0x24c   : > { %v8639_v36 = vpop.permute.xlu1 %5985  ;;  %v8653_v2 = vpop.permute.xlu0 %5995  ;;  %v13351_v37 = vld [vmem:[#allocation11_spill] sm:$0xff]  ;;  %v5833_v63 = vunpack.i.h.bf16 %v13366_v31  ;;  %v5832_v10 = vunpack.i.l.bf16 %v13366_v31 }
 0x24d   : > { %13347 = vst [vmem:[#allocation55_spill] sm:$0xff] %v8639_v36  ;;  %v8651_v39 = vpop.permute.xlu2 %6050  ;;  %4072 = vmatpush.msra.mxu3 %v874_v24  ;;  %v873_v24 = vld [vmem:[%s7613_s28 + $0xf0] sm:$0xff]  ;;  %v8723_v33 = vsel %vm419_vm1, %v13351_v37, %v5837_v41  ;;  %v846_v37 = vld [vmem:[%s7613_s28 + $0x18] sm:$0xff]  ;;  %v5997_v53 = vunpack.i.l.bf16 %v8653_v2 }
 0x24e   : > { %13348 = vst [vmem:[#allocation59_spill] sm:$0xff] %v8651_v39  ;;  %v869_v41 = vld [vmem:[%s7613_s28 + $0xd0] sm:$0xff]  ;;  %1828 = vmatpush.msrb.mxu2 %v846_v37  ;;  %v8795_v37 = vsel %vm419_vm1, 0.0, %v5833_v63 }
 0x24f   : > { %4073 = vmatpush.msra.mxu3 %v873_v24  ;;  %v5842_v24 = vunpack.i.l.bf16 %v8389_v17  ;;  %13352 = vst [vmem:[#allocation11_spill] sm:$0xff] %v8723_v33  ;;  %v13362_v17 = vld [vmem:[#allocation90_spill] sm:$0xff]  ;;  %v13364_v33 = vld [vmem:[#allocation88_spill] sm:$0xff] }
 0x250   : > { %v5817_v57 = vunpack.i.l.bf16 %v13362_v17  ;;  %13379 = vst [vmem:[#allocation104_spill] sm:$0xff] %v8795_v37 }
 0x251   : > { %4074 = vmatpush.msra.mxu3 %v872_v32  ;;  %v8740_v32 = vsel %vm419_vm1, 0.0, %v5842_v24  ;;  %v8744_v51 = vsel %vm419_vm1, %v13359_v43, %v5842_v24  ;;  %v868_v24 = vld [vmem:[%s7613_s28 + $0xc8] sm:$0xff]  ;;  %v845_v43 = vld [vmem:[%s7613_s28 + $0x10] sm:$0xff] }
 0x252   : > { %6195 = vrot.lane.b32.xlu1 %v8547_v56, %s7059_s11  ;;  %6220 = vrot.lane.b32.xlu0 %v8588_v35, %s7059_s11  ;;  %13358 = vst [vmem:[#allocation103_spill] sm:$0xff] %v8740_v32 }
 0x253   : > { %6230 = vrot.lane.b32.xlu2 %v8586_v19, %s7059_s11  ;;  %4075 = vmatpush.msra.mxu3 %v871_v4  ;;  %13360 = vst [vmem:[#allocation10_spill] sm:$0xff] %v8744_v51  ;;  %v13361_v4 = vld [vmem:[#allocation31_spill] sm:$0xff] }
 0x254   : > { %v8696_v9 = vpop.permute.xlu1 %6000  ;;  %v8704_v34 = vpop.permute.xlu0 %6010  ;;  %v5828_v5 = vunpack.i.h.bf16 %v13361_v4  ;;  %v5827_v32 = vunpack.i.l.bf16 %v13361_v4  ;;  %1829 = vmatpush.msrb.mxu2 %v845_v43  ;;  %v865_v43 = vld [vmem:[%s7613_s28 + $0xb0] sm:$0xff] }
 0x255   : > { %v8702_v56 = vpop.permute.xlu2 %6070  ;;  %4076 = vmatpush.msra.mxu3 %v870_v11  ;;  %v13365_v11 = vld [vmem:[#allocation89_spill] sm:$0xff] }
 0x256   : > { %v8776_v39 = vsel %vm419_vm1, 0.0, %v5828_v5  ;;  %v8785_v31 = vsel %vm419_vm1, 0.0, %v5827_v32  ;;  %v8789_v36 = vsel %vm419_vm1, %v13376_v45, %v5827_v32  ;;  %v8805_v45 = vsel %vm419_vm1, 0.0, %v5832_v10  ;;  %v13383_v32 = vld [vmem:[#allocation12_spill] sm:$0xff]  ;;  %1830 = vmatpush.msrb.mxu2 %v844_v0 }
 0x257   : > { %4077 = vmatpush.msra.mxu3 %v869_v41  ;;  %13372 = vst [vmem:[#allocation89_spill] sm:$0xff] %v8776_v39  ;;  %v13381_v39 = vld [vmem:[#allocation13_spill] sm:$0xff]  ;;  %v5933_v0 = vunpack.i.h.bf16 %v8474_v61 }
 0x258   : > { %13377 = vst [vmem:[#allocation4_spill] sm:$0xff] %v8789_v36 }
 0x259   : > { %4078 = vmatpush.msra.mxu3 %v868_v24 }
 0x25a   : > { %6225 = vrot.lane.b32.xlu1 %v8588_v35, %s7053_s29  ;;  %6235 = vrot.lane.b32.xlu0 %v8598_v49, %s7055_s7 }
 0x25b   : > { %6245 = vrot.lane.b32.xlu2 %v8586_v19, %s7053_s29  ;;  %v1420_v19 = vsel %vm419_vm1, 0.0, %v5817_v57  ;;  %4079 = vmatpush.msra.mxu3 %v867_v42  ;;  %v13385_v42 = vld [vmem:[#allocation37_spill] sm:$0xff] }
 0x25c   : > { %v8764_v3 = vpop.permute.xlu1 %6015  ;;  %v8772_v51 = vpop.permute.xlu0 %6025  ;;  %v8818_v4 = vsel %vm419_vm1, 0.0, %v13385_v42 }
 0x25d   : > { %13367 = vst [vmem:[#allocation31_spill] sm:$0xff] %v8764_v3  ;;  %v8770_v35 = vpop.permute.xlu2 %6085  ;;  %v13373_v3 = vld [vmem:[#allocation5_spill] sm:$0xff] }
 0x25e   : > { %13370 = vst [vmem:[#allocation90_spill] sm:$0xff] %v8770_v35  ;;  %v8780_v41 = vsel %vm419_vm1, %v13373_v3, %v5828_v5  ;;  %v5818_v3 = vunpack.i.h.bf16 %v13362_v17  ;;  %v866_v5 = vld [vmem:[%s7613_s28 + $0xb8] sm:$0xff]  ;;  %v8809_v17 = vsel %vm419_vm1, %v13383_v32, %v5832_v10  ;;  %v13401_v35 = vld [vmem:[#allocation7_spill] sm:$0xff] }
 0x25f   : > { %13371 = vst [vmem:[#allocation88_spill] sm:$0xff] %v8772_v51  ;;  %v13384_v51 = vunpack.i.l.bf16 %v13345_v55  ;;  %4080 = vmatpush.msra.mxu3 %v866_v5  ;;  %v843_v5 = vld [vmem:[%s7613_s28] sm:$0xff] }
 0x260   : > { %13374 = vst [vmem:[#allocation34_spill] sm:$0xff] %v8780_v41  ;;  %v8802_v41 = vsel %vm419_vm1, %v13381_v39, %v5833_v63  ;;  %v13387_v63 = vunpack.i.h.bf16 %v13345_v55  ;;  %v5847_v55 = vunpack.i.l.bf16 %v8463_v15  ;;  %1831 = vmatpush.msrb.mxu2 %v843_v5 }
 0x261   : > { %13375 = vst [vmem:[#allocation5_spill] sm:$0xff] %v8785_v31  ;;  %v1450_v57 = vsel %vm1449_vm11, %v1420_v19, %v13384_v51  ;;  %v13390_v51 = vld [vmem:[#allocation15_spill] sm:$0xff]  ;;  %4081 = vmatpush.msra.mxu3 %v865_v43  ;;  %v5932_v31 = vunpack.i.l.bf16 %v8474_v61  ;;  %v13415_v61 = vunpack.i.l.bf16 %v13354_v22 }
 0x262   : > { %13382 = vst [vmem:[#allocation13_spill] sm:$0xff] %v8802_v41  ;;  %v8823_v39 = vsel %vm1449_vm11, %v1420_v19, %v13387_v63  ;;  %v13389_v41 = vld [vmem:[#allocation91_spill] sm:$0xff]  ;;  %6240 = vrot.lane.b32.xlu1 %v8604_v46, %s7058_s10  ;;  %v8832_v37 = vsel %vm419_vm1, %v13390_v51, %v13385_v42  ;;  %v8837_v19 = vsel %vm419_vm1, 0.0, %v5818_v3  ;;  %6250 = vrot.lane.b32.xlu0 %v8598_v49, %s7054_s30  ;;  %v13393_v63 = vld [vmem:[#allocation8_spill] sm:$0xff]  ;;  %v13404_v49 = vld [vmem:[#allocation14_spill] sm:$0xff]  ;;  %v8897_v5 = vsel %vm419_vm1, 0.0, %v5847_v55 }
 0x263   : > { %13386 = vst [vmem:[#allocation12_spill] sm:$0xff] %v8818_v4  ;;  %v5823_v10 = vunpack.i.h.bf16 %v13389_v41  ;;  %v5822_v32 = vunpack.i.l.bf16 %v13389_v41  ;;  %6260 = vrot.lane.b32.xlu2 %v8594_v28, %s7059_s11  ;;  %v864_v41 = vld [vmem:[%s7613_s28 + $0xa8] sm:$0xff]  ;;  %v8847_v42 = vsel %vm419_vm1, %v13393_v63, %v5818_v3  ;;  %v8851_v51 = vsel %vm1480_vm12, %v1450_v57, %v8647_v58 }
 0x264   : > { %13388 = vst [vmem:[#allocation37_spill] sm:$0xff] %v8823_v39  ;;  %v5848_v4 = vunpack.i.h.bf16 %v8463_v15  ;;  %v13398_v3 = vunpack.i.h.bf16 %v8325_v48  ;;  %v8866_v15 = vpop.permute.xlu0 %6040  ;;  %4082 = vmatpush.msra.mxu3 %v864_v41  ;;  %v5948_v48 = vunpack.i.h.bf16 %v8485_v6 }
 0x265   : > { %13391 = vst [vmem:[#allocation91_spill] sm:$0xff] %v8832_v37  ;;  %v8855_v37 = vpop.permute.xlu1 %6030  ;;  %v8864_v63 = vpop.permute.xlu2 %6100  ;;  %v8871_v43 = vsel %vm419_vm1, 0.0, %v5823_v10  ;;  %v8875_v24 = vsel %vm419_vm1, %v13401_v35, %v5823_v10  ;;  %v8878_v36 = vsel %vm419_vm1, 0.0, %v5822_v32  ;;  %v5947_v35 = vunpack.i.l.bf16 %v8485_v6 }
 0x266   : > { %13394 = vst [vmem:[#allocation15_spill] sm:$0xff] %v8851_v51  ;;  %v1497_v57 = vsel %vm1480_vm12, %v8823_v39, %v13398_v3  ;;  %v13402_v3 = vld [vmem:[#allocation6_spill] sm:$0xff]  ;;  %v8890_v10 = vsel %vm419_vm1, 0.0, %v5848_v4  ;;  %v8894_v41 = vsel %vm419_vm1, %v13404_v49, %v5848_v4  ;;  %v8921_v6 = vsel %vm419_vm1, 0.0, %v5932_v31 }
 0x267   : > { %13395 = vst [vmem:[#allocation8_spill] sm:$0xff] %v8855_v37  ;;  %v863_v37 = vld [vmem:[%s7613_s28 + $0xa0] sm:$0xff]  ;;  %v13411_v4 = vunpack.i.l.bf16 %v13363_v1 }
 0x268   : > { %13399 = vst [vmem:[#allocation105_spill] sm:$0xff] %v8864_v63  ;;  %v8882_v63 = vsel %vm419_vm1, %v13402_v3, %v5822_v32  ;;  %4083 = vmatpush.msra.mxu3 %v863_v37  ;;  %v13406_v32 = vld [vmem:[#allocation17_spill] sm:$0xff]  ;;  %v8914_v37 = vsel %vm419_vm1, 0.0, %v5933_v0 }
 0x269   : > { %13400 = vst [vmem:[#allocation106_spill] sm:$0xff] %v8866_v15  ;;  %v862_v15 = vld [vmem:[%s7613_s28 + $0x98] sm:$0xff]  ;;  %v8901_v3 = vsel %vm419_vm1, %v13406_v32, %v5847_v55  ;;  %v13408_v55 = vld [vmem:[#allocation26_spill] sm:$0xff]  ;;  %v3761_v49 = vsel %vm1480_vm12, %v8823_v39, %v13411_v4  ;;  %v8943_v4 = vsel %vm1480_vm12, %v8823_v39, %v13415_v61 }
 0x26a   : > { %13403 = vst [vmem:[#allocation7_spill] sm:$0xff] %v8890_v10  ;;  %6255 = vrot.lane.b32.xlu1 %v8604_v46, %s7057_s9  ;;  %4084 = vmatpush.msra.mxu3 %v862_v15  ;;  %v8918_v32 = vsel %vm419_vm1, %v13408_v55, %v5933_v0  ;;  %v13412_v46 = vld [vmem:[#allocation25_spill] sm:$0xff]  ;;  %v8936_v0 = vunpack.i.h.bf16 %v8483_v38  ;;  %v13419_v61 = vld [vmem:[#allocation30_spill] sm:$0xff] }
 0x26b   : > { %13405 = vst [vmem:[#allocation6_spill] sm:$0xff] %v8894_v41  ;;  %v5872_v41 = vunpack.i.l.bf16 %v8487_v50  ;;  %6275 = vrot.lane.b32.xlu2 %v8608_v30, %s7055_s7  ;;  %6265 = vrot.lane.b32.xlu0 %v8594_v28, %s7053_s29  ;;  %v8933_v15 = vsel %vm419_vm1, %v13412_v46, %v5932_v31  ;;  %v8948_v28 = vsel %vm419_vm1, 0.0, %v5948_v48  ;;  %v8952_v31 = vsel %vm419_vm1, %v13265_v44, %v5948_v48 }
 0x26c   : > { %13407 = vst [vmem:[#allocation14_spill] sm:$0xff] %v8914_v37  ;;  %4085 = vmatpush.msra.mxu3 %v861_v20  ;;  %v8955_v46 = vsel %vm419_vm1, 0.0, %v5947_v35 }
 0x26d   : > { %13409 = vst [vmem:[#allocation17_spill] sm:$0xff] %v8918_v32  ;;  %v8945_v10 = vpop.permute.xlu1 %6045  ;;  %v8958_v1 = vpop.permute.xlu2 %6115  ;;  %v8968_v20 = vsel %vm1512_vm13, %v8851_v51, %v5872_v41  ;;  %v8971_v44 = vsel %vm1512_vm13, %v1497_v57, %v5872_v41 }
 0x26e   : > { %13410 = vst [vmem:[#allocation26_spill] sm:$0xff] %v8921_v6  ;;  %v8964_v6 = vsel %vm419_vm1, %v13419_v61, %v5947_v35 }
 0x26f   : > { %13413 = vst [vmem:[#allocation25_spill] sm:$0xff] %v8933_v15  ;;  %v8960_v15 = vpop.permute.xlu0 %6055 }
 0x270   : > { %13414 = vst [vmem:[#allocation107_spill] sm:$0xff] %v8936_v0  ;;  %v5998_v0 = vunpack.i.h.bf16 %v8653_v2 }
 0x271   : > { %13416 = vst [vmem:[#allocation108_spill] sm:$0xff] %v8948_v28 }
 0x272   : > { %13417 = vst [vmem:[#allocation109_spill] sm:$0xff] %v8952_v31  ;;  %v5943_v31 = vunpack.i.h.bf16 %v8523_v60  ;;  %6270 = vrot.lane.b32.xlu1 %v8612_v62, %s7059_s11  ;;  %v1453_v50 = vsel %vm1449_vm11, %v8847_v42, %v5998_v0  ;;  %v6072_v0 = vunpack.i.l.bf16 %v8702_v56 }
 0x273   : > { %13418 = vst [vmem:[#allocation110_spill] sm:$0xff] %v8955_v46  ;;  %v13424_v46 = vld [vmem:[#allocation95_spill] sm:$0xff]  ;;  %6290 = vrot.lane.b32.xlu2 %v8612_v62, %s7053_s29  ;;  %6280 = vrot.lane.b32.xlu0 %v8614_v27, %s7058_s10 }
 0x274   : > { %13420 = vst [vmem:[#allocation30_spill] sm:$0xff] %v8964_v6  ;;  %v5928_v37 = vunpack.i.h.bf16 %v13424_v46  ;;  %v5927_v32 = vunpack.i.l.bf16 %v13424_v46  ;;  %v13428_v46 = vld [vmem:[#allocation97_spill] sm:$0xff]  ;;  %v5942_v6 = vunpack.i.l.bf16 %v8523_v60  ;;  %v13432_v60 = vld [vmem:[#allocation23_spill] sm:$0xff]  ;;  %v9025_v41 = vsel %vm419_vm1, 0.0, %v5943_v31 }
 0x275   : > { %13421 = vst [vmem:[#allocation111_spill] sm:$0xff] %v8968_v20  ;;  %v13426_v20 = vunpack.i.h.bf16 %v8261_v21  ;;  %v9031_v35 = vpop.permute.xlu2 %6130 }
 0x276   : > { %13422 = vst [vmem:[#allocation112_spill] sm:$0xff] %v8971_v44  ;;  %v8996_v21 = vsel %vm419_vm1, 0.0, %v5928_v37  ;;  %v9003_v28 = vsel %vm419_vm1, 0.0, %v5927_v32  ;;  %v5992_v44 = vunpack.i.l.bf16 %v8525_v13  ;;  %v9012_v2 = vsel %vm419_vm1, %v13432_v60, %v5927_v32  ;;  %v13443_v32 = vld [vmem:[#allocation22_spill] sm:$0xff] }
 0x277   : > { %v1482_v57 = vsel %vm1480_vm12, %v8823_v39, %v13426_v20  ;;  %13429 = vst [vmem:[#allocation95_spill] sm:$0xff] %v8996_v21  ;;  %v13430_v20 = vld [vmem:[#allocation24_spill] sm:$0xff]  ;;  %v9015_v39 = vpop.permute.xlu1 %6060  ;;  %v1452_v60 = vsel %vm1449_vm11, %v8837_v19, %v5997_v53  ;;  %v9033_v13 = vpop.permute.xlu0 %6075  ;;  %v9047_v55 = vsel %vm419_vm1, %v13443_v32, %v5942_v6  ;;  %v13446_v19 = vld [vmem:[#allocation98_spill] sm:$0xff] }
 0x278   : > { %v9000_v48 = vsel %vm419_vm1, %v13430_v20, %v5928_v37  ;;  %13433 = vst [vmem:[#allocation24_spill] sm:$0xff] %v9015_v39  ;;  %v13434_v37 = vunpack.i.l.bf16 %v13365_v11  ;;  %v13439_v39 = vld [vmem:[#allocation28_spill] sm:$0xff]  ;;  %v9051_v53 = vsel %vm1512_vm13, %v8851_v51, %v5992_v44  ;;  %v1483_v42 = vsel %vm1480_vm12, %v1452_v60, %v8647_v58 }
 0x279   : > { %13431 = vst [vmem:[#allocation97_spill] sm:$0xff] %v9000_v48  ;;  %v6002_v60 = vunpack.i.l.bf16 %v8696_v9 }
 0x27a   : > { %v1513_v20 = vsel %vm1512_vm13, %v8851_v51, %v13434_v37  ;;  %v13435_v61 = vmov %v13434_v37  ;;  %13436 = vst [vmem:[#allocation23_spill] sm:$0xff] %v9025_v41  ;;  %v9037_v37 = vsel %vm419_vm1, %v13439_v39, %v5943_v31  ;;  %v6007_v39 = vunpack.i.l.bf16 %v13446_v19  ;;  %6285 = vrot.lane.b32.xlu1 %v8616_v12, %s7056_s8 }
 0x27b   : > { %v1514_v62 = vsel %vm1512_vm13, %v1482_v57, %v13435_v61  ;;  %13438 = vst [vmem:[#allocation113_spill] sm:$0xff] %v9031_v35  ;;  %v9040_v61 = vsel %vm419_vm1, 0.0, %v5942_v6  ;;  %v13442_v57 = vld [vmem:[#allocation49_spill] sm:$0xff]  ;;  %v6008_v35 = vunpack.i.h.bf16 %v13446_v19  ;;  %v9056_v31 = vsel %vm1512_vm13, %v3761_v49, %v5992_v44  ;;  %v13448_v6 = vld [vmem:[#allocation99_spill] sm:$0xff]  ;;  %6305 = vrot.lane.b32.xlu2 %v8627_v14, %s7059_s11  ;;  %6295 = vrot.lane.b32.xlu0 %v8608_v30, %s7054_s30 }
 0x27c   : > { %13440 = vst [vmem:[#allocation28_spill] sm:$0xff] %v9037_v37  ;;  %v5952_v41 = vunpack.i.l.bf16 %v13442_v57  ;;  %v1456_v37 = vsel %vm1449_vm11, %v8871_v43, %v6007_v39  ;;  %v1454_v21 = vsel %vm1449_vm11, %v8878_v36, %v6002_v60 }
 0x27d   : > { %13441 = vst [vmem:[#allocation114_spill] sm:$0xff] %v9040_v61  ;;  %v13449_v61 = vunpack.i.l.bf16 %v8309_v23 }
 0x27e   : > { %13444 = vst [vmem:[#allocation49_spill] sm:$0xff] %v9047_v55  ;;  %v6073_v55 = vunpack.i.h.bf16 %v8702_v56  ;;  %v3776_v49 = vsel %vm1512_vm13, %v8851_v51, %v5952_v41  ;;  %v3777_v44 = vsel %vm1512_vm13, %v8943_v4, %v5952_v41  ;;  %v6003_v56 = vunpack.i.h.bf16 %v8696_v9  ;;  %v13451_v4 = vld [vmem:[#allocation100_spill] sm:$0xff]  ;;  %v13452_v41 = vld [vmem:[#allocation101_spill] sm:$0xff]  ;;  %v6146_v51 = vpop.permute.xlu2 %6145 }
 0x27f   : > { %13445 = vst [vmem:[#allocation22_spill] sm:$0xff] %v9051_v53  ;;  %v1484_v53 = vsel %vm1480_vm12, %v1453_v50, %v13449_v61  ;;  %v1457_v50 = vsel %vm1449_vm11, %v8875_v24, %v6008_v35  ;;  %v13450_v61 = vunpack.i.h.bf16 %v13365_v11  ;;  %v5957_v12 = vunpack.i.l.bf16 %v13451_v4  ;;  %v6066_v35 = vpop.permute.xlu1 %6065 }
 0x280   : > { %13447 = vst [vmem:[#allocation98_spill] sm:$0xff] %v9056_v31  ;;  %v6023_v19 = vunpack.i.h.bf16 %v13452_v41  ;;  %v9094_v31 = vpop.permute.xlu0 %6090  ;;  %v6022_v30 = vunpack.i.l.bf16 %v13452_v41  ;;  %v6148_v48 = vunpack.i.h.bf16 %v6146_v51  ;;  %v6147_v11 = vunpack.i.l.bf16 %v6146_v51 }
 0x281   : > { %v1515_v32 = vsel %vm1512_vm13, %v1483_v42, %v13450_v61  ;;  %v13453_v43 = vmov %v13450_v61  ;;  %v6068_v42 = vunpack.i.h.bf16 %v6066_v35  ;;  %v6067_v61 = vunpack.i.l.bf16 %v6066_v35 }
 0x282   : > { %v1516_v24 = vsel %vm1512_vm13, %v1484_v53, %v13453_v43  ;;  %v1548_v9 = vsel %vm1545_vm14, %v1515_v32, %v6072_v0  ;;  %v1455_v53 = vsel %vm1449_vm11, %v8882_v63, %v6003_v56  ;;  %v3808_v32 = vsel %vm1545_vm14, %v3776_v49, %v6147_v11  ;;  %6300 = vrot.lane.b32.xlu1 %v8614_v27, %s7057_s9 }
 0x283   : > { %v1549_v39 = vsel %vm1545_vm14, %v1516_v24, %v6073_v55  ;;  %v1546_v0 = vsel %vm1545_vm14, %v1513_v20, %v6067_v61  ;;  %v1547_v55 = vsel %vm1545_vm14, %v1514_v62, %v6068_v42  ;;  %v3809_v43 = vsel %vm1545_vm14, %v3777_v44, %v6148_v48  ;;  %6320 = vrot.lane.b32.xlu2 %v8620_v7, %s7055_s7 }
 0x284   : > { %v1581_v41 = vsel %vm1578_vm15, %v1548_v9, %v8664_v54  ;;  %v13454_v24 = vunpack.i.l.bf16 %v8356_v29  ;;  %v3840_v51 = vsel %vm1578_vm15, %v3808_v32, %v8664_v54  ;;  %v13455_v63 = vunpack.i.l.bf16 %v13364_v33  ;;  %6310 = vrot.lane.b32.xlu0 %v8627_v14, %s7053_s29 }
 0x285   : > { %v1579_v62 = vsel %vm1578_vm15, %v1546_v0, %v8664_v54  ;;  %v13456_v49 = vunpack.i.h.bf16 %v8311_v8  ;;  %v13457_v44 = vunpack.i.l.bf16 %v8472_v59  ;;  %v3872_v35 = vsel %vm1611_vm0, %v3840_v51, %v5957_v12  ;;  %v13461_v51 = vld [vmem:[#allocation19_spill] sm:$0xff] }
 0x286   : > { %v1582_v36 = vsel %vm1578_vm15, %v1549_v39, %v13454_v24  ;;  %v3841_v20 = vsel %vm1578_vm15, %v3809_v43, %v13455_v63  ;;  %v3936_v42 = vrot.slane %v3872_v35, 7  ;;  %v1485_v11 = vsel %vm1480_vm12, %v1454_v21, %v8647_v58 }
 0x287   : > { %v1580_v48 = vsel %vm1578_vm15, %v1547_v55, %v13456_v49  ;;  %v1612_v60 = vsel %vm1611_vm0, %v1579_v62, %v13457_v44  ;;  %v13458_v56 = vmov %v13457_v44  ;;  %v3873_v39 = vsel %vm1611_vm0, %v3841_v20, %v5957_v12  ;;  %v6081_v43 = vpop.permute.xlu1 %6080 }
 0x288   : > { %v1613_v9 = vsel %vm1611_vm0, %v1580_v48, %v13458_v56  ;;  %v1677_v8 = vrot.slane %v1612_v60, 7  ;;  %v3937_v61 = vrot.slane %v3873_v39, 7  ;;  %v13459_v0 = vunpack.i.h.bf16 %v8309_v23  ;;  %v9149_v20 = vpop.permute.xlu0 %6105 }
 0x289   : > { %v1678_v27 = vrot.slane %v1613_v9, 7  ;;  %v6078_v32 = vunpack.i.h.bf16 %v9033_v13  ;;  %v6077_v12 = vunpack.i.l.bf16 %v9033_v13  ;;  %v1487_v24 = vsel %vm1480_vm12, %v1456_v37, %v8647_v58 }
 0x28a   : > { %v1486_v55 = vsel %vm1480_vm12, %v1455_v53, %v13459_v0  ;;  %v13460_v14 = vunpack.i.h.bf16 %v13448_v6  ;;  %v3938_v21 = vsel %vm1676_vm7, %v3936_v42, %v3937_v61  ;;  %v13462_v53 = vunpack.i.l.bf16 %v8307_v25  ;;  %6315 = vrot.lane.b32.xlu1 %v8643_v26, %s7059_s11 }
 0x28b   : > { %v1679_v23 = vsel %vm1676_vm7, %v1677_v8, %v1678_v27  ;;  %4086 = vmatmul.f32.vlgmr.msra.gmra.mxu3 %v3938_v21  ;;  %v13464_v49 = vunpack.i.h.bf16 %v8472_v59  ;;  %v13466_v56 = vunpack.i.l.bf16 %v13448_v6  ;;  %v13467_v35 = vunpack.i.l.bf16 %v8476_v18  ;;  %v13470_v27 = vld [vmem:[#allocation18_spill] sm:$0xff]  ;;  %6335 = vrot.lane.b32.xlu2 %v8643_v26, %s7053_s29 }
 0x28c   : > { %v9147_v63 = vsel %vm419_vm1, %v13461_v51, %v13460_v14  ;;  %v1488_v13 = vsel %vm1480_vm12, %v1457_v50, %v13462_v53  ;;  %v13463_v62 = vmov %v13460_v14  ;;  %1832 = vmatmul.f32.vlgmr.msrb.gmra.mxu2 %v1679_v23  ;;  %v1463_v50 = vsel %vm1449_vm11, %v8809_v17, %v6023_v19  ;;  %v13471_v19 = vld [vmem:[#allocation54_spill] sm:$0xff]  ;;  %6325 = vrot.lane.b32.xlu0 %v8634_v40, %s7058_s10 }
 0x28d   : > { %v9159_v37 = vsel %vm419_vm1, 0.0, %v13463_v62  ;;  %v1614_v48 = vsel %vm1611_vm0, %v1581_v41, %v13464_v49  ;;  %v13465_v44 = vmov %v13464_v49  ;;  %v9170_v9 = vsel %vm419_vm1, 0.0, %v13466_v56  ;;  %v13473_v21 = vld [vmem:[#allocation102_spill] sm:$0xff] }
 0x28e   : > { %v1615_v60 = vsel %vm1611_vm0, %v1582_v36, %v13465_v44  ;;  %v1517_v39 = vsel %vm1512_vm13, %v1485_v11, %v13467_v35  ;;  %v13468_v8 = vmov %v13467_v35  ;;  %v13469_v59 = vmov %v13466_v56  ;;  %v13487_v44 = vld [vmem:[#allocation55_spill] sm:$0xff] }
 0x28f   : > { %v1518_v41 = vsel %vm1512_vm13, %v1486_v55, %v13468_v8  ;;  %v9184_v36 = vsel %vm419_vm1, %v13470_v27, %v13469_v59  ;;  %v1462_v42 = vsel %vm1449_vm11, %v8805_v45, %v6022_v30  ;;  %v1550_v61 = vsel %vm1545_vm14, %v1517_v39, %v6077_v12  ;;  %v9218_v35 = vpop.permute.xlu1 %6095  ;;  %v13476_v59 = vld [vmem:[#allocation59_spill] sm:$0xff] }
 0x290   : > { %v1551_v17 = vsel %vm1545_vm14, %v1518_v41, %v6078_v32  ;;  %v6038_v0 = vunpack.i.h.bf16 %v13471_v19  ;;  %v6037_v11 = vunpack.i.l.bf16 %v13471_v19  ;;  %v1683_v14 = vrot.slane %v1614_v48, 7  ;;  %v13475_v48 = vld [vmem:[#allocation45_spill] sm:$0xff]  ;;  %v9225_v41 = vpop.permute.xlu0 %6120 }
 0x291   : > { %v1684_v51 = vrot.slane %v1615_v60, 7  ;;  %v5958_v55 = vunpack.i.h.bf16 %v13451_v4  ;;  %v13472_v6 = vunpack.i.h.bf16 %v8277_v16  ;;  %v9204_v30 = vsel %vm1480_vm12, %v1462_v42, %v8647_v58 }
 0x292   : > { %v6012_v32 = vunpack.i.l.bf16 %v8704_v34  ;;  %v1583_v12 = vsel %vm1578_vm15, %v1550_v61, %v8664_v54  ;;  %v13474_v62 = vunpack.i.h.bf16 %v8356_v29  ;;  %v6083_v56 = vunpack.i.h.bf16 %v6081_v43 }
 0x293   : > { %v9196_v23 = vsel %vm1480_vm12, %v1463_v50, %v13472_v6  ;;  %v6082_v50 = vunpack.i.l.bf16 %v6081_v43  ;;  %v1469_v26 = vsel %vm1449_vm11, %v8716_v47, %v6038_v0  ;;  %v1468_v39 = vsel %vm1449_vm11, %v8712_v52, %v6037_v11  ;;  %v13477_v43 = vld [vmem:[#allocation38_spill] sm:$0xff]  ;;  %v13480_v52 = vld [vmem:[#allocation52_spill] sm:$0xff] }
 0x294   : > { %v1584_v49 = vsel %vm1578_vm15, %v1551_v17, %v13474_v62  ;;  %v6013_v8 = vunpack.i.h.bf16 %v8704_v34  ;;  %v1685_v29 = vsel %vm1676_vm7, %v1683_v14, %v1684_v51  ;;  %v6053_v27 = vunpack.i.h.bf16 %v13476_v59  ;;  %v13481_v34 = vld [vmem:[#allocation5_spill] sm:$0xff]  ;;  %6340 = vrot.lane.b32.xlu0 %v8620_v7, %s7054_s30 }
 0x295   : > { %v6052_v42 = vunpack.i.l.bf16 %v13476_v59  ;;  %1835 = vmatmul.f32.gmra.mxu2 %v1685_v29  ;;  %v13478_v61 = vunpack.i.l.bf16 %v13477_v43  ;;  %v1458_v11 = vsel %vm1449_vm11, %v13481_v34, %v6012_v32  ;;  %v13482_v14 = vunpack.i.h.bf16 %v8476_v18  ;;  %v13484_v29 = vld [vmem:[#allocation20_spill] sm:$0xff] }
 0x296   : > { %v13485_v59 = vunpack.i.h.bf16 %v13484_v29  ;;  %v1500_v32 = vsel %vm1480_vm12, %v1468_v39, %v8647_v58  ;;  %v13486_v34 = vld [vmem:[#allocation4_spill] sm:$0xff]  ;;  %v13489_v39 = vld [vmem:[#allocation31_spill] sm:$0xff]  ;;  %v6098_v4 = vunpack.i.h.bf16 %v9218_v35 }
 0x297   : > { %v1616_v17 = vsel %vm1611_vm0, %v1583_v12, %v13478_v61  ;;  %v13479_v47 = vmov %v13478_v61  ;;  %v1519_v51 = vsel %vm1512_vm13, %v1487_v24, %v13482_v14  ;;  %v13483_v6 = vmov %v13482_v14  ;;  %v13500_v61 = vld [vmem:[#allocation34_spill] sm:$0xff] }
 0x298   : > { %v1617_v19 = vsel %vm1611_vm0, %v1584_v49, %v13479_v47  ;;  %v1520_v62 = vsel %vm1512_vm13, %v1488_v13, %v13483_v6  ;;  %v1501_v12 = vsel %vm1480_vm12, %v1469_v26, %v13485_v59  ;;  %v1552_v49 = vsel %vm1545_vm14, %v1519_v51, %v6082_v50  ;;  %v13488_v51 = vld [vmem:[#allocation47_spill] sm:$0xff]  ;;  %v13493_v59 = vld [vmem:[#allocation90_spill] sm:$0xff]  ;;  %v9283_v60 = vpop.permute.xlu0 %6135 }
 0x299   : > { %v1553_v47 = vsel %vm1545_vm14, %v1520_v62, %v6083_v56  ;;  %v1459_v24 = vsel %vm1449_vm11, %v13486_v34, %v6013_v8  ;;  %v1689_v14 = vrot.slane %v1616_v17, 7  ;;  %v1690_v18 = vrot.slane %v1617_v19, 7  ;;  %v6151_v56 = vpop.permute.xlu2 %6150  ;;  %6330 = vrot.lane.b32.xlu1 %v13488_v51, %s7056_s8 }
 0x29a   : > { %v1474_v6 = vsel %vm1449_vm11, %v8897_v5, %v6052_v42  ;;  %v1475_v26 = vsel %vm1449_vm11, %v8901_v3, %v6053_v27  ;;  %v1489_v50 = vsel %vm1480_vm12, %v1458_v11, %v8647_v58  ;;  %v6018_v62 = vunpack.i.h.bf16 %v13489_v39  ;;  %v13490_v42 = vld [vmem:[#allocation46_spill] sm:$0xff] }
 0x29b   : > { %v6017_v8 = vunpack.i.l.bf16 %v13489_v39  ;;  %v1585_v5 = vsel %vm1578_vm15, %v1552_v49, %v8664_v54  ;;  %v13491_v17 = vunpack.i.l.bf16 %v13490_v42  ;;  %v13492_v19 = vunpack.i.h.bf16 %v8307_v25  ;;  %v9279_v39 = vpop.permute.xlu1 %6110 }
 0x29c   : > { %v6088_v34 = vunpack.i.h.bf16 %v13493_v59  ;;  %v6087_v51 = vunpack.i.l.bf16 %v13493_v59  ;;  %v1506_v7 = vsel %vm1480_vm12, %v1474_v6, %v8647_v58  ;;  %v6153_v49 = vunpack.i.h.bf16 %v6151_v56 }
 0x29d   : > { %v1586_v3 = vsel %vm1578_vm15, %v1553_v47, %v13491_v17  ;;  %v1490_v11 = vsel %vm1480_vm12, %v1459_v24, %v13492_v19  ;;  %v6152_v13 = vunpack.i.l.bf16 %v6151_v56  ;;  %v1691_v47 = vsel %vm1676_vm7, %v1689_v14, %v1690_v18  ;;  %v13494_v17 = vld [vmem:[#allocation79_spill] sm:$0xff]  ;;  %v13501_v18 = vld [vmem:[#allocation89_spill] sm:$0xff] }
 0x29e   : > { %v13495_v27 = vunpack.i.l.bf16 %v13494_v17  ;;  %v13496_v24 = vld [vmem:[#allocation39_spill] sm:$0xff]  ;;  %1838 = vmatmul.f32.gmra.mxu2 %v1691_v47  ;;  %v13498_v59 = vunpack.i.h.bf16 %v13477_v43  ;;  %v1461_v14 = vsel %vm1449_vm11, %v13500_v61, %v6018_v62  ;;  %v1460_v45 = vsel %vm1449_vm11, %v13501_v18, %v6017_v8 }
 0x29f   : > { %v13497_v19 = vunpack.i.l.bf16 %v13496_v24  ;;  %v3719_v61 = vsel %vm1449_vm11, %v9012_v2, %v6153_v49  ;;  %v3718_v62 = vsel %vm1449_vm11, %v9003_v28, %v6152_v13  ;;  %v13510_v28 = vld [vmem:[#allocation104_spill] sm:$0xff]  ;;  %v13512_v13 = vunpack.i.h.bf16 %v13490_v42 }
 0x2a0   : > { %v1507_v25 = vsel %vm1480_vm12, %v1475_v26, %v13495_v27  ;;  %v1618_v53 = vsel %vm1611_vm0, %v1585_v5, %v13498_v59  ;;  %v13499_v6 = vmov %v13498_v59  ;;  %v13504_v59 = vld [vmem:[#allocation41_spill] sm:$0xff]  ;;  %v13515_v42 = vunpack.i.h.bf16 %v13496_v24  ;;  %v13519_v24 = vld [vmem:[#allocation8_spill] sm:$0xff] }
 0x2a1   : > { %v1521_v0 = vsel %vm1512_vm13, %v1489_v50, %v13497_v19  ;;  %v1619_v56 = vsel %vm1611_vm0, %v1586_v3, %v13499_v6  ;;  %v13502_v26 = vmov %v13497_v19  ;;  %v13503_v50 = vld [vmem:[#allocation88_spill] sm:$0xff]  ;;  %v13505_v3 = vunpack.i.l.bf16 %v13504_v59  ;;  %6345 = vrot.lane.b32.xlu1 %v8634_v40, %s7057_s9 }
 0x2a2   : > { %v1522_v27 = vsel %vm1512_vm13, %v1490_v11, %v13502_v26  ;;  %v6027_v47 = vunpack.i.l.bf16 %v13503_v50  ;;  %v1554_v19 = vsel %vm1545_vm14, %v1521_v0, %v6087_v51  ;;  %v6028_v43 = vunpack.i.h.bf16 %v13503_v50  ;;  %v13508_v26 = vld [vmem:[#allocation36_spill] sm:$0xff] }
 0x2a3   : > { %v1555_v5 = vsel %vm1545_vm14, %v1522_v27, %v6088_v34  ;;  %v9312_v6 = vsel %vm1512_vm13, %v1500_v32, %v13505_v3  ;;  %v1695_v8 = vrot.slane %v1618_v53, 7  ;;  %v1696_v11 = vrot.slane %v1619_v56, 7 }
 0x2a4   : > { %v1491_v0 = vsel %vm1480_vm12, %v1460_v45, %v8647_v58  ;;  %v13506_v34 = vunpack.i.l.bf16 %v8277_v16  ;;  %v13507_v18 = vmov %v13505_v3  ;;  %v13509_v27 = vunpack.i.h.bf16 %v13508_v26 }
 0x2a5   : > { %v9326_v32 = vsel %vm1512_vm13, %v1501_v12, %v13507_v18  ;;  %v1464_v53 = vsel %vm1449_vm11, %v13510_v28, %v6027_v47  ;;  %v1587_v12 = vsel %vm1578_vm15, %v1554_v19, %v8664_v54  ;;  %v1588_v49 = vsel %vm1578_vm15, %v1555_v5, %v13512_v13  ;;  %v13514_v47 = vld [vmem:[#allocation13_spill] sm:$0xff] }
 0x2a6   : > { %v1492_v51 = vsel %vm1480_vm12, %v1461_v14, %v13506_v34  ;;  %v9331_v2 = vsel %vm1512_vm13, %v1506_v7, %v13509_v27  ;;  %v13511_v16 = vmov %v13509_v27  ;;  %v6093_v7 = vunpack.i.h.bf16 %v9094_v31  ;;  %v6156_v34 = vpop.permute.xlu0 %6155 }
 0x2a7   : > { %v9340_v45 = vsel %vm1512_vm13, %v1507_v25, %v13511_v16  ;;  %v6092_v56 = vunpack.i.l.bf16 %v9094_v31  ;;  %v13513_v40 = vunpack.i.h.bf16 %v13354_v22  ;;  %v3747_v50 = vsel %vm1480_vm12, %v3718_v62, %v8647_v58  ;;  %v9354_v25 = vpop.permute.xlu1 %6125 }
 0x2a8   : > { %v1465_v19 = vsel %vm1449_vm11, %v13514_v47, %v6028_v43  ;;  %v1523_v5 = vsel %vm1512_vm13, %v1491_v0, %v13515_v42  ;;  %v13516_v3 = vmov %v13515_v42  ;;  %v1697_v22 = vsel %vm1676_vm7, %v1695_v8, %v1696_v11 }
 0x2a9   : > { %v3748_v14 = vsel %vm1480_vm12, %v3719_v61, %v13513_v40  ;;  %v1524_v31 = vsel %vm1512_vm13, %v1492_v51, %v13516_v3  ;;  %v6158_v61 = vunpack.i.h.bf16 %v6156_v34  ;;  %v6157_v18 = vunpack.i.l.bf16 %v6156_v34  ;;  %1841 = vmatmul.f32.gmra.mxu2 %v1697_v22 }
 0x2aa   : > { %v13517_v62 = vunpack.i.l.bf16 %v13428_v46  ;;  %v1495_v0 = vsel %vm1480_vm12, %v1464_v53, %v8647_v58  ;;  %v6033_v16 = vunpack.i.h.bf16 %v13519_v24  ;;  %v13520_v51 = vunpack.i.h.bf16 %v13442_v57 }
 0x2ab   : > { %v1557_v40 = vsel %vm1545_vm14, %v1524_v31, %v6093_v7  ;;  %v13522_v34 = vunpack.i.h.bf16 %v13364_v33  ;;  %v6032_v57 = vunpack.i.l.bf16 %v13519_v24 }
 0x2ac   : > { %v1620_v27 = vsel %vm1611_vm0, %v1587_v12, %v13517_v62  ;;  %v13518_v43 = vmov %v13517_v62  ;;  %v3778_v8 = vsel %vm1512_vm13, %v3747_v50, %v13520_v51  ;;  %v13521_v11 = vmov %v13520_v51 }
 0x2ad   : > { %v1621_v28 = vsel %vm1611_vm0, %v1588_v49, %v13518_v43  ;;  %v3779_v13 = vsel %vm1512_vm13, %v3748_v14, %v13521_v11  ;;  %v1556_v12 = vsel %vm1545_vm14, %v1523_v5, %v6092_v56  ;;  %v3810_v49 = vsel %vm1545_vm14, %v3778_v8, %v6157_v18  ;;  %v13523_v14 = vld [vmem:[#allocation106_spill] sm:$0xff]  ;;  %v9397_v5 = vpop.permute.xlu2 %6175  ;;  %v13524_v18 = vld [vmem:[#allocation77_spill] sm:$0xff]  ;;  %v13526_v43 = vld [vmem:[#allocation76_spill] sm:$0xff] }
 0x2ae   : > { %v3811_v47 = vsel %vm1545_vm14, %v3779_v13, %v6158_v61  ;;  %v1701_v42 = vrot.slane %v1620_v27, 7  ;;  %v1702_v53 = vrot.slane %v1621_v28, 7  ;;  %v3842_v3 = vsel %vm1578_vm15, %v3810_v49, %v8664_v54  ;;  %v13528_v11 = vld [vmem:[#allocation105_spill] sm:$0xff] }
 0x2af   : > { %v3843_v50 = vsel %vm1578_vm15, %v3811_v47, %v13522_v34  ;;  %v6043_v22 = vunpack.i.h.bf16 %v13523_v14  ;;  %v3874_v7 = vsel %vm1611_vm0, %v3842_v3, %v5958_v55  ;;  %v1589_v33 = vsel %vm1578_vm15, %v1556_v12, %v8664_v54  ;;  %v9410_v8 = vpop.permute.xlu1 %6140  ;;  %v13529_v47 = vld [vmem:[#allocation33_spill] sm:$0xff]  ;;  %v9416_v3 = vpop.permute.xlu0 %6180 }
 0x2b0   : > { %v3875_v56 = vsel %vm1611_vm0, %v3843_v50, %v5958_v55  ;;  %v3942_v31 = vrot.slane %v3874_v7, 7  ;;  %v13525_v62 = vunpack.i.l.bf16 %v13524_v18  ;;  %v13527_v28 = vunpack.i.l.bf16 %v13526_v43  ;;  %v13531_v34 = vld [vmem:[#allocation9_spill] sm:$0xff] }
 0x2b1   : > { %v3943_v61 = vrot.slane %v3875_v56, 7  ;;  %v6042_v51 = vunpack.i.l.bf16 %v13523_v14  ;;  %v6097_v55 = vunpack.i.l.bf16 %v9218_v35  ;;  %v6103_v13 = vunpack.i.h.bf16 %v13528_v11 }
 0x2b2   : > { %v1590_v27 = vsel %vm1578_vm15, %v1557_v40, %v13525_v62  ;;  %v1496_v24 = vsel %vm1480_vm12, %v1465_v19, %v13527_v28  ;;  %v13530_v12 = vunpack.i.h.bf16 %v13529_v47  ;;  %v1703_v40 = vsel %vm1676_vm7, %v1701_v42, %v1702_v53  ;;  %v13534_v62 = vld [vmem:[#allocation11_spill] sm:$0xff]  ;;  %v13535_v53 = vld [vmem:[#allocation10_spill] sm:$0xff] }
 0x2b3   : > { %v3944_v19 = vsel %vm1676_vm7, %v3942_v31, %v3943_v61  ;;  %v1466_v50 = vsel %vm1449_vm11, %v13531_v34, %v6032_v57  ;;  %v6102_v14 = vunpack.i.l.bf16 %v13528_v11  ;;  %1844 = vmatmul.f32.gmra.mxu2 %v1703_v40  ;;  %v13532_v35 = vunpack.i.h.bf16 %v13428_v46  ;;  %v13538_v28 = vld [vmem:[#allocation103_spill] sm:$0xff] }
 0x2b4   : > { %v1527_v49 = vsel %vm1512_vm13, %v1495_v0, %v13530_v12  ;;  %4089 = vmatmul.f32.gmra.mxu3 %v3944_v19  ;;  %v1467_v42 = vsel %vm1449_vm11, %v13534_v62, %v6033_v16  ;;  %v1471_v31 = vsel %vm1449_vm11, %v13535_v53, %v6043_v22  ;;  %v13536_v57 = vunpack.i.l.bf16 %v13529_v47 }
 0x2b5   : > { %v1622_v7 = vsel %vm1611_vm0, %v1589_v33, %v13532_v35  ;;  %v13533_v56 = vmov %v13532_v35  ;;  %v1470_v46 = vsel %vm1449_vm11, %v13538_v28, %v6042_v51  ;;  %v13539_v22 = vmov %v13530_v12 }
 0x2b6   : > { %v1623_v0 = vsel %vm1611_vm0, %v1590_v27, %v13533_v56  ;;  %v1525_v61 = vsel %vm1512_vm13, %v9204_v30, %v13536_v57  ;;  %v13537_v43 = vmov %v13536_v57  ;;  %v6047_v27 = vunpack.i.l.bf16 %v8945_v10 }
 0x2b7   : > { %v1526_v33 = vsel %vm1512_vm13, %v9196_v23, %v13537_v43  ;;  %v1558_v16 = vsel %vm1545_vm14, %v1525_v61, %v6097_v55  ;;  %v1528_v12 = vsel %vm1512_vm13, %v1496_v24, %v13539_v22  ;;  %v6048_v30 = vunpack.i.h.bf16 %v8945_v10  ;;  %v6161_v62 = vpop.permute.xlu1 %6160 }
 0x2b8   : > { %v1559_v11 = vsel %vm1545_vm14, %v1526_v33, %v6098_v4  ;;  %v1707_v40 = vrot.slane %v1622_v7, 7  ;;  %v1708_v19 = vrot.slane %v1623_v0, 7  ;;  %v1498_v23 = vsel %vm1480_vm12, %v1466_v50, %v8647_v58  ;;  %v13541_v4 = vld [vmem:[#allocation75_spill] sm:$0xff] }
 0x2b9   : > { %v13540_v34 = vunpack.i.l.bf16 %v13484_v29  ;;  %v1560_v35 = vsel %vm1545_vm14, %v1527_v49, %v6102_v14  ;;  %v1561_v55 = vsel %vm1545_vm14, %v1528_v12, %v6103_v13  ;;  %v13542_v56 = vunpack.i.l.bf16 %v13541_v4  ;;  %v13544_v7 = vld [vmem:[#allocation87_spill] sm:$0xff] }
 0x2ba   : > { %v1502_v10 = vsel %vm1480_vm12, %v1470_v46, %v8647_v58  ;;  %v1591_v24 = vsel %vm1578_vm15, %v1558_v16, %v8664_v54  ;;  %v13543_v50 = vunpack.i.h.bf16 %v13524_v18  ;;  %v1472_v0 = vsel %vm1449_vm11, %v13544_v7, %v6047_v27  ;;  %v9476_v18 = vpop.permute.xlu0 %6185 }
 0x2bb   : > { %v1499_v51 = vsel %vm1480_vm12, %v1467_v42, %v13540_v34  ;;  %v1503_v47 = vsel %vm1480_vm12, %v1471_v31, %v13542_v56  ;;  %v6118_v49 = vunpack.i.h.bf16 %v8958_v1  ;;  %v6117_v13 = vunpack.i.l.bf16 %v8958_v1  ;;  %v13545_v42 = vld [vmem:[#allocation16_spill] sm:$0xff]  ;;  %v9474_v31 = vpop.permute.xlu2 %6200 }
 0x2bc   : > { %v1592_v29 = vsel %vm1578_vm15, %v1559_v11, %v13543_v50  ;;  %v1473_v53 = vsel %vm1449_vm11, %v13545_v42, %v6048_v30  ;;  %v6163_v57 = vunpack.i.h.bf16 %v6161_v62  ;;  %v6162_v61 = vunpack.i.l.bf16 %v6161_v62  ;;  %v13552_v50 = vld [vmem:[#allocation95_spill] sm:$0xff] }
 0x2bd   : > { %v1709_v43 = vsel %vm1676_vm7, %v1707_v40, %v1708_v19  ;;  %v6057_v33 = vunpack.i.l.bf16 %v8960_v15  ;;  %v13546_v28 = vunpack.i.h.bf16 %v13504_v59  ;;  %v13547_v46 = vunpack.i.l.bf16 %v8483_v38 }
 0x2be   : > { %1847 = vmatmul.f32.gmra.mxu2 %v1709_v43  ;;  %v9493_v22 = vsel %vm1480_vm12, %v1472_v0, %v8647_v58  ;;  %v6108_v12 = vunpack.i.h.bf16 %v9149_v20  ;;  %v6107_v30 = vunpack.i.l.bf16 %v9149_v20  ;;  %v13550_v34 = vunpack.i.h.bf16 %v13541_v4 }
 0x2bf   : > { %v9483_v1 = vsel %vm1512_vm13, %v1502_v10, %v13546_v28  ;;  %v1624_v27 = vsel %vm1611_vm0, %v1591_v24, %v13547_v46  ;;  %v13548_v16 = vmov %v13547_v46  ;;  %v13549_v40 = vmov %v13546_v28  ;;  %v13551_v10 = vld [vmem:[#allocation97_spill] sm:$0xff] }
 0x2c0   : > { %v1625_v11 = vsel %vm1611_vm0, %v1592_v29, %v13548_v16  ;;  %v9500_v19 = vsel %vm1512_vm13, %v1503_v47, %v13549_v40  ;;  %v9505_v56 = vsel %vm1480_vm12, %v1473_v53, %v13550_v34  ;;  %v9509_v38 = vsel %vm1545_vm14, %v9312_v6, %v6117_v13  ;;  %v13553_v6 = vld [vmem:[#allocation7_spill] sm:$0xff] }
 0x2c1   : > { %v3721_v24 = vsel %vm1449_vm11, %v13551_v10, %v6163_v57  ;;  %v3720_v20 = vsel %vm1449_vm11, %v13552_v50, %v6162_v61  ;;  %v1713_v29 = vrot.slane %v1624_v27, 7  ;;  %v1714_v59 = vrot.slane %v1625_v11, 7  ;;  %v13554_v13 = vld [vmem:[#allocation27_spill] sm:$0xff]  ;;  %v6166_v27 = vpop.permute.xlu1 %6165 }
 0x2c2   : > { %v1593_v47 = vsel %vm1578_vm15, %v1560_v35, %v8664_v54  ;;  %v1594_v4 = vsel %vm1578_vm15, %v1561_v55, %v8664_v54  ;;  %v9521_v7 = vsel %vm1545_vm14, %v9326_v32, %v6118_v49  ;;  %v9525_v0 = vsel %vm1449_vm11, %v13553_v6, %v6057_v33  ;;  %v13557_v35 = vld [vmem:[#allocation111_spill] sm:$0xff]  ;;  %v13558_v55 = vld [vmem:[#allocation112_spill] sm:$0xff]  ;;  %v13559_v32 = vld [vmem:[#allocation81_spill] sm:$0xff]  ;;  %v9549_v34 = vpop.permute.xlu0 %6190 }
 0x2c3   : > { %v13555_v62 = vunpack.i.h.bf16 %v13554_v13  ;;  %v1562_v61 = vsel %vm1545_vm14, %v13557_v35, %v6107_v30  ;;  %v1563_v43 = vsel %vm1545_vm14, %v13558_v55, %v6108_v12  ;;  %v13560_v49 = vunpack.i.l.bf16 %v13559_v32  ;;  %v13561_v16 = vld [vmem:[#allocation107_spill] sm:$0xff] }
 0x2c4   : > { %v3749_v33 = vsel %vm1480_vm12, %v3720_v20, %v8647_v58  ;;  %v6183_v46 = vunpack.i.h.bf16 %v9416_v3  ;;  %v1627_v11 = vsel %vm1611_vm0, %v1594_v4, %v13561_v16  ;;  %v6178_v12 = vunpack.i.h.bf16 %v9397_v5  ;;  %v13564_v4 = vld [vmem:[#allocation83_spill] sm:$0xff] }
 0x2c5   : > { %v1531_v42 = vsel %vm1512_vm13, %v1498_v23, %v13555_v62  ;;  %v13556_v53 = vmov %v13555_v62  ;;  %v3750_v28 = vsel %vm1480_vm12, %v3721_v24, %v13560_v49  ;;  %v6182_v23 = vunpack.i.l.bf16 %v9416_v3  ;;  %v9563_v62 = vpop.permute.xlu2 %6205 }
 0x2c6   : > { %v1532_v57 = vsel %vm1512_vm13, %v1499_v51, %v13556_v53  ;;  %v1626_v51 = vsel %vm1611_vm0, %v1593_v47, %v13561_v16  ;;  %v6168_v30 = vunpack.i.h.bf16 %v6166_v27  ;;  %v6167_v40 = vunpack.i.l.bf16 %v6166_v27 }
 0x2c7   : > { %v1715_v10 = vsel %vm1676_vm7, %v1713_v29, %v1714_v59  ;;  %v13562_v24 = vunpack.i.l.bf16 %v13473_v21  ;;  %v1595_v47 = vsel %vm1578_vm15, %v1562_v61, %v8664_v54  ;;  %v13565_v6 = vunpack.i.l.bf16 %v13564_v4  ;;  %v13567_v61 = vld [vmem:[#allocation14_spill] sm:$0xff] }
 0x2c8   : > { %1850 = vmatmul.f32.gmra.mxu2 %v1715_v10  ;;  %v1719_v53 = vrot.slane %v1626_v51, 7  ;;  %v1720_v35 = vrot.slane %v1627_v11, 7  ;;  %v6177_v55 = vunpack.i.l.bf16 %v9397_v5  ;;  %v6113_v49 = vunpack.i.h.bf16 %v9279_v39  ;;  %v13568_v10 = vld [vmem:[#allocation84_spill] sm:$0xff] }
 0x2c9   : > { %v3780_v50 = vsel %vm1512_vm13, %v3749_v33, %v13562_v24  ;;  %v13563_v3 = vmov %v13562_v24  ;;  %v1596_v13 = vsel %vm1578_vm15, %v1563_v43, %v13565_v6  ;;  %v3724_v27 = vsel %vm1449_vm11, %v13567_v61, %v6182_v23 }
 0x2ca   : > { %v3781_v20 = vsel %vm1512_vm13, %v3750_v28, %v13563_v3  ;;  %v3812_v29 = vsel %vm1545_vm14, %v3780_v50, %v6167_v40  ;;  %v13566_v28 = vld [vmem:[#allocation17_spill] sm:$0xff]  ;;  %v13569_v24 = vunpack.i.l.bf16 %v13568_v10  ;;  %v13573_v23 = vunpack.i.l.bf16 %v13480_v52 }
 0x2cb   : > { %v3813_v59 = vsel %vm1545_vm14, %v3781_v20, %v6168_v30  ;;  %v3725_v33 = vsel %vm1449_vm11, %v13566_v28, %v6183_v46  ;;  %v3844_v43 = vsel %vm1578_vm15, %v3812_v29, %v8664_v54  ;;  %v13570_v30 = vld [vmem:[#allocation40_spill] sm:$0xff]  ;;  %v6112_v46 = vunpack.i.l.bf16 %v9279_v39 }
 0x2cc   : > { %v3845_v40 = vsel %vm1578_vm15, %v3813_v59, %v13569_v24  ;;  %v13571_v51 = vunpack.i.l.bf16 %v13570_v30  ;;  %v3876_v20 = vsel %vm1611_vm0, %v3844_v43, %v13573_v23  ;;  %v13574_v6 = vmov %v13573_v23 }
 0x2cd   : > { %v3877_v29 = vsel %vm1611_vm0, %v3845_v40, %v13574_v6  ;;  %v3753_v59 = vsel %vm1480_vm12, %v3724_v27, %v8647_v58  ;;  %v3948_v28 = vrot.slane %v3876_v20, 7  ;;  %v6187_v23 = vunpack.i.l.bf16 %v9476_v18  ;;  %v9600_v6 = vpop.permute.xlu0 %6215 }
 0x2ce   : > { %v1628_v11 = vsel %vm1611_vm0, %v1595_v47, %v13571_v51  ;;  %v13572_v5 = vmov %v13571_v51  ;;  %v1721_v47 = vsel %vm1676_vm7, %v1719_v53, %v1720_v35  ;;  %v3949_v61 = vrot.slane %v3877_v29, 7 }
 0x2cf   : > { %v1629_v50 = vsel %vm1611_vm0, %v1596_v13, %v13572_v5  ;;  %v13575_v13 = vld [vmem:[#allocation85_spill] sm:$0xff]  ;;  %v6188_v51 = vunpack.i.h.bf16 %v9476_v18  ;;  %v6171_v5 = vpop.permute.xlu1 %6170  ;;  %v1725_v3 = vrot.slane %v1628_v11, 7  ;;  %v1564_v53 = vsel %vm1545_vm14, %v1531_v42, %v6112_v46 }
 0x2d0   : > { %v13576_v24 = vunpack.i.l.bf16 %v13575_v13  ;;  %v1726_v43 = vrot.slane %v1629_v50, 7  ;;  %v6173_v14 = vunpack.i.h.bf16 %v6171_v5  ;;  %v6172_v40 = vunpack.i.l.bf16 %v6171_v5  ;;  %1853 = vmatmul.f32.gmra.mxu2 %v1721_v47  ;;  %v13579_v50 = vld [vmem:[#allocation26_spill] sm:$0xff] }
 0x2d1   : > { %v3950_v27 = vsel %vm1676_vm7, %v3948_v28, %v3949_v61  ;;  %v1565_v35 = vsel %vm1545_vm14, %v1532_v57, %v6113_v49  ;;  %v6202_v20 = vunpack.i.l.bf16 %v9474_v31  ;;  %v6193_v18 = vunpack.i.h.bf16 %v9549_v34  ;;  %v13580_v28 = vld [vmem:[#allocation25_spill] sm:$0xff] }
 0x2d2   : > { %v3754_v39 = vsel %vm1480_vm12, %v3725_v33, %v13576_v24  ;;  %v13577_v33 = vld [vmem:[#allocation93_spill] sm:$0xff]  ;;  %4092 = vmatmul.f32.gmra.mxu3 %v3950_v27  ;;  %v6192_v11 = vunpack.i.l.bf16 %v9549_v34  ;;  %v3722_v5 = vsel %vm1449_vm11, %v13579_v50, %v6172_v40  ;;  %v3723_v42 = vsel %vm1449_vm11, %v13580_v28, %v6173_v14  ;;  %v9624_v34 = vpop.permute.xlu2 %6210 }
 0x2d3   : > { %v13578_v29 = vunpack.i.l.bf16 %v13577_v33  ;;  %v3751_v46 = vsel %vm1480_vm12, %v3722_v5, %v8647_v58  ;;  %v1727_v61 = vsel %vm1676_vm7, %v1725_v3, %v1726_v43  ;;  %v13583_v14 = vunpack.i.h.bf16 %v13473_v21 }
 0x2d4   : > { %v1597_v3 = vsel %vm1578_vm15, %v1564_v53, %v8664_v54  ;;  %v13585_v43 = vunpack.i.h.bf16 %v13564_v4  ;;  %v13587_v53 = vunpack.i.h.bf16 %v13480_v52 }
 0x2d5   : > { %v3784_v24 = vsel %vm1512_vm13, %v3753_v59, %v13578_v29  ;;  %v13581_v57 = vmov %v13578_v29  ;;  %v13582_v59 = vunpack.i.h.bf16 %v13559_v32  ;;  %v3782_v29 = vsel %vm1512_vm13, %v3751_v46, %v13583_v14 }
 0x2d6   : > { %v3785_v49 = vsel %vm1512_vm13, %v3754_v39, %v13581_v57  ;;  %v3816_v40 = vsel %vm1545_vm14, %v3784_v24, %v6187_v23  ;;  %v13584_v39 = vmov %v13583_v14  ;;  %v3814_v32 = vsel %vm1545_vm14, %v3782_v29, %v6177_v55  ;;  %v9661_v57 = vpop.permute.xlu0 %6220 }
 0x2d7   : > { %v3752_v47 = vsel %vm1480_vm12, %v3723_v42, %v13582_v59  ;;  %v3817_v27 = vsel %vm1545_vm14, %v3785_v49, %v6188_v51  ;;  %v1598_v23 = vsel %vm1578_vm15, %v1565_v35, %v13585_v43  ;;  %v3726_v51 = vsel %vm1449_vm11, %v9170_v9, %v6192_v11  ;;  %v6196_v28 = vpop.permute.xlu1 %6195 }
 0x2d8   : > { %v3783_v50 = vsel %vm1512_vm13, %v3752_v47, %v13584_v39  ;;  %v3727_v24 = vsel %vm1449_vm11, %v9184_v36, %v6193_v18  ;;  %v3846_v21 = vsel %vm1578_vm15, %v3814_v32, %v8664_v54  ;;  %v13586_v55 = vunpack.i.h.bf16 %v13568_v10  ;;  %v13589_v36 = vld [vmem:[#allocation86_spill] sm:$0xff]  ;;  %1856 = vmatmul.f32.gmra.mxu2 %v1727_v61 }
 0x2d9   : > { %v3815_v5 = vsel %vm1545_vm14, %v3783_v50, %v6178_v12  ;;  %v3878_v4 = vsel %vm1611_vm0, %v3846_v21, %v13587_v53  ;;  %v13588_v35 = vmov %v13587_v53  ;;  %v3848_v9 = vsel %vm1578_vm15, %v3816_v40, %v8664_v54  ;;  %v13595_v32 = vld [vmem:[#allocation6_spill] sm:$0xff] }
 0x2da   : > { %v3847_v12 = vsel %vm1578_vm15, %v3815_v5, %v13586_v55  ;;  %v13590_v18 = vunpack.i.l.bf16 %v13589_v36  ;;  %v3954_v10 = vrot.slane %v3878_v4, 7  ;;  %v13591_v46 = vunpack.i.h.bf16 %v13570_v30 }
 0x2db   : > { %v3879_v42 = vsel %vm1611_vm0, %v3847_v12, %v13588_v35  ;;  %v3755_v14 = vsel %vm1480_vm12, %v3726_v51, %v8647_v58  ;;  %v13593_v40 = vunpack.i.h.bf16 %v13575_v13  ;;  %v6197_v39 = vunpack.i.l.bf16 %v6196_v28 }
 0x2dc   : > { %v3849_v11 = vsel %vm1578_vm15, %v3817_v27, %v13590_v18  ;;  %v3955_v49 = vrot.slane %v3879_v42, 7  ;;  %v1630_v59 = vsel %vm1611_vm0, %v1597_v3, %v13591_v46  ;;  %v13592_v47 = vmov %v13591_v46 }
 0x2dd   : > { %v1631_v52 = vsel %vm1611_vm0, %v1598_v23, %v13592_v47  ;;  %v3756_v29 = vsel %vm1480_vm12, %v3727_v24, %v13593_v40  ;;  %v6198_v27 = vunpack.i.h.bf16 %v6196_v28  ;;  %v13594_v50 = vunpack.i.h.bf16 %v8960_v15  ;;  %v13597_v15 = vld [vmem:[#allocation96_spill] sm:$0xff] }
 0x2de   : > { %v9681_v30 = vsel %vm1480_vm12, %v9525_v0, %v8647_v58  ;;  %v3728_v3 = vsel %vm1449_vm11, %v9159_v37, %v6202_v20  ;;  %v3956_v13 = vsel %vm1676_vm7, %v3954_v10, %v3955_v49  ;;  %v13596_v43 = vunpack.i.h.bf16 %v9474_v31  ;;  %v13605_v49 = vld [vmem:[#allocation24_spill] sm:$0xff] }
 0x2df   : > { %v1477_v5 = vsel %vm1449_vm11, %v13595_v32, %v13594_v50  ;;  %4095 = vmatmul.f32.gmra.mxu3 %v3956_v13  ;;  %v13598_v23 = vunpack.i.l.bf16 %v13597_v15  ;;  %v1599_v37 = vsel %vm1578_vm15, %v9509_v38, %v8664_v54  ;;  %v13600_v20 = vunpack.i.h.bf16 %v13577_v33  ;;  %v13603_v38 = vld [vmem:[#allocation82_spill] sm:$0xff]  ;;  %v13606_v47 = vld [vmem:[#allocation32_spill] sm:$0xff]  ;;  %v9726_v40 = vpop.permute.xlu1 %6225 }
 0x2e0   : > { %v3729_v61 = vsel %vm1449_vm11, %v9147_v63, %v13596_v43  ;;  %v1731_v55 = vrot.slane %v1630_v59, 7  ;;  %v1732_v12 = vrot.slane %v1631_v52, 7  ;;  %v13602_v28 = vunpack.i.h.bf16 %v13494_v17 }
 0x2e1   : > { %v3880_v51 = vsel %vm1611_vm0, %v3848_v9, %v13598_v23  ;;  %v13599_v24 = vmov %v13598_v23  ;;  %v3786_v31 = vsel %vm1512_vm13, %v3755_v14, %v13600_v20  ;;  %v13601_v21 = vmov %v13600_v20 }
 0x2e2   : > { %v3881_v0 = vsel %vm1611_vm0, %v3849_v11, %v13599_v24  ;;  %v3787_v63 = vsel %vm1512_vm13, %v3756_v29, %v13601_v21  ;;  %v9708_v53 = vsel %vm1480_vm12, %v1477_v5, %v13602_v28  ;;  %v3818_v4 = vsel %vm1545_vm14, %v3786_v31, %v6197_v39  ;;  %v9718_v11 = vpop.permute.xlu2 %6230 }
 0x2e3   : > { %v3819_v35 = vsel %vm1545_vm14, %v3787_v63, %v6198_v27  ;;  %v13604_v42 = vunpack.i.l.bf16 %v13603_v38  ;;  %v6123_v33 = vunpack.i.h.bf16 %v9225_v41  ;;  %v6122_v18 = vunpack.i.l.bf16 %v9225_v41  ;;  %v9731_v41 = vpop.permute.xlu0 %6235 }
 0x2e4   : > { %v3960_v10 = vrot.slane %v3880_v51, 7  ;;  %v3961_v17 = vrot.slane %v3881_v0, 7  ;;  %v6063_v46 = vunpack.i.h.bf16 %v13605_v49  ;;  %v3757_v59 = vsel %vm1480_vm12, %v3728_v3, %v8647_v58 }
 0x2e5   : > { %v1600_v9 = vsel %vm1578_vm15, %v9521_v7, %v13604_v42  ;;  %v13607_v52 = vunpack.i.l.bf16 %v13606_v47  ;;  %v13608_v7 = vld [vmem:[#allocation51_spill] sm:$0xff]  ;;  %v1733_v39 = vsel %vm1676_vm7, %v1731_v55, %v1732_v12  ;;  %v3850_v5 = vsel %vm1578_vm15, %v3818_v4, %v8664_v54  ;;  %v13614_v55 = vld [vmem:[#allocation113_spill] sm:$0xff] }
 0x2e6   : > { %v13609_v29 = vunpack.i.l.bf16 %v13608_v7  ;;  %v13611_v3 = vunpack.i.h.bf16 %v13589_v36  ;;  %v6208_v43 = vunpack.i.h.bf16 %v9563_v62  ;;  %v6213_v23 = vunpack.i.h.bf16 %v9624_v34  ;;  %1859 = vmatmul.f32.gmra.mxu2 %v1733_v39 }
 0x2e7   : > { %v3758_v14 = vsel %vm1480_vm12, %v3729_v61, %v13607_v52  ;;  %v6207_v61 = vunpack.i.l.bf16 %v9563_v62  ;;  %v6212_v51 = vunpack.i.l.bf16 %v9624_v34  ;;  %v6062_v24 = vunpack.i.l.bf16 %v13605_v49 }
 0x2e8   : > { %v1632_v27 = vsel %vm1611_vm0, %v1599_v37, %v13609_v29  ;;  %v13610_v50 = vmov %v13609_v29  ;;  %v3851_v13 = vsel %vm1578_vm15, %v3819_v35, %v13611_v3  ;;  %v1568_v0 = vsel %vm1545_vm14, %v9483_v1, %v6122_v18  ;;  %v13618_v18 = vld [vmem:[#allocation114_spill] sm:$0xff] }
 0x2e9   : > { %v1633_v32 = vsel %vm1611_vm0, %v1600_v9, %v13610_v50  ;;  %v1569_v37 = vsel %vm1545_vm14, %v9500_v19, %v6123_v33  ;;  %v3962_v36 = vsel %vm1676_vm7, %v3960_v10, %v3961_v17  ;;  %v1737_v20 = vrot.slane %v1632_v27, 7  ;;  %v13617_v33 = vld [vmem:[#allocation49_spill] sm:$0xff] }
 0x2ea   : > { %4098 = vmatmul.f32.gmra.mxu3 %v3962_v36  ;;  %v1738_v31 = vrot.slane %v1633_v32, 7  ;;  %v13612_v62 = vunpack.i.h.bf16 %v13597_v15  ;;  %v6133_v12 = vunpack.i.h.bf16 %v13614_v55  ;;  %v6132_v1 = vunpack.i.l.bf16 %v13614_v55  ;;  %v9781_v32 = vpop.permute.xlu1 %6240 }
 0x2eb   : > { %v13615_v28 = vunpack.i.l.bf16 %v13475_v48  ;;  %v3731_v15 = vsel %vm1449_vm11, %v13617_v33, %v6213_v23  ;;  %v3730_v10 = vsel %vm1449_vm11, %v13618_v18, %v6212_v51  ;;  %v1601_v52 = vsel %vm1578_vm15, %v1568_v0, %v8664_v54  ;;  %v13622_v23 = vld [vmem:[#allocation35_spill] sm:$0xff]  ;;  %v13633_v18 = vld [vmem:[#allocation78_spill] sm:$0xff] }
 0x2ec   : > { %v3882_v21 = vsel %vm1611_vm0, %v3850_v5, %v13612_v62  ;;  %v13613_v34 = vmov %v13612_v62  ;;  %v6128_v39 = vunpack.i.h.bf16 %v9354_v25  ;;  %v6127_v50 = vunpack.i.l.bf16 %v9354_v25  ;;  %v13626_v62 = vld [vmem:[#allocation12_spill] sm:$0xff] }
 0x2ed   : > { %v3883_v63 = vsel %vm1611_vm0, %v3851_v13, %v13613_v34  ;;  %v3788_v19 = vsel %vm1512_vm13, %v3757_v59, %v13615_v28  ;;  %v13616_v4 = vmov %v13615_v28  ;;  %v3966_v17 = vrot.slane %v3882_v21, 7 }
 0x2ee   : > { %v3789_v35 = vsel %vm1512_vm13, %v3758_v14, %v13616_v4  ;;  %v3820_v42 = vsel %vm1545_vm14, %v3788_v19, %v6207_v61  ;;  %v3967_v49 = vrot.slane %v3883_v63, 7  ;;  %v13619_v59 = vunpack.i.h.bf16 %v13603_v38  ;;  %v13620_v14 = vld [vmem:[#allocation91_spill] sm:$0xff]  ;;  %v9791_v61 = vpop.permute.xlu0 %6250 }
 0x2ef   : > { %v3821_v9 = vsel %vm1545_vm14, %v3789_v35, %v6208_v43  ;;  %v1479_v27 = vsel %vm1449_vm11, %v13620_v14, %v6063_v46  ;;  %v1739_v5 = vsel %vm1676_vm7, %v1737_v20, %v1738_v31  ;;  %v13621_v3 = vunpack.i.h.bf16 %v13606_v47  ;;  %v9789_v43 = vpop.permute.xlu2 %6245 }
 0x2f0   : > { %v1602_v29 = vsel %vm1578_vm15, %v1569_v37, %v13619_v59  ;;  %v3759_v38 = vsel %vm1480_vm12, %v3730_v10, %v8647_v58  ;;  %v3852_v46 = vsel %vm1578_vm15, %v3820_v42, %v8664_v54  ;;  %v13623_v25 = vunpack.i.l.bf16 %v13622_v23  ;;  %1862 = vmatmul.f32.gmra.mxu2 %v1739_v5 }
 0x2f1   : > { %v3760_v13 = vsel %vm1480_vm12, %v3731_v15, %v13621_v3  ;;  %v6218_v0 = vunpack.i.h.bf16 %v9600_v6  ;;  %v6217_v47 = vunpack.i.l.bf16 %v9600_v6  ;;  %v13624_v37 = vunpack.i.h.bf16 %v13608_v7 }
 0x2f2   : > { %v3853_v51 = vsel %vm1578_vm15, %v3821_v9, %v13623_v25  ;;  %v1478_v21 = vsel %vm1449_vm11, %v13626_v62, %v6062_v24  ;;  %v13627_v34 = vunpack.i.l.bf16 %v13508_v26  ;;  %v3968_v28 = vsel %vm1676_vm7, %v3966_v17, %v3967_v49 }
 0x2f3   : > { %v1634_v36 = vsel %vm1611_vm0, %v1601_v52, %v13624_v37  ;;  %v13625_v20 = vmov %v13624_v37  ;;  %4101 = vmatmul.f32.gmra.mxu3 %v3968_v28  ;;  %v13629_v4 = vunpack.i.l.bf16 %v13487_v44  ;;  %v13631_v26 = vunpack.i.h.bf16 %v13475_v48  ;;  %v13634_v48 = vld [vmem:[#allocation80_spill] sm:$0xff] }
 0x2f4   : > { %v1635_v31 = vsel %vm1611_vm0, %v1602_v29, %v13625_v20  ;;  %v1537_v63 = vsel %vm1512_vm13, %v9493_v22, %v13627_v34  ;;  %v13628_v55 = vmov %v13627_v34  ;;  %v1743_v33 = vrot.slane %v1634_v36, 7 }
 0x2f5   : > { %v1538_v6 = vsel %vm1512_vm13, %v9505_v56, %v13628_v55  ;;  %v1570_v19 = vsel %vm1545_vm14, %v1537_v63, %v6127_v50  ;;  %v3884_v24 = vsel %vm1611_vm0, %v3852_v46, %v13629_v4  ;;  %v13630_v35 = vmov %v13629_v4  ;;  %v9854_v46 = vpop.permute.xlu1 %6255 }
 0x2f6   : > { %v1571_v7 = vsel %vm1545_vm14, %v1538_v6, %v6128_v39  ;;  %v3885_v22 = vsel %vm1611_vm0, %v3853_v51, %v13630_v35  ;;  %v3790_v42 = vsel %vm1512_vm13, %v3759_v38, %v13631_v26  ;;  %v13632_v56 = vmov %v13631_v26  ;;  %v878_v26 = vld [vmem:[%s7613_s28 + $0x118] sm:$0xff] }
 0x2f7   : > { %v3791_v9 = vsel %vm1512_vm13, %v3760_v13, %v13632_v56  ;;  %v1744_v15 = vrot.slane %v1635_v31, 7  ;;  %v1511_v10 = vsel %vm1480_vm12, %v1479_v27, %v13633_v18  ;;  %v1572_v17 = vsel %vm1545_vm14, %v9331_v2, %v6132_v1  ;;  %v13636_v2 = vld [vmem:[#allocation94_spill] sm:$0xff]  ;;  %v9873_v62 = vpop.permute.xlu2 %6260  ;;  %4149 = vmatpush.msra.mxu2 %v878_v26  ;;  %v877_v26 = vld [vmem:[%s7613_s28 + $0x110] sm:$0xff] }
 0x2f8   : > { %v3823_v49 = vsel %vm1545_vm14, %v3791_v9, %v6218_v0  ;;  %v3822_v52 = vsel %vm1545_vm14, %v3790_v42, %v6217_v47  ;;  %v3972_v59 = vrot.slane %v3884_v24, 7  ;;  %v3973_v29 = vrot.slane %v3885_v22, 7  ;;  %v9865_v47 = vpop.permute.xlu0 %6265  ;;  %v13644_v56 = vld [vmem:[#allocation22_spill] sm:$0xff] }
 0x2f9   : > { %v1603_v14 = vsel %vm1578_vm15, %v1570_v19, %v8664_v54  ;;  %v13635_v39 = vunpack.i.l.bf16 %v13634_v48  ;;  %v1510_v5 = vsel %vm1480_vm12, %v1478_v21, %v8647_v58  ;;  %v1573_v27 = vsel %vm1545_vm14, %v9340_v45, %v6133_v12  ;;  %v13645_v9 = vld [vmem:[#allocation98_spill] sm:$0xff]  ;;  %4150 = vmatpush.msra.mxu2 %v877_v26 }
 0x2fa   : > { %v13637_v1 = vunpack.i.l.bf16 %v13636_v2  ;;  %v1745_v25 = vsel %vm1676_vm7, %v1743_v33, %v1744_v15  ;;  %v3854_v51 = vsel %vm1578_vm15, %v3822_v52, %v8664_v54  ;;  %v3855_v45 = vsel %vm1578_vm15, %v3823_v49, %v8664_v54  ;;  %v13648_v52 = vld [vmem:[#allocation23_spill] sm:$0xff] }
 0x2fb   : > { %v1604_v50 = vsel %vm1578_vm15, %v1571_v7, %v13635_v39  ;;  %v1605_v12 = vsel %vm1578_vm15, %v1572_v17, %v8664_v54  ;;  %v6222_v0 = vunpack.i.l.bf16 %v9661_v57  ;;  %1865 = vmatmul.f32.gmra.mxu2 %v1745_v25  ;;  %v6228_v21 = vunpack.i.h.bf16 %v9726_v40  ;;  %v13647_v17 = vld [vmem:[#allocation28_spill] sm:$0xff] }
 0x2fc   : > { %v1541_v3 = vsel %vm1512_vm13, %v9681_v30, %v13637_v1  ;;  %v13638_v13 = vmov %v13637_v1  ;;  %v6223_v30 = vunpack.i.h.bf16 %v9661_v57  ;;  %v6227_v34 = vunpack.i.l.bf16 %v9726_v40 }
 0x2fd   : > { %v1542_v38 = vsel %vm1512_vm13, %v9708_v53, %v13638_v13  ;;  %v13639_v53 = vld [vmem:[#allocation21_spill] sm:$0xff]  ;;  %v3974_v57 = vsel %vm1676_vm7, %v3972_v59, %v3973_v29  ;;  %v13642_v63 = vunpack.i.h.bf16 %v13634_v48  ;;  %v6138_v6 = vunpack.i.h.bf16 %v9283_v60  ;;  %v9912_v25 = vpop.permute.xlu1 %6270 }
 0x2fe   : > { %v13640_v37 = vunpack.i.l.bf16 %v13639_v53  ;;  %v6137_v28 = vunpack.i.l.bf16 %v9283_v60  ;;  %4104 = vmatmul.f32.gmra.mxu3 %v3974_v57  ;;  %v3886_v19 = vsel %vm1611_vm0, %v3854_v51, %v13561_v16  ;;  %v3887_v7 = vsel %vm1611_vm0, %v3855_v45, %v13561_v16 }
 0x2ff   : > { %v1606_v55 = vsel %vm1578_vm15, %v1573_v27, %v13642_v63  ;;  %v6142_v4 = vunpack.i.l.bf16 %v9410_v8  ;;  %v13643_v35 = vunpack.i.h.bf16 %v13639_v53  ;;  %v6247_v42 = vunpack.i.l.bf16 %v9789_v43 }
 0x300   : > { %v1636_v36 = vsel %vm1611_vm0, %v1603_v14, %v13640_v37  ;;  %v13641_v20 = vmov %v13640_v37  ;;  %v3824_v60 = vsel %vm1545_vm14, %v13644_v56, %v6222_v0  ;;  %v3825_v33 = vsel %vm1545_vm14, %v13645_v9, %v6223_v30  ;;  %v9920_v30 = vpop.f32.mrf.mxu3  ;;  %v13652_v0 = vld [vmem:[#allocation29_spill] sm:$0xff]  ;;  %v9935_v57 = vpop.permute.xlu0 %6280 }
 0x301   : > { %v1637_v31 = vsel %vm1611_vm0, %v1604_v50, %v13641_v20  ;;  %v1749_v40 = vrot.slane %v1636_v36, 7  ;;  %v1638_v22 = vsel %vm1611_vm0, %v1605_v12, %v13643_v35  ;;  %v13646_v15 = vmov %v13643_v35  ;;  %v13654_v20 = vld [vmem:[#allocation110_spill] sm:$0xff] }
 0x302   : > { %v1750_v24 = vrot.slane %v1637_v31, 7  ;;  %v1639_v18 = vsel %vm1611_vm0, %v1606_v55, %v13646_v15  ;;  %v3733_v49 = vsel %vm1449_vm11, %v13647_v17, %v6228_v21  ;;  %v3732_v59 = vsel %vm1449_vm11, %v13648_v52, %v6227_v34 }
 0x303   : > { %v3978_v29 = vrot.slane %v3886_v19, 7  ;;  %v3979_v14 = vrot.slane %v3887_v7, 7  ;;  %v1574_v48 = vsel %vm1545_vm14, %v1541_v3, %v6137_v28  ;;  %v1575_v39 = vsel %vm1545_vm14, %v1542_v38, %v6138_v6  ;;  %v9944_v19 = vpop.permute.xlu2 %6275  ;;  %v13657_v7 = vld [vmem:[#allocation44_spill] sm:$0xff] }
 0x304   : > { %v13649_v50 = vunpack.i.h.bf16 %v13636_v2  ;;  %v1751_v51 = vsel %vm1676_vm7, %v1749_v40, %v1750_v24  ;;  %v1755_v45 = vrot.slane %v1638_v22, 7  ;;  %v3856_v12 = vsel %vm1578_vm15, %v3824_v60, %v8664_v54 }
 0x305   : > { %v13651_v3 = vunpack.i.h.bf16 %v13622_v23  ;;  %v13653_v2 = vunpack.i.h.bf16 %v13652_v0  ;;  %v3762_v53 = vsel %vm1480_vm12, %v3732_v59, %v8647_v58  ;;  %1868 = vmatmul.f32.gmra.mxu2 %v1751_v51  ;;  %v1756_v37 = vrot.slane %v1639_v18, 7  ;;  %v13661_v18 = vld [vmem:[#allocation43_spill] sm:$0xff]  ;;  %v9974_v51 = vpop.permute.xlu1 %6285 }
 0x306   : > { %v1543_v27 = vsel %vm1512_vm13, %v1510_v5, %v13649_v50  ;;  %v13650_v1 = vmov %v13649_v50  ;;  %v6248_v5 = vunpack.i.h.bf16 %v9789_v43  ;;  %v6143_v36 = vunpack.i.h.bf16 %v9410_v8 }
 0x307   : > { %v1544_v13 = vsel %vm1512_vm13, %v1511_v10, %v13650_v1  ;;  %v3857_v38 = vsel %vm1578_vm15, %v3825_v33, %v13651_v3  ;;  %v3763_v10 = vsel %vm1480_vm12, %v3733_v49, %v13653_v2  ;;  %v1576_v23 = vsel %vm1545_vm14, %v1543_v27, %v6142_v4 }
 0x308   : > { %v3734_v31 = vsel %vm1449_vm11, %v13654_v20, %v6247_v42  ;;  %v3980_v21 = vsel %vm1676_vm7, %v3978_v29, %v3979_v14  ;;  %v6233_v43 = vunpack.i.h.bf16 %v9718_v11  ;;  %v6252_v34 = vunpack.i.l.bf16 %v9791_v61  ;;  %v13660_v42 = vld [vmem:[#allocation30_spill] sm:$0xff]  ;;  %v9985_v2 = vpop.f32.mrf.mxu3 }
 0x309   : > { %4107 = vmatmul.f32.gmra.mxu3 %v3980_v21  ;;  %v13655_v63 = vunpack.i.h.bf16 %v13487_v44  ;;  %v6232_v28 = vunpack.i.l.bf16 %v9718_v11  ;;  %v13658_v4 = vunpack.i.h.bf16 %v13657_v7  ;;  %v6257_v22 = vunpack.i.l.bf16 %v9854_v46 }
 0x30a   : > { %v3735_v44 = vsel %vm1449_vm11, %v13660_v42, %v6248_v5  ;;  %v6263_v56 = vunpack.i.h.bf16 %v9873_v62  ;;  %v3764_v11 = vsel %vm1480_vm12, %v3734_v31, %v8647_v58  ;;  %v1757_v60 = vsel %vm1676_vm7, %v1755_v45, %v1756_v37  ;;  %v13662_v45 = vld [vmem:[#allocation92_spill] sm:$0xff] }
 0x30b   : > { %v3888_v55 = vsel %vm1611_vm0, %v3856_v12, %v13655_v63  ;;  %v13656_v8 = vmov %v13655_v63  ;;  %v3794_v40 = vsel %vm1512_vm13, %v3762_v53, %v13658_v4  ;;  %v13659_v24 = vmov %v13658_v4  ;;  %v13664_v63 = vld [vmem:[#allocation108_spill] sm:$0xff] }
 0x30c   : > { %v3889_v6 = vsel %vm1611_vm0, %v3857_v38, %v13656_v8  ;;  %v3795_v35 = vsel %vm1512_vm13, %v3763_v10, %v13659_v24  ;;  %v3981_v9 = vrot.slane %v3888_v55, 7  ;;  %v1607_v15 = vsel %vm1578_vm15, %v1574_v48, %v8664_v54  ;;  %v9999_v8 = vpop.permute.xlu0 %6295 }
 0x30d   : > { %v3982_v33 = vrot.slane %v3889_v6, 7  ;;  %v1608_v17 = vsel %vm1578_vm15, %v1575_v39, %v13661_v18  ;;  %v3827_v49 = vsel %vm1545_vm14, %v3795_v35, %v6233_v43  ;;  %v6242_v52 = vunpack.i.l.bf16 %v9781_v32  ;;  %1871 = vmatmul.f32.gmra.mxu2 %v1757_v60  ;;  %v13663_v43 = vld [vmem:[#allocation109_spill] sm:$0xff] }
 0x30e   : > { %v3765_v59 = vsel %vm1480_vm12, %v3735_v44, %v6252_v34  ;;  %v3826_v29 = vsel %vm1545_vm14, %v3794_v40, %v6232_v28  ;;  %v6262_v14 = vunpack.i.l.bf16 %v9873_v62  ;;  %v6237_v50 = vunpack.i.l.bf16 %v9731_v41  ;;  %v6291_v28 = vpop.permute.xlu2 %6290 }
 0x30f   : > { %v3796_v27 = vsel %vm1512_vm13, %v3764_v11, %v6257_v22  ;;  %v3797_v1 = vsel %vm1512_vm13, %v3765_v59, %v6257_v22  ;;  %v6268_v48 = vunpack.i.h.bf16 %v9865_v47  ;;  %v6267_v39 = vunpack.i.l.bf16 %v9865_v47 }
 0x310   : > { %v1640_v12 = vsel %vm1611_vm0, %v1607_v15, %v13662_v45  ;;  %v1641_v3 = vsel %vm1611_vm0, %v1608_v17, %v13662_v45  ;;  %v1577_v62 = vsel %vm1545_vm14, %v1544_v13, %v6143_v36  ;;  %v3859_v38 = vsel %vm1578_vm15, %v3827_v49, %v6237_v50  ;;  %v13665_v17 = vld [vmem:[#allocation48_spill] sm:$0xff] }
 0x311   : > { %v3983_v5 = vsel %vm1676_vm7, %v3981_v9, %v3982_v33  ;;  %v3858_v0 = vsel %vm1578_vm15, %v3826_v29, %v8664_v54  ;;  %v3828_v47 = vsel %vm1545_vm14, %v3796_v27, %v6262_v14  ;;  %v3829_v10 = vsel %vm1545_vm14, %v3797_v1, %v6263_v56  ;;  %v10029_v1 = vpop.f32.mrf.mxu3 }
 0x312   : > { %4110 = vmatmul.f32.gmra.mxu3 %v3983_v5  ;;  %v3890_v53 = vsel %vm1611_vm0, %v3858_v0, %v6242_v52  ;;  %v3891_v37 = vsel %vm1611_vm0, %v3859_v38, %v6242_v52  ;;  %v6238_v13 = vunpack.i.h.bf16 %v9731_v41  ;;  %v1761_v36 = vrot.slane %v1640_v12, 7  ;;  %v10025_v52 = vpop.permute.xlu1 %6300 }
 0x313   : > { %v1762_v20 = vrot.slane %v1641_v3, 7  ;;  %v1609_v31 = vsel %vm1578_vm15, %v1576_v23, %v8664_v54  ;;  %v6253_v21 = vunpack.i.h.bf16 %v9791_v61  ;;  %v3737_v34 = vsel %vm1449_vm11, %v13663_v43, %v6268_v48 }
 0x314   : > { %v3736_v55 = vsel %vm1449_vm11, %v13664_v63, %v6267_v39  ;;  %v1610_v6 = vsel %vm1578_vm15, %v1577_v62, %v8664_v54  ;;  %v3987_v41 = vrot.slane %v3890_v53, 7  ;;  %v3988_v7 = vrot.slane %v3891_v37, 7  ;;  %v6311_v38 = vpop.permute.xlu0 %6310 }
 0x315   : > { %v3860_v4 = vsel %vm1578_vm15, %v3828_v47, %v8664_v54  ;;  %v3861_v23 = vsel %vm1578_vm15, %v3829_v10, %v6238_v13  ;;  %v6243_v61 = vunpack.i.h.bf16 %v9781_v32  ;;  %v6287_v40 = vunpack.i.l.bf16 %v9974_v51 }
 0x316   : > { %v1642_v24 = vsel %vm1611_vm0, %v1609_v31, %v13561_v16  ;;  %v3766_v35 = vsel %vm1480_vm12, %v3736_v55, %v8647_v58  ;;  %v3767_v22 = vsel %vm1480_vm12, %v3737_v34, %v6253_v21  ;;  %v1763_v26 = vsel %vm1676_vm7, %v1761_v36, %v1762_v20  ;;  %v6306_v5 = vpop.permute.xlu2 %6305 }
 0x317   : > { %v1643_v42 = vsel %vm1611_vm0, %v1610_v6, %v13561_v16  ;;  %v6273_v44 = vunpack.i.h.bf16 %v9912_v25  ;;  %v6272_v56 = vunpack.i.l.bf16 %v9912_v25  ;;  %1874 = vmatmul.f32.gmra.mxu2 %v1763_v26  ;;  %v3892_v32 = vsel %vm1611_vm0, %v3860_v4, %v6243_v61 }
 0x318   : > { %v3893_v11 = vsel %vm1611_vm0, %v3861_v23, %v6243_v61  ;;  %v6293_v60 = vunpack.i.h.bf16 %v6291_v28  ;;  %v6292_v9 = vunpack.i.l.bf16 %v6291_v28  ;;  %v6258_v33 = vunpack.i.h.bf16 %v9854_v46 }
 0x319   : > { %v3989_v15 = vsel %vm1676_vm7, %v3987_v41, %v3988_v7  ;;  %v3710_v18 = vsel %vm419_vm1, 0.0, %v6287_v40  ;;  %v3711_v49 = vsel %vm419_vm1, %v13665_v17, %v6287_v40  ;;  %v1767_v25 = vrot.slane %v1642_v24, 7  ;;  %v13666_v7 = vld [vmem:[#allocation50_spill] sm:$0xff] }
 0x31a   : > { %4113 = vmatmul.f32.gmra.mxu3 %v3989_v15  ;;  %v1768_v59 = vrot.slane %v1643_v42, 7  ;;  %v3798_v29 = vsel %vm1512_vm13, %v3766_v35, %v6258_v33  ;;  %v3799_v14 = vsel %vm1512_vm13, %v3767_v22, %v6258_v33  ;;  %v3993_v50 = vrot.slane %v3892_v32, 7  ;;  %v6316_v35 = vpop.permute.xlu1 %6315  ;;  %v1907_v42 = vpop.f32.mrf.mxu3  ;;  %v13667_v15 = vld [vmem:[#allocation57_spill] sm:$0xff] }
 0x31b   : > { %v3994_v27 = vrot.slane %v3893_v11, 7  ;;  %v3830_v46 = vsel %vm1545_vm14, %v3798_v29, %v6272_v56  ;;  %v3831_v48 = vsel %vm1545_vm14, %v3799_v14, %v6273_v44  ;;  %v6277_v39 = vunpack.i.l.bf16 %v9944_v19  ;;  %v1833_v29 = vpop.f32.mrf.mxu2 }
 0x31c   : > { %v3738_v45 = vsel %vm1449_vm11, %v3710_v18, %v6292_v9  ;;  %v3739_v12 = vsel %vm1449_vm11, %v3711_v49, %v6293_v60  ;;  %v6302_v3 = vunpack.i.l.bf16 %v10025_v52  ;;  %v6297_v62 = vunpack.i.l.bf16 %v9999_v8 }
 0x31d   : > { %v1769_v0 = vsel %vm1676_vm7, %v1767_v25, %v1768_v59  ;;  %v3995_v47 = vsel %vm1676_vm7, %v3993_v50, %v3994_v27  ;;  %v3862_v10 = vsel %vm1578_vm15, %v3830_v46, %v8664_v54  ;;  %v3863_v53 = vsel %vm1578_vm15, %v3831_v48, %v6277_v39  ;;  %v10081_v27 = vpop.permute.xlu0 %6325 }
 0x31e   : > { %v6282_v37 = vunpack.i.l.bf16 %v9935_v57  ;;  %v6288_v13 = vunpack.i.h.bf16 %v9974_v51  ;;  %v3769_v36 = vsel %vm1480_vm12, %v3739_v12, %v6297_v62  ;;  %v3768_v20 = vsel %vm1480_vm12, %v3738_v45, %v8647_v58  ;;  %v13668_v62 = vld [vmem:[#allocation58_spill] sm:$0xff] }
 0x31f   : > { %1877 = vmatmul.f32.gmra.mxu2 %v1769_v0  ;;  %v3800_v31 = vsel %vm1512_vm13, %v3768_v20, %v6302_v3  ;;  %v3801_v21 = vsel %vm1512_vm13, %v3769_v36, %v6302_v3  ;;  %v6313_v43 = vunpack.i.h.bf16 %v6311_v38  ;;  %v6312_v34 = vunpack.i.l.bf16 %v6311_v38 }
 0x320   : > { %v6308_v63 = vunpack.i.h.bf16 %v6306_v5  ;;  %v6307_v55 = vunpack.i.l.bf16 %v6306_v5  ;;  %v3894_v6 = vsel %vm1611_vm0, %v3862_v10, %v6282_v37  ;;  %v3895_v28 = vsel %vm1611_vm0, %v3863_v53, %v6282_v37 }
 0x321   : > { %v6278_v51 = vunpack.i.h.bf16 %v9944_v19  ;;  %v3712_v41 = vsel %vm419_vm1, 0.0, %v6288_v13  ;;  %v3713_v4 = vsel %vm419_vm1, %v13666_v7, %v6288_v13  ;;  %v3999_v22 = vrot.slane %v3894_v6, 7  ;;  %v13670_v6 = vld [vmem:[#allocation61_spill] sm:$0xff] }
 0x322   : > { %4116 = vmatmul.f32.gmra.mxu3 %v3995_v47  ;;  %v3832_v23 = vsel %vm1545_vm14, %v3800_v31, %v6307_v55  ;;  %v3833_v61 = vsel %vm1545_vm14, %v3801_v21, %v6308_v63  ;;  %v3741_v40 = vsel %vm1449_vm11, %v3713_v4, %v6313_v43  ;;  %v3740_v24 = vsel %vm1449_vm11, %v3712_v41, %v6312_v34  ;;  %v1910_v12 = vpop.f32.mrf.mxu3  ;;  %v13669_v21 = vld [vmem:[#allocation60_spill] sm:$0xff]  ;;  %v13671_v4 = vld [vmem:[#allocation62_spill] sm:$0xff] }
 0x323   : > { %v4000_v26 = vrot.slane %v3895_v28, 7  ;;  %v6298_v44 = vunpack.i.h.bf16 %v9999_v8  ;;  %v6283_v19 = vunpack.i.h.bf16 %v9935_v57  ;;  %v3864_v56 = vsel %vm1578_vm15, %v3832_v23, %v8664_v54  ;;  %v10072_v57 = vpop.permute.xlu2 %6320  ;;  %v1836_v10 = vpop.f32.mrf.mxu2 }
 0x324   : > { %v3865_v32 = vsel %vm1578_vm15, %v3833_v61, %v6278_v51  ;;  %v3770_v11 = vsel %vm1480_vm12, %v3740_v24, %v8647_v58  ;;  %v6318_v9 = vunpack.i.h.bf16 %v6316_v35  ;;  %v6317_v33 = vunpack.i.l.bf16 %v6316_v35  ;;  %v13672_v35 = vld [vmem:[#allocation63_spill] sm:$0xff] }
 0x325   : > { %v3771_v60 = vsel %vm1480_vm12, %v3741_v40, %v6298_v44  ;;  %v6303_v18 = vunpack.i.h.bf16 %v10025_v52  ;;  %v4001_v8 = vsel %vm1676_vm7, %v3999_v22, %v4000_v26  ;;  %v3896_v17 = vsel %vm1611_vm0, %v3864_v56, %v6283_v19  ;;  %v13674_v56 = vld [vmem:[#allocation42_spill] sm:$0xff] }
 0x326   : > { %v3897_v49 = vsel %vm1611_vm0, %v3865_v32, %v6283_v19  ;;  %v6322_v52 = vunpack.i.l.bf16 %v10072_v57  ;;  %v4005_v46 = vrot.slane %v3896_v17, 7  ;;  %v6327_v3 = vunpack.i.l.bf16 %v10081_v27 }
 0x327   : > { %5634 = vmatmul.msk.f32.vlgmr.msra.gmra.mxu2 %vm419_vm1, %v13667_v15  ;;  %v3802_v25 = vsel %vm1512_vm13, %v3770_v11, %v6303_v18  ;;  %v3803_v59 = vsel %vm1512_vm13, %v3771_v60, %v6303_v18  ;;  %v4006_v48 = vrot.slane %v3897_v49, 7  ;;  %v10093_v47 = vadd.f32 %v9920_v30, %v1833_v29  ;;  %v13675_v11 = vld [vmem:[#allocation65_spill] sm:$0xff] }
 0x328   : > { %v3834_v14 = vsel %vm1545_vm14, %v3802_v25, %v6317_v33  ;;  %v3835_v50 = vsel %vm1545_vm14, %v3803_v59, %v6318_v9  ;;  %v10096_v53 = vadd.f32 %v9985_v2, %v1836_v10  ;;  %v13676_v33 = vld [vmem:[#allocation66_spill] sm:$0xff] }
 0x329   : > { %v3866_v39 = vsel %vm1578_vm15, %v3834_v14, %v8664_v54  ;;  %v3867_v45 = vsel %vm1578_vm15, %v3835_v50, %v6322_v52  ;;  %v4007_v38 = vsel %vm1676_vm7, %v4005_v46, %v4006_v48  ;;  %v1946_v36 = vsel %vm419_vm1, %v10093_v47, 0.0  ;;  %v13678_v25 = vld [vmem:[#allocation70_spill] sm:$0xff]  ;;  %v13679_v14 = vld [vmem:[#allocation71_spill] sm:$0xff]  ;;  %v13680_v52 = vld [vmem:[#allocation68_spill] sm:$0xff] }
 0x32a   : > { %4119 = vmatmul.f32.gmra.mxu3 %v4001_v8  ;;  %v3898_v5 = vsel %vm1611_vm0, %v3866_v39, %v6327_v3  ;;  %v3899_v0 = vsel %vm1611_vm0, %v3867_v45, %v6327_v3  ;;  %v1947_v20 = vsel %vm419_vm1, %v10096_v53, 0.0  ;;  %v1913_v43 = vpop.f32.mrf.mxu3  ;;  %v13677_v8 = vld [vmem:[#allocation67_spill] sm:$0xff]  ;;  %v4014_v46 = vrot.slane %v13680_v52, 7  ;;  %v13681_v48 = vld [vmem:[#allocation72_spill] sm:$0xff] }
 0x32b   : > { %v4011_v37 = vrot.slane %v3898_v5, 7  ;;  %v4012_v13 = vrot.slane %v3899_v0, 7  ;;  %v1948_v31 = vadd.f32 %v1947_v20, %v1946_v36  ;;  %v1839_v34 = vpop.f32.mrf.mxu2  ;;  %v4015_v39 = vrot.slane %v13681_v48, 7  ;;  %v13682_v36 = vld [vmem:[#allocation69_spill] sm:$0xff]  ;;  %v13684_v48 = vld [vmem:[#allocation2_spill] sm:$0xff] }
 0x32c   : > { %v10106_v2 = vadd.f32 %v10029_v1, %v1839_v34  ;;  %v4020_v20 = vrot.slane %v13682_v36, 7 }
 0x32d   : > { %v4013_v30 = vsel %vm1676_vm7, %v4011_v37, %v4012_v13  ;;  %v4016_v3 = vsel %vm1676_vm7, %v4014_v46, %v4015_v39 }
 0x32e   : > { %v1949_v63 = vsel %vm419_vm1, %v10106_v2, 0.0 }
 0x32f   : > { %5635 = vmatmul.msk.f32.gmra.mxu2 %vm419_vm1, %v13668_v62  ;;  %v1950_v55 = vadd.f32 %v1949_v63, %v1948_v31  ;;  %v13683_v31 = vld [vmem:[#allocation73_spill] sm:$0xff] }
 0x332   : > { %4122 = vmatmul.f32.gmra.mxu3 %v4007_v38  ;;  %v1916_v23 = vpop.f32.mrf.mxu3 }
 0x333   : > { %v1842_v28 = vpop.f32.mrf.mxu2 }
 0x334   : > { %v10112_v51 = vadd.f32 %v1907_v42, %v1842_v28  ;;  %v13673_v42 = vld [vmem:[#allocation64_spill] sm:$0xff] }
 0x336   : > { %v1951_v41 = vsel %vm419_vm1, %v10112_v51, 0.0 }
 0x337   : > { %5636 = vmatmul.msk.f32.gmra.mxu2 %vm419_vm1, %v13669_v21  ;;  %v1952_v7 = vadd.f32 %v1951_v41, %v1950_v55  ;;  %v4021_v21 = vrot.slane %v13683_v31, 7 }
 0x339   : > { %v4022_v28 = vsel %vm1676_vm7, %v4020_v20, %v4021_v21 }
 0x33a   : > { %4125 = vmatmul.f32.gmra.mxu3 %v4013_v30  ;;  %v1919_v26 = vpop.f32.mrf.mxu3 }
 0x33b   : > { %v1845_v1 = vpop.f32.mrf.mxu2 }
 0x33c   : > { %v10118_v61 = vadd.f32 %v1910_v12, %v1845_v1 }
 0x33e   : > { %v1953_v40 = vsel %vm419_vm1, %v10118_v61, 0.0 }
 0x33f   : > { %5637 = vmatmul.msk.f32.gmra.mxu2 %vm419_vm1, %v13670_v6  ;;  %v1954_v24 = vadd.f32 %v1953_v40, %v1952_v7 }
 0x342   : > { %v1922_v19 = vpop.f32.mrf.mxu3 }
 0x343   : > { %v1848_v22 = vpop.f32.mrf.mxu2 }
 0x344   : > { %v1914_v45 = vadd.f32 %v1913_v43, %v1848_v22 }
 0x346   : > { %v1955_v62 = vsel %vm419_vm1, %v1914_v45, 0.0 }
 0x347   : > { %5638 = vmatmul.msk.f32.gmra.mxu2 %vm419_vm1, %v13671_v4  ;;  %v1956_v37 = vadd.f32 %v1955_v62, %v1954_v24 }
 0x34a   : > { %v1925_v60 = vpop.f32.mrf.mxu3 }
 0x34b   : > { %v1851_v44 = vpop.f32.mrf.mxu2 }
 0x34c   : > { %v10140_v12 = vadd.f32 %v1916_v23, %v1851_v44 }
 0x34e   : > { %v1957_v0 = vsel %vm419_vm1, %v10140_v12, 0.0 }
 0x34f   : > { %5639 = vmatmul.msk.f32.gmra.mxu2 %vm419_vm1, %v13672_v35  ;;  %v1958_v34 = vadd.f32 %v1957_v0, %v1956_v37 }
 0x352   : > { %v1928_v15 = vpop.f32.mrf.mxu3 }
 0x353   : > { %v1854_v32 = vpop.f32.mrf.mxu2 }
 0x354   : > { %v10144_v38 = vadd.f32 %v1919_v26, %v1854_v32 }
 0x356   : > { %v1959_v30 = vsel %vm419_vm1, %v10144_v38, 0.0 }
 0x357   : > { %5640 = vmatmul.msk.f32.gmra.mxu2 %vm419_vm1, %v13673_v42  ;;  %v1960_v6 = vadd.f32 %v1959_v30, %v1958_v34 }
 0x35a   : > { %v1931_v49 = vpop.f32.mrf.mxu3 }
 0x35b   : > { %v1857_v9 = vpop.f32.mrf.mxu2 }
 0x35c   : > { %v10149_v10 = vadd.f32 %v1922_v19, %v1857_v9 }
 0x35e   : > { %v1961_v63 = vsel %vm419_vm1, %v10149_v10, 0.0 }
 0x35f   : > { %5641 = vmatmul.msk.f32.gmra.mxu2 %vm419_vm1, %v13674_v56  ;;  %v1962_v4 = vadd.f32 %v1961_v63, %v1960_v6 }
 0x362   : > { %v1934_v29 = vpop.f32.mrf.mxu3 }
 0x367   : > { %5642 = vmatmul.msk.f32.gmra.mxu2 %vm419_vm1, %v13675_v11 }
 0x369   : > { %v1860_v18 = vpop.f32.mrf.mxu2 }
 0x36a   : > { %v1937_v5 = vpop.f32.mrf.mxu3  ;;  %v10155_v43 = vadd.f32 %v1925_v60, %v1860_v18 }
 0x36c   : > { %v1963_v41 = vsel %vm419_vm1, %v10155_v43, 0.0 }
 0x36d   : > { %v1964_v24 = vadd.f32 %v1963_v41, %v1962_v4 }
 0x36f   : > { %5643 = vmatmul.msk.f32.gmra.mxu2 %vm419_vm1, %v13676_v33 }
 0x372   : > { %v1940_v40 = vpop.f32.mrf.mxu3 }
 0x373   : > { %v1863_v17 = vpop.f32.mrf.mxu2 }
 0x374   : > { %v10159_v55 = vadd.f32 %v1928_v15, %v1863_v17 }
 0x376   : > { %v1965_v23 = vsel %vm419_vm1, %v10159_v55, 0.0 }
 0x377   : > { %5644 = vmatmul.msk.f32.gmra.mxu2 %vm419_vm1, %v13677_v8  ;;  %v1966_v42 = vadd.f32 %v1965_v23, %v1964_v24 }
 0x37a   : > { %v1943_v33 = vpop.f32.mrf.mxu3 }
 0x37e   : > { %v1866_v59 = vpop.f32.mrf.mxu2 }
 0x37f   : > { %5645 = vmatmul.msk.f32.gmra.mxu2 %vm419_vm1, %v13678_v25  ;;  %v10164_v7 = vadd.f32 %v1931_v49, %v1866_v59 }
 0x381   : > { %v1967_v22 = vsel %vm419_vm1, %v10164_v7, 0.0 }
 0x382   : > { %v1968_v32 = vadd.f32 %v1967_v22, %v1966_v42 }
 0x387   : > { %5646 = vmatmul.msk.f32.gmra.mxu2 %vm419_vm1, %v13679_v14 }
 0x388   : > { %v1869_v50 = vpop.f32.mrf.mxu2 }
 0x389   : > { %v10169_v1 = vadd.f32 %v1934_v29, %v1869_v50 }
 0x38b   : > { %v1969_v44 = vsel %vm419_vm1, %v10169_v1, 0.0 }
 0x38c   : > { %v1970_v60 = vadd.f32 %v1969_v44, %v1968_v32 }
 0x38f   : > { %5647 = vmatmul.msk.f32.gmra.mxu2 %vm419_vm1, %v4016_v3 }
 0x390   : > { %v1872_v13 = vpop.f32.mrf.mxu2 }
 0x391   : > { %v10173_v26 = vadd.f32 %v1937_v5, %v1872_v13 }
 0x393   : > { %v1971_v11 = vsel %vm419_vm1, %v10173_v26, 0.0 }
 0x394   : > { %v1972_v15 = vadd.f32 %v1971_v11, %v1970_v60 }
 0x397   : > { %5648 = vmatmul.msk.f32.gmra.mxu2 %vm419_vm1, %v4022_v28 }
 0x39a   : > { %v1875_v35 = vpop.f32.mrf.mxu2 }
 0x39b   : > { %v10177_v19 = vadd.f32 %v1940_v40, %v1875_v35 }
 0x39d   : > { %v1973_v9 = vsel %vm419_vm1, %v10177_v19, 0.0 }
 0x39e   : > { %v1974_v17 = vadd.f32 %v1973_v9, %v1972_v15 }
 0x39f   : > { %5649 = vmatmul.msk.f32.gmra.mxu2 %vm419_vm1, %v13674_v56 }
 0x3a2   : > { %v1878_v18 = vpop.f32.mrf.mxu2 }
 0x3a3   : > { %v1944_v8 = vadd.f32 %v1943_v33, %v1878_v18 }
 0x3a5   : > { %v1975_v49 = vsel %vm419_vm1, %v1944_v8, 0.0 }
 0x3a6   : > { %v1976_v25 = vadd.f32 %v1975_v49, %v1974_v17 }
 0x3a8   : > { %v1977_v59 = vrot.slane %v1976_v25, 4 }
 0x3aa   : > { %v1978_v29 = vadd.f32 %v1977_v59, %v1976_v25 }
 0x3ac   : > { %v1979_v14 = vrot.slane %v1978_v29, 2 }
 0x3ae   : > { %v1980_v50 = vadd.f32 %v1979_v14, %v1978_v29 }
 0x3b0   : > { %v1981_v52 = vrot.slane %v1980_v50, 1 }
 0x3b2   : > { %v1982_v46 = vadd.f32 %v1981_v52, %v1980_v50 }
 0x3b4   : > { %v1983_v39 = vmul.f32 %v1982_v46, %v13684_v48 }
 0x3b6   : > { %v10188_v3 = vsub.f32 %v10093_v47, %v1983_v39  ;;  %v10191_v62 = vsub.f32 %v10096_v53, %v1983_v39  ;;  %v10194_v5 = vsub.f32 %v10106_v2, %v1983_v39  ;;  %v10197_v0 = vsub.f32 %v10112_v51, %v1983_v39 }
 0x3b7   : > { %v10200_v37 = vsub.f32 %v10118_v61, %v1983_v39  ;;  %v10208_v53 = vsub.f32 %v1914_v45, %v1983_v39  ;;  %v10215_v30 = vsub.f32 %v10140_v12, %v1983_v39  ;;  %v10221_v45 = vsub.f32 %v10144_v38, %v1983_v39 }
 0x3b8   : > { %v2000_v13 = vmul.f32 %v10188_v3, %v10188_v3  ;;  %v2001_v20 = vmul.f32 %v10191_v62, %v10191_v62  ;;  %v2002_v47 = vmul.f32 %v10194_v5, %v10194_v5  ;;  %v2003_v2 = vmul.f32 %v10197_v0, %v10197_v0 }
 0x3b9   : > { %v2004_v34 = vmul.f32 %v10200_v37, %v10200_v37  ;;  %v2005_v28 = vmul.f32 %v10208_v53, %v10208_v53  ;;  %v10227_v23 = vsub.f32 %v10149_v10, %v1983_v39  ;;  %v2006_v12 = vmul.f32 %v10215_v30, %v10215_v30 }
 0x3ba   : > { %v2016_v51 = vsel %vm419_vm1, %v2000_v13, 0.0  ;;  %v2017_v21 = vsel %vm419_vm1, %v2001_v20, 0.0  ;;  %v2019_v63 = vsel %vm419_vm1, %v2002_v47, 0.0  ;;  %v2021_v41 = vsel %vm419_vm1, %v2003_v2, 0.0 }
 0x3bb   : > { %v2018_v61 = vadd.f32 %v2017_v21, %v2016_v51  ;;  %v2023_v40 = vsel %vm419_vm1, %v2004_v34, 0.0  ;;  %v10233_v35 = vsub.f32 %v10155_v43, %v1983_v39  ;;  %v2007_v38 = vmul.f32 %v10221_v45, %v10221_v45 }
 0x3bc   : > { %v2025_v22 = vsel %vm419_vm1, %v2005_v28, 0.0  ;;  %v10239_v44 = vsub.f32 %v10159_v55, %v1983_v39  ;;  %v2008_v10 = vmul.f32 %v10227_v23, %v10227_v23  ;;  %v2027_v32 = vsel %vm419_vm1, %v2006_v12, 0.0 }
 0x3bd   : > { %v2020_v6 = vadd.f32 %v2019_v63, %v2018_v61  ;;  %v10245_v60 = vsub.f32 %v10164_v7, %v1983_v39  ;;  %v2009_v43 = vmul.f32 %v10233_v35, %v10233_v35  ;;  %v2029_v9 = vsel %vm419_vm1, %v2007_v38, 0.0 }
 0x3be   : > { %v10251_v15 = vsub.f32 %v10169_v1, %v1983_v39  ;;  %v2010_v55 = vmul.f32 %v10239_v44, %v10239_v44  ;;  %v2031_v18 = vsel %vm419_vm1, %v2008_v10, 0.0  ;;  %v10257_v49 = vsub.f32 %v10173_v26, %v1983_v39 }
 0x3bf   : > { %v2022_v4 = vadd.f32 %v2021_v41, %v2020_v6  ;;  %v2011_v7 = vmul.f32 %v10245_v60, %v10245_v60  ;;  %v2033_v25 = vsel %vm419_vm1, %v2009_v43, 0.0  ;;  %v1998_v29 = vsub.f32 %v10177_v19, %v1983_v39  ;;  %v4087_v6 = vpop.f32.mrf.mxu3 }
 0x3c0   : > { %v2012_v1 = vmul.f32 %v10251_v15, %v10251_v15  ;;  %v2035_v14 = vsel %vm419_vm1, %v2010_v55, 0.0  ;;  %v1999_v52 = vsub.f32 %v1944_v8, %v1983_v39  ;;  %v2013_v46 = vmul.f32 %v10257_v49, %v10257_v49 }
 0x3c1   : > { %v2024_v24 = vadd.f32 %v2023_v40, %v2022_v4  ;;  %v2037_v26 = vsel %vm419_vm1, %v2011_v7, 0.0  ;;  %v2014_v20 = vmul.f32 %v1998_v29, %v1998_v29  ;;  %v4152_v4 = vpop.f32.mrf.mxu2 }
 0x3c2   : > { %v2039_v47 = vsel %vm419_vm1, %v2012_v1, 0.0  ;;  %v2015_v51 = vmul.f32 %v1999_v52, %v1999_v52  ;;  %v2041_v19 = vsel %vm419_vm1, %v2013_v46, 0.0 }
 0x3c3   : > { %v2026_v42 = vadd.f32 %v2025_v22, %v2024_v24  ;;  %v2043_v61 = vsel %vm419_vm1, %v2014_v20, 0.0  ;;  %v10273_v22 = vadd.f32 %v4152_v4, %v4087_v6 }
 0x3c4   : > { %v2045_v63 = vsel %vm419_vm1, %v2015_v51, 0.0 }
 0x3c5   : > { %v2028_v11 = vadd.f32 %v2027_v32, %v2026_v42  ;;  %13685 = vst [vmem:[#allocation99_spill] sm:$0xff] %v10273_v22  ;;  %v4200_v43 = vsel %vm419_vm1, %v10273_v22, 0.0 }
 0x3c7   : > { %v2030_v33 = vadd.f32 %v2029_v9, %v2028_v11  ;;  %v4090_v24 = vpop.f32.mrf.mxu3 }
 0x3c9   : > { %v2032_v17 = vadd.f32 %v2031_v18, %v2030_v33  ;;  %v4155_v10 = vpop.f32.mrf.mxu2 }
 0x3ca   : > { %v10276_v32 = vadd.f32 %v4155_v10, %v4090_v24  ;;  %v895_v10 = vld [vmem:[%s10301_s14 + $0x80] sm:$0xff] }
 0x3cb   : > { %v2034_v59 = vadd.f32 %v2033_v25, %v2032_v17 }
 0x3cc   : > { %13686 = vst [vmem:[#allocation100_spill] sm:$0xff] %v10276_v32  ;;  %v4201_v9 = vsel %vm419_vm1, %v10276_v32, 0.0 }
 0x3cd   : > { %v2036_v50 = vadd.f32 %v2035_v14, %v2034_v59  ;;  %v4202_v33 = vadd.f32 %v4201_v9, %v4200_v43 }
 0x3cf   : > { %v2038_v13 = vadd.f32 %v2037_v26, %v2036_v50  ;;  %v4093_v55 = vpop.f32.mrf.mxu3 }
 0x3d1   : > { %v2040_v2 = vadd.f32 %v2039_v47, %v2038_v13  ;;  %v4158_v18 = vpop.f32.mrf.mxu2 }
 0x3d2   : > { %v10282_v17 = vadd.f32 %v4158_v18, %v4093_v55 }
 0x3d3   : > { %v2042_v21 = vadd.f32 %v2041_v19, %v2040_v2 }
 0x3d4   : > { %13687 = vst [vmem:[#allocation101_spill] sm:$0xff] %v10282_v17  ;;  %v4203_v59 = vsel %vm419_vm1, %v10282_v17, 0.0 }
 0x3d5   : > { %v2044_v34 = vadd.f32 %v2043_v61, %v2042_v21  ;;  %v4204_v1 = vadd.f32 %v4203_v59, %v4202_v33 }
 0x3d7   : > { %v2046_v8 = vadd.f32 %v2045_v63, %v2044_v34  ;;  %v4096_v50 = vpop.f32.mrf.mxu3 }
 0x3d9   : > { %v2047_v39 = vrot.slane %v2046_v8, 4  ;;  %v4161_v26 = vpop.f32.mrf.mxu2 }
 0x3da   : > { %v10286_v20 = vadd.f32 %v4161_v26, %v4096_v50 }
 0x3db   : > { %v2048_v28 = vadd.f32 %v2047_v39, %v2046_v8 }
 0x3dc   : > { %13688 = vst [vmem:[#allocation19_spill] sm:$0xff] %v10286_v20  ;;  %v4205_v2 = vsel %vm419_vm1, %v10286_v20, 0.0 }
 0x3dd   : > { %v2049_v41 = vrot.slane %v2048_v28, 2  ;;  %v4206_v51 = vadd.f32 %v4205_v2, %v4204_v1 }
 0x3df   : > { %v2050_v12 = vadd.f32 %v2049_v41, %v2048_v28  ;;  %v4099_v34 = vpop.f32.mrf.mxu3  ;;  %v896_v41 = vld [vmem:[%s10301_s14 + $0x88] sm:$0xff] }
 0x3e0   : > { %3022 = vmatpush.msrb.mxu1 %v896_v41 }
 0x3e1   : > { %v2051_v40 = vrot.slane %v2050_v12, 1  ;;  %v4164_v63 = vpop.f32.mrf.mxu2 }
 0x3e2   : > { %v10290_v8 = vadd.f32 %v4164_v63, %v4099_v34  ;;  %3023 = vmatpush.msrb.mxu1 %v895_v10 }
 0x3e3   : > { %v2052_v38 = vadd.f32 %v2051_v40, %v2050_v12 }
 0x3e4   : > { %13689 = vst [vmem:[#allocation18_spill] sm:$0xff] %v10290_v8  ;;  %v4207_v39 = vsel %vm419_vm1, %v10290_v8, 0.0 }
 0x3e5   : > { %v2053_v42 = vmul.f32 %v2052_v38, %v13684_v48  ;;  %v10294_v6 = vadd.f32 %v4207_v39, %v4206_v51 }
 0x3e7   : > { %v2054_v11 = vadd.f32 1e-05, %v2053_v42  ;;  %13690 = vst [vmem:[#allocation54_spill] sm:$0xff] %v10294_v6 }
 0x3e9   : > { %7035 = vrsqrt.f32 %v2054_v11  ;;  %vm2061_vm3 = vweird.f32 %v2054_v11 }
 0x3ef   : > { %v7036_v7 = vpop.eup %7035 }
 0x3f0   : > { %v2056_v25 = vmul.f32 %v7036_v7, %v2054_v11  ;;  %vm2062_vm2 = vweird.f32 %v7036_v7 }
 0x3f1   : > { %vm2063_vm4 = vmor %vm2061_vm3, %vm2062_vm2 }
 0x3f2   : > { %v2057_v14 = vmul.f32 %v7036_v7, %v2056_v25  ;;  %v13691_v25 = vld [vmem:[#allocation3_spill] sm:$0xff] }
 0x3f4   : > { %v2058_v46 = vmul.f32 0.5, %v2057_v14 }
 0x3f6   : > { %v2059_v13 = vsub.f32 1.5, %v2058_v46 }
 0x3f8   : > { %v2060_v47 = vmul.f32 %v7036_v7, %v2059_v13 }
 0x3fa   : > { %v2064_v19 = vsel %vm2063_vm4, %v7036_v7, %v2060_v47 }
 0x3fb   : > { %v2079_v21 = vmul.f32 %v2064_v19, %v1998_v29  ;;  %v2080_v61 = vmul.f32 %v2064_v19, %v1999_v52  ;;  %v2069_v28 = vmul.f32 %v2064_v19, %v10200_v37  ;;  %v2070_v29 = vmul.f32 %v2064_v19, %v10208_v53 }
 0x3fc   : > { %v2067_v52 = vmul.f32 %v2064_v19, %v10194_v5  ;;  %v2068_v4 = vmul.f32 %v2064_v19, %v10197_v0  ;;  %v2065_v12 = vmul.f32 %v2064_v19, %v10188_v3  ;;  %v2066_v40 = vmul.f32 %v2064_v19, %v10191_v62 }
 0x3fd   : > { %v10310_v24 = vmax.f32 %v2069_v28, 0.0  ;;  %v10312_v38 = vmax.f32 %v2070_v29, 0.0  ;;  %v2075_v43 = vmul.f32 %v2064_v19, %v10239_v44  ;;  %v2076_v9 = vmul.f32 %v2064_v19, %v10245_v60 }
 0x3fe   : > { %v10314_v42 = vmax.f32 %v2067_v52, 0.0  ;;  %v10316_v37 = vmax.f32 %v2068_v4, 0.0  ;;  %v10318_v53 = vmax.f32 %v2065_v12, 0.0  ;;  %v10320_v5 = vmax.f32 %v2066_v40, 0.0 }
 0x3ff   : > { %v6359_v0 = vpack.i.bf16 %v10312_v38, %v10310_v24  ;;  %v2073_v33 = vmul.f32 %v2064_v19, %v10227_v23  ;;  %v2074_v55 = vmul.f32 %v2064_v19, %v10233_v35  ;;  %v2071_v18 = vmul.f32 %v2064_v19, %v10215_v30 }
 0x400   : > { %v6354_v3 = vpack.i.bf16 %v10316_v37, %v10314_v42  ;;  %v6349_v62 = vpack.i.bf16 %v10320_v5, %v10318_v53  ;;  %v10333_v11 = vrot.slane %v10320_v5, 2  ;;  %v2072_v7 = vmul.f32 %v2064_v19, %v10221_v45 }
 0x401   : > { %6360 = vrot.lane.b32.xlu2 %v6359_v0, %s7054_s30  ;;  %v10347_v14 = vmax.f32 %v2075_v43, 0.0  ;;  %v10349_v44 = vmax.f32 %v2076_v9, 0.0  ;;  %v10352_v23 = vmax.f32 %v2073_v33, 0.0  ;;  %v10354_v35 = vmax.f32 %v2074_v55, 0.0 }
 0x402   : > { %6355 = vrot.lane.b32.xlu1 %v6354_v3, %s7054_s30  ;;  %6350 = vrot.lane.b32.xlu0 %v6349_v62, %s7054_s30  ;;  %v10344_v59 = vsel %vm1006_vm6, %v10333_v11, %v13691_v25  ;;  %v2812_v1 = vrot.slane %v10333_v11, 7  ;;  %v10356_v30 = vmax.f32 %v2071_v18, 0.0  ;;  %v10360_v50 = vmax.f32 %v2072_v7, 0.0 }
 0x403   : > { %v2813_v60 = vrot.slane %v10344_v59, 7  ;;  %13692 = vst [vmem:[#allocation102_spill] sm:$0xff] %v10354_v35  ;;  %v6374_v45 = vpack.i.bf16 %v10349_v44, %v10347_v14  ;;  %v6369_v26 = vpack.i.bf16 %v10354_v35, %v10352_v23  ;;  %v10372_v47 = vrot.slane %v10314_v42, 2 }
 0x404   : > { %v6364_v13 = vpack.i.bf16 %v10360_v50, %v10356_v30  ;;  %v10374_v2 = vmax.f32 %v2080_v61, 0.0  ;;  %v10376_v51 = vmax.f32 %v2079_v21, 0.0  ;;  %v2077_v34 = vmul.f32 %v2064_v19, %v10251_v15 }
 0x405   : > { %v2814_v46 = vsel %vm1676_vm7, %v2812_v1, %v2813_v60  ;;  %v2078_v63 = vmul.f32 %v2064_v19, %v10257_v49  ;;  %v10383_v39 = vsel %vm1006_vm6, %v10372_v47, %v13691_v25  ;;  %v2818_v28 = vrot.slane %v10372_v47, 7 }
 0x406   : > { %5618 = vmatmul.msk.f32.vlgmr.msrb.gmra.mxu1 %vm419_vm1, %v2814_v46  ;;  %v2819_v29 = vrot.slane %v10383_v39, 7  ;;  %v10387_v52 = vmax.f32 %v2077_v34, 0.0  ;;  %v6389_v21 = vpack.i.bf16 %v10314_v42, %v10320_v5  ;;  %v6384_v49 = vpack.i.bf16 %v10374_v2, %v10376_v51 }
 0x407   : > { %v10389_v41 = vmax.f32 %v2078_v63, 0.0  ;;  %v2173_v61 = vrot.slane %v10316_v37, 2  ;;  %v6404_v0 = vpack.i.bf16 %v10354_v35, %v10360_v50  ;;  %v2175_v3 = vrot.slane %v10310_v24, 2 }
 0x408   : > { %13693 = vst [vmem:[#allocation45_spill] sm:$0xff] %v10387_v52  ;;  %v2820_v15 = vsel %vm1676_vm7, %v2818_v28, %v2819_v29  ;;  %v6399_v10 = vpack.i.bf16 %v10356_v30, %v10312_v38  ;;  %v6394_v43 = vpack.i.bf16 %v10310_v24, %v10316_v37  ;;  %v2177_v18 = vrot.slane %v10312_v38, 2 }
 0x409   : > { %6375 = vrot.lane.b32.xlu2 %v6374_v45, %s7054_s30  ;;  %13694 = vst [vmem:[#allocation59_spill] sm:$0xff] %v10389_v41  ;;  %v6379_v19 = vpack.i.bf16 %v10389_v41, %v10387_v52  ;;  %v2174_v4 = vsel %vm1006_vm6, %v2173_v61, %v13691_v25  ;;  %v2824_v12 = vrot.slane %v2173_v61, 7  ;;  %v2176_v9 = vsel %vm1006_vm6, %v2175_v3, %v13691_v25 }
 0x40a   : > { %6370 = vrot.lane.b32.xlu1 %v6369_v26, %s7054_s30  ;;  %6365 = vrot.lane.b32.xlu0 %v6364_v13, %s7054_s30  ;;  %v2825_v40 = vrot.slane %v2174_v4, 7  ;;  %v2830_v33 = vrot.slane %v2175_v3, 7  ;;  %v2831_v55 = vrot.slane %v2176_v9, 7  ;;  %v2178_v1 = vsel %vm1006_vm6, %v2177_v18, %v13691_v25 }
 0x40b   : > { %v13124_v60 = vrot.slane %v10310_v24, 1  ;;  %v13123_v46 = vrot.slane %v10312_v38, 1  ;;  %v2836_v26 = vrot.slane %v2177_v18, 7  ;;  %v2837_v13 = vrot.slane %v2178_v1, 7 }
 0x40c   : > { %v2826_v62 = vsel %vm1676_vm7, %v2824_v12, %v2825_v40  ;;  %v2832_v7 = vsel %vm1676_vm7, %v2830_v33, %v2831_v55  ;;  %v13121_v34 = vrot.slane %v10314_v42, 1  ;;  %v13125_v63 = vrot.slane %v10316_v37, 1 }
 0x40d   : > { %v2111_v28 = vrot.slane %v10318_v53, 1  ;;  %v13122_v29 = vrot.slane %v10320_v5, 1  ;;  %v10454_v40 = vrot.slane %v10354_v35, 1  ;;  %v2122_v33 = vrot.slane %v10387_v52, 1 }
 0x40e   : > { %5619 = vmatmul.msk.f32.gmra.mxu1 %vm419_vm1, %v2820_v15  ;;  %v2838_v15 = vsel %vm1676_vm7, %v2836_v26, %v2837_v13  ;;  %v2118_v26 = vrot.slane %v10352_v23, 1  ;;  %v10467_v13 = vpack.i.bf16 %v2174_v4, %v2173_v61  ;;  %v2185_v4 = vrot.slane %v10347_v14, 2 }
 0x40f   : > { %v10512_v20 = vpack.i.bf16 %v2178_v1, %v2177_v18 }
 0x410   : > { %v2186_v8 = vsel %vm1006_vm6, %v2185_v4, %v13691_v25 }
 0x411   : > { %6390 = vrot.lane.b32.xlu2 %v6389_v21, %s7055_s7  ;;  %v2179_v21 = vrot.slane %v10356_v30, 2  ;;  %v10540_v6 = vpack.i.bf16 %v2186_v8, %v2185_v4 }
 0x412   : > { %6385 = vrot.lane.b32.xlu1 %v6384_v49, %s7054_s30  ;;  %6380 = vrot.lane.b32.xlu0 %v6379_v19, %s7054_s30 }
 0x413   : > { %v2180_v12 = vsel %vm1006_vm6, %v2179_v21, %v13691_v25 }
 0x414   : > { %v2843_v55 = vrot.slane %v2180_v12, 7 }
 0x416   : > { %5620 = vmatmul.msk.f32.gmra.mxu1 %vm419_vm1, %v2826_v62  ;;  %v2842_v62 = vrot.slane %v2179_v21, 7 }
 0x419   : > { %6405 = vrot.lane.b32.xlu2 %v6404_v0, %s7055_s7  ;;  %v10457_v0 = vrot.slane %v10360_v50, 2 }
 0x41a   : > { %6400 = vrot.lane.b32.xlu1 %v6399_v10, %s7055_s7  ;;  %6395 = vrot.lane.b32.xlu0 %v6394_v43, %s7055_s7  ;;  %v2120_v10 = vrot.slane %v10347_v14, 1  ;;  %v2121_v43 = vrot.slane %v10349_v44, 1 }
 0x41b   : > { %v2848_v61 = vrot.slane %v10457_v0, 7 }
 0x41c   : > { %v6484_v16 = vpack.i.bf16 %v2121_v43, %v2120_v10 }
 0x41e   : > { %5621 = vmatmul.msk.f32.gmra.mxu1 %vm419_vm1, %v2832_v7  ;;  %v10464_v7 = vrot.slane %v10356_v30, 1 }
 0x421   : > { %6420 = vrot.lane.b32.xlu2 %v6384_v49, %s7055_s7  ;;  %v10443_v49 = vpack.i.bf16 %v13125_v63, %v13121_v34  ;;  %v10478_v34 = vpack.i.bf16 %v2176_v9, %v2175_v3  ;;  %v6439_v63 = vpack.i.bf16 %v2118_v26, %v10464_v7  ;;  %v10491_v3 = vpack.i.bf16 %v10383_v39, %v10372_v47 }
 0x422   : > { %6415 = vrot.lane.b32.xlu1 %v6379_v19, %s7055_s7  ;;  %6410 = vrot.lane.b32.xlu0 %v6374_v45, %s7055_s7  ;;  %v6434_v45 = vpack.i.bf16 %v13123_v46, %v13124_v60  ;;  %v6424_v19 = vpack.i.bf16 %v13122_v29, %v2111_v28  ;;  %v10471_v28 = vpack.i.bf16 %v10344_v59, %v10333_v11  ;;  %v2183_v59 = vrot.slane %v10354_v35, 2 }
 0x423   : > { %v6449_v29 = vpack.i.bf16 %v2122_v33, %v2121_v43  ;;  %v2844_v46 = vsel %vm1676_vm7, %v2842_v62, %v2843_v55  ;;  %v6444_v60 = vpack.i.bf16 %v2120_v10, %v10454_v40  ;;  %v2187_v9 = vrot.slane %v10349_v44, 2 }
 0x424   : > { %v10496_v62 = vrot.slane %v10387_v52, 2  ;;  %v2123_v55 = vrot.slane %v10389_v41, 1  ;;  %v2124_v47 = vrot.slane %v10376_v51, 1  ;;  %v13696_v52 = vrot.slane %v10310_v24, 1 }
 0x425   : > { %v6479_v43 = vpack.i.bf16 %v10454_v40, %v2118_v26  ;;  %v2167_v26 = vrot.slane %v10318_v53, 2 }
 0x426   : > { %5622 = vmatmul.msk.f32.gmra.mxu1 %vm419_vm1, %v2838_v15  ;;  %v10476_v15 = vsel %vm1006_vm6, %v10457_v0, %v13691_v25  ;;  %v2190_v17 = vsel %vm1006_vm6, %v10496_v62, %v13691_v25  ;;  %v6454_v22 = vpack.i.bf16 %v2124_v47, %v2123_v55 }
 0x427   : > { %v2849_v11 = vrot.slane %v10476_v15, 7  ;;  %v10538_v48 = vpack.i.bf16 %v2190_v17, %v10496_v62 }
 0x429   : > { %6435 = vrot.lane.b32.xlu2 %v6434_v45, %s7056_s8  ;;  %v2850_v39 = vsel %vm1676_vm7, %v2848_v61, %v2849_v11  ;;  %v10529_v11 = vpack.i.bf16 %v2180_v12, %v2179_v21 }
 0x42a   : > { %6430 = vrot.lane.b32.xlu1 %v10443_v49, %s7056_s8  ;;  %6425 = vrot.lane.b32.xlu0 %v6424_v19, %s7056_s8 }
 0x42e   : > { %5623 = vmatmul.msk.f32.gmra.mxu1 %vm419_vm1, %v2844_v46  ;;  %v10499_v46 = vrot.slane %v10389_v41, 2  ;;  %v6489_v41 = vpack.i.bf16 %v2123_v55, %v2122_v33  ;;  %v2330_v33 = vrot.slane %v10374_v2, 1 }
 0x430   : > { %v10522_v32 = vsel %vm1006_vm6, %v10499_v46, %v13691_v25 }
 0x431   : > { %6450 = vrot.lane.b32.xlu2 %v6449_v29, %s7056_s8  ;;  %v10503_v29 = vrot.slane %v10376_v51, 2  ;;  %v10545_v21 = vpack.i.bf16 %v10522_v32, %v10499_v46 }
 0x432   : > { %6445 = vrot.lane.b32.xlu1 %v6444_v60, %s7056_s8  ;;  %6440 = vrot.lane.b32.xlu0 %v6439_v63, %s7056_s8  ;;  %v2184_v60 = vsel %vm1006_vm6, %v2183_v59, %v13691_v25  ;;  %v2188_v63 = vsel %vm1006_vm6, %v2187_v9, %v13691_v25 }
 0x433   : > { %v10527_v61 = vsel %vm1006_vm6, %v10503_v29, %v13691_v25  ;;  %v10531_v18 = vpack.i.bf16 %v2184_v60, %v2183_v59  ;;  %v10547_v12 = vpack.i.bf16 %v2188_v63, %v2187_v9  ;;  %v2858_v35 = vrot.slane %v2184_v60, 7 }
 0x434   : > { %v10551_v1 = vpack.i.bf16 %v10527_v61, %v10503_v29  ;;  %v6494_v60 = vpack.i.bf16 %v2330_v33, %v2124_v47  ;;  %v13698_v47 = vrot.slane %v10320_v5, 1 }
 0x436   : > { %5624 = vmatmul.msk.f32.gmra.mxu1 %vm419_vm1, %v2850_v39 }
 0x439   : > { %6460 = vrot.lane.b32.xlu2 %v6424_v19, %s7057_s9  ;;  %v2329_v19 = vrot.slane %v10360_v50, 1  ;;  %v13695_v50 = vrot.slane %v10316_v37, 1 }
 0x43a   : > { %6470 = vrot.lane.b32.xlu1 %v6434_v45, %s7057_s9  ;;  %6455 = vrot.lane.b32.xlu0 %v6454_v22, %s7056_s8  ;;  %v2857_v45 = vrot.slane %v2183_v59, 7  ;;  %v2864_v59 = vrot.slane %v2186_v8, 7  ;;  %v2869_v8 = vrot.slane %v2187_v9, 7 }
 0x43b   : > { %v6474_v39 = vpack.i.bf16 %v2329_v19, %v10464_v7  ;;  %v6504_v10 = vpack.i.bf16 %v13696_v52, %v13695_v50 }
 0x43c   : > { %v2859_v22 = vsel %vm1676_vm7, %v2857_v45, %v2858_v35  ;;  %v13697_v35 = vrot.slane %v10312_v38, 1 }
 0x43e   : > { %5625 = vmatmul.msk.f32.gmra.mxu1 %vm419_vm1, %v13674_v56  ;;  %v6509_v55 = vpack.i.bf16 %v10464_v7, %v13697_v35  ;;  %v2168_v7 = vsel %vm1006_vm6, %v2167_v26, %v13691_v25  ;;  %v2181_v35 = vrot.slane %v10352_v23, 2 }
 0x441   : > { %6475 = vrot.lane.b32.xlu2 %v6474_v39, %s7057_s9  ;;  %v10581_v39 = vpop.permute.xlu2 %6335 }
 0x442   : > { %6485 = vrot.lane.b32.xlu1 %v6484_v16, %s7057_s9  ;;  %6465 = vrot.lane.b32.xlu0 %v10443_v49, %s7057_s9  ;;  %v2863_v49 = vrot.slane %v2185_v4, 7  ;;  %v2870_v4 = vrot.slane %v2188_v63, 7  ;;  %v2875_v63 = vrot.slane %v10496_v62, 7  ;;  %v2882_v62 = vrot.slane %v10522_v32, 7 }
 0x443   : > { %v2887_v32 = vrot.slane %v10503_v29, 7 }
 0x444   : > { %v2865_v52 = vsel %vm1676_vm7, %v2863_v49, %v2864_v59  ;;  %v2871_v45 = vsel %vm1676_vm7, %v2869_v8, %v2870_v4  ;;  %v10603_v49 = vpop.permute.xlu1 %6330 }
 0x445   : > { %13700 = vst [vmem:[#allocation38_spill] sm:$0xff] %v10603_v49 }
 0x446   : > { %5626 = vmatmul.msk.f32.gmra.mxu1 %vm419_vm1, %v2859_v22  ;;  %v6534_v22 = vpack.i.bf16 %v2168_v7, %v2167_v26  ;;  %v10631_v26 = vrot.slane %v10374_v2, 2 }
 0x448   : > { %v2893_v7 = vrot.slane %v10631_v26, 7 }
 0x449   : > { %6490 = vrot.lane.b32.xlu2 %v6489_v41, %s7057_s9 }
 0x44a   : > { %6505 = vrot.lane.b32.xlu1 %v6504_v10, %s7058_s10  ;;  %6480 = vrot.lane.b32.xlu0 %v6479_v43, %s7057_s9  ;;  %v2876_v10 = vrot.slane %v2190_v17, 7  ;;  %v2881_v17 = vrot.slane %v10499_v46, 7 }
 0x44c   : > { %v2877_v43 = vsel %vm1676_vm7, %v2875_v63, %v2876_v10  ;;  %v2883_v33 = vsel %vm1676_vm7, %v2881_v17, %v2882_v62  ;;  %v10624_v46 = vpop.permute.xlu1 %6345 }
 0x44d   : > { %13702 = vst [vmem:[#allocation5_spill] sm:$0xff] %v10624_v46 }
 0x44e   : > { %5627 = vmatmul.msk.f32.gmra.mxu1 %vm419_vm1, %v2865_v52  ;;  %v2182_v52 = vsel %vm1006_vm6, %v2181_v35, %v13691_v25 }
 0x44f   : > { %v6569_v8 = vpack.i.bf16 %v2182_v52, %v2181_v35 }
 0x451   : > { %6510 = vrot.lane.b32.xlu2 %v6509_v55, %s7058_s10  ;;  %v2888_v55 = vrot.slane %v10527_v61, 7 }
 0x452   : > { %6520 = vrot.lane.b32.xlu1 %v6484_v16, %s7058_s10  ;;  %6495 = vrot.lane.b32.xlu0 %v6494_v60, %s7057_s9  ;;  %v13699_v16 = vrot.slane %v10314_v42, 1 }
 0x453   : > { %v2889_v4 = vsel %vm1676_vm7, %v2887_v32, %v2888_v55  ;;  %v13707_v55 = vld [vmem:[#allocation37_spill] sm:$0xff] }
 0x454   : > { %v6499_v50 = vpack.i.bf16 %v13699_v16, %v13698_v47 }
 0x456   : > { %5628 = vmatmul.msk.f32.gmra.mxu1 %vm419_vm1, %v2871_v45 }
 0x459   : > { %6525 = vrot.lane.b32.xlu2 %v6489_v41, %s7058_s10  ;;  %v6514_v41 = vpack.i.bf16 %v10454_v40, %v2329_v19  ;;  %v10622_v19 = vpop.permute.xlu0 %6340 }
 0x45a   : > { %6535 = vrot.lane.b32.xlu1 %v6534_v22, %s7053_s29  ;;  %6500 = vrot.lane.b32.xlu0 %v6499_v50, %s7058_s10  ;;  %13701 = vst [vmem:[#allocation52_spill] sm:$0xff] %v10622_v19 }
 0x45b   : > { %v10595_v9 = vpop.permute.xlu2 %6360 }
 0x45e   : > { %5629 = vmatmul.msk.f32.gmra.mxu1 %vm419_vm1, %v2877_v43 }
 0x461   : > { %6540 = vrot.lane.b32.xlu2 %v10471_v28, %s7053_s29 }
 0x462   : > { %6550 = vrot.lane.b32.xlu1 %v10467_v13, %s7053_s29  ;;  %6515 = vrot.lane.b32.xlu0 %v6514_v41, %s7058_s10 }
 0x463   : > { %v10608_v59 = vpop.permute.xlu2 %6375 }
 0x466   : > { %5630 = vmatmul.msk.f32.gmra.mxu1 %vm419_vm1, %v2883_v33 }
 0x469   : > { %6555 = vrot.lane.b32.xlu2 %v10478_v34, %s7053_s29 }
 0x46a   : > { %6565 = vrot.lane.b32.xlu1 %v10529_v11, %s7053_s29  ;;  %6530 = vrot.lane.b32.xlu0 %v6494_v60, %s7058_s10  ;;  %v2382_v60 = vsel %vm1006_vm6, %v10631_v26, %v13691_v25 }
 0x46b   : > { %v10620_v40 = vpop.permute.xlu2 %6390  ;;  %v2894_v45 = vrot.slane %v2382_v60, 7 }
 0x46d   : > { %v2895_v47 = vsel %vm1676_vm7, %v2893_v7, %v2894_v45  ;;  %v13711_v45 = vpack.i.bf16 %v10476_v15, %v10457_v0 }
 0x46e   : > { %5631 = vmatmul.msk.f32.gmra.mxu1 %vm419_vm1, %v2889_v4 }
 0x471   : > { %6570 = vrot.lane.b32.xlu2 %v6569_v8, %s7053_s29 }
 0x472   : > { %6580 = vrot.lane.b32.xlu1 %v10540_v6, %s7053_s29  ;;  %6545 = vrot.lane.b32.xlu0 %v10491_v3, %s7053_s29 }
 0x473   : > { %v10643_v29 = vpop.permute.xlu2 %6405 }
 0x474   : > { %13703 = vst [vmem:[#allocation20_spill] sm:$0xff] %v10643_v29  ;;  %v10645_v2 = vpop.permute.xlu1 %6355  ;;  %v10647_v61 = vpop.permute.xlu0 %6350 }
 0x475   : > { %v6352_v33 = vunpack.i.l.bf16 %v10647_v61 }
 0x476   : > { %5632 = vmatmul.msk.f32.gmra.mxu1 %vm419_vm1, %v2895_v47 }
 0x477   : > { %v2619_v52 = vsel %vm1480_vm12, %v13707_v55, %v6352_v33 }
 0x479   : > { %6585 = vrot.lane.b32.xlu2 %v10547_v12, %s7053_s29 }
 0x47a   : > { %6595 = vrot.lane.b32.xlu1 %v10545_v21, %s7053_s29  ;;  %6560 = vrot.lane.b32.xlu0 %v10512_v20, %s7053_s29 }
 0x47b   : > { %v10658_v16 = vpop.permute.xlu2 %6420 }
 0x47c   : > { %13704 = vst [vmem:[#allocation4_spill] sm:$0xff] %v10658_v16  ;;  %v10660_v50 = vpop.permute.xlu1 %6370  ;;  %v10662_v63 = vpop.permute.xlu0 %6365 }
 0x47e   : > { %5633 = vmatmul.msk.f32.gmra.mxu1 %vm419_vm1, %v13674_v56 }
 0x481   : > { %6600 = vrot.lane.b32.xlu2 %v10551_v1, %s7053_s29 }
 0x482   : > { %6605 = vrot.lane.b32.xlu1 %v6534_v22, %s7059_s11  ;;  %6575 = vrot.lane.b32.xlu0 %v10531_v18, %s7053_s29 }
 0x483   : > { %v10671_v10 = vpop.permute.xlu2 %6435 }
 0x484   : > { %v10673_v43 = vpop.permute.xlu1 %6385  ;;  %v10675_v41 = vpop.permute.xlu0 %6380 }
 0x489   : > { %6610 = vrot.lane.b32.xlu2 %v10471_v28, %s7059_s11  ;;  %v13705_v28 = vpack.i.bf16 %v13683_v31, %v13682_v36  ;;  %v13710_v36 = vld [vmem:[#allocation74_spill] sm:$0xff] }
 0x48a   : > { %6620 = vrot.lane.b32.xlu1 %v10467_v13, %s7059_s11  ;;  %6590 = vrot.lane.b32.xlu0 %v10538_v48, %s7053_s29 }
 0x48b   : > { %v10683_v17 = vpop.permute.xlu2 %6450 }
 0x48c   : > { %v10685_v22 = vpop.permute.xlu1 %6400  ;;  %v10687_v62 = vpop.permute.xlu0 %6395 }
 0x491   : > { %6625 = vrot.lane.b32.xlu2 %v10478_v34, %s7059_s11 }
 0x492   : > { %6640 = vrot.lane.b32.xlu1 %v13705_v28, %s7059_s11  ;;  %6615 = vrot.lane.b32.xlu0 %v10491_v3, %s7059_s11 }
 0x493   : > { %v10698_v13 = vpop.permute.xlu2 %6460 }
 0x494   : > { %v10700_v35 = vpop.permute.xlu1 %6415  ;;  %v13136_v32 = vunpack.i.l.bf16 %v10698_v13  ;;  %v10705_v4 = vpop.permute.xlu0 %6410 }
 0x495   : > { %13706 = vst [vmem:[#allocation55_spill] sm:$0xff] %v10700_v35 }
 0x496   : > { %13708 = vst [vmem:[#allocation47_spill] sm:$0xff] %v10705_v4  ;;  %v10710_v34 = vsel %vm1512_vm13, %v2619_v52, %v13136_v32  ;;  %v6372_v52 = vunpack.i.l.bf16 %v10660_v50  ;;  %v13716_v4 = vld [vmem:[#allocation53_spill] sm:$0xff] }
 0x497   : > { %13709 = vst [vmem:[#allocation31_spill] sm:$0xff] %v10710_v34 }
 0x499   : > { %6630 = vrot.lane.b32.xlu2 %v13710_v36, %s7059_s11 }
 0x49a   : > { %6650 = vrot.lane.b32.xlu1 %v10529_v11, %s7059_s11  ;;  %6635 = vrot.lane.b32.xlu0 %v13710_v36, %s7053_s29  ;;  %v6357_v36 = vunpack.i.l.bf16 %v10645_v2 }
 0x49b   : > { %v10718_v31 = vpop.permute.xlu2 %6475 }
 0x49c   : > { %v10720_v3 = vpop.permute.xlu1 %6430  ;;  %v10722_v7 = vpop.permute.xlu0 %6425 }
 0x49d   : > { %v6428_v28 = vunpack.i.h.bf16 %v10722_v7 }
 0x4a1   : > { %6655 = vrot.lane.b32.xlu2 %v13711_v45, %s7059_s11  ;;  %v2565_v45 = vsel %vm419_vm1, 0.0, %v6428_v28 }
 0x4a2   : > { %6665 = vrot.lane.b32.xlu1 %v10531_v18, %s7059_s11  ;;  %6645 = vrot.lane.b32.xlu0 %v10512_v20, %s7059_s11  ;;  %v6694_v20 = vpack.i.bf16 %v2382_v60, %v10631_v26 }
 0x4a3   : > { %v10732_v11 = vpop.permute.xlu2 %6490 }
 0x4a4   : > { %v10734_v47 = vpop.permute.xlu1 %6445  ;;  %v10736_v33 = vpop.permute.xlu0 %6440 }
 0x4a9   : > { %6670 = vrot.lane.b32.xlu2 %v10540_v6, %s7059_s11 }
 0x4aa   : > { %6680 = vrot.lane.b32.xlu1 %v10538_v48, %s7059_s11  ;;  %6660 = vrot.lane.b32.xlu0 %v6569_v8, %s7059_s11 }
 0x4ab   : > { %v10743_v0 = vpop.permute.xlu2 %6510 }
 0x4ac   : > { %v10745_v15 = vpop.permute.xlu1 %6470  ;;  %v10747_v18 = vpop.permute.xlu0 %6455 }
 0x4b1   : > { %6685 = vrot.lane.b32.xlu2 %v10545_v21, %s7059_s11 }
 0x4b2   : > { %6695 = vrot.lane.b32.xlu1 %v6694_v20, %s7059_s11  ;;  %6675 = vrot.lane.b32.xlu0 %v10547_v12, %s7059_s11  ;;  %v2566_v20 = vsel %vm419_vm1, %v10320_v5, %v6428_v28  ;;  %v894_v5 = vld [vmem:[%s10301_s14 + $0x78] sm:$0xff]  ;;  %v893_v28 = vld [vmem:[%s10301_s14 + $0x70] sm:$0xff] }
 0x4b3   : > { %v10755_v6 = vpop.permute.xlu2 %6525  ;;  %2943 = vmatpush.msrb.mxu0 %v894_v5 }
 0x4b4   : > { %13712 = vst [vmem:[#allocation46_spill] sm:$0xff] %v10755_v6  ;;  %v10757_v48 = vpop.permute.xlu1 %6485  ;;  %v10759_v8 = vpop.permute.xlu0 %6465  ;;  %v2634_v6 = vsel %vm1480_vm12, %v13707_v55, %v6372_v52  ;;  %v6363_v55 = vunpack.i.h.bf16 %v10595_v9 }
 0x4b5   : > { %2944 = vmatpush.msrb.mxu0 %v893_v28 }
 0x4ba   : > { %6690 = vrot.lane.b32.xlu0 %v10551_v1, %s7059_s11 }
 0x4bb   : > { %v6541_v21 = vpop.permute.xlu2 %6540 }
 0x4bc   : > { %v10765_v26 = vpop.permute.xlu1 %6505  ;;  %v6543_v60 = vunpack.i.h.bf16 %v6541_v21  ;;  %v6542_v12 = vunpack.i.l.bf16 %v6541_v21  ;;  %v10771_v32 = vpop.permute.xlu0 %6480 }
 0x4bd   : > { %v13142_v25 = vunpack.i.l.bf16 %v10771_v32 }
 0x4be   : > { %v10774_v56 = vsel %vm1449_vm11, %v2565_v45, %v6542_v12  ;;  %v2594_v1 = vsel %vm1449_vm11, %v2566_v20, %v6543_v60  ;;  %v6437_v12 = vunpack.i.l.bf16 %v10671_v10  ;;  %v892_v60 = vld [vmem:[%s10301_s14 + $0x68] sm:$0xff]  ;;  %v6332_v20 = vunpack.i.l.bf16 %v10603_v49 }
 0x4bf   : > { %v10781_v21 = vsel %vm1480_vm12, %v2594_v1, %v6357_v36  ;;  %v10786_v16 = vsel %vm1512_vm13, %v2634_v6, %v13142_v25  ;;  %2945 = vmatpush.msrb.mxu0 %v892_v60  ;;  %v890_v60 = vld [vmem:[%s10301_s14 + $0x58] sm:$0xff]  ;;  %v888_v49 = vld [vmem:[%s10301_s14 + $0x48] sm:$0xff] }
 0x4c0   : > { %13713 = vst [vmem:[#allocation90_spill] sm:$0xff] %v10786_v16  ;;  %v2571_v6 = vsel %vm419_vm1, 0.0, %v6437_v12  ;;  %v2572_v25 = vsel %vm419_vm1, %v10310_v24, %v6437_v12  ;;  %v891_v16 = vld [vmem:[%s10301_s14 + $0x60] sm:$0xff]  ;;  %v3715_v29 = vsel %vm419_vm1, %v13716_v4, %v6332_v20  ;;  %v6338_v24 = vunpack.i.h.bf16 %v10581_v39 }
 0x4c1   : > { %2946 = vmatpush.msrb.mxu0 %v891_v16  ;;  %v6337_v12 = vunpack.i.l.bf16 %v10581_v39  ;;  %v6353_v4 = vunpack.i.h.bf16 %v10647_v61  ;;  %v6373_v39 = vunpack.i.h.bf16 %v10660_v50 }
 0x4c2   : > { %v3743_v16 = vsel %vm1449_vm11, %v3715_v29, %v6338_v24 }
 0x4c3   : > { %v6556_v45 = vpop.permute.xlu2 %6555  ;;  %2947 = vmatpush.msrb.mxu0 %v890_v60 }
 0x4c4   : > { %v10793_v52 = vpop.permute.xlu1 %6520  ;;  %v6558_v36 = vunpack.i.h.bf16 %v6556_v45  ;;  %v6557_v1 = vunpack.i.l.bf16 %v6556_v45  ;;  %v10799_v35 = vpop.permute.xlu0 %6495 }
 0x4c5   : > { %13714 = vst [vmem:[#allocation79_spill] sm:$0xff] %v10793_v52  ;;  %v3714_v52 = vsel %vm419_vm1, 0.0, %v6332_v20 }
 0x4c6   : > { %13715 = vst [vmem:[#allocation39_spill] sm:$0xff] %v10799_v35  ;;  %v2600_v5 = vsel %vm1449_vm11, %v2572_v25, %v6558_v36  ;;  %v10803_v28 = vsel %vm1449_vm11, %v2571_v6, %v6557_v1  ;;  %v6443_v25 = vunpack.i.h.bf16 %v10736_v33  ;;  %v889_v36 = vld [vmem:[%s10301_s14 + $0x50] sm:$0xff]  ;;  %v6427_v1 = vunpack.i.l.bf16 %v10722_v7 }
 0x4c7   : > { %v10807_v45 = vsel %vm1480_vm12, %v2600_v5, %v6363_v55  ;;  %v3742_v55 = vsel %vm1449_vm11, %v3714_v52, %v6337_v12  ;;  %v6347_v6 = vunpack.i.l.bf16 %v10624_v46  ;;  %2948 = vmatpush.msrb.mxu0 %v889_v36 }
 0x4c8   : > { %v2577_v7 = vsel %vm419_vm1, 0.0, %v6443_v25  ;;  %v2578_v52 = vsel %vm419_vm1, %v10352_v23, %v6443_v25  ;;  %v2563_v60 = vsel %vm419_vm1, 0.0, %v6427_v1  ;;  %v2564_v61 = vsel %vm419_vm1, %v10318_v53, %v6427_v1 }
 0x4c9   : > { %2949 = vmatpush.msrb.mxu0 %v888_v49  ;;  %v6463_v23 = vunpack.i.h.bf16 %v10698_v13  ;;  %v6342_v53 = vunpack.i.l.bf16 %v10622_v19  ;;  %v6452_v49 = vunpack.i.l.bf16 %v10683_v17 }
 0x4cb   : > { %v6571_v5 = vpop.permute.xlu2 %6570 }
 0x4cc   : > { %v6536_v20 = vpop.permute.xlu1 %6535  ;;  %v6573_v35 = vunpack.i.h.bf16 %v6571_v5  ;;  %v6572_v34 = vunpack.i.l.bf16 %v6571_v5  ;;  %v10827_v24 = vpop.permute.xlu0 %6500  ;;  %v887_v5 = vld [vmem:[%s10301_s14 + $0x40] sm:$0xff] }
 0x4cd   : > { %v6538_v12 = vunpack.i.h.bf16 %v6536_v20  ;;  %v6537_v29 = vunpack.i.l.bf16 %v6536_v20  ;;  %2950 = vmatpush.msrb.mxu0 %v887_v5 }
 0x4ce   : > { %v10833_v50 = vsel %vm1449_vm11, %v2577_v7, %v6572_v34  ;;  %v2606_v36 = vsel %vm1449_vm11, %v2578_v52, %v6573_v35  ;;  %v886_v52 = vld [vmem:[%s10301_s14 + $0x38] sm:$0xff] }
 0x4cf   : > { %v2591_v25 = vsel %vm1449_vm11, %v2563_v60, %v6537_v29  ;;  %v2592_v20 = vsel %vm1449_vm11, %v2564_v61, %v6538_v12  ;;  %v10841_v46 = vsel %vm1480_vm12, %v2606_v36, %v6373_v39  ;;  %v885_v39 = vld [vmem:[%s10301_s14 + $0x30] sm:$0xff]  ;;  %v3772_v12 = vsel %vm1480_vm12, %v3742_v55, %v8647_v58  ;;  %2951 = vmatpush.msrb.mxu0 %v886_v52 }
 0x4d0   : > { %v2620_v34 = vsel %vm1480_vm12, %v2591_v25, %v8647_v58  ;;  %v2621_v1 = vsel %vm1480_vm12, %v2592_v20, %v6353_v4  ;;  %v3773_v29 = vsel %vm1480_vm12, %v3743_v16, %v6342_v53  ;;  %v6433_v60 = vunpack.i.h.bf16 %v10720_v3  ;;  %v884_v25 = vld [vmem:[%s10301_s14 + $0x28] sm:$0xff] }
 0x4d1   : > { %v10849_v35 = vsel %vm1512_vm13, %v2620_v34, %v6463_v23  ;;  %v10852_v7 = vsel %vm1512_vm13, %v2621_v1, %v6463_v23  ;;  %v10863_v36 = vsel %vm1512_vm13, %v3772_v12, %v6347_v6  ;;  %v10866_v5 = vsel %vm1512_vm13, %v3773_v29, %v6347_v6  ;;  %2952 = vmatpush.msrb.mxu0 %v885_v39  ;;  %v883_v39 = vld [vmem:[%s10301_s14 + $0x20] sm:$0xff] }
 0x4d2   : > { %v6362_v20 = vunpack.i.l.bf16 %v10595_v9  ;;  %v6382_v55 = vunpack.i.l.bf16 %v10675_v41  ;;  %v2583_v1 = vsel %vm419_vm1, 0.0, %v6452_v49  ;;  %v2584_v52 = vsel %vm419_vm1, %v10349_v44, %v6452_v49 }
 0x4d3   : > { %v6586_v23 = vpop.permute.xlu2 %6585  ;;  %v2569_v29 = vsel %vm419_vm1, 0.0, %v6433_v60  ;;  %v2570_v9 = vsel %vm419_vm1, %v10316_v37, %v6433_v60  ;;  %2953 = vmatpush.msrb.mxu0 %v884_v25  ;;  %v6472_v44 = vunpack.i.l.bf16 %v10745_v15  ;;  %v6442_v37 = vunpack.i.l.bf16 %v10736_v33  ;;  %v882_v33 = vld [vmem:[%s10301_s14 + $0x18] sm:$0xff] }
 0x4d4   : > { %v6551_v16 = vpop.permute.xlu1 %6550  ;;  %v6588_v53 = vunpack.i.h.bf16 %v6586_v23  ;;  %v6587_v34 = vunpack.i.l.bf16 %v6586_v23  ;;  %v10874_v6 = vpop.permute.xlu0 %6515  ;;  %v6458_v60 = vunpack.i.h.bf16 %v10747_v18 }
 0x4d5   : > { %v6553_v12 = vunpack.i.h.bf16 %v6551_v16  ;;  %v6552_v61 = vunpack.i.l.bf16 %v6551_v16  ;;  %13717 = vst [vmem:[#allocation34_spill] sm:$0xff] %v10874_v6  ;;  %2954 = vmatpush.msrb.mxu0 %v883_v39  ;;  %v6438_v39 = vunpack.i.h.bf16 %v10671_v10  ;;  %v2622_v10 = vsel %vm1480_vm12, %v10774_v56, %v8647_v58 }
 0x4d6   : > { %v2612_v4 = vsel %vm1449_vm11, %v2584_v52, %v6588_v53  ;;  %v10881_v19 = vsel %vm1449_vm11, %v2583_v1, %v6587_v34  ;;  %v2589_v1 = vsel %vm419_vm1, 0.0, %v6458_v60 }
 0x4d7   : > { %v2598_v49 = vsel %vm1449_vm11, %v2570_v9, %v6553_v12  ;;  %v2597_v23 = vsel %vm1449_vm11, %v2569_v29, %v6552_v61  ;;  %v10888_v16 = vsel %vm1480_vm12, %v2612_v4, %v6382_v55  ;;  %v881_v55 = vld [vmem:[%s10301_s14 + $0x10] sm:$0xff]  ;;  %v6368_v29 = vunpack.i.h.bf16 %v10662_v63  ;;  %2955 = vmatpush.msrb.mxu0 %v882_v33 }
 0x4d8   : > { %13718 = vst [vmem:[#allocation89_spill] sm:$0xff] %v10888_v16  ;;  %v2627_v53 = vsel %vm1480_vm12, %v2598_v49, %v6362_v20  ;;  %v2626_v25 = vsel %vm1480_vm12, %v2597_v23, %v8647_v58  ;;  %v6388_v9 = vunpack.i.h.bf16 %v10673_v43  ;;  %v6432_v49 = vunpack.i.l.bf16 %v10720_v3 }
 0x4d9   : > { %v10898_v61 = vsel %vm1512_vm13, %v2626_v25, %v6472_v44  ;;  %v10901_v4 = vsel %vm1512_vm13, %v2627_v53, %v6472_v44  ;;  %v6478_v44 = vunpack.i.h.bf16 %v10718_v31  ;;  %v880_v53 = vld [vmem:[%s10301_s14 + $0x8] sm:$0xff]  ;;  %v2575_v25 = vsel %vm419_vm1, 0.0, %v6442_v37  ;;  %2956 = vmatpush.msrb.mxu0 %v881_v55 }
 0x4da   : > { %13719 = vst [vmem:[#allocation88_spill] sm:$0xff] %v10898_v61  ;;  %v2590_v33 = vsel %vm419_vm1, %v10376_v51, %v6458_v60  ;;  %v879_v61 = vld [vmem:[%s10301_s14] sm:$0xff]  ;;  %v6467_v16 = vunpack.i.l.bf16 %v10759_v8  ;;  %v6448_v51 = vunpack.i.h.bf16 %v10734_v47 }
 0x4db   : > { %13720 = vst [vmem:[#allocation41_spill] sm:$0xff] %v10901_v4  ;;  %v6601_v23 = vpop.permute.xlu2 %6600  ;;  %v2576_v4 = vsel %vm419_vm1, %v10356_v30, %v6442_v37  ;;  %2957 = vmatpush.msrb.mxu0 %v880_v53  ;;  %v2567_v53 = vsel %vm419_vm1, 0.0, %v6432_v49 }
 0x4dc   : > { %v6566_v20 = vpop.permute.xlu1 %6565  ;;  %v6603_v52 = vunpack.i.h.bf16 %v6601_v23  ;;  %v6602_v12 = vunpack.i.l.bf16 %v6601_v23  ;;  %v10921_v6 = vpop.permute.xlu0 %6530 }
 0x4dd   : > { %v6568_v3 = vunpack.i.h.bf16 %v6566_v20  ;;  %v6567_v34 = vunpack.i.l.bf16 %v6566_v20  ;;  %2958 = vmatpush.msrb.mxu0 %v879_v61  ;;  %v10960_v61 = vsel %vm419_vm1, %v10312_v38, %v6438_v39  ;;  %v2628_v38 = vsel %vm1480_vm12, %v10803_v28, %v8647_v58 }
 0x4de   : > { %v10928_v23 = vsel %vm1449_vm11, %v2589_v1, %v6602_v12  ;;  %v2618_v55 = vsel %vm1449_vm11, %v2590_v33, %v6603_v52  ;;  %v10941_v1 = vsel %vm1512_vm13, %v2622_v10, %v6467_v16  ;;  %v10945_v52 = vsel %vm1512_vm13, %v10781_v21, %v6467_v16 }
 0x4df   : > { %v2603_v56 = vsel %vm1449_vm11, %v2575_v25, %v6567_v34  ;;  %v2604_v60 = vsel %vm1449_vm11, %v2576_v4, %v6568_v3  ;;  %v10935_v20 = vsel %vm1480_vm12, %v2618_v55, %v6388_v9  ;;  %v6367_v34 = vunpack.i.l.bf16 %v10662_v63 }
 0x4e0   : > { %v2632_v30 = vsel %vm1480_vm12, %v2603_v56, %v8647_v58  ;;  %v2633_v37 = vsel %vm1480_vm12, %v2604_v60, %v6368_v29  ;;  %v6387_v4 = vunpack.i.l.bf16 %v10673_v43  ;;  %v10956_v29 = vsel %vm419_vm1, 0.0, %v6438_v39 }
 0x4e1   : > { %v10950_v12 = vsel %vm1512_vm13, %v2632_v30, %v6478_v44  ;;  %v10953_v9 = vsel %vm1512_vm13, %v2633_v37, %v6478_v44  ;;  %v6453_v16 = vunpack.i.h.bf16 %v10683_v17  ;;  %v2568_v25 = vsel %vm419_vm1, %v10314_v42, %v6432_v49 }
 0x4e2   : > { %v2581_v33 = vsel %vm419_vm1, 0.0, %v6448_v51  ;;  %v2582_v44 = vsel %vm419_vm1, %v10347_v14, %v6448_v51  ;;  %v6473_v3 = vunpack.i.h.bf16 %v10745_v15  ;;  %v6457_v56 = vunpack.i.l.bf16 %v10747_v18 }
 0x4e3   : > { %v6611_v10 = vpop.permute.xlu2 %6610  ;;  %v6468_v60 = vunpack.i.h.bf16 %v10759_v8 }
 0x4e4   : > { %v6581_v39 = vpop.permute.xlu1 %6580  ;;  %v6613_v55 = vunpack.i.h.bf16 %v6611_v10  ;;  %v6612_v17 = vunpack.i.l.bf16 %v6611_v10  ;;  %v6546_v30 = vpop.permute.xlu0 %6545  ;;  %v10985_v18 = vsel %vm1512_vm13, %v2628_v38, %v6473_v3  ;;  %v10989_v8 = vsel %vm1512_vm13, %v10807_v45, %v6473_v3 }
 0x4e5   : > { %v6583_v42 = vunpack.i.h.bf16 %v6581_v39  ;;  %v6582_v49 = vunpack.i.l.bf16 %v6581_v39  ;;  %v6548_v51 = vunpack.i.h.bf16 %v6546_v30  ;;  %v6547_v37 = vunpack.i.l.bf16 %v6546_v30 }
 0x4e6   : > { %v2683_v14 = vsel %vm1545_vm14, %v10849_v35, %v6612_v17  ;;  %v2684_v15 = vsel %vm1545_vm14, %v10852_v7, %v6613_v55  ;;  %v6503_v10 = vunpack.i.h.bf16 %v10827_v24  ;;  %v13721_v35 = vunpack.i.h.bf16 %v10608_v59 }
 0x4e7   : > { %v2610_v28 = vsel %vm1449_vm11, %v2582_v44, %v6583_v42  ;;  %v10982_v21 = vsel %vm1449_vm11, %v2581_v33, %v6582_v49  ;;  %v2596_v39 = vsel %vm1449_vm11, %v2568_v25, %v6548_v51  ;;  %v2595_v44 = vsel %vm1449_vm11, %v2567_v53, %v6547_v37 }
 0x4e8   : > { %v10995_v7 = vsel %vm1480_vm12, %v2610_v28, %v13721_v35  ;;  %v13722_v33 = vunpack.i.h.bf16 %v10645_v2  ;;  %v2624_v55 = vsel %vm1480_vm12, %v2595_v44, %v8647_v58  ;;  %v2715_v45 = vsel %vm1578_vm15, %v2683_v14, %v8664_v54 }
 0x4e9   : > { %v13723_v3 = vunpack.i.h.bf16 %v10620_v40  ;;  %v11010_v42 = vsel %vm1512_vm13, %v2624_v55, %v6468_v60  ;;  %v2747_v2 = vsel %vm1611_vm0, %v2715_v45, %v6503_v10  ;;  %v11019_v30 = vsel %vm419_vm1, 0.0, %v6453_v16 }
 0x4ea   : > { %v2625_v38 = vsel %vm1480_vm12, %v2596_v39, %v13722_v33  ;;  %v2815_v51 = vrot.slane %v2747_v2, 7  ;;  %v6447_v35 = vunpack.i.l.bf16 %v10734_v47  ;;  %v6483_v44 = vunpack.i.h.bf16 %v10771_v32 }
 0x4eb   : > { %v2716_v17 = vsel %vm1578_vm15, %v2684_v15, %v13723_v3  ;;  %v11013_v25 = vsel %vm1512_vm13, %v2625_v38, %v6468_v60  ;;  %v11021_v14 = vpop.permute.xlu2 %6625  ;;  %v13724_v15 = vld [vmem:[#allocation45_spill] sm:$0xff]  ;;  %v6398_v60 = vunpack.i.h.bf16 %v10687_v62  ;;  %v13725_v3 = vld [vmem:[#allocation59_spill] sm:$0xff] }
 0x4ec   : > { %v2748_v53 = vsel %vm1611_vm0, %v2716_v17, %v6503_v10  ;;  %v11025_v28 = vsel %vm419_vm1, %v13724_v15, %v6453_v16  ;;  %v2635_v10 = vsel %vm1480_vm12, %v10833_v50, %v8647_v58  ;;  %v6596_v39 = vpop.permute.xlu1 %6595  ;;  %v6561_v55 = vpop.permute.xlu0 %6560  ;;  %v2587_v16 = vsel %vm419_vm1, 0.0, %v6457_v56 }
 0x4ed   : > { %v2816_v37 = vrot.slane %v2748_v53, 7  ;;  %v6598_v33 = vunpack.i.h.bf16 %v6596_v39  ;;  %v6597_v38 = vunpack.i.l.bf16 %v6596_v39  ;;  %v2588_v17 = vsel %vm419_vm1, %v13725_v3, %v6457_v56 }
 0x4ee   : > { %v6563_v2 = vunpack.i.h.bf16 %v6561_v55  ;;  %v6562_v47 = vunpack.i.l.bf16 %v6561_v55  ;;  %v11044_v15 = vsel %vm1512_vm13, %v2635_v10, %v6483_v44  ;;  %v11048_v39 = vsel %vm1512_vm13, %v10841_v46, %v6483_v44  ;;  %v13728_v44 = vld [vmem:[#allocation102_spill] sm:$0xff]  ;;  %v13729_v46 = vld [vmem:[#allocation31_spill] sm:$0xff] }
 0x4ef   : > { %v11034_v45 = vsel %vm1676_vm7, %v2815_v51, %v2816_v37  ;;  %v11040_v53 = vsel %vm1449_vm11, %v2587_v16, %v6597_v38  ;;  %v2616_v50 = vsel %vm1449_vm11, %v2588_v17, %v6598_v33  ;;  %v6477_v51 = vunpack.i.l.bf16 %v10718_v31  ;;  %v13727_v38 = vld [vmem:[#allocation15_spill] sm:$0xff] }
 0x4f0   : > { %v11054_v56 = vsel %vm1480_vm12, %v2616_v50, %v6387_v4  ;;  %v2602_v37 = vsel %vm1449_vm11, %v10960_v61, %v6563_v2  ;;  %v2601_v33 = vsel %vm1449_vm11, %v10956_v29, %v6562_v47  ;;  %v13726_v10 = vunpack.i.l.bf16 %v10698_v13 }
 0x4f1   : > { %v2631_v43 = vsel %vm1480_vm12, %v2602_v37, %v6367_v34  ;;  %v2630_v31 = vsel %vm1480_vm12, %v2601_v33, %v8647_v58  ;;  %v2579_v4 = vsel %vm419_vm1, 0.0, %v6447_v35  ;;  %v6492_v61 = vunpack.i.l.bf16 %v10732_v11 }
 0x4f2   : > { %v2649_v55 = vsel %vm1512_vm13, %v13727_v38, %v13726_v10  ;;  %v11073_v29 = vsel %vm1512_vm13, %v2630_v31, %v6477_v51  ;;  %v11076_v13 = vsel %vm1512_vm13, %v2631_v43, %v6477_v51  ;;  %v2580_v16 = vsel %vm419_vm1, %v13728_v44, %v6447_v35 }
 0x4f3   : > { %v6487_v34 = vunpack.i.l.bf16 %v10757_v48  ;;  %v6631_v17 = vpop.permute.xlu2 %6630  ;;  %v6502_v2 = vunpack.i.l.bf16 %v10827_v24  ;;  %v2641_v47 = vsel %vm1480_vm12, %v10881_v19, %v8647_v58  ;;  %v6628_v33 = vunpack.i.h.bf16 %v11021_v14 }
 0x4f4   : > { %v6606_v50 = vpop.permute.xlu1 %6605  ;;  %v6633_v37 = vunpack.i.h.bf16 %v6631_v17  ;;  %v6632_v51 = vunpack.i.l.bf16 %v6631_v17  ;;  %v6627_v35 = vunpack.i.l.bf16 %v11021_v14  ;;  %v6576_v31 = vpop.permute.xlu0 %6575  ;;  %v13730_v3 = vunpack.i.h.bf16 %v10072_v57 }
 0x4f5   : > { %v6608_v10 = vunpack.i.h.bf16 %v6606_v50  ;;  %v6607_v43 = vunpack.i.l.bf16 %v6606_v50  ;;  %v6578_v63 = vunpack.i.h.bf16 %v6576_v31  ;;  %v6577_v49 = vunpack.i.l.bf16 %v6576_v31 }
 0x4f6   : > { %v3837_v44 = vsel %vm1545_vm14, %v10866_v5, %v6633_v37  ;;  %v3836_v24 = vsel %vm1545_vm14, %v10863_v36, %v6632_v51  ;;  %v13731_v37 = vunpack.i.l.bf16 %v10620_v40  ;;  %v13733_v40 = vunpack.i.h.bf16 %v10081_v27 }
 0x4f7   : > { %v2681_v19 = vsel %vm1545_vm14, %v2649_v55, %v6607_v43  ;;  %v2682_v17 = vsel %vm1545_vm14, %v13729_v46, %v6608_v10  ;;  %v3869_v14 = vsel %vm1578_vm15, %v3837_v44, %v13730_v3  ;;  %v3868_v50 = vsel %vm1578_vm15, %v3836_v24, %v8664_v54 }
 0x4f8   : > { %v2713_v5 = vsel %vm1578_vm15, %v2681_v19, %v8664_v54  ;;  %v2714_v36 = vsel %vm1578_vm15, %v2682_v17, %v13731_v37  ;;  %v2608_v51 = vsel %vm1449_vm11, %v2580_v16, %v6578_v63  ;;  %v2607_v55 = vsel %vm1449_vm11, %v2579_v4, %v6577_v49  ;;  %v13735_v17 = vld [vmem:[#allocation39_spill] sm:$0xff] }
 0x4f9   : > { %v13732_v46 = vunpack.i.l.bf16 %v10608_v59  ;;  %v2637_v3 = vsel %vm1480_vm12, %v2607_v55, %v8647_v58  ;;  %v2745_v10 = vsel %vm1611_vm0, %v2713_v5, %v6502_v2  ;;  %v2746_v43 = vsel %vm1611_vm0, %v2714_v36, %v6502_v2 }
 0x4fa   : > { %v2809_v31 = vrot.slane %v2745_v10, 7  ;;  %v2810_v44 = vrot.slane %v2746_v43, 7  ;;  %v3900_v24 = vsel %vm1611_vm0, %v3868_v50, %v13733_v40  ;;  %v13734_v16 = vmov %v13733_v40 }
 0x4fb   : > { %v2638_v57 = vsel %vm1480_vm12, %v2608_v51, %v13732_v46  ;;  %v3901_v49 = vsel %vm1611_vm0, %v3869_v14, %v13734_v16  ;;  %v4017_v59 = vrot.slane %v3900_v24, 7  ;;  %v11122_v63 = vsel %vm1512_vm13, %v2637_v3, %v6487_v34 }
 0x4fc   : > { %v4018_v4 = vrot.slane %v3901_v49, 7  ;;  %v11125_v19 = vsel %vm1512_vm13, %v2638_v57, %v6487_v34  ;;  %v6498_v2 = vunpack.i.h.bf16 %v13735_v17  ;;  %v2647_v5 = vsel %vm1480_vm12, %v10928_v23, %v8647_v58  ;;  %v6621_v37 = vpop.permute.xlu1 %6620  ;;  %v6591_v51 = vpop.permute.xlu0 %6590  ;;  %v13736_v34 = vld [vmem:[#allocation89_spill] sm:$0xff]  ;;  %v13738_v23 = vld [vmem:[#allocation88_spill] sm:$0xff] }
 0x4fd   : > { %v2811_v50 = vsel %vm1676_vm7, %v2809_v31, %v2810_v44  ;;  %v11133_v27 = vsel %vm1512_vm13, %v2641_v47, %v6492_v61  ;;  %v6623_v14 = vunpack.i.h.bf16 %v6621_v37  ;;  %v6622_v36 = vunpack.i.l.bf16 %v6621_v37  ;;  %v13737_v57 = vld [vmem:[#allocation41_spill] sm:$0xff] }
 0x4fe   : > { %2959 = vmatmul.f32.vlgmr.msrb.gmra.mxu0 %v2811_v50  ;;  %v4019_v55 = vsel %vm1676_vm7, %v4017_v59, %v4018_v4  ;;  %v11138_v46 = vsel %vm1512_vm13, %v13736_v34, %v6492_v61  ;;  %v2690_v3 = vsel %vm1545_vm14, %v13737_v57, %v6628_v33  ;;  %v2689_v10 = vsel %vm1545_vm14, %v13738_v23, %v6627_v35 }
 0x4ff   : > { %v6593_v43 = vunpack.i.h.bf16 %v6591_v51  ;;  %v6592_v31 = vunpack.i.l.bf16 %v6591_v51  ;;  %4128 = vmatmul.f32.gmra.mxu3 %v4019_v55  ;;  %v2687_v47 = vsel %vm1545_vm14, %v11010_v42, %v6622_v36  ;;  %v2688_v44 = vsel %vm1545_vm14, %v11013_v25, %v6623_v14 }
 0x500   : > { %v11149_v40 = vsel %vm1512_vm13, %v2647_v5, %v6498_v2  ;;  %v11153_v61 = vsel %vm1512_vm13, %v10935_v20, %v6498_v2  ;;  %v2719_v24 = vsel %vm1578_vm15, %v2687_v47, %v8664_v54  ;;  %v2720_v42 = vsel %vm1578_vm15, %v2688_v44, %v6398_v60  ;;  %v13747_v47 = vld [vmem:[#allocation38_spill] sm:$0xff] }
 0x501   : > { %v2614_v33 = vsel %vm1449_vm11, %v11025_v28, %v6593_v43  ;;  %v2613_v35 = vsel %vm1449_vm11, %v11019_v30, %v6592_v31  ;;  %v13739_v25 = vunpack.i.h.bf16 %v10675_v41  ;;  %v13740_v49 = vunpack.i.h.bf16 %v10765_v26 }
 0x502   : > { %v2643_v20 = vsel %vm1480_vm12, %v2613_v35, %v8647_v58  ;;  %v13742_v4 = vunpack.i.h.bf16 %v10732_v11  ;;  %v2721_v50 = vsel %vm1578_vm15, %v2689_v10, %v8664_v54  ;;  %v13744_v14 = vunpack.i.l.bf16 %v10685_v22  ;;  %v6656_v10 = vpop.permute.xlu2 %6655 }
 0x503   : > { %v2644_v16 = vsel %vm1480_vm12, %v2614_v33, %v13739_v25  ;;  %v2751_v28 = vsel %vm1611_vm0, %v2719_v24, %v13740_v49  ;;  %v13741_v30 = vmov %v13740_v49  ;;  %v2639_v51 = vsel %vm1480_vm12, %v10982_v21, %v8647_v58  ;;  %v13748_v33 = vld [vmem:[#allocation52_spill] sm:$0xff] }
 0x504   : > { %v2752_v59 = vsel %vm1611_vm0, %v2720_v42, %v13741_v30  ;;  %v11178_v2 = vsel %vm1512_vm13, %v2643_v20, %v13742_v4  ;;  %v13743_v41 = vmov %v13742_v4  ;;  %v2827_v5 = vrot.slane %v2751_v28, 7  ;;  %v11193_v55 = vpop.permute.xlu1 %6640  ;;  %v6616_v43 = vpop.permute.xlu0 %6615 }
 0x505   : > { %v11183_v60 = vsel %vm1512_vm13, %v2644_v16, %v13743_v41  ;;  %v2828_v37 = vrot.slane %v2752_v59, 7  ;;  %v2722_v36 = vsel %vm1578_vm15, %v2690_v3, %v13744_v14  ;;  %v13745_v34 = vunpack.i.l.bf16 %v10743_v0  ;;  %v13751_v14 = vld [vmem:[#allocation20_spill] sm:$0xff] }
 0x506   : > { %v6488_v23 = vunpack.i.h.bf16 %v10757_v48  ;;  %2962 = vmatmul.f32.gmra.mxu0 %v11034_v45  ;;  %v6333_v44 = vunpack.i.h.bf16 %v13747_v47  ;;  %v6343_v35 = vunpack.i.h.bf16 %v13748_v33  ;;  %v6618_v24 = vunpack.i.h.bf16 %v6616_v43 }
 0x507   : > { %v11196_v11 = vsel %vm1676_vm7, %v2827_v5, %v2828_v37  ;;  %v2753_v57 = vsel %vm1611_vm0, %v2721_v50, %v13745_v34  ;;  %v13746_v3 = vmov %v13745_v34  ;;  %v6617_v42 = vunpack.i.l.bf16 %v6616_v43  ;;  %v13749_v5 = vld [vmem:[#allocation56_spill] sm:$0xff]  ;;  %v13750_v50 = vld [vmem:[#allocation5_spill] sm:$0xff] }
 0x508   : > { %v2754_v31 = vsel %vm1611_vm0, %v2722_v36, %v13746_v3  ;;  %v2833_v21 = vrot.slane %v2753_v57, 7  ;;  %v6397_v25 = vunpack.i.l.bf16 %v10687_v62  ;;  %v11210_v48 = vsel %vm1512_vm13, %v2639_v51, %v6488_v23 }
 0x509   : > { %v2834_v16 = vrot.slane %v2754_v31, 7  ;;  %v11214_v45 = vsel %vm1512_vm13, %v10995_v7, %v6488_v23  ;;  %v6507_v20 = vunpack.i.l.bf16 %v10765_v26  ;;  %v6657_v49 = vunpack.i.l.bf16 %v6656_v10  ;;  %v13752_v23 = vld [vmem:[#allocation34_spill] sm:$0xff] }
 0x50a   : > { %v2685_v28 = vsel %vm1545_vm14, %v10941_v1, %v6617_v42  ;;  %v2686_v30 = vsel %vm1545_vm14, %v10945_v52, %v6618_v24  ;;  %v6658_v59 = vunpack.i.h.bf16 %v6656_v10  ;;  %v3716_v7 = vsel %vm419_vm1, 0.0, %v6333_v44 }
 0x50b   : > { %v2717_v62 = vsel %vm1578_vm15, %v2685_v28, %v8664_v54  ;;  %v2718_v4 = vsel %vm1578_vm15, %v2686_v30, %v6397_v25  ;;  %v11225_v41 = vsel %vm1676_vm7, %v2833_v21, %v2834_v16  ;;  %v3717_v26 = vsel %vm419_vm1, %v13749_v5, %v6333_v44 }
 0x50c   : > { %v2749_v37 = vsel %vm1611_vm0, %v2717_v62, %v6507_v20  ;;  %v2750_v1 = vsel %vm1611_vm0, %v2718_v4, %v6507_v20  ;;  %v6348_v52 = vunpack.i.h.bf16 %v13750_v50  ;;  %v6407_v36 = vunpack.i.l.bf16 %v13751_v14  ;;  %v6651_v31 = vpop.permute.xlu1 %6650  ;;  %v6636_v33 = vpop.permute.xlu0 %6635 }
 0x50d   : > { %v2821_v51 = vrot.slane %v2749_v37, 7  ;;  %v2822_v34 = vrot.slane %v2750_v1, 7  ;;  %v6497_v57 = vunpack.i.l.bf16 %v13735_v17  ;;  %v6517_v10 = vunpack.i.l.bf16 %v13752_v23 }
 0x50e   : > { %v2645_v43 = vsel %vm1480_vm12, %v11040_v53, %v8647_v58  ;;  %v2695_v3 = vsel %vm1545_vm14, %v10950_v12, %v6657_v49  ;;  %v2696_v21 = vsel %vm1545_vm14, %v10953_v9, %v6658_v59  ;;  %v6653_v47 = vunpack.i.h.bf16 %v6651_v31 }
 0x50f   : > { %v6652_v44 = vunpack.i.l.bf16 %v6651_v31  ;;  %v2823_v24 = vsel %vm1676_vm7, %v2821_v51, %v2822_v34  ;;  %v6643_v17 = vunpack.i.h.bf16 %v11193_v55  ;;  %v6642_v42 = vunpack.i.l.bf16 %v11193_v55  ;;  %v13753_v34 = vld [vmem:[#allocation107_spill] sm:$0xff] }
 0x510   : > { %v6638_v25 = vunpack.i.h.bf16 %v6636_v33  ;;  %v6637_v16 = vunpack.i.l.bf16 %v6636_v33  ;;  %2965 = vmatmul.f32.gmra.mxu0 %v2823_v24  ;;  %v2694_v12 = vsel %vm1545_vm14, %v11076_v13, %v6653_v47  ;;  %v11251_v9 = vsel %vm1512_vm13, %v2645_v43, %v6497_v57 }
 0x511   : > { %v2693_v53 = vsel %vm1545_vm14, %v11073_v29, %v6652_v44  ;;  %v11255_v20 = vsel %vm1512_vm13, %v11054_v56, %v6497_v57  ;;  %v2726_v30 = vsel %vm1578_vm15, %v2694_v12, %v6407_v36  ;;  %v2728_v1 = vsel %vm1578_vm15, %v2696_v21, %v8664_v54 }
 0x512   : > { %v3745_v49 = vsel %vm1449_vm11, %v3717_v26, %v6638_v25  ;;  %v3744_v55 = vsel %vm1449_vm11, %v3716_v7, %v6637_v16  ;;  %v2725_v28 = vsel %vm1578_vm15, %v2693_v53, %v8664_v54  ;;  %v2758_v62 = vsel %vm1611_vm0, %v2726_v30, %v6517_v10 }
 0x513   : > { %v3775_v29 = vsel %vm1480_vm12, %v3745_v49, %v6343_v35  ;;  %v3774_v13 = vsel %vm1480_vm12, %v3744_v55, %v8647_v58  ;;  %v2757_v59 = vsel %vm1611_vm0, %v2725_v28, %v6517_v10  ;;  %v2846_v7 = vrot.slane %v2758_v62, 7 }
 0x514   : > { %v3807_v56 = vsel %vm1512_vm13, %v3775_v29, %v6348_v52  ;;  %v3806_v4 = vsel %vm1512_vm13, %v3774_v13, %v6348_v52  ;;  %v2845_v5 = vrot.slane %v2757_v59, 7  ;;  %v2727_v35 = vsel %vm1578_vm15, %v2695_v3, %v8664_v54  ;;  %v6666_v50 = vpop.permute.xlu1 %6665  ;;  %v6646_v3 = vpop.permute.xlu0 %6645 }
 0x515   : > { %v3838_v26 = vsel %vm1545_vm14, %v3806_v4, %v6642_v42  ;;  %v3839_v37 = vsel %vm1545_vm14, %v3807_v56, %v6643_v17  ;;  %v2759_v57 = vsel %vm1611_vm0, %v2727_v35, %v13753_v34  ;;  %v6403_v10 = vunpack.i.h.bf16 %v10685_v22  ;;  %v13754_v56 = vld [vmem:[#allocation47_spill] sm:$0xff] }
 0x516   : > { %v3870_v36 = vsel %vm1578_vm15, %v3838_v26, %v8664_v54  ;;  %v3871_v51 = vsel %vm1578_vm15, %v3839_v37, %v8664_v54  ;;  %v11280_v52 = vsel %vm1676_vm7, %v2845_v5, %v2846_v7  ;;  %v6513_v43 = vunpack.i.h.bf16 %v10743_v0  ;;  %v13756_v26 = vld [vmem:[#allocation79_spill] sm:$0xff] }
 0x517   : > { %v3902_v31 = vsel %vm1611_vm0, %v3870_v36, %v13753_v34  ;;  %v3903_v21 = vsel %vm1611_vm0, %v3871_v51, %v13753_v34  ;;  %v6648_v47 = vunpack.i.h.bf16 %v6646_v3  ;;  %v6647_v44 = vunpack.i.l.bf16 %v6646_v3 }
 0x518   : > { %2968 = vmatmul.f32.gmra.mxu0 %v11196_v11  ;;  %v4023_v33 = vrot.slane %v3902_v31, 7  ;;  %v4024_v24 = vrot.slane %v3903_v21, 7  ;;  %v6668_v17 = vunpack.i.h.bf16 %v6666_v50  ;;  %v6667_v42 = vunpack.i.l.bf16 %v6666_v50 }
 0x519   : > { %v2760_v22 = vsel %vm1611_vm0, %v2728_v1, %v13753_v34  ;;  %v2851_v25 = vrot.slane %v2759_v57, 7  ;;  %v2692_v0 = vsel %vm1545_vm14, %v10989_v8, %v6648_v47  ;;  %v2691_v16 = vsel %vm1545_vm14, %v10985_v18, %v6647_v44  ;;  %v6671_v8 = vpop.permute.xlu2 %6670 }
 0x51a   : > { %v4025_v53 = vsel %vm1676_vm7, %v4023_v33, %v4024_v24  ;;  %v2852_v12 = vrot.slane %v2760_v22, 7  ;;  %v2723_v11 = vsel %vm1578_vm15, %v2691_v16, %v8664_v54  ;;  %v2724_v49 = vsel %vm1578_vm15, %v2692_v0, %v6403_v10 }
 0x51b   : > { %4131 = vmatmul.f32.gmra.mxu3 %v4025_v53  ;;  %v2755_v55 = vsel %vm1611_vm0, %v2723_v11, %v6513_v43  ;;  %v2756_v28 = vsel %vm1611_vm0, %v2724_v49, %v6513_v43  ;;  %v2699_v18 = vsel %vm1545_vm14, %v11044_v15, %v6667_v42  ;;  %v2700_v29 = vsel %vm1545_vm14, %v11048_v39, %v6668_v17  ;;  %v13757_v43 = vld [vmem:[#allocation90_spill] sm:$0xff] }
 0x51c   : > { %v11304_v30 = vsel %vm1676_vm7, %v2851_v25, %v2852_v12  ;;  %v2839_v13 = vrot.slane %v2755_v55, 7  ;;  %v2840_v59 = vrot.slane %v2756_v28, 7  ;;  %v6408_v62 = vunpack.i.h.bf16 %v13751_v14  ;;  %v6661_v1 = vpop.permute.xlu0 %6660 }
 0x51d   : > { %v6412_v4 = vunpack.i.l.bf16 %v13754_v56  ;;  %v13755_v5 = vunpack.i.l.bf16 %v10771_v32  ;;  %v6522_v37 = vunpack.i.l.bf16 %v13756_v26  ;;  %v6518_v35 = vunpack.i.h.bf16 %v13752_v23 }
 0x51e   : > { %v2841_v15 = vsel %vm1676_vm7, %v2839_v13, %v2840_v59  ;;  %v6663_v50 = vunpack.i.h.bf16 %v6661_v1  ;;  %v6662_v39 = vunpack.i.l.bf16 %v6661_v1  ;;  %v2731_v14 = vsel %vm1578_vm15, %v2699_v18, %v8664_v54  ;;  %v13759_v1 = vld [vmem:[#allocation4_spill] sm:$0xff] }
 0x51f   : > { %v2665_v7 = vsel %vm1512_vm13, %v13727_v38, %v13755_v5  ;;  %v2732_v36 = vsel %vm1578_vm15, %v2700_v29, %v6412_v4  ;;  %v6673_v32 = vunpack.i.h.bf16 %v6671_v8  ;;  %v6672_v51 = vunpack.i.l.bf16 %v6671_v8 }
 0x520   : > { %2971 = vmatmul.f32.gmra.mxu0 %v11225_v41  ;;  %v2763_v57 = vsel %vm1611_vm0, %v2731_v14, %v6522_v37  ;;  %v2764_v10 = vsel %vm1611_vm0, %v2732_v36, %v6522_v37  ;;  %v2697_v23 = vsel %vm1545_vm14, %v2665_v7, %v6662_v39  ;;  %v2698_v3 = vsel %vm1545_vm14, %v13757_v43, %v6663_v50  ;;  %v13758_v7 = vld [vmem:[#allocation55_spill] sm:$0xff]  ;;  %v13760_v50 = vld [vmem:[#allocation46_spill] sm:$0xff] }
 0x521   : > { %v2860_v31 = vrot.slane %v2763_v57, 7  ;;  %v2861_v21 = vrot.slane %v2764_v10, 7  ;;  %v2729_v41 = vsel %vm1578_vm15, %v2697_v23, %v8664_v54  ;;  %v2730_v47 = vsel %vm1578_vm15, %v2698_v3, %v6408_v62  ;;  %v6686_v53 = vpop.permute.xlu2 %6685 }
 0x522   : > { %v2761_v44 = vsel %vm1611_vm0, %v2729_v41, %v6518_v35  ;;  %v2762_v33 = vsel %vm1611_vm0, %v2730_v47, %v6518_v35  ;;  %v2701_v17 = vsel %vm1545_vm14, %v11122_v63, %v6672_v51  ;;  %v2702_v42 = vsel %vm1545_vm14, %v11125_v19, %v6673_v32 }
 0x523   : > { %v11334_v24 = vsel %vm1676_vm7, %v2860_v31, %v2861_v21  ;;  %v2854_v22 = vrot.slane %v2761_v44, 7  ;;  %v2855_v25 = vrot.slane %v2762_v33, 7  ;;  %v6413_v0 = vunpack.i.h.bf16 %v13754_v56  ;;  %v6681_v56 = vpop.permute.xlu1 %6680 }
 0x524   : > { %v6523_v16 = vunpack.i.h.bf16 %v13756_v26  ;;  %v6676_v12 = vpop.permute.xlu0 %6675  ;;  %v2733_v49 = vsel %vm1578_vm15, %v2701_v17, %v8664_v54  ;;  %v6688_v18 = vunpack.i.h.bf16 %v6686_v53  ;;  %v6687_v29 = vunpack.i.l.bf16 %v6686_v53 }
 0x525   : > { %v2856_v11 = vsel %vm1676_vm7, %v2854_v22, %v2855_v25  ;;  %v2734_v55 = vsel %vm1578_vm15, %v2702_v42, %v6413_v0  ;;  %v6678_v63 = vunpack.i.h.bf16 %v6676_v12  ;;  %v6677_v28 = vunpack.i.l.bf16 %v6676_v12  ;;  %v4167_v0 = vpop.f32.mrf.mxu2  ;;  %v4102_v12 = vpop.f32.mrf.mxu3 }
 0x526   : > { %v2765_v19 = vsel %vm1611_vm0, %v2733_v49, %v6523_v16  ;;  %v2766_v8 = vsel %vm1611_vm0, %v2734_v55, %v6523_v16  ;;  %v6417_v26 = vunpack.i.l.bf16 %v13758_v7  ;;  %v2707_v37 = vsel %vm1545_vm14, %v11178_v2, %v6687_v29 }
 0x527   : > { %v2866_v13 = vrot.slane %v2765_v19, 7  ;;  %v2867_v59 = vrot.slane %v2766_v8, 7  ;;  %v2704_v4 = vsel %vm1545_vm14, %v11214_v45, %v6678_v63  ;;  %v2703_v5 = vsel %vm1545_vm14, %v11210_v48, %v6677_v28 }
 0x528   : > { %2974 = vmatmul.f32.gmra.mxu0 %v2841_v15  ;;  %v2708_v35 = vsel %vm1545_vm14, %v11183_v60, %v6688_v18  ;;  %v6422_v15 = vunpack.i.l.bf16 %v13759_v1  ;;  %v6527_v39 = vunpack.i.l.bf16 %v13760_v50  ;;  %v6532_v14 = vunpack.i.l.bf16 %v10921_v6 }
 0x529   : > { %v11349_v62 = vsel %vm1676_vm7, %v2866_v13, %v2867_v59  ;;  %v6683_v36 = vunpack.i.h.bf16 %v6681_v56  ;;  %v6682_v32 = vunpack.i.l.bf16 %v6681_v56  ;;  %v2735_v48 = vsel %vm1578_vm15, %v2703_v5, %v8664_v54 }
 0x52a   : > { %v2736_v45 = vsel %vm1578_vm15, %v2704_v4, %v6417_v26  ;;  %v2767_v2 = vsel %vm1611_vm0, %v2735_v48, %v6527_v39  ;;  %v2739_v60 = vsel %vm1578_vm15, %v2707_v37, %v8664_v54  ;;  %v2740_v57 = vsel %vm1578_vm15, %v2708_v35, %v6422_v15 }
 0x52b   : > { %v2768_v51 = vsel %vm1611_vm0, %v2736_v45, %v6527_v39  ;;  %v2872_v10 = vrot.slane %v2767_v2, 7  ;;  %v2771_v43 = vsel %vm1611_vm0, %v2739_v60, %v6532_v14  ;;  %v2705_v41 = vsel %vm1545_vm14, %v11133_v27, %v6682_v32  ;;  %v6696_v49 = vpop.permute.xlu1 %6695 }
 0x52c   : > { %v2873_v23 = vrot.slane %v2768_v51, 7  ;;  %v2884_v31 = vrot.slane %v2771_v43, 7  ;;  %v2706_v47 = vsel %vm1545_vm14, %v11138_v46, %v6683_v36  ;;  %v6418_v44 = vunpack.i.h.bf16 %v13758_v7  ;;  %v6691_v55 = vpop.permute.xlu0 %6690 }
 0x52d   : > { %v6528_v17 = vunpack.i.h.bf16 %v13760_v50  ;;  %v2737_v42 = vsel %vm1578_vm15, %v2705_v41, %v8664_v54  ;;  %v6698_v63 = vunpack.i.h.bf16 %v6696_v49  ;;  %v6693_v28 = vunpack.i.h.bf16 %v6691_v55  ;;  %v4170_v8 = vpop.f32.mrf.mxu2  ;;  %v4105_v4 = vpop.f32.mrf.mxu3 }
 0x52e   : > { %v2874_v3 = vsel %vm1676_vm7, %v2872_v10, %v2873_v23  ;;  %v2738_v22 = vsel %vm1578_vm15, %v2706_v47, %v6418_v44  ;;  %v6692_v19 = vunpack.i.l.bf16 %v6691_v55  ;;  %v6423_v56 = vunpack.i.h.bf16 %v13759_v1  ;;  %v11416_v10 = vpop.f32.mrf.mxu1 }
 0x52f   : > { %v2769_v25 = vsel %vm1611_vm0, %v2737_v42, %v6528_v17  ;;  %v2770_v27 = vsel %vm1611_vm0, %v2738_v22, %v6528_v17  ;;  %v2712_v29 = vsel %vm1545_vm14, %v11153_v61, %v6698_v63  ;;  %v2710_v59 = vsel %vm1545_vm14, %v11255_v20, %v6693_v28  ;;  %v13761_v17 = vld [vmem:[#allocation54_spill] sm:$0xff] }
 0x530   : > { %2977 = vmatmul.f32.gmra.mxu0 %v11280_v52  ;;  %v2772_v52 = vsel %vm1611_vm0, %v2740_v57, %v6532_v14  ;;  %v2878_v16 = vrot.slane %v2769_v25, 7  ;;  %v2879_v46 = vrot.slane %v2770_v27, 7  ;;  %v2709_v13 = vsel %vm1545_vm14, %v11251_v9, %v6692_v19 }
 0x531   : > { %v2885_v21 = vrot.slane %v2772_v52, 7  ;;  %v2741_v5 = vsel %vm1578_vm15, %v2709_v13, %v8664_v54  ;;  %v2744_v9 = vsel %vm1578_vm15, %v2712_v29, %v8664_v54 }
 0x532   : > { %v2880_v53 = vsel %vm1676_vm7, %v2878_v16, %v2879_v46 }
 0x533   : > { %v2886_v33 = vsel %vm1676_vm7, %v2884_v31, %v2885_v21 }
 0x535   : > { %v4173_v39 = vpop.f32.mrf.mxu2  ;;  %v4108_v14 = vpop.f32.mrf.mxu3 }
 0x536   : > { %v11418_v52 = vpop.f32.mrf.mxu1  ;;  %v11426_v41 = vadd.f32 %v4173_v39, %v4108_v14 }
 0x538   : > { %2980 = vmatmul.f32.gmra.mxu0 %v11304_v30  ;;  %v6697_v30 = vunpack.i.l.bf16 %v6696_v49  ;;  %v4213_v22 = vsel %vm419_vm1, %v11426_v41, 0.0 }
 0x53a   : > { %v2711_v18 = vsel %vm1545_vm14, %v11149_v40, %v6697_v30  ;;  %v2742_v40 = vsel %vm1578_vm15, %v2710_v59, %v6423_v56 }
 0x53b   : > { %v2743_v61 = vsel %vm1578_vm15, %v2711_v18, %v8664_v54 }
 0x53d   : > { %v4176_v36 = vpop.f32.mrf.mxu2  ;;  %v4111_v32 = vpop.f32.mrf.mxu3 }
 0x53e   : > { %v11430_v44 = vadd.f32 %v4176_v36, %v4111_v32 }
 0x540   : > { %2983 = vmatmul.f32.gmra.mxu0 %v2856_v11  ;;  %v6533_v11 = vunpack.i.h.bf16 %v10921_v6  ;;  %v2775_v6 = vsel %vm1611_vm0, %v2743_v61, %v13753_v34  ;;  %v4215_v46 = vsel %vm419_vm1, %v11430_v44, 0.0 }
 0x541   : > { %v2896_v35 = vrot.slane %v2775_v6, 7 }
 0x542   : > { %v2773_v20 = vsel %vm1611_vm0, %v2741_v5, %v6533_v11  ;;  %v2774_v7 = vsel %vm1611_vm0, %v2742_v40, %v6533_v11 }
 0x543   : > { %v2890_v26 = vrot.slane %v2773_v20, 7  ;;  %v2891_v37 = vrot.slane %v2774_v7, 7 }
 0x545   : > { %v2892_v15 = vsel %vm1676_vm7, %v2890_v26, %v2891_v37  ;;  %v4179_v48 = vpop.f32.mrf.mxu2  ;;  %v4114_v45 = vpop.f32.mrf.mxu3 }
 0x546   : > { %v11435_v25 = vadd.f32 %v4179_v48, %v4114_v45 }
 0x548   : > { %2986 = vmatmul.f32.gmra.mxu0 %v11334_v24  ;;  %v2776_v24 = vsel %vm1611_vm0, %v2744_v9, %v13753_v34  ;;  %v4217_v49 = vsel %vm419_vm1, %v11435_v25, 0.0 }
 0x549   : > { %v2897_v1 = vrot.slane %v2776_v24, 7 }
 0x54b   : > { %v2898_v50 = vsel %vm1676_vm7, %v2896_v35, %v2897_v1 }
 0x54d   : > { %v4182_v2 = vpop.f32.mrf.mxu2  ;;  %v4117_v51 = vpop.f32.mrf.mxu3 }
 0x550   : > { %2989 = vmatmul.f32.gmra.mxu0 %v11349_v62  ;;  %v11420_v62 = vadd.f32 %v4167_v0, %v4102_v12  ;;  %v11437_v0 = vpop.f32.mrf.mxu1 }
 0x552   : > { %v4209_v21 = vsel %vm419_vm1, %v11420_v62, 0.0 }
 0x553   : > { %v4210_v42 = vadd.f32 %v4209_v21, %v13761_v17  ;;  %v13766_v17 = vld [vmem:[#allocation19_spill] sm:$0xff] }
 0x555   : > { %v4185_v60 = vpop.f32.mrf.mxu2  ;;  %v4120_v57 = vpop.f32.mrf.mxu3 }
 0x556   : > { %v11447_v55 = vadd.f32 %v4185_v60, %v4120_v57  ;;  %v13762_v60 = vld [vmem:[#allocation2_spill] sm:$0xff] }
 0x558   : > { %2992 = vmatmul.f32.gmra.mxu0 %v2874_v3  ;;  %v11422_v3 = vadd.f32 %v4170_v8, %v4105_v4  ;;  %v4221_v29 = vsel %vm419_vm1, %v11447_v55, 0.0  ;;  %v11461_v5 = vpop.f32.mrf.mxu1 }
 0x55a   : > { %v4211_v47 = vsel %vm419_vm1, %v11422_v3, 0.0 }
 0x55b   : > { %v4212_v27 = vadd.f32 %v4211_v47, %v4210_v42  ;;  %v13765_v47 = vld [vmem:[#allocation101_spill] sm:$0xff] }
 0x55d   : > { %v4188_v23 = vpop.f32.mrf.mxu2  ;;  %v4123_v43 = vpop.f32.mrf.mxu3  ;;  %v4214_v12 = vadd.f32 %v4213_v22, %v4212_v27  ;;  %v13767_v22 = vld [vmem:[#allocation18_spill] sm:$0xff] }
 0x55e   : > { %v11451_v19 = vadd.f32 %v4188_v23, %v4123_v43  ;;  %v13763_v23 = vld [vmem:[#allocation99_spill] sm:$0xff] }
 0x55f   : > { %v4216_v63 = vadd.f32 %v4215_v46, %v4214_v12 }
 0x560   : > { %2995 = vmatmul.f32.gmra.mxu0 %v2880_v53  ;;  %v11443_v53 = vadd.f32 %v4182_v2, %v4117_v51  ;;  %v4223_v56 = vsel %vm419_vm1, %v11451_v19, 0.0 }
 0x561   : > { %v4218_v8 = vadd.f32 %v4217_v49, %v4216_v63 }
 0x562   : > { %v4219_v28 = vsel %vm419_vm1, %v11443_v53, 0.0 }
 0x563   : > { %v4220_v59 = vadd.f32 %v4219_v28, %v4218_v8 }
 0x565   : > { %v4191_v31 = vpop.f32.mrf.mxu2  ;;  %v4222_v4 = vadd.f32 %v4221_v29, %v4220_v59 }
 0x567   : > { %v4224_v9 = vadd.f32 %v4223_v56, %v4222_v4 }
 0x568   : > { %2998 = vmatmul.f32.gmra.mxu0 %v2886_v33  ;;  %v4126_v33 = vpop.f32.mrf.mxu3 }
 0x569   : > { %v11455_v13 = vadd.f32 %v4191_v31, %v4126_v33  ;;  %v13764_v31 = vld [vmem:[#allocation100_spill] sm:$0xff] }
 0x56b   : > { %v4225_v61 = vsel %vm419_vm1, %v11455_v13, 0.0 }
 0x56c   : > { %v4226_v6 = vadd.f32 %v4225_v61, %v4224_v9 }
 0x56d   : > { %v4194_v30 = vpop.f32.mrf.mxu2 }
 0x570   : > { %3001 = vmatmul.f32.gmra.mxu0 %v2892_v15  ;;  %v11473_v15 = vpop.f32.mrf.mxu1 }
 0x575   : > { %v4197_v20 = vpop.f32.mrf.mxu2 }
 0x578   : > { %3004 = vmatmul.f32.gmra.mxu0 %v2898_v50  ;;  %v11477_v45 = vpop.f32.mrf.mxu1 }
 0x57b   : > { %v11439_v16 = vpop.f32.mrf.mxu0 }
 0x580   : > { %v11501_v49 = vpop.f32.mrf.mxu1 }
 0x582   : > { %v4129_v18 = vpop.f32.mrf.mxu3 }
 0x583   : > { %v11459_v11 = vadd.f32 %v4194_v30, %v4129_v18  ;;  %v11463_v40 = vpop.f32.mrf.mxu0 }
 0x585   : > { %v4227_v7 = vsel %vm419_vm1, %v11459_v11, 0.0 }
 0x586   : > { %v4228_v37 = vadd.f32 %v4227_v7, %v4226_v6 }
 0x58d   : > { %v11475_v50 = vpop.f32.mrf.mxu0 }
 0x595   : > { %v11479_v2 = vpop.f32.mrf.mxu0 }
 0x59d   : > { %v11503_v63 = vpop.f32.mrf.mxu0 }
 0x59e   : > { %v4132_v24 = vpop.f32.mrf.mxu3 }
 0x59f   : > { %v11469_v26 = vadd.f32 %v4197_v20, %v4132_v24 }
 0x5a1   : > { %v4229_v35 = vsel %vm419_vm1, %v11469_v26, 0.0 }
 0x5a2   : > { %v4230_v1 = vadd.f32 %v4229_v35, %v4228_v37 }
 0x5a4   : > { %v4231_v39 = vrot.slane %v4230_v1, 4 }
 0x5a6   : > { %v4232_v14 = vadd.f32 %v4231_v39, %v4230_v1  ;;  %v11532_v1 = vpop.f32.mrf.mxu1 }
 0x5a8   : > { %v4233_v36 = vrot.slane %v4232_v14, 2 }
 0x5aa   : > { %v4234_v32 = vadd.f32 %v4233_v36, %v4232_v14  ;;  %v2975_v36 = vpop.f32.mrf.mxu0 }
 0x5ac   : > { %v4235_v48 = vrot.slane %v4234_v32, 1 }
 0x5ae   : > { %v4236_v51 = vadd.f32 %v4235_v48, %v4234_v32 }
 0x5b0   : > { %v4237_v57 = vmul.f32 %v4236_v51, %v13762_v60 }
 0x5b2   : > { %v11483_v43 = vsub.f32 %v13763_v23, %v4237_v57  ;;  %v11486_v21 = vsub.f32 %v13764_v31, %v4237_v57  ;;  %v11489_v33 = vsub.f32 %v13765_v47, %v4237_v57  ;;  %v11492_v42 = vsub.f32 %v13766_v17, %v4237_v57 }
 0x5b3   : > { %v11495_v27 = vsub.f32 %v13767_v22, %v4237_v57  ;;  %v11508_v28 = vsub.f32 %v11420_v62, %v4237_v57  ;;  %v11515_v56 = vsub.f32 %v11422_v3, %v4237_v57  ;;  %v11521_v62 = vsub.f32 %v11426_v41, %v4237_v57 }
 0x5b4   : > { %v4254_v46 = vmul.f32 %v11483_v43, %v11483_v43  ;;  %v4255_v12 = vmul.f32 %v11486_v21, %v11486_v21  ;;  %v4256_v30 = vmul.f32 %v11489_v33, %v11489_v33  ;;  %v4257_v8 = vmul.f32 %v11492_v42, %v11492_v42 }
 0x5b5   : > { %v4258_v4 = vmul.f32 %v11495_v27, %v11495_v27  ;;  %v4259_v20 = vmul.f32 %v11508_v28, %v11508_v28  ;;  %v11527_v24 = vsub.f32 %v11430_v44, %v4237_v57  ;;  %v4260_v3 = vmul.f32 %v11515_v56, %v11515_v56 }
 0x5b6   : > { %v4270_v18 = vsel %vm419_vm1, %v4254_v46, 0.0  ;;  %v4271_v29 = vsel %vm419_vm1, %v4255_v12, 0.0  ;;  %v4273_v61 = vsel %vm419_vm1, %v4256_v30, 0.0  ;;  %v4275_v7 = vsel %vm419_vm1, %v4257_v8, 0.0 }
 0x5b7   : > { %v4272_v59 = vadd.f32 %v4271_v29, %v4270_v18  ;;  %v4277_v37 = vsel %vm419_vm1, %v4258_v4, 0.0  ;;  %v11535_v41 = vsub.f32 %v11435_v25, %v4237_v57  ;;  %v4261_v39 = vmul.f32 %v11521_v62, %v11521_v62  ;;  %v2978_v18 = vpop.f32.mrf.mxu0 }
 0x5b8   : > { %v4279_v14 = vsel %vm419_vm1, %v4259_v20, 0.0  ;;  %v11541_v44 = vsub.f32 %v11443_v53, %v4237_v57  ;;  %v4262_v48 = vmul.f32 %v11527_v24, %v11527_v24  ;;  %v4281_v51 = vsel %vm419_vm1, %v4260_v3, 0.0 }
 0x5b9   : > { %v4274_v9 = vadd.f32 %v4273_v61, %v4272_v59  ;;  %v11547_v31 = vsub.f32 %v11447_v55, %v4237_v57  ;;  %v4263_v25 = vmul.f32 %v11535_v41, %v11535_v41  ;;  %v4283_v47 = vsel %vm419_vm1, %v4261_v39, 0.0  ;;  %v3049_v59 = vpop.f32.mrf.mxu1 }
 0x5ba   : > { %v11553_v22 = vsub.f32 %v11451_v19, %v4237_v57  ;;  %v4264_v53 = vmul.f32 %v11541_v44, %v11541_v44  ;;  %v4285_v46 = vsel %vm419_vm1, %v4262_v48, 0.0  ;;  %v11559_v30 = vsub.f32 %v11455_v13, %v4237_v57 }
 0x5bb   : > { %v4276_v6 = vadd.f32 %v4275_v7, %v4274_v9  ;;  %v4265_v55 = vmul.f32 %v11547_v31, %v11547_v31  ;;  %v4287_v8 = vsel %vm419_vm1, %v4263_v25, 0.0  ;;  %v11565_v19 = vsub.f32 %v11459_v11, %v4237_v57 }
 0x5bc   : > { %v4266_v4 = vmul.f32 %v11553_v22, %v11553_v22  ;;  %v4289_v61 = vsel %vm419_vm1, %v4264_v53, 0.0  ;;  %v11571_v13 = vsub.f32 %v11469_v26, %v4237_v57  ;;  %v4267_v20 = vmul.f32 %v11559_v30, %v11559_v30 }
 0x5bd   : > { %v4278_v35 = vadd.f32 %v4277_v37, %v4276_v6  ;;  %v4291_v7 = vsel %vm419_vm1, %v4265_v55, 0.0  ;;  %v11578_v6 = vadd.f32 %v11418_v52, %v11463_v40  ;;  %v4268_v3 = vmul.f32 %v11565_v19, %v11565_v19 }
 0x5be   : > { %v4293_v37 = vsel %vm419_vm1, %v4266_v4, 0.0  ;;  %v11589_v26 = vadd.f32 %v11437_v0, %v11475_v50  ;;  %v4269_v39 = vmul.f32 %v11571_v13, %v11571_v13  ;;  %v4295_v52 = vsel %vm419_vm1, %v4267_v20, 0.0 }
 0x5bf   : > { %v4280_v32 = vadd.f32 %v4279_v14, %v4278_v35  ;;  %v11585_v35 = vadd.f32 %v11416_v10, %v11439_v16  ;;  %v2981_v40 = vpop.f32.mrf.mxu0  ;;  %v3074_v14 = vsel %vm419_vm1, %v11578_v6, 0.0  ;;  %v4297_v16 = vsel %vm419_vm1, %v4268_v3, 0.0 }
 0x5c0   : > { %v3076_v50 = vsel %vm419_vm1, %v11589_v26, 0.0  ;;  %v11607_v48 = vadd.f32 %v11473_v15, %v11503_v63  ;;  %v11618_v15 = vadd.f32 %v11501_v49, %v2978_v18  ;;  %v11623_v4 = vadd.f32 %v11532_v1, %v2981_v40 }
 0x5c1   : > { %v4282_v23 = vadd.f32 %v4281_v51, %v4280_v32  ;;  %v11598_v32 = vadd.f32 %v11461_v5, %v11479_v2  ;;  %v3073_v0 = vsel %vm419_vm1, %v11585_v35, 0.0 }
 0x5c2   : > { %v3075_v25 = vadd.f32 %v3074_v14, %v3073_v0  ;;  %v3086_v49 = vsel %vm419_vm1, %v11623_v4, 0.0 }
 0x5c3   : > { %v4284_v17 = vadd.f32 %v4283_v47, %v4282_v23  ;;  %v3052_v23 = vpop.f32.mrf.mxu1  ;;  %v4299_v47 = vsel %vm419_vm1, %v4269_v39, 0.0  ;;  %v3078_v5 = vsel %vm419_vm1, %v11598_v32, 0.0 }
 0x5c4   : > { %v3077_v53 = vadd.f32 %v3076_v50, %v3075_v25 }
 0x5c5   : > { %v4286_v12 = vadd.f32 %v4285_v46, %v4284_v17  ;;  %v11613_v17 = vadd.f32 %v11477_v45, %v2975_v36  ;;  %v3080_v46 = vsel %vm419_vm1, %v11607_v48, 0.0  ;;  %v3084_v36 = vsel %vm419_vm1, %v11618_v15, 0.0 }
 0x5c6   : > { %v3079_v63 = vadd.f32 %v3078_v5, %v3077_v53 }
 0x5c7   : > { %v4288_v29 = vadd.f32 %v4287_v8, %v4286_v12  ;;  %v2984_v55 = vpop.f32.mrf.mxu0 }
 0x5c9   : > { %v4290_v9 = vadd.f32 %v4289_v61, %v4288_v29  ;;  %v3082_v29 = vsel %vm419_vm1, %v11613_v17, 0.0  ;;  %v3081_v61 = vadd.f32 %v3080_v46, %v3079_v63 }
 0x5cb   : > { %v4292_v11 = vadd.f32 %v4291_v7, %v4290_v9  ;;  %v11627_v9 = vadd.f32 %v3049_v59, %v2984_v55  ;;  %v3083_v20 = vadd.f32 %v3082_v29, %v3081_v61  ;;  %v3055_v18 = vpop.f32.mrf.mxu1 }
 0x5cd   : > { %v4294_v57 = vadd.f32 %v4293_v37, %v4292_v11  ;;  %v3085_v11 = vadd.f32 %v3084_v36, %v3083_v20  ;;  %v3088_v3 = vsel %vm419_vm1, %v11627_v9, 0.0 }
 0x5cf   : > { %v4296_v10 = vadd.f32 %v4295_v52, %v4294_v57  ;;  %v3087_v37 = vadd.f32 %v3086_v49, %v3085_v11  ;;  %v2987_v1 = vpop.f32.mrf.mxu0 }
 0x5d0   : > { %v11633_v57 = vadd.f32 %v3052_v23, %v2987_v1 }
 0x5d1   : > { %v4298_v51 = vadd.f32 %v4297_v16, %v4296_v10  ;;  %v3089_v52 = vadd.f32 %v3088_v3, %v3087_v37 }
 0x5d2   : > { %v3090_v59 = vsel %vm419_vm1, %v11633_v57, 0.0 }
 0x5d3   : > { %v4300_v2 = vadd.f32 %v4299_v47, %v4298_v51  ;;  %v3091_v40 = vadd.f32 %v3090_v59, %v3089_v52  ;;  %v3058_v10 = vpop.f32.mrf.mxu1 }
 0x5d5   : > { %v4301_v12 = vrot.slane %v4300_v2, 4 }
 0x5d7   : > { %v4302_v8 = vadd.f32 %v4301_v12, %v4300_v2  ;;  %v2990_v16 = vpop.f32.mrf.mxu0 }
 0x5d8   : > { %v11637_v0 = vadd.f32 %v3055_v18, %v2990_v16 }
 0x5d9   : > { %v4303_v45 = vrot.slane %v4302_v8, 2 }
 0x5da   : > { %v3092_v51 = vsel %vm419_vm1, %v11637_v0, 0.0 }
 0x5db   : > { %v4304_v7 = vadd.f32 %v4303_v45, %v4302_v8  ;;  %v3093_v25 = vadd.f32 %v3092_v51, %v3091_v40  ;;  %v3061_v2 = vpop.f32.mrf.mxu1 }
 0x5dd   : > { %v4305_v39 = vrot.slane %v4304_v7, 1 }
 0x5df   : > { %v4306_v14 = vadd.f32 %v4305_v39, %v4304_v7  ;;  %v2993_v23 = vpop.f32.mrf.mxu0 }
 0x5e0   : > { %v11642_v5 = vadd.f32 %v3058_v10, %v2993_v23 }
 0x5e1   : > { %v4307_v50 = vmul.f32 %v4306_v14, %v13762_v60 }
 0x5e2   : > { %v3094_v53 = vsel %vm419_vm1, %v11642_v5, 0.0 }
 0x5e3   : > { %v4308_v47 = vadd.f32 1e-05, %v4307_v50  ;;  %v3095_v46 = vadd.f32 %v3094_v53, %v3093_v25  ;;  %v3064_v29 = vpop.f32.mrf.mxu1 }
 0x5e5   : > { %7037 = vrsqrt.f32 %v4308_v47  ;;  %vm4315_vm8 = vweird.f32 %v4308_v47 }
 0x5e7   : > { %v2996_v63 = vpop.f32.mrf.mxu0 }
 0x5e8   : > { %v11646_v55 = vadd.f32 %v3061_v2, %v2996_v63 }
 0x5ea   : > { %v3096_v61 = vsel %vm419_vm1, %v11646_v55, 0.0 }
 0x5eb   : > { %v7038_v12 = vpop.eup %7037  ;;  %v3097_v45 = vadd.f32 %v3096_v61, %v3095_v46  ;;  %v3067_v3 = vpop.f32.mrf.mxu1 }
 0x5ec   : > { %v4310_v8 = vmul.f32 %v7038_v12, %v4308_v47  ;;  %vm4316_vm5 = vweird.f32 %v7038_v12 }
 0x5ed   : > { %vm4317_vm9 = vmor %vm4315_vm8, %vm4316_vm5 }
 0x5ee   : > { %v4311_v36 = vmul.f32 %v7038_v12, %v4310_v8 }
 0x5ef   : > { %v2999_v20 = vpop.f32.mrf.mxu0 }
 0x5f0   : > { %v11650_v49 = vadd.f32 %v3064_v29, %v2999_v20  ;;  %v4312_v18 = vmul.f32 0.5, %v4311_v36 }
 0x5f2   : > { %v3098_v7 = vsel %vm419_vm1, %v11650_v49, 0.0  ;;  %v4313_v37 = vsub.f32 1.5, %v4312_v18  ;;  %v914_v18 = vld [vmem:[%s10301_s14 + $0x118] sm:$0xff] }
 0x5f3   : > { %v3099_v11 = vadd.f32 %v3098_v7, %v3097_v45  ;;  %v3070_v14 = vpop.f32.mrf.mxu1  ;;  %5276 = vmatpush.msra.mxu1 %v914_v18 }
 0x5f4   : > { %v4314_v52 = vmul.f32 %v7038_v12, %v4313_v37 }
 0x5f6   : > { %v11658_v10 = vsel %vm4317_vm9, %v7038_v12, %v4314_v52 }
 0x5f7   : > { %v3002_v1 = vpop.f32.mrf.mxu0  ;;  %v4323_v51 = vmul.f32 %v11658_v10, %v11495_v27  ;;  %v4324_v25 = vmul.f32 %v11658_v10, %v11508_v28  ;;  %v4321_v23 = vmul.f32 %v11658_v10, %v11489_v33  ;;  %v4322_v2 = vmul.f32 %v11658_v10, %v11492_v42 }
 0x5f8   : > { %v11654_v39 = vadd.f32 %v3067_v3, %v3002_v1  ;;  %v4319_v53 = vmul.f32 %v11658_v10, %v11483_v43  ;;  %v4320_v46 = vmul.f32 %v11658_v10, %v11486_v21  ;;  %v4325_v21 = vmul.f32 %v11658_v10, %v11515_v56  ;;  %v13768_v56 = vld [vmem:[#allocation3_spill] sm:$0xff]  ;;  %v913_v1 = vld [vmem:[%s10301_s14 + $0x110] sm:$0xff] }
 0x5f9   : > { %v11676_v12 = vmax.f32 %v4323_v51, 0.0  ;;  %v11678_v28 = vmax.f32 %v4324_v25, 0.0  ;;  %v11680_v63 = vmax.f32 %v4321_v23, 0.0  ;;  %v11682_v33 = vmax.f32 %v4322_v2, 0.0  ;;  %5277 = vmatpush.msra.mxu1 %v913_v1 }
 0x5fa   : > { %v3100_v59 = vsel %vm419_vm1, %v11654_v39, 0.0  ;;  %v11684_v42 = vmax.f32 %v4319_v53, 0.0  ;;  %v11686_v8 = vmax.f32 %v4320_v46, 0.0 }
 0x5fb   : > { %v3101_v40 = vadd.f32 %v3100_v59, %v3099_v11  ;;  %v6719_v43 = vpack.i.bf16 %v11678_v28, %v11676_v12  ;;  %v6709_v61 = vpack.i.bf16 %v11682_v33, %v11680_v63  ;;  %v11702_v7 = vrot.slane %v11680_v63, 2 }
 0x5fc   : > { %v6699_v45 = vpack.i.bf16 %v11686_v8, %v11684_v42  ;;  %v11697_v36 = vrot.slane %v11686_v8, 2  ;;  %v11714_v59 = vmax.f32 %v4325_v21, 0.0  ;;  %v11726_v23 = vrot.slane %v11682_v33, 2 }
 0x5fd   : > { %6720 = vrot.lane.b32.xlu0 %v6719_v43, %s7054_s30  ;;  %6710 = vrot.lane.b32.xlu1 %v6709_v61, %s7054_s30  ;;  %v6714_v2 = vpack.i.bf16 %v11676_v12, %v11682_v33  ;;  %v5072_v53 = vrot.slane %v11702_v7, 7  ;;  %v13154_v43 = vrot.slane %v11678_v28, 1  ;;  %v4326_v21 = vmul.f32 %v11658_v10, %v11521_v62 }
 0x5fe   : > { %6700 = vrot.lane.b32.xlu2 %v6699_v45, %s7054_s30  ;;  %v11709_v11 = vsel %vm1006_vm6, %v11697_v36, %v13768_v56  ;;  %v5066_v3 = vrot.slane %v11697_v36, 7  ;;  %v6724_v25 = vpack.i.bf16 %v11714_v59, %v11678_v28  ;;  %v13155_v61 = vrot.slane %v11680_v63, 1 }
 0x5ff   : > { %v3005_v16 = vpop.f32.mrf.mxu0  ;;  %v5067_v52 = vrot.slane %v11709_v11, 7  ;;  %v13153_v45 = vrot.slane %v11682_v33, 1  ;;  %v11749_v18 = vsel %vm1006_vm6, %v11726_v23, %v13768_v56 }
 0x600   : > { %v11660_v50 = vadd.f32 %v3070_v14, %v3005_v16  ;;  %v11720_v16 = vsel %vm1006_vm6, %v11702_v7, %v13768_v56 }
 0x601   : > { %v5068_v14 = vsel %vm1676_vm7, %v5066_v3, %v5067_v52  ;;  %v5073_v46 = vrot.slane %v11720_v16, 7  ;;  %v11764_v52 = vmax.f32 %v4326_v21, 0.0 }
 0x602   : > { %v3102_v47 = vsel %vm419_vm1, %v11660_v50, 0.0  ;;  %5650 = vmatmul.msk.f32.vlgmr.msra.gmra.mxu1 %vm419_vm1, %v5068_v14  ;;  %v5079_v14 = vrot.slane %v11749_v18, 7 }
 0x603   : > { %v3103_v27 = vadd.f32 %v3102_v47, %v3101_v40  ;;  %v6704_v47 = vpack.i.bf16 %v11680_v63, %v11686_v8  ;;  %v5074_v3 = vsel %vm1676_vm7, %v5072_v53, %v5073_v46  ;;  %v4365_v46 = vrot.slane %v11684_v42, 1 }
 0x605   : > { %v3104_v29 = vrot.slane %v3103_v27, 4  ;;  %6725 = vrot.lane.b32.xlu0 %v6724_v25, %s7055_s7  ;;  %6715 = vrot.lane.b32.xlu1 %v6714_v2, %s7055_s7 }
 0x606   : > { %6705 = vrot.lane.b32.xlu2 %v6704_v47, %s7055_s7 }
 0x607   : > { %v3105_v20 = vadd.f32 %v3104_v29, %v3103_v27  ;;  %v13152_v29 = vrot.slane %v11676_v12, 1 }
 0x609   : > { %v3106_v37 = vrot.slane %v3105_v20, 2  ;;  %v6749_v1 = vpack.i.bf16 %v13154_v43, %v13152_v29 }
 0x60a   : > { %5651 = vmatmul.msk.f32.gmra.mxu1 %vm419_vm1, %v5074_v3 }
 0x60b   : > { %v3107_v40 = vadd.f32 %v3106_v37, %v3105_v20 }
 0x60d   : > { %v3108_v51 = vrot.slane %v3107_v40, 1  ;;  %6750 = vrot.lane.b32.xlu1 %v6749_v1, %s7056_s8 }
 0x60f   : > { %v3109_v27 = vadd.f32 %v3108_v51, %v3107_v40 }
 0x611   : > { %v11744_v20 = vmul.f32 %v3109_v27, %v13762_v60  ;;  %v4366_v27 = vrot.slane %v11686_v8, 1 }
 0x613   : > { %v11754_v62 = vsub.f32 %v11585_v35, %v11744_v20  ;;  %v11758_v37 = vsub.f32 %v11578_v6, %v11744_v20  ;;  %v11768_v40 = vsub.f32 %v11589_v26, %v11744_v20  ;;  %v11775_v35 = vpack.i.bf16 %v13153_v45, %v13155_v61 }
 0x614   : > { %v5078_v6 = vrot.slane %v11726_v23, 7  ;;  %v11781_v51 = vsub.f32 %v11627_v9, %v11744_v20  ;;  %v11785_v26 = vsub.f32 %v11633_v57, %v11744_v20  ;;  %v11789_v25 = vsub.f32 %v11637_v0, %v11744_v20 }
 0x615   : > { %13769 = vst [vmem:[#allocation36_spill] sm:$0xff] %v11754_v62  ;;  %v11793_v2 = vsub.f32 %v11642_v5, %v11744_v20  ;;  %v11797_v47 = vsub.f32 %v11646_v55, %v11744_v20  ;;  %v11801_v9 = vsub.f32 %v11650_v49, %v11744_v20  ;;  %v11805_v57 = vsub.f32 %v11654_v39, %v11744_v20 }
 0x616   : > { %13770 = vst [vmem:[#allocation104_spill] sm:$0xff] %v11758_v37  ;;  %v4328_v0 = vmul.f32 %v11658_v10, %v11535_v41  ;;  %v11811_v53 = vsub.f32 %v11598_v32, %v11744_v20  ;;  %v3127_v5 = vmul.f32 %v11754_v62, %v11754_v62  ;;  %v3128_v55 = vmul.f32 %v11758_v37, %v11758_v37 }
 0x617   : > { %13771 = vst [vmem:[#allocation13_spill] sm:$0xff] %v11768_v40  ;;  %6745 = vrot.lane.b32.xlu0 %v11775_v35, %s7056_s8  ;;  %v6729_v49 = vpack.i.bf16 %v11764_v52, %v11714_v59  ;;  %v11823_v41 = vrot.slane %v11676_v12, 2  ;;  %v11827_v32 = vsub.f32 %v11607_v48, %v11744_v20  ;;  %v3129_v39 = vmul.f32 %v11768_v40, %v11768_v40 }
 0x618   : > { %13772 = vst [vmem:[#allocation8_spill] sm:$0xff] %v11811_v53  ;;  %v5080_v21 = vsel %vm1676_vm7, %v5078_v6, %v5079_v14  ;;  %v11835_v3 = vmax.f32 %v4328_v0, 0.0  ;;  %v11839_v29 = vsub.f32 %v11613_v17, %v11744_v20  ;;  %v3130_v48 = vmul.f32 %v11811_v53, %v11811_v53  ;;  %6775 = vrot.lane.b32.xlu1 %v6749_v1, %s7057_s9 }
 0x619   : > { %13773 = vst [vmem:[#allocation106_spill] sm:$0xff] %v11827_v32  ;;  %6730 = vrot.lane.b32.xlu2 %v6729_v49, %s7054_s30  ;;  %v3143_v45 = vsel %vm419_vm1, %v3127_v5, 0.0  ;;  %v3144_v43 = vsel %vm419_vm1, %v3128_v55, 0.0  ;;  %5652 = vmatmul.msk.f32.gmra.mxu1 %vm419_vm1, %v5080_v21  ;;  %v11849_v6 = vsel %vm1006_vm6, %v11823_v41, %v13768_v56  ;;  %v11853_v14 = vsub.f32 %v11618_v15, %v11744_v20 }
 0x61a   : > { %v3145_v49 = vadd.f32 %v3144_v43, %v3143_v45  ;;  %v3131_v17 = vmul.f32 %v11827_v32, %v11827_v32  ;;  %v3146_v0 = vsel %vm419_vm1, %v3129_v39, 0.0  ;;  %v6754_v5 = vpack.i.bf16 %v4366_v27, %v4365_v46 }
 0x61b   : > { %v6734_v43 = vpack.i.bf16 %v11835_v3, %v11764_v52  ;;  %v5084_v45 = vrot.slane %v11823_v41, 7  ;;  %v11863_v55 = vsub.f32 %v11623_v4, %v11744_v20  ;;  %v3132_v15 = vmul.f32 %v11839_v29, %v11839_v29 }
 0x61c   : > { %v3147_v61 = vadd.f32 %v3146_v0, %v3145_v49  ;;  %v3148_v21 = vsel %vm419_vm1, %v3130_v48, 0.0  ;;  %v5085_v39 = vrot.slane %v11849_v6, 7  ;;  %v11872_v49 = vrot.slane %v11678_v28, 2 }
 0x61d   : > { %v3133_v0 = vmul.f32 %v11853_v14, %v11853_v14  ;;  %v3150_v4 = vsel %vm419_vm1, %v3131_v17, 0.0  ;;  %v4371_v48 = vrot.slane %v11714_v59, 1  ;;  %v4327_v53 = vmul.f32 %v11658_v10, %v11527_v24 }
 0x61e   : > { %v3149_v46 = vadd.f32 %v3148_v21, %v3147_v61  ;;  %v3134_v61 = vmul.f32 %v11863_v55, %v11863_v55  ;;  %v3152_v1 = vsel %vm419_vm1, %v3132_v15, 0.0  ;;  %v5086_v21 = vsel %vm1676_vm7, %v5084_v45, %v5085_v39 }
 0x61f   : > { %6755 = vrot.lane.b32.xlu0 %v6754_v5, %s7057_s9  ;;  %v11889_v17 = vsel %vm1006_vm6, %v11872_v49, %v13768_v56  ;;  %v3154_v24 = vsel %vm419_vm1, %v3133_v0, 0.0  ;;  %v13775_v15 = vrot.slane %v11678_v28, 1  ;;  %v3136_v39 = vmul.f32 %v11785_v26, %v11785_v26 }
 0x620   : > { %v3151_v32 = vadd.f32 %v3150_v4, %v3149_v46  ;;  %v13774_v46 = vrot.slane %v11680_v63, 1  ;;  %v5091_v0 = vrot.slane %v11889_v17, 7 }
 0x621   : > { %6735 = vrot.lane.b32.xlu2 %v6734_v43, %s7055_s7  ;;  %5653 = vmatmul.msk.f32.gmra.mxu1 %vm419_vm1, %v5086_v21  ;;  %v3135_v43 = vmul.f32 %v11781_v51, %v11781_v51  ;;  %v6779_v45 = vpack.i.bf16 %v4371_v48, %v13775_v15  ;;  %v5090_v21 = vrot.slane %v11872_v49, 7 }
 0x622   : > { %v3153_v40 = vadd.f32 %v3152_v1, %v3151_v32  ;;  %v6759_v4 = vpack.i.bf16 %v13774_v46, %v4366_v27  ;;  %v11898_v32 = vmax.f32 %v4327_v53, 0.0  ;;  %v3156_v1 = vsel %vm419_vm1, %v3134_v61, 0.0 }
 0x623   : > { %6780 = vrot.lane.b32.xlu1 %v6779_v45, %s7058_s10  ;;  %v3137_v53 = vmul.f32 %v11789_v25, %v11789_v25  ;;  %v3158_v27 = vsel %vm419_vm1, %v3135_v43, 0.0  ;;  %v4583_v61 = vrot.slane %v11764_v52, 1  ;;  %v5092_v15 = vsel %vm1676_vm7, %v5090_v21, %v5091_v0 }
 0x624   : > { %v3155_v37 = vadd.f32 %v3154_v24, %v3153_v40  ;;  %v11908_v40 = vrot.slane %v11714_v59, 2  ;;  %v3138_v24 = vmul.f32 %v11793_v2, %v11793_v2  ;;  %v3140_v21 = vmul.f32 %v11801_v9, %v11801_v9 }
 0x626   : > { %v3157_v62 = vadd.f32 %v3156_v1, %v3155_v37  ;;  %v4372_v37 = vrot.slane %v11898_v32, 1  ;;  %v11924_v43 = vsel %vm1006_vm6, %v11908_v40, %v13768_v56  ;;  %v3162_v1 = vsel %vm419_vm1, %v3137_v53, 0.0 }
 0x627   : > { %6760 = vrot.lane.b32.xlu0 %v6759_v4, %s7058_s10  ;;  %v3160_v4 = vsel %vm419_vm1, %v3136_v39, 0.0  ;;  %v6784_v39 = vpack.i.bf16 %v4583_v61, %v4371_v48  ;;  %v11942_v53 = vrot.slane %v11764_v52, 2 }
 0x628   : > { %v3159_v46 = vadd.f32 %v3158_v27, %v3157_v62  ;;  %v3139_v62 = vmul.f32 %v11797_v47, %v11797_v47  ;;  %v3164_v27 = vsel %vm419_vm1, %v3138_v24, 0.0 }
 0x629   : > { %6740 = vrot.lane.b32.xlu2 %v6754_v5, %s7056_s8  ;;  %5654 = vmatmul.msk.f32.gmra.mxu1 %vm419_vm1, %v5092_v15  ;;  %v11928_v5 = vsub.f32 %v11660_v50, %v11744_v20  ;;  %v5097_v50 = vrot.slane %v11924_v43, 7  ;;  %v4421_v20 = vrot.slane %v11684_v42, 2 }
 0x62a   : > { %v3161_v45 = vadd.f32 %v3160_v4, %v3159_v46  ;;  %v6794_v46 = vpack.i.bf16 %v4372_v37, %v4371_v48  ;;  %v5096_v4 = vrot.slane %v11908_v40, 7  ;;  %v3166_v24 = vsel %vm419_vm1, %v3139_v62, 0.0 }
 0x62b   : > { %v11950_v48 = vrot.slane %v11835_v3, 1 }
 0x62c   : > { %v3163_v0 = vadd.f32 %v3162_v1, %v3161_v45  ;;  %6795 = vrot.lane.b32.xlu1 %v6794_v46, %s7056_s8  ;;  %v3141_v45 = vmul.f32 %v11805_v57, %v11805_v57  ;;  %v5098_v52 = vsel %vm1676_vm7, %v5096_v4, %v5097_v50  ;;  %v13776_v50 = vrot.slane %v11682_v33, 1 }
 0x62e   : > { %v3165_v15 = vadd.f32 %v3164_v27, %v3163_v0  ;;  %v3168_v0 = vsel %vm419_vm1, %v3140_v21, 0.0  ;;  %v4422_v27 = vsel %vm1006_vm6, %v4421_v20, %v13768_v56  ;;  %v3170_v62 = vsel %vm419_vm1, %v3141_v45, 0.0 }
 0x62f   : > { %6785 = vrot.lane.b32.xlu0 %v6784_v39, %s7057_s9  ;;  %v3142_v39 = vmul.f32 %v11928_v5, %v11928_v5  ;;  %v6799_v21 = vpack.i.bf16 %v4422_v27, %v4421_v20  ;;  %v6824_v27 = vpack.i.bf16 %v11709_v11, %v11697_v36  ;;  %v910_v36 = vld [vmem:[%s10301_s14 + $0xf8] sm:$0xff] }
 0x630   : > { %v3167_v1 = vadd.f32 %v3166_v24, %v3165_v15  ;;  %v6789_v15 = vpack.i.bf16 %v11950_v48, %v4583_v61 }
 0x631   : > { %6765 = vrot.lane.b32.xlu2 %v11775_v35, %s7057_s9  ;;  %5655 = vmatmul.msk.f32.gmra.mxu1 %vm419_vm1, %v5098_v52  ;;  %v11962_v35 = vsel %vm1006_vm6, %v11942_v53, %v13768_v56  ;;  %v3172_v4 = vsel %vm419_vm1, %v3142_v39, 0.0  ;;  %v5102_v52 = vrot.slane %v11942_v53, 7 }
 0x632   : > { %v3169_v46 = vadd.f32 %v3168_v0, %v3167_v1  ;;  %v13777_v1 = vrot.slane %v11676_v12, 1  ;;  %v5103_v34 = vrot.slane %v11962_v35, 7 }
 0x634   : > { %v3171_v24 = vadd.f32 %v3170_v62, %v3169_v46  ;;  %v6769_v0 = vpack.i.bf16 %v13777_v1, %v13776_v50  ;;  %6800 = vrot.lane.b32.xlu1 %v6799_v21, %s7059_s11  ;;  %v5104_v20 = vsel %vm1676_vm7, %v5102_v52, %v5103_v34  ;;  %v912_v62 = vld [vmem:[%s10301_s14 + $0x108] sm:$0xff]  ;;  %v11988_v34 = vrot.slane %v11835_v3, 2  ;;  %v909_v1 = vld [vmem:[%s10301_s14 + $0xf0] sm:$0xff]  ;;  %v13778_v52 = vld [vmem:[#allocation42_spill] sm:$0xff] }
 0x635   : > { %5197 = vmatpush.msra.mxu0 %v912_v62  ;;  %v907_v62 = vld [vmem:[%s10301_s14 + $0xe0] sm:$0xff] }
 0x636   : > { %v3173_v45 = vadd.f32 %v3172_v4, %v3171_v24  ;;  %v911_v24 = vld [vmem:[%s10301_s14 + $0x100] sm:$0xff]  ;;  %v4329_v4 = vmul.f32 %v11658_v10, %v11541_v44  ;;  %v12000_v44 = vsel %vm1006_vm6, %v11988_v34, %v13768_v56 }
 0x637   : > { %6790 = vrot.lane.b32.xlu0 %v6789_v15, %s7058_s10  ;;  %v6814_v15 = vpack.i.bf16 %v11950_v48, %v4372_v37  ;;  %5198 = vmatpush.msra.mxu0 %v911_v24 }
 0x638   : > { %v3174_v61 = vrot.slane %v3173_v45, 4  ;;  %v11993_v37 = vmax.f32 %v4329_v4, 0.0  ;;  %v906_v4 = vld [vmem:[%s10301_s14 + $0xd8] sm:$0xff] }
 0x639   : > { %6770 = vrot.lane.b32.xlu2 %v6769_v0, %s7058_s10  ;;  %5656 = vmatmul.msk.f32.gmra.mxu1 %vm419_vm1, %v5104_v20  ;;  %v6809_v20 = vpack.i.bf16 %v11835_v3, %v11898_v32 }
 0x63a   : > { %v3175_v39 = vadd.f32 %v3174_v61, %v3173_v45  ;;  %5199 = vmatpush.msra.mxu0 %v910_v36  ;;  %v908_v45 = vld [vmem:[%s10301_s14 + $0xe8] sm:$0xff]  ;;  %v4331_v36 = vmul.f32 %v11658_v10, %v11553_v22 }
 0x63c   : > { %v3176_v46 = vrot.slane %v3175_v39, 2  ;;  %6805 = vrot.lane.b32.xlu1 %v6799_v21, %s7053_s29  ;;  %v6829_v21 = vpack.i.bf16 %v11720_v16, %v11702_v7  ;;  %5200 = vmatpush.msra.mxu0 %v909_v1  ;;  %v12016_v7 = vrot.slane %v11993_v37, 2  ;;  %v12041_v22 = vmax.f32 %v4331_v36, 0.0 }
 0x63d   : > { %v6859_v36 = vpack.i.bf16 %v11849_v6, %v11823_v41 }
 0x63e   : > { %v3177_v50 = vadd.f32 %v3176_v46, %v3175_v39  ;;  %v5111_v39 = vrot.slane %v11988_v34, 7  ;;  %v5112_v46 = vrot.slane %v12000_v44, 7  ;;  %5201 = vmatpush.msra.mxu0 %v908_v45 }
 0x63f   : > { %6825 = vrot.lane.b32.xlu0 %v6824_v27, %s7053_s29 }
 0x640   : > { %v3178_v11 = vrot.slane %v3177_v50, 1  ;;  %5202 = vmatpush.msra.mxu0 %v907_v62  ;;  %v5113_v16 = vsel %vm1676_vm7, %v5111_v39, %v5112_v46  ;;  %v905_v46 = vld [vmem:[%s10301_s14 + $0xd0] sm:$0xff] }
 0x641   : > { %6815 = vrot.lane.b32.xlu2 %v6814_v15, %s7057_s9  ;;  %5657 = vmatmul.msk.f32.gmra.mxu1 %vm419_vm1, %v13778_v52  ;;  %v4330_v15 = vmul.f32 %v11658_v10, %v11547_v31  ;;  %v12027_v31 = vsel %vm1006_vm6, %v12016_v7, %v13768_v56 }
 0x642   : > { %v3179_v0 = vadd.f32 %v3178_v11, %v3177_v50  ;;  %5203 = vmatpush.msra.mxu0 %v906_v4  ;;  %v5117_v11 = vrot.slane %v12016_v7, 7  ;;  %v5118_v1 = vrot.slane %v12027_v31, 7 }
 0x643   : > { %v12021_v50 = vmax.f32 %v4330_v15, 0.0 }
 0x644   : > { %v3180_v61 = vmul.f32 %v3179_v0, %v13762_v60  ;;  %6810 = vrot.lane.b32.xlu1 %v6809_v20, %s7054_s30  ;;  %v5119_v20 = vsel %vm1676_vm7, %v5117_v11, %v5118_v1  ;;  %5204 = vmatpush.msra.mxu0 %v905_v46  ;;  %v6879_v46 = vpack.i.bf16 %v11889_v17, %v11872_v49 }
 0x645   : > { %v12038_v45 = vrot.slane %v12021_v50, 2  ;;  %v12055_v15 = vpack.i.bf16 %v12021_v50, %v11993_v37 }
 0x646   : > { %v3181_v24 = vadd.f32 1e-05, %v3180_v61 }
 0x647   : > { %6830 = vrot.lane.b32.xlu0 %v6829_v21, %s7059_s11  ;;  %v12050_v39 = vsel %vm1006_vm6, %v12038_v45, %v13768_v56  ;;  %v5123_v1 = vrot.slane %v12038_v45, 7 }
 0x648   : > { %7039 = vrsqrt.f32 %v3181_v24  ;;  %vm3188_vm2 = vweird.f32 %v3181_v24 }
 0x649   : > { %6820 = vrot.lane.b32.xlu2 %v6824_v27, %s7059_s11  ;;  %5658 = vmatmul.msk.f32.gmra.mxu1 %vm419_vm1, %v5113_v16  ;;  %v6844_v27 = vpack.i.bf16 %v11749_v18, %v11726_v23  ;;  %v4374_v23 = vrot.slane %v11993_v37, 1  ;;  %v4375_v18 = vrot.slane %v12021_v50, 1  ;;  %v4332_v16 = vmul.f32 %v11658_v10, %v11559_v30 }
 0x64a   : > { %v5124_v30 = vrot.slane %v12050_v39, 7 }
 0x64b   : > { %v12061_v4 = vpack.i.bf16 %v4375_v18, %v4374_v23  ;;  %v12080_v6 = vmax.f32 %v4332_v16, 0.0 }
 0x64c   : > { %6845 = vrot.lane.b32.xlu1 %v6844_v27, %s7059_s11 }
 0x64d   : > { %13779 = vst [vmem:[#allocation77_spill] sm:$0xff] %v12080_v6 }
 0x64e   : > { %v7040_v0 = vpop.eup %7039 }
 0x64f   : > { %6835 = vrot.lane.b32.xlu0 %v6829_v21, %s7053_s29  ;;  %v3183_v61 = vmul.f32 %v7040_v0, %v3181_v24  ;;  %vm3189_vm10 = vweird.f32 %v7040_v0 }
 0x650   : > { %vm3190_vm3 = vmor %vm3188_vm2, %vm3189_vm10 }
 0x651   : > { %6855 = vrot.lane.b32.xlu2 %v6844_v27, %s7053_s29  ;;  %v3184_v21 = vmul.f32 %v7040_v0, %v3183_v61  ;;  %5659 = vmatmul.msk.f32.gmra.mxu1 %vm419_vm1, %v5119_v20  ;;  %v12066_v27 = vrot.slane %v12041_v22, 2  ;;  %v5125_v20 = vsel %vm1676_vm7, %v5123_v1, %v5124_v30 }
 0x653   : > { %v3185_v62 = vmul.f32 0.5, %v3184_v21  ;;  %v12078_v41 = vsel %vm1006_vm6, %v12066_v27, %v13768_v56  ;;  %v5129_v24 = vrot.slane %v12066_v27, 7 }
 0x654   : > { %6850 = vrot.lane.b32.xlu1 %v12061_v4, %s7058_s10  ;;  %v5130_v1 = vrot.slane %v12078_v41, 7 }
 0x655   : > { %v3186_v11 = vsub.f32 1.5, %v3185_v62  ;;  %v904_v62 = vld [vmem:[%s10301_s14 + $0xc8] sm:$0xff] }
 0x656   : > { %5205 = vmatpush.msra.mxu0 %v904_v62  ;;  %v4334_v62 = vmul.f32 %v11658_v10, %v11571_v13  ;;  %v6919_v13 = vpack.i.bf16 %v11962_v35, %v11942_v53  ;;  %v4376_v53 = vrot.slane %v12041_v22, 1  ;;  %v13162_v35 = vrot.slane %v12080_v6, 1 }
 0x657   : > { %6840 = vrot.lane.b32.xlu0 %v12055_v15, %s7055_s7  ;;  %v3187_v61 = vmul.f32 %v7040_v0, %v3186_v11 }
 0x659   : > { %6860 = vrot.lane.b32.xlu2 %v6859_v36, %s7059_s11  ;;  %v12082_v21 = vsel %vm3190_vm3, %v7040_v0, %v3187_v61  ;;  %5660 = vmatmul.msk.f32.gmra.mxu1 %vm419_vm1, %v5125_v20  ;;  %v6884_v61 = vpack.i.bf16 %v11924_v43, %v11908_v40  ;;  %v6869_v20 = vpack.i.bf16 %v4374_v23, %v11950_v48  ;;  %v12173_v48 = vmax.f32 %v4334_v62, 0.0 }
 0x65a   : > { %13780 = vst [vmem:[#allocation76_spill] sm:$0xff] %v12082_v21  ;;  %v12092_v11 = vmul.f32 %v12082_v21, %v11839_v29  ;;  %v12096_v16 = vmul.f32 %v12082_v21, %v11853_v14  ;;  %v12100_v0 = vmul.f32 %v12082_v21, %v11863_v55  ;;  %v12105_v49 = vmul.f32 %v12082_v21, %v11781_v51 }
 0x65b   : > { %v12109_v17 = vmul.f32 %v12082_v21, %v11785_v26  ;;  %v12113_v29 = vmul.f32 %v12082_v21, %v11789_v25  ;;  %v12117_v14 = vmul.f32 %v12082_v21, %v11793_v2  ;;  %v12121_v55 = vmul.f32 %v12082_v21, %v11797_v47 }
 0x65c   : > { %13781 = vst [vmem:[#allocation105_spill] sm:$0xff] %v12092_v11  ;;  %v12125_v51 = vmul.f32 %v12082_v21, %v11801_v9  ;;  %v12129_v26 = vmul.f32 %v12082_v21, %v11805_v57  ;;  %v12133_v25 = vmul.f32 %v12082_v21, %v11928_v5  ;;  %v4333_v2 = vmul.f32 %v11658_v10, %v11565_v19  ;;  %v12143_v9 = vpop.permute.xlu2 %6700 }
 0x65d   : > { %13782 = vst [vmem:[#allocation33_spill] sm:$0xff] %v12096_v16  ;;  %6880 = vrot.lane.b32.xlu1 %v6879_v46, %s7053_s29  ;;  %v12140_v47 = vrot.slane %v12080_v6, 2  ;;  %v5131_v57 = vsel %vm1676_vm7, %v5129_v24, %v5130_v1  ;;  %v6904_v19 = vpack.i.bf16 %v12080_v6, %v12041_v22  ;;  %v4435_v10 = vrot.slane %v11898_v32, 2 }
 0x65e   : > { %13783 = vst [vmem:[#allocation9_spill] sm:$0xff] %v12100_v0  ;;  %v12146_v30 = vmax.f32 %v4333_v2, 0.0  ;;  %v902_v2 = vld [vmem:[%s10301_s14 + $0xb8] sm:$0xff] }
 0x65f   : > { %13784 = vst [vmem:[#allocation11_spill] sm:$0xff] %v12105_v49  ;;  %6875 = vrot.lane.b32.xlu0 %v6879_v46, %s7059_s11  ;;  %v12152_v5 = vsel %vm1006_vm6, %v12140_v47, %v13768_v56  ;;  %v5135_v46 = vrot.slane %v12140_v47, 7 }
 0x660   : > { %13785 = vst [vmem:[#allocation10_spill] sm:$0xff] %v12109_v17  ;;  %v5136_v24 = vrot.slane %v12152_v5, 7  ;;  %v12167_v1 = vrot.slane %v12146_v30, 2 }
 0x661   : > { %13786 = vst [vmem:[#allocation103_spill] sm:$0xff] %v12113_v29  ;;  %6865 = vrot.lane.b32.xlu2 %v6859_v36, %s7053_s29  ;;  %5661 = vmatmul.msk.f32.gmra.mxu1 %vm419_vm1, %v5131_v57  ;;  %v903_v36 = vld [vmem:[%s10301_s14 + $0xc0] sm:$0xff] }
 0x662   : > { %13787 = vst [vmem:[#allocation75_spill] sm:$0xff] %v12117_v14  ;;  %5206 = vmatpush.msra.mxu0 %v903_v36  ;;  %v5137_v43 = vsel %vm1676_vm7, %v5135_v46, %v5136_v24  ;;  %v12179_v23 = vsel %vm1006_vm6, %v12167_v1, %v13768_v56  ;;  %v5141_v57 = vrot.slane %v12167_v1, 7  ;;  %v4436_v46 = vsel %vm1006_vm6, %v4435_v10, %v13768_v56 }
 0x663   : > { %13788 = vst [vmem:[#allocation87_spill] sm:$0xff] %v12121_v55  ;;  %v5142_v36 = vrot.slane %v12179_v23, 7  ;;  %v13794_v55 = vld [vmem:[#allocation37_spill] sm:$0xff] }
 0x664   : > { %13789 = vst [vmem:[#allocation16_spill] sm:$0xff] %v12125_v51  ;;  %v12170_v40 = vpop.permute.xlu2 %6705  ;;  %5207 = vmatpush.msra.mxu0 %v902_v2 }
 0x665   : > { %13790 = vst [vmem:[#allocation97_spill] sm:$0xff] %v12129_v26  ;;  %6885 = vrot.lane.b32.xlu1 %v6884_v61, %s7059_s11  ;;  %v5143_v62 = vsel %vm1676_vm7, %v5141_v57, %v5142_v36  ;;  %v6707_v17 = vunpack.i.l.bf16 %v12170_v40 }
 0x666   : > { %13791 = vst [vmem:[#allocation95_spill] sm:$0xff] %v12133_v25  ;;  %v6989_v25 = vpack.i.bf16 %v12078_v41, %v12066_v27  ;;  %v7009_v41 = vpack.i.bf16 %v12152_v5, %v12140_v47 }
 0x667   : > { %13792 = vst [vmem:[#allocation7_spill] sm:$0xff] %v12146_v30  ;;  %6905 = vrot.lane.b32.xlu0 %v6904_v19, %s7055_s7 }
 0x669   : > { %6870 = vrot.lane.b32.xlu2 %v6869_v20, %s7056_s8  ;;  %5662 = vmatmul.msk.f32.gmra.mxu1 %vm419_vm1, %v5137_v43  ;;  %v12191_v20 = vrot.slane %v12173_v48, 2  ;;  %v6924_v43 = vpack.i.bf16 %v4436_v46, %v4435_v10 }
 0x66b   : > { %v5147_v2 = vrot.slane %v12191_v20, 7 }
 0x66d   : > { %6890 = vrot.lane.b32.xlu1 %v12055_v15, %s7054_s30  ;;  %v12205_v15 = vsel %vm1006_vm6, %v12191_v20, %v13768_v56 }
 0x66e   : > { %v5148_v57 = vrot.slane %v12205_v15, 7 }
 0x66f   : > { %6920 = vrot.lane.b32.xlu0 %v6919_v13, %s7059_s11  ;;  %v6909_v13 = vpack.i.bf16 %v13162_v35, %v4376_v53  ;;  %v12216_v56 = vpop.permute.xlu0 %6720  ;;  %v12218_v36 = vpop.permute.xlu1 %6710  ;;  %v6954_v35 = vpack.i.bf16 %v12000_v44, %v11988_v34  ;;  %v898_v34 = vld [vmem:[%s10301_s14 + $0x98] sm:$0xff] }
 0x670   : > { %v5149_v46 = vsel %vm1676_vm7, %v5147_v2, %v5148_v57  ;;  %v6722_v5 = vunpack.i.l.bf16 %v12216_v56 }
 0x671   : > { %6895 = vrot.lane.b32.xlu2 %v6884_v61, %s7053_s29  ;;  %5663 = vmatmul.msk.f32.gmra.mxu1 %vm419_vm1, %v5143_v62  ;;  %v901_v61 = vld [vmem:[%s10301_s14 + $0xb0] sm:$0xff]  ;;  %v12226_v62 = vpack.i.bf16 %v12173_v48, %v12146_v30 }
 0x672   : > { %5208 = vmatpush.msra.mxu0 %v901_v61  ;;  %v900_v61 = vld [vmem:[%s10301_s14 + $0xa8] sm:$0xff] }
 0x673   : > { %v12198_v24 = vpop.permute.xlu2 %6730 }
 0x674   : > { %5209 = vmatpush.msra.mxu0 %v900_v61 }
 0x675   : > { %6910 = vrot.lane.b32.xlu1 %v6909_v13, %s7058_s10 }
 0x677   : > { %6925 = vrot.lane.b32.xlu0 %v6924_v43, %s7059_s11  ;;  %v12235_v2 = vpop.permute.xlu0 %6725  ;;  %v12237_v57 = vpop.permute.xlu1 %6715 }
 0x679   : > { %6900 = vrot.lane.b32.xlu2 %v12061_v4, %s7057_s9  ;;  %5664 = vmatmul.msk.f32.gmra.mxu1 %vm419_vm1, %v5149_v46  ;;  %v6914_v4 = vpack.i.bf16 %v4376_v53, %v4375_v18  ;;  %v899_v18 = vld [vmem:[%s10301_s14 + $0xa0] sm:$0xff] }
 0x67a   : > { %5210 = vmatpush.msra.mxu0 %v899_v18  ;;  %v13163_v18 = vrot.slane %v12173_v48, 1 }
 0x67b   : > { %v12220_v10 = vpop.permute.xlu2 %6735 }
 0x67c   : > { %5211 = vmatpush.msra.mxu0 %v898_v34 }
 0x67d   : > { %6930 = vrot.lane.b32.xlu1 %v6924_v43, %s7053_s29 }
 0x67f   : > { %6950 = vrot.lane.b32.xlu0 %v12226_v62, %s7055_s7  ;;  %v12251_v43 = vpop.permute.xlu1 %6750 }
 0x680   : > { %v6752_v51 = vunpack.i.l.bf16 %v12251_v43 }
 0x681   : > { %6915 = vrot.lane.b32.xlu2 %v6914_v4, %s7056_s8  ;;  %5665 = vmatmul.msk.f32.gmra.mxu1 %vm419_vm1, %v13778_v52  ;;  %v6959_v52 = vpack.i.bf16 %v12027_v31, %v12016_v7  ;;  %v12267_v4 = vrot.slane %v12146_v30, 1  ;;  %v6984_v31 = vpack.i.bf16 %v12050_v39, %v12038_v45  ;;  %v13793_v45 = vrot.slane %v12080_v6, 1 }
 0x683   : > { %v12239_v46 = vpop.permute.xlu2 %6740  ;;  %v6979_v39 = vpack.i.bf16 %v12267_v4, %v13793_v45  ;;  %v7019_v45 = vpack.i.bf16 %v12179_v23, %v12167_v1 }
 0x684   : > { %v6743_v27 = vunpack.i.h.bf16 %v12239_v46 }
 0x685   : > { %6935 = vrot.lane.b32.xlu1 %v6904_v19, %s7054_s30  ;;  %v897_v19 = vld [vmem:[%s10301_s14 + $0x90] sm:$0xff] }
 0x686   : > { %5212 = vmatpush.msra.mxu0 %v897_v19  ;;  %v4819_v29 = vsel %vm419_vm1, 0.0, %v6743_v27  ;;  %v4820_v1 = vsel %vm419_vm1, %v11686_v8, %v6743_v27 }
 0x687   : > { %6955 = vrot.lane.b32.xlu0 %v6954_v35, %s7053_s29 }
 0x689   : > { %6940 = vrot.lane.b32.xlu2 %v6954_v35, %s7059_s11  ;;  %v12249_v53 = vpop.permute.xlu0 %6745 }
 0x68a   : > { %v12264_v35 = vpop.permute.xlu1 %6775  ;;  %v6748_v49 = vunpack.i.h.bf16 %v12249_v53 }
 0x68b   : > { %v12253_v61 = vpop.permute.xlu2 %6765 }
 0x68c   : > { %v4824_v16 = vsel %vm419_vm1, %v11682_v33, %v6748_v49 }
 0x68d   : > { %6965 = vrot.lane.b32.xlu1 %v6959_v52, %s7053_s29 }
 0x68f   : > { %6960 = vrot.lane.b32.xlu0 %v6959_v52, %s7059_s11 }
 0x691   : > { %6945 = vrot.lane.b32.xlu2 %v6909_v13, %s7057_s9  ;;  %v12261_v44 = vpop.permute.xlu0 %6755  ;;  %v6969_v13 = vpack.i.bf16 %v13163_v18, %v12267_v4  ;;  %v6702_v18 = vunpack.i.l.bf16 %v12143_v9 }
 0x692   : > { %v6757_v23 = vunpack.i.l.bf16 %v12261_v44 }
 0x693   : > { %v12270_v7 = vpop.permute.xlu2 %6770  ;;  %v4873_v14 = vsel %vm1480_vm12, %v13794_v55, %v6702_v18  ;;  %v4823_v18 = vsel %vm419_vm1, 0.0, %v6748_v49 }
 0x694   : > { %v4903_v60 = vsel %vm1512_vm13, %v13727_v38, %v6757_v23  ;;  %v4904_v8 = vsel %vm1512_vm13, %v4873_v14, %v6757_v23 }
 0x695   : > { %6970 = vrot.lane.b32.xlu1 %v6969_v13, %s7058_s10  ;;  %v12282_v34 = vpop.permute.xlu1 %6780 }
 0x697   : > { %6985 = vrot.lane.b32.xlu0 %v6984_v31, %s7053_s29 }
 0x699   : > { %6975 = vrot.lane.b32.xlu2 %v6984_v31, %s7059_s11  ;;  %v12280_v52 = vpop.permute.xlu0 %6760 }
 0x69b   : > { %v12284_v19 = vpop.permute.xlu2 %6815 }
 0x69d   : > { %6995 = vrot.lane.b32.xlu1 %v6989_v25, %s7053_s29 }
 0x69e   : > { %v12296_v13 = vpop.permute.xlu1 %6795 }
 0x69f   : > { %6990 = vrot.lane.b32.xlu0 %v6989_v25, %s7059_s11 }
 0x6a1   : > { %6980 = vrot.lane.b32.xlu2 %v6979_v39, %s7056_s8  ;;  %v12294_v31 = vpop.permute.xlu0 %6785  ;;  %v6742_v39 = vunpack.i.l.bf16 %v12239_v46 }
 0x6a3   : > { %v12299_v26 = vpop.permute.xlu2 %6820  ;;  %v4817_v25 = vsel %vm419_vm1, 0.0, %v6742_v39 }
 0x6a5   : > { %7000 = vrot.lane.b32.xlu1 %v12226_v62, %s7054_s30  ;;  %v4818_v62 = vsel %vm419_vm1, %v11684_v42, %v6742_v39  ;;  %v12342_v42 = vsel %vm419_vm1, 0.0, %v6752_v51  ;;  %v6762_v39 = vunpack.i.l.bf16 %v12280_v52 }
 0x6a6   : > { %v6801_v0 = vpop.permute.xlu1 %6800 }
 0x6a7   : > { %7010 = vrot.lane.b32.xlu0 %v7009_v41, %s7053_s29  ;;  %v6803_v11 = vunpack.i.h.bf16 %v6801_v0 }
 0x6a9   : > { %7005 = vrot.lane.b32.xlu2 %v7009_v41, %s7059_s11  ;;  %v12327_v47 = vpop.permute.xlu0 %6790  ;;  %v6802_v41 = vunpack.i.l.bf16 %v6801_v0  ;;  %v4936_v6 = vsel %vm1545_vm14, %v4904_v8, %v6803_v11 }
 0x6aa   : > { %v4968_v0 = vsel %vm1578_vm15, %v4936_v6, %v6707_v17 }
 0x6ab   : > { %v6856_v21 = vpop.permute.xlu2 %6855  ;;  %v4935_v46 = vsel %vm1545_vm14, %v4903_v60, %v6802_v41  ;;  %v5000_v11 = vsel %vm1611_vm0, %v4968_v0, %v6762_v39  ;;  %v6823_v41 = vunpack.i.h.bf16 %v12299_v26 }
 0x6ac   : > { %v6858_v27 = vunpack.i.h.bf16 %v6856_v21  ;;  %v6857_v30 = vunpack.i.l.bf16 %v6856_v21  ;;  %v4967_v33 = vsel %vm1578_vm15, %v4935_v46, %v8664_v54  ;;  %v12354_v21 = vsel %vm419_vm1, %v11676_v12, %v6752_v51 }
 0x6ad   : > { %v4999_v60 = vsel %vm1611_vm0, %v4967_v33, %v6762_v39  ;;  %v6767_v46 = vunpack.i.l.bf16 %v12253_v61  ;;  %7020 = vrot.lane.b32.xlu1 %v7019_v45, %s7053_s29  ;;  %v5064_v17 = vrot.slane %v5000_v11, 7  ;;  %v6777_v51 = vunpack.i.l.bf16 %v12264_v35 }
 0x6ae   : > { %v4852_v49 = vsel %vm1449_vm11, %v4824_v16, %v6858_v27  ;;  %v4851_v14 = vsel %vm1449_vm11, %v4823_v18, %v6857_v30  ;;  %v5063_v16 = vrot.slane %v4999_v60, 7  ;;  %v6758_v30 = vunpack.i.h.bf16 %v12261_v44  ;;  %v6806_v8 = vpop.permute.xlu1 %6805 }
 0x6af   : > { %v4881_v23 = vsel %vm1480_vm12, %v4852_v49, %v6722_v5  ;;  %7015 = vrot.lane.b32.xlu0 %v7019_v45, %s7059_s11  ;;  %v4880_v6 = vsel %vm1480_vm12, %v4851_v14, %v8647_v58  ;;  %v6822_v33 = vunpack.i.l.bf16 %v12299_v26  ;;  %v6808_v0 = vunpack.i.h.bf16 %v6806_v8 }
 0x6b0   : > { %v5065_v45 = vsel %vm1676_vm7, %v5063_v16, %v5064_v17  ;;  %v6807_v49 = vunpack.i.l.bf16 %v6806_v8  ;;  %v4911_v44 = vsel %vm1512_vm13, %v4880_v6, %v6777_v51  ;;  %v4912_v12 = vsel %vm1512_vm13, %v4881_v23, %v6777_v51 }
 0x6b1   : > { %4613 = vrot.lane.b32.xlu2 %v12267_v4, %s7057_s9  ;;  %v6826_v18 = vpop.permute.xlu0 %6825  ;;  %5213 = vmatmul.f32.vlgmr.msra.gmra.mxu0 %v5065_v45  ;;  %v13795_v6 = vunpack.i.h.bf16 %v12143_v9  ;;  %v13796_v51 = vunpack.i.l.bf16 %v12235_v2  ;;  %v13797_v9 = vpack.i.bf16 %v12205_v15, %v12191_v20  ;;  %v6782_v45 = vunpack.i.l.bf16 %v12282_v34 }
 0x6b2   : > { %v6828_v27 = vunpack.i.h.bf16 %v6826_v18  ;;  %v6827_v39 = vunpack.i.l.bf16 %v6826_v18  ;;  %v4845_v5 = vsel %vm1449_vm11, %v4817_v25, %v6807_v49  ;;  %v4846_v18 = vsel %vm1449_vm11, %v4818_v62, %v6808_v0 }
 0x6b3   : > { %v6861_v14 = vpop.permute.xlu2 %6860  ;;  %v4874_v17 = vsel %vm1480_vm12, %v4845_v5, %v8647_v58  ;;  %v6763_v25 = vunpack.i.h.bf16 %v12280_v52  ;;  %v13798_v5 = vunpack.i.l.bf16 %v12218_v36  ;;  %v13799_v0 = vrot.slane %v12173_v48, 1 }
 0x6b4   : > { %v4847_v60 = vsel %vm1449_vm11, %v4819_v29, %v6827_v39  ;;  %v6863_v11 = vunpack.i.h.bf16 %v6861_v14  ;;  %v6862_v4 = vunpack.i.l.bf16 %v6861_v14  ;;  %v4848_v16 = vsel %vm1449_vm11, %v4820_v1, %v6828_v27 }
 0x6b5   : > { %v4876_v26 = vsel %vm1480_vm12, %v4847_v60, %v8647_v58  ;;  %v4875_v29 = vsel %vm1480_vm12, %v4846_v18, %v13795_v6  ;;  %v4905_v62 = vsel %vm1512_vm13, %v4874_v17, %v6758_v30  ;;  %v4877_v39 = vsel %vm1480_vm12, %v4848_v16, %v13798_v5 }
 0x6b6   : > { %v4943_v8 = vsel %vm1545_vm14, %v4911_v44, %v6862_v4  ;;  %v4944_v23 = vsel %vm1545_vm14, %v4912_v12, %v6863_v11  ;;  %v4906_v1 = vsel %vm1512_vm13, %v4875_v29, %v6758_v30  ;;  %v4937_v12 = vsel %vm1545_vm14, %v4905_v62, %v6822_v33  ;;  %v12415_v60 = vpop.permute.xlu1 %6810 }
 0x6b7   : > { %v4976_v27 = vsel %vm1578_vm15, %v4944_v23, %v13796_v51  ;;  %7025 = vrot.lane.b32.xlu0 %v13797_v9, %s7059_s11  ;;  %v4975_v52 = vsel %vm1578_vm15, %v4943_v8, %v8664_v54  ;;  %v4938_v30 = vsel %vm1545_vm14, %v4906_v1, %v6823_v41  ;;  %v4907_v20 = vsel %vm1512_vm13, %v4876_v26, %v6767_v46 }
 0x6b8   : > { %v4969_v15 = vsel %vm1578_vm15, %v4937_v12, %v8664_v54  ;;  %v13800_v14 = vunpack.i.h.bf16 %v12170_v40  ;;  %v4908_v48 = vsel %vm1512_vm13, %v4877_v39, %v6767_v46  ;;  %v5007_v17 = vsel %vm1611_vm0, %v4975_v52, %v6782_v45 }
 0x6b9   : > { %4615 = vrot.lane.b32.xlu2 %v13799_v0, %s7057_s9  ;;  %v6831_v49 = vpop.permute.xlu0 %6830  ;;  %v5001_v11 = vsel %vm1611_vm0, %v4969_v15, %v6763_v25  ;;  %v13801_v62 = vunpack.i.l.bf16 %v12237_v57  ;;  %v5008_v1 = vsel %vm1611_vm0, %v4976_v27, %v6782_v45  ;;  %v13802_v5 = vunpack.i.l.bf16 %v12270_v7 }
 0x6ba   : > { %v4970_v44 = vsel %vm1578_vm15, %v4938_v30, %v13800_v14  ;;  %v6833_v33 = vunpack.i.h.bf16 %v6831_v49  ;;  %v6832_v41 = vunpack.i.l.bf16 %v6831_v49  ;;  %v5069_v16 = vrot.slane %v5001_v11, 7 }
 0x6bb   : > { %v5002_v4 = vsel %vm1611_vm0, %v4970_v44, %v6763_v25  ;;  %v6866_v18 = vpop.permute.xlu2 %6865  ;;  %v13803_v52 = vmov %v13802_v5  ;;  %v13804_v30 = vunpack.i.h.bf16 %v12216_v56  ;;  %v5087_v14 = vrot.slane %v5007_v17, 7 }
 0x6bc   : > { %v5070_v26 = vrot.slane %v5002_v4, 7  ;;  %v4939_v6 = vsel %vm1545_vm14, %v4907_v20, %v6832_v41  ;;  %v4940_v40 = vsel %vm1545_vm14, %v4908_v48, %v6833_v33  ;;  %v6868_v29 = vunpack.i.h.bf16 %v6866_v18 }
 0x6bd   : > { %v6867_v8 = vunpack.i.l.bf16 %v6866_v18  ;;  %v4971_v23 = vsel %vm1578_vm15, %v4939_v6, %v8664_v54  ;;  %v4972_v25 = vsel %vm1578_vm15, %v4940_v40, %v13801_v62  ;;  %v5088_v44 = vrot.slane %v5008_v1, 7 }
 0x6be   : > { %v5071_v46 = vsel %vm1676_vm7, %v5069_v16, %v5070_v26  ;;  %v4854_v51 = vsel %vm1449_vm11, %v12354_v21, %v6868_v29  ;;  %v5003_v39 = vsel %vm1611_vm0, %v4971_v23, %v13802_v5  ;;  %v5004_v12 = vsel %vm1611_vm0, %v4972_v25, %v13803_v52  ;;  %v6846_v41 = vpop.permute.xlu1 %6845 }
 0x6bf   : > { %v4853_v9 = vsel %vm1449_vm11, %v12342_v42, %v6867_v8  ;;  %5216 = vmatmul.f32.gmra.mxu0 %v5071_v46  ;;  %v4883_v0 = vsel %vm1480_vm12, %v4854_v51, %v13804_v30  ;;  %v5075_v21 = vrot.slane %v5003_v39, 7  ;;  %v5076_v45 = vrot.slane %v5004_v12, 7 }
 0x6c0   : > { %v4882_v27 = vsel %vm1480_vm12, %v4853_v9, %v8647_v58  ;;  %v13805_v42 = vunpack.i.h.bf16 %v12264_v35  ;;  %v5089_v4 = vsel %vm1676_vm7, %v5087_v14, %v5088_v44  ;;  %v6713_v48 = vunpack.i.h.bf16 %v12218_v36 }
 0x6c1   : > { %v6836_v33 = vpop.permute.xlu0 %6835  ;;  %v13807_v18 = vunpack.i.l.bf16 %v12249_v53  ;;  %v6768_v17 = vunpack.i.h.bf16 %v12253_v61  ;;  %v5077_v8 = vsel %vm1676_vm7, %v5075_v21, %v5076_v45  ;;  %v6848_v36 = vunpack.i.h.bf16 %v6846_v41 }
 0x6c2   : > { %v4913_v49 = vsel %vm1512_vm13, %v4882_v27, %v13805_v42  ;;  %v13806_v20 = vmov %v13805_v42  ;;  %v6838_v56 = vunpack.i.h.bf16 %v6836_v33  ;;  %v6837_v11 = vunpack.i.l.bf16 %v6836_v33 }
 0x6c3   : > { %v4914_v15 = vsel %vm1512_vm13, %v4883_v0, %v13806_v20  ;;  %v4821_v16 = vsel %vm419_vm1, 0.0, %v13807_v18  ;;  %v13808_v26 = vmov %v13807_v18  ;;  %v12460_v6 = vpop.permute.xlu2 %6870  ;;  %v6847_v23 = vunpack.i.l.bf16 %v6846_v41 }
 0x6c4   : > { %v4822_v35 = vsel %vm419_vm1, %v11680_v63, %v13808_v26  ;;  %v4849_v29 = vsel %vm1449_vm11, %v4821_v16, %v6837_v11  ;;  %v6718_v25 = vunpack.i.h.bf16 %v12237_v57  ;;  %v6773_v61 = vunpack.i.h.bf16 %v12270_v7 }
 0x6c5   : > { %v4850_v40 = vsel %vm1449_vm11, %v4822_v35, %v6838_v56  ;;  %v4878_v53 = vsel %vm1480_vm12, %v4849_v29, %v8647_v58  ;;  %v6797_v39 = vunpack.i.l.bf16 %v12296_v13  ;;  %v6733_v42 = vunpack.i.h.bf16 %v12198_v24 }
 0x6c6   : > { %v4879_v62 = vsel %vm1480_vm12, %v4850_v40, %v6713_v48  ;;  %v4909_v63 = vsel %vm1512_vm13, %v4878_v53, %v6768_v17  ;;  %v12483_v30 = vpop.permute.xlu1 %6850  ;;  %v6788_v14 = vunpack.i.h.bf16 %v12294_v31  ;;  %v6753_v41 = vunpack.i.h.bf16 %v12251_v43 }
 0x6c7   : > { %v4910_v46 = vsel %vm1512_vm13, %v4879_v62, %v6768_v17  ;;  %5219 = vmatmul.f32.gmra.mxu0 %v5077_v8  ;;  %v4941_v1 = vsel %vm1545_vm14, %v4909_v63, %v6847_v23  ;;  %v4830_v20 = vsel %vm419_vm1, %v11714_v59, %v6797_v39  ;;  %v6732_v26 = vunpack.i.l.bf16 %v12198_v24 }
 0x6c8   : > { %v4942_v51 = vsel %vm1545_vm14, %v4910_v46, %v6848_v36  ;;  %v4973_v9 = vsel %vm1578_vm15, %v4941_v1, %v8664_v54  ;;  %v6728_v35 = vunpack.i.h.bf16 %v12235_v2  ;;  %v4828_v40 = vsel %vm419_vm1, %v11678_v28, %v6753_v41 }
 0x6c9   : > { %v4974_v5 = vsel %vm1578_vm15, %v4942_v51, %v6718_v25  ;;  %v12479_v52 = vpop.permute.xlu0 %6840  ;;  %v5005_v57 = vsel %vm1611_vm0, %v4973_v9, %v6773_v61  ;;  %v6783_v29 = vunpack.i.h.bf16 %v12282_v34  ;;  %v4827_v36 = vsel %vm419_vm1, 0.0, %v6753_v41 }
 0x6ca   : > { %v5006_v12 = vsel %vm1611_vm0, %v4974_v5, %v6773_v61  ;;  %v5081_v7 = vrot.slane %v5005_v57, 7  ;;  %v6787_v51 = vunpack.i.l.bf16 %v12294_v31 }
 0x6cb   : > { %v5082_v0 = vrot.slane %v5006_v12, 7  ;;  %v6896_v27 = vpop.permute.xlu2 %6895  ;;  %v4829_v12 = vsel %vm419_vm1, 0.0, %v6797_v39 }
 0x6cc   : > { %v6898_v21 = vunpack.i.h.bf16 %v6896_v27  ;;  %v6897_v63 = vunpack.i.l.bf16 %v6896_v27  ;;  %v6792_v27 = vunpack.i.l.bf16 %v12327_v47 }
 0x6cd   : > { %v5083_v45 = vsel %vm1676_vm7, %v5081_v7, %v5082_v0 }
 0x6ce   : > { %v4858_v44 = vsel %vm1449_vm11, %v4830_v20, %v6898_v21  ;;  %v4857_v21 = vsel %vm1449_vm11, %v4829_v12, %v6897_v63 }
 0x6cf   : > { %5222 = vmatmul.f32.gmra.mxu0 %v5083_v45  ;;  %v4887_v33 = vsel %vm1480_vm12, %v4858_v44, %v6733_v42  ;;  %v6881_v48 = vpop.permute.xlu1 %6880  ;;  %v4886_v41 = vsel %vm1480_vm12, %v4857_v21, %v8647_v58 }
 0x6d0   : > { %v4918_v56 = vsel %vm1512_vm13, %v4887_v33, %v6788_v14  ;;  %v6883_v59 = vunpack.i.h.bf16 %v6881_v48  ;;  %v6882_v17 = vunpack.i.l.bf16 %v6881_v48 }
 0x6d1   : > { %v6876_v11 = vpop.permute.xlu0 %6875 }
 0x6d2   : > { %v6878_v18 = vunpack.i.h.bf16 %v6876_v11  ;;  %v6877_v16 = vunpack.i.l.bf16 %v6876_v11  ;;  %v4856_v23 = vsel %vm1449_vm11, %v4828_v40, %v6883_v59  ;;  %v4855_v28 = vsel %vm1449_vm11, %v4827_v36, %v6882_v17 }
 0x6d3   : > { %v12506_v62 = vpop.permute.xlu2 %6900  ;;  %v4885_v53 = vsel %vm1480_vm12, %v4856_v23, %v6732_v26  ;;  %v4884_v46 = vsel %vm1480_vm12, %v4855_v28, %v8647_v58  ;;  %v4917_v17 = vsel %vm1512_vm13, %v4886_v41, %v6788_v14  ;;  %v6812_v40 = vunpack.i.l.bf16 %v12415_v60  ;;  %v13809_v23 = vld [vmem:[#allocation107_spill] sm:$0xff] }
 0x6d4   : > { %v4945_v8 = vsel %vm1545_vm14, %v4913_v49, %v6877_v16  ;;  %v4946_v43 = vsel %vm1545_vm14, %v4914_v15, %v6878_v18  ;;  %v4915_v7 = vsel %vm1512_vm13, %v4884_v46, %v6787_v51  ;;  %v4916_v0 = vsel %vm1512_vm13, %v4885_v53, %v6787_v51 }
 0x6d5   : > { %v4977_v24 = vsel %vm1578_vm15, %v4945_v8, %v8664_v54  ;;  %v4978_v2 = vsel %vm1578_vm15, %v4946_v43, %v6728_v35  ;;  %v6817_v14 = vunpack.i.l.bf16 %v12284_v19  ;;  %v6813_v41 = vunpack.i.h.bf16 %v12415_v60 }
 0x6d6   : > { %v5009_v34 = vsel %vm1611_vm0, %v4977_v24, %v6783_v29  ;;  %v5010_v49 = vsel %vm1611_vm0, %v4978_v2, %v6783_v29 }
 0x6d7   : > { %5225 = vmatmul.f32.gmra.mxu0 %v5089_v4  ;;  %v5093_v15 = vrot.slane %v5009_v34, 7  ;;  %v5094_v25 = vrot.slane %v5010_v49, 7  ;;  %v6886_v9 = vpop.permute.xlu1 %6885  ;;  %v6737_v4 = vunpack.i.l.bf16 %v12220_v10  ;;  %v4919_v51 = vsel %vm1512_vm13, %v13727_v38, %v6817_v14 }
 0x6d8   : > { %v6888_v5 = vunpack.i.h.bf16 %v6886_v9  ;;  %v6887_v57 = vunpack.i.l.bf16 %v6886_v9 }
 0x6d9   : > { %v12514_v61 = vpop.permute.xlu0 %6905  ;;  %v5095_v1 = vsel %vm1676_vm7, %v5093_v15, %v5094_v25 }
 0x6da   : > { %v4947_v45 = vsel %vm1545_vm14, %v4915_v7, %v6887_v57  ;;  %v4948_v42 = vsel %vm1545_vm14, %v4916_v0, %v6888_v5  ;;  %v6793_v5 = vunpack.i.h.bf16 %v12327_v47 }
 0x6db   : > { %v4979_v31 = vsel %vm1578_vm15, %v4947_v45, %v8664_v54  ;;  %v4980_v20 = vsel %vm1578_vm15, %v4948_v42, %v6737_v4  ;;  %v12529_v44 = vpop.permute.xlu2 %6915 }
 0x6dc   : > { %v5011_v39 = vsel %vm1611_vm0, %v4979_v31, %v6792_v27  ;;  %v5012_v33 = vsel %vm1611_vm0, %v4980_v20, %v6792_v27  ;;  %v6798_v27 = vunpack.i.h.bf16 %v12296_v13 }
 0x6dd   : > { %v5099_v11 = vrot.slane %v5011_v39, 7  ;;  %v5100_v48 = vrot.slane %v5012_v33, 7 }
 0x6de   : > { %v4831_v39 = vsel %vm419_vm1, 0.0, %v6798_v27  ;;  %v4832_v33 = vsel %vm419_vm1, %v11898_v32, %v6798_v27  ;;  %v6907_v27 = vunpack.i.l.bf16 %v12514_v61 }
 0x6df   : > { %5228 = vmatmul.f32.gmra.mxu0 %v5095_v1  ;;  %v12535_v16 = vpop.permute.xlu1 %6890  ;;  %v5101_v59 = vsel %vm1676_vm7, %v5099_v11, %v5100_v48  ;;  %v6738_v1 = vunpack.i.h.bf16 %v12220_v10  ;;  %v6818_v11 = vunpack.i.h.bf16 %v12284_v19  ;;  %v6872_v19 = vunpack.i.l.bf16 %v12460_v6 }
 0x6e1   : > { %v6921_v18 = vpop.permute.xlu0 %6920 }
 0x6e2   : > { %v6923_v26 = vunpack.i.h.bf16 %v6921_v18  ;;  %v6922_v35 = vunpack.i.l.bf16 %v6921_v18 }
 0x6e3   : > { %v6941_v34 = vpop.permute.xlu2 %6940 }
 0x6e4   : > { %v4949_v29 = vsel %vm1545_vm14, %v4917_v17, %v6922_v35  ;;  %v4950_v8 = vsel %vm1545_vm14, %v4918_v56, %v6923_v26  ;;  %v4888_v56 = vsel %vm1480_vm12, %v13794_v55, %v6812_v40  ;;  %v6943_v18 = vunpack.i.h.bf16 %v6941_v34 }
 0x6e5   : > { %v4981_v43 = vsel %vm1578_vm15, %v4949_v29, %v8664_v54  ;;  %v4982_v36 = vsel %vm1578_vm15, %v4950_v8, %v8664_v54  ;;  %v4920_v9 = vsel %vm1512_vm13, %v4888_v56, %v6817_v14  ;;  %v6942_v26 = vunpack.i.l.bf16 %v6941_v34 }
 0x6e6   : > { %v5013_v24 = vsel %vm1611_vm0, %v4981_v43, %v13809_v23  ;;  %v5014_v2 = vsel %vm1611_vm0, %v4982_v36, %v13809_v23  ;;  %v6842_v17 = vunpack.i.l.bf16 %v12479_v52  ;;  %v6852_v40 = vunpack.i.l.bf16 %v12483_v30 }
 0x6e7   : > { %5231 = vmatmul.f32.gmra.mxu0 %v5101_v59  ;;  %v5105_v53 = vrot.slane %v5013_v24, 7  ;;  %v5106_v28 = vrot.slane %v5014_v2, 7  ;;  %v12554_v25 = vpop.permute.xlu1 %6910 }
 0x6e9   : > { %v6926_v49 = vpop.permute.xlu0 %6925  ;;  %v5107_v15 = vsel %vm1676_vm7, %v5105_v53, %v5106_v28 }
 0x6ea   : > { %v6928_v63 = vunpack.i.h.bf16 %v6926_v49  ;;  %v6927_v46 = vunpack.i.l.bf16 %v6926_v49 }
 0x6eb   : > { %v12572_v42 = vpop.permute.xlu2 %6945 }
 0x6ec   : > { %v4951_v57 = vsel %vm1545_vm14, %v4919_v51, %v6927_v46  ;;  %v4952_v55 = vsel %vm1545_vm14, %v4920_v9, %v6928_v63  ;;  %v4833_v63 = vsel %vm419_vm1, 0.0, %v6872_v19  ;;  %v4834_v46 = vsel %vm419_vm1, %v11835_v3, %v6872_v19 }
 0x6ed   : > { %v4983_v4 = vsel %vm1578_vm15, %v4951_v57, %v8664_v54  ;;  %v4984_v12 = vsel %vm1578_vm15, %v4952_v55, %v6738_v1  ;;  %v6892_v57 = vunpack.i.l.bf16 %v12535_v16 }
 0x6ee   : > { %v5015_v7 = vsel %vm1611_vm0, %v4983_v4, %v6793_v5  ;;  %v5016_v10 = vsel %vm1611_vm0, %v4984_v12, %v6793_v5  ;;  %v6853_v12 = vunpack.i.h.bf16 %v12483_v30 }
 0x6ef   : > { %5234 = vmatmul.f32.gmra.mxu0 %v5107_v15  ;;  %v5108_v0 = vrot.slane %v5015_v7, 7  ;;  %v5109_v38 = vrot.slane %v5016_v10, 7  ;;  %v6931_v45 = vpop.permute.xlu1 %6930  ;;  %v6873_v15 = vunpack.i.h.bf16 %v12460_v6  ;;  %v6843_v7 = vunpack.i.h.bf16 %v12479_v52 }
 0x6f0   : > { %v6933_v31 = vunpack.i.h.bf16 %v6931_v45  ;;  %v6932_v20 = vunpack.i.l.bf16 %v6931_v45  ;;  %v6903_v10 = vunpack.i.h.bf16 %v12506_v62 }
 0x6f1   : > { %v12569_v21 = vpop.permute.xlu0 %6950  ;;  %v5110_v47 = vsel %vm1676_vm7, %v5108_v0, %v5109_v38  ;;  %v4835_v55 = vsel %vm419_vm1, 0.0, %v6873_v15  ;;  %v4836_v6 = vsel %vm419_vm1, %v11993_v37, %v6873_v15  ;;  %v6902_v0 = vunpack.i.l.bf16 %v12506_v62 }
 0x6f2   : > { %v4860_v13 = vsel %vm1449_vm11, %v4832_v33, %v6933_v31  ;;  %v4859_v48 = vsel %vm1449_vm11, %v4831_v39, %v6932_v20 }
 0x6f3   : > { %v4889_v35 = vsel %vm1480_vm12, %v4859_v48, %v8647_v58  ;;  %v4890_v59 = vsel %vm1480_vm12, %v4860_v13, %v6813_v41  ;;  %v6976_v1 = vpop.permute.xlu2 %6975 }
 0x6f4   : > { %v4921_v32 = vsel %vm1512_vm13, %v4889_v35, %v6818_v11  ;;  %v4922_v60 = vsel %vm1512_vm13, %v4890_v59, %v6818_v11  ;;  %v6978_v41 = vunpack.i.h.bf16 %v6976_v1  ;;  %v6977_v52 = vunpack.i.l.bf16 %v6976_v1 }
 0x6f5   : > { %v4953_v29 = vsel %vm1545_vm14, %v4921_v32, %v6942_v26  ;;  %v4954_v8 = vsel %vm1545_vm14, %v4922_v60, %v6943_v18  ;;  %v6918_v1 = vunpack.i.h.bf16 %v12529_v44 }
 0x6f6   : > { %v4985_v36 = vsel %vm1578_vm15, %v4953_v29, %v8664_v54  ;;  %v4986_v24 = vsel %vm1578_vm15, %v4954_v8, %v6842_v17  ;;  %v6917_v8 = vunpack.i.l.bf16 %v12529_v44 }
 0x6f7   : > { %5237 = vmatmul.f32.gmra.mxu0 %v5110_v47  ;;  %v12594_v2 = vpop.permute.xlu1 %6935  ;;  %v5017_v28 = vsel %vm1611_vm0, %v4985_v36, %v6852_v40  ;;  %v5018_v56 = vsel %vm1611_vm0, %v4986_v24, %v6852_v40  ;;  %v6893_v47 = vunpack.i.h.bf16 %v12535_v16  ;;  %v4840_v44 = vsel %vm419_vm1, %v12041_v22, %v6918_v1 }
 0x6f8   : > { %v5114_v34 = vrot.slane %v5017_v28, 7  ;;  %v5115_v49 = vrot.slane %v5018_v56, 7 }
 0x6f9   : > { %v6956_v43 = vpop.permute.xlu0 %6955 }
 0x6fa   : > { %v6958_v14 = vunpack.i.h.bf16 %v6956_v43  ;;  %v6957_v53 = vunpack.i.l.bf16 %v6956_v43  ;;  %v5116_v5 = vsel %vm1676_vm7, %v5114_v34, %v5115_v49  ;;  %v6912_v43 = vunpack.i.l.bf16 %v12554_v25 }
 0x6fb   : > { %v12632_v32 = vpop.permute.xlu2 %6980 }
 0x6fc   : > { %v4861_v51 = vsel %vm1449_vm11, %v4833_v63, %v6957_v53  ;;  %v4862_v9 = vsel %vm1449_vm11, %v4834_v46, %v6958_v14 }
 0x6fd   : > { %v4891_v4 = vsel %vm1480_vm12, %v4861_v51, %v8647_v58  ;;  %v4892_v3 = vsel %vm1480_vm12, %v4862_v9, %v6892_v57  ;;  %v4837_v51 = vsel %vm419_vm1, 0.0, %v6917_v8  ;;  %v4838_v9 = vsel %vm419_vm1, %v12021_v50, %v6917_v8 }
 0x6fe   : > { %v4923_v33 = vsel %vm1512_vm13, %v4891_v4, %v6902_v0  ;;  %v4924_v30 = vsel %vm1512_vm13, %v4892_v3, %v6902_v0  ;;  %v6937_v4 = vunpack.i.l.bf16 %v12594_v2  ;;  %v6908_v3 = vunpack.i.h.bf16 %v12514_v61 }
 0x6ff   : > { %5240 = vmatmul.f32.gmra.mxu0 %v5116_v5  ;;  %v6966_v45 = vpop.permute.xlu1 %6965  ;;  %v6948_v0 = vunpack.i.h.bf16 %v12572_v42 }
 0x700   : > { %v6968_v20 = vunpack.i.h.bf16 %v6966_v45  ;;  %v6967_v39 = vunpack.i.l.bf16 %v6966_v45  ;;  %v6952_v45 = vunpack.i.l.bf16 %v12569_v21 }
 0x701   : > { %v6961_v38 = vpop.permute.xlu0 %6960 }
 0x702   : > { %v6963_v37 = vunpack.i.h.bf16 %v6961_v38  ;;  %v6962_v31 = vunpack.i.l.bf16 %v6961_v38  ;;  %v4863_v13 = vsel %vm1449_vm11, %v4835_v55, %v6967_v39  ;;  %v4864_v48 = vsel %vm1449_vm11, %v4836_v6, %v6968_v20 }
 0x703   : > { %v4893_v26 = vsel %vm1480_vm12, %v4863_v13, %v8647_v58  ;;  %v4894_v35 = vsel %vm1480_vm12, %v4864_v48, %v6893_v47  ;;  %v6947_v38 = vunpack.i.l.bf16 %v12572_v42 }
 0x704   : > { %v4955_v11 = vsel %vm1545_vm14, %v4923_v33, %v6962_v31  ;;  %v4956_v62 = vsel %vm1545_vm14, %v4924_v30, %v6963_v37  ;;  %v4925_v60 = vsel %vm1512_vm13, %v4893_v26, %v6903_v10  ;;  %v4926_v19 = vsel %vm1512_vm13, %v4894_v35, %v6903_v10 }
 0x705   : > { %v4987_v16 = vsel %vm1578_vm15, %v4955_v11, %v8664_v54  ;;  %v4988_v18 = vsel %vm1578_vm15, %v4956_v62, %v6843_v7  ;;  %v4957_v36 = vsel %vm1545_vm14, %v4925_v60, %v6977_v52  ;;  %v4958_v24 = vsel %vm1545_vm14, %v4926_v19, %v6978_v41 }
 0x706   : > { %v5019_v59 = vsel %vm1611_vm0, %v4987_v16, %v6853_v12  ;;  %v5020_v17 = vsel %vm1611_vm0, %v4988_v18, %v6853_v12  ;;  %v4989_v28 = vsel %vm1578_vm15, %v4957_v36, %v8664_v54  ;;  %v4990_v56 = vsel %vm1578_vm15, %v4958_v24, %v6907_v27  ;;  %v7006_v27 = vpop.permute.xlu2 %7005  ;;  %v12688_v36 = vpop.f32.mrf.mxu1 }
 0x707   : > { %v5120_v40 = vrot.slane %v5019_v59, 7  ;;  %v5121_v29 = vrot.slane %v5020_v17, 7  ;;  %v12644_v34 = vpop.permute.xlu1 %6970  ;;  %v5021_v63 = vsel %vm1611_vm0, %v4989_v28, %v6912_v43  ;;  %v5022_v46 = vsel %vm1611_vm0, %v4990_v56, %v6912_v43 }
 0x708   : > { %v5126_v55 = vrot.slane %v5021_v63, 7  ;;  %v5127_v6 = vrot.slane %v5022_v46, 7  ;;  %v4839_v12 = vsel %vm419_vm1, 0.0, %v6918_v1  ;;  %v6913_v10 = vunpack.i.h.bf16 %v12554_v25 }
 0x709   : > { %v6986_v14 = vpop.permute.xlu0 %6985  ;;  %v5122_v53 = vsel %vm1676_vm7, %v5120_v40, %v5121_v29  ;;  %v6938_v37 = vunpack.i.h.bf16 %v12594_v2  ;;  %v7008_v41 = vunpack.i.h.bf16 %v7006_v27  ;;  %v7007_v42 = vunpack.i.l.bf16 %v7006_v27 }
 0x70a   : > { %v6988_v49 = vunpack.i.h.bf16 %v6986_v14  ;;  %v6987_v15 = vunpack.i.l.bf16 %v6986_v14  ;;  %5243 = vmatmul.f32.gmra.mxu0 %v5122_v53  ;;  %v5128_v61 = vsel %vm1676_vm7, %v5126_v55, %v5127_v6  ;;  %v6982_v40 = vunpack.i.l.bf16 %v12632_v32 }
 0x70b   : > { %v6972_v29 = vunpack.i.l.bf16 %v12644_v34 }
 0x70c   : > { %v4865_v5 = vsel %vm1449_vm11, %v4837_v51, %v6987_v15  ;;  %v4866_v57 = vsel %vm1449_vm11, %v4838_v9, %v6988_v49  ;;  %v4841_v1 = vsel %vm419_vm1, 0.0, %v6982_v40  ;;  %v13810_v51 = vld [vmem:[#allocation77_spill] sm:$0xff] }
 0x70d   : > { %v4895_v7 = vsel %vm1480_vm12, %v4865_v5, %v8647_v58  ;;  %v4896_v50 = vsel %vm1480_vm12, %v4866_v57, %v6937_v4  ;;  %v4842_v9 = vsel %vm419_vm1, %v13810_v51, %v6982_v40 }
 0x70e   : > { %v4927_v25 = vsel %vm1512_vm13, %v4895_v7, %v6947_v38  ;;  %v4928_v30 = vsel %vm1512_vm13, %v4896_v50, %v6947_v38 }
 0x70f   : > { %v6996_v22 = vpop.permute.xlu1 %6995 }
 0x710   : > { %v6998_v39 = vunpack.i.h.bf16 %v6996_v22  ;;  %v6997_v33 = vunpack.i.l.bf16 %v6996_v22 }
 0x711   : > { %v6991_v47 = vpop.permute.xlu0 %6990 }
 0x712   : > { %v6993_v31 = vunpack.i.h.bf16 %v6991_v47  ;;  %v6992_v20 = vunpack.i.l.bf16 %v6991_v47  ;;  %5246 = vmatmul.f32.gmra.mxu0 %v5128_v61  ;;  %v4867_v62 = vsel %vm1449_vm11, %v4839_v12, %v6997_v33  ;;  %v4868_v2 = vsel %vm1449_vm11, %v4840_v44, %v6998_v39  ;;  %v4614_v12 = vpop.permute.xlu2 %4613 }
 0x713   : > { %v4897_v16 = vsel %vm1480_vm12, %v4867_v62, %v8647_v58  ;;  %v4898_v18 = vsel %vm1480_vm12, %v4868_v2, %v6938_v37  ;;  %v6973_v33 = vunpack.i.h.bf16 %v12644_v34 }
 0x714   : > { %v4959_v52 = vsel %vm1545_vm14, %v4927_v25, %v6992_v20  ;;  %v4960_v11 = vsel %vm1545_vm14, %v4928_v30, %v6993_v31  ;;  %v4929_v59 = vsel %vm1512_vm13, %v4897_v16, %v6948_v0  ;;  %v4930_v17 = vsel %vm1512_vm13, %v4898_v18, %v6948_v0  ;;  %v13811_v20 = vld [vmem:[#allocation7_spill] sm:$0xff] }
 0x715   : > { %v4991_v13 = vsel %vm1578_vm15, %v4959_v52, %v8664_v54  ;;  %v4992_v48 = vsel %vm1578_vm15, %v4960_v11, %v6908_v3  ;;  %v4961_v8 = vsel %vm1545_vm14, %v4929_v59, %v7007_v42  ;;  %v4962_v43 = vsel %vm1545_vm14, %v4930_v17, %v7008_v41 }
 0x716   : > { %v5023_v26 = vsel %vm1611_vm0, %v4991_v13, %v6913_v10  ;;  %v5024_v35 = vsel %vm1611_vm0, %v4992_v48, %v6913_v10  ;;  %v4993_v53 = vsel %vm1578_vm15, %v4961_v8, %v8664_v54  ;;  %v4994_v28 = vsel %vm1578_vm15, %v4962_v43, %v6952_v45  ;;  %v5282_v45 = vpop.f32.mrf.mxu1 }
 0x717   : > { %v5132_v60 = vrot.slane %v5023_v26, 7  ;;  %v5133_v19 = vrot.slane %v5024_v35, 7  ;;  %v7001_v56 = vpop.permute.xlu1 %7000  ;;  %v5025_v63 = vsel %vm1611_vm0, %v4993_v53, %v6972_v29  ;;  %v5026_v46 = vsel %vm1611_vm0, %v4994_v28, %v6972_v29 }
 0x718   : > { %v7002_v5 = vunpack.i.l.bf16 %v7001_v56  ;;  %v5138_v6 = vrot.slane %v5025_v63, 7  ;;  %v5139_v4 = vrot.slane %v5026_v46, 7  ;;  %v6983_v3 = vunpack.i.h.bf16 %v12632_v32 }
 0x719   : > { %v7011_v24 = vpop.permute.xlu0 %7010  ;;  %v5134_v14 = vsel %vm1676_vm7, %v5132_v60, %v5133_v19  ;;  %v6953_v0 = vunpack.i.h.bf16 %v12569_v21  ;;  %v7003_v11 = vunpack.i.h.bf16 %v7001_v56 }
 0x71a   : > { %v7013_v49 = vunpack.i.h.bf16 %v7011_v24  ;;  %v7012_v15 = vunpack.i.l.bf16 %v7011_v24  ;;  %5249 = vmatmul.f32.gmra.mxu0 %v5134_v14  ;;  %v5140_v10 = vsel %vm1676_vm7, %v5138_v6, %v5139_v4  ;;  %v4843_v38 = vsel %vm419_vm1, 0.0, %v6983_v3  ;;  %v4616_v35 = vpop.permute.xlu2 %4615 }
 0x71b   : > { %v4844_v39 = vsel %vm419_vm1, %v13811_v20, %v6983_v3 }
 0x71c   : > { %v4869_v57 = vsel %vm1449_vm11, %v4841_v1, %v7012_v15  ;;  %v4870_v55 = vsel %vm1449_vm11, %v4842_v9, %v7013_v49 }
 0x71d   : > { %v4899_v44 = vsel %vm1480_vm12, %v4869_v57, %v8647_v58  ;;  %v4900_v7 = vsel %vm1480_vm12, %v4870_v55, %v7002_v5 }
 0x71e   : > { %v4931_v22 = vsel %vm1512_vm13, %v4899_v44, %v4614_v12  ;;  %v4932_v31 = vsel %vm1512_vm13, %v4900_v7, %v4614_v12  ;;  %v5285_v8 = vpop.f32.mrf.mxu1 }
 0x71f   : > { %v7021_v27 = vpop.permute.xlu1 %7020 }
 0x720   : > { %v7023_v37 = vunpack.i.h.bf16 %v7021_v27  ;;  %v7022_v32 = vunpack.i.l.bf16 %v7021_v27 }
 0x721   : > { %v7016_v50 = vpop.permute.xlu0 %7015 }
 0x722   : > { %v7018_v47 = vunpack.i.h.bf16 %v7016_v50  ;;  %v7017_v61 = vunpack.i.l.bf16 %v7016_v50  ;;  %5252 = vmatmul.f32.gmra.mxu0 %v5140_v10  ;;  %v4871_v30 = vsel %vm1449_vm11, %v4843_v38, %v7022_v32  ;;  %v4872_v41 = vsel %vm1449_vm11, %v4844_v39, %v7023_v37 }
 0x723   : > { %v4901_v48 = vsel %vm1480_vm12, %v4871_v30, %v8647_v58  ;;  %v4902_v16 = vsel %vm1480_vm12, %v4872_v41, %v7003_v11 }
 0x724   : > { %v4963_v21 = vsel %vm1545_vm14, %v4931_v22, %v7017_v61  ;;  %v4964_v25 = vsel %vm1545_vm14, %v4932_v31, %v7018_v47  ;;  %v4933_v60 = vsel %vm1512_vm13, %v4901_v48, %v4616_v35  ;;  %v4934_v19 = vsel %vm1512_vm13, %v4902_v16, %v4616_v35 }
 0x725   : > { %v4995_v42 = vsel %vm1578_vm15, %v4963_v21, %v8664_v54  ;;  %v4996_v52 = vsel %vm1578_vm15, %v4964_v25, %v6953_v0 }
 0x726   : > { %v5027_v62 = vsel %vm1611_vm0, %v4995_v42, %v6973_v33  ;;  %v5028_v2 = vsel %vm1611_vm0, %v4996_v52, %v6973_v33  ;;  %v5288_v15 = vpop.f32.mrf.mxu1 }
 0x727   : > { %v5144_v13 = vrot.slane %v5027_v62, 7  ;;  %v5145_v34 = vrot.slane %v5028_v2, 7 }
 0x729   : > { %v7026_v18 = vpop.permute.xlu0 %7025  ;;  %v5146_v26 = vsel %vm1676_vm7, %v5144_v13, %v5145_v34 }
 0x72a   : > { %v7028_v59 = vunpack.i.h.bf16 %v7026_v18  ;;  %v7027_v17 = vunpack.i.l.bf16 %v7026_v18  ;;  %5255 = vmatmul.f32.gmra.mxu0 %v5146_v26 }
 0x72c   : > { %v4965_v40 = vsel %vm1545_vm14, %v4933_v60, %v7027_v17  ;;  %v4966_v29 = vsel %vm1545_vm14, %v4934_v19, %v7028_v59 }
 0x72d   : > { %v4997_v58 = vsel %vm1578_vm15, %v4965_v40, %v8664_v54  ;;  %v4998_v43 = vsel %vm1578_vm15, %v4966_v29, %v8664_v54 }
 0x72e   : > { %v5029_v24 = vsel %vm1611_vm0, %v4997_v58, %v13809_v23  ;;  %v5030_v14 = vsel %vm1611_vm0, %v4998_v43, %v13809_v23  ;;  %v5214_v49 = vpop.f32.mrf.mxu0  ;;  %v5291_v9 = vpop.f32.mrf.mxu1 }
 0x72f   : > { %v5150_v53 = vrot.slane %v5029_v24, 7  ;;  %v5151_v28 = vrot.slane %v5030_v14, 7  ;;  %v12740_v63 = vadd.f32 %v12688_v36, %v5214_v49 }
 0x731   : > { %v5152_v56 = vsel %vm1676_vm7, %v5150_v53, %v5151_v28  ;;  %v5327_v54 = vsel %vm419_vm1, %v12740_v63, 0.0 }
 0x732   : > { %5258 = vmatmul.f32.gmra.mxu0 %v5152_v56 }
 0x736   : > { %v5294_v36 = vpop.f32.mrf.mxu1 }
 0x73c   : > { %v5217_v46 = vpop.f32.mrf.mxu0 }
 0x73d   : > { %v12742_v1 = vadd.f32 %v5282_v45, %v5217_v46 }
 0x73e   : > { %v5297_v10 = vpop.f32.mrf.mxu1 }
 0x73f   : > { %v5328_v51 = vsel %vm419_vm1, %v12742_v1, 0.0 }
 0x740   : > { %v5329_v23 = vadd.f32 %v5328_v51, %v5327_v54 }
 0x744   : > { %v5220_v5 = vpop.f32.mrf.mxu0 }
 0x745   : > { %v12748_v57 = vadd.f32 %v5285_v8, %v5220_v5 }
 0x746   : > { %v5300_v47 = vpop.f32.mrf.mxu1 }
 0x747   : > { %v5330_v55 = vsel %vm419_vm1, %v12748_v57, 0.0 }
 0x748   : > { %v5331_v6 = vadd.f32 %v5330_v55, %v5329_v23 }
 0x74c   : > { %v5223_v4 = vpop.f32.mrf.mxu0 }
 0x74d   : > { %v12752_v3 = vadd.f32 %v5288_v15, %v5223_v4 }
 0x74e   : > { %v5303_v45 = vpop.f32.mrf.mxu1 }
 0x74f   : > { %v5332_v12 = vsel %vm419_vm1, %v12752_v3, 0.0 }
 0x750   : > { %v5333_v44 = vadd.f32 %v5332_v12, %v5331_v6 }
 0x754   : > { %v5226_v7 = vpop.f32.mrf.mxu0 }
 0x755   : > { %v12756_v50 = vadd.f32 %v5291_v9, %v5226_v7 }
 0x756   : > { %v5306_v32 = vpop.f32.mrf.mxu1 }
 0x757   : > { %v5334_v0 = vsel %vm419_vm1, %v12756_v50, 0.0 }
 0x758   : > { %v5335_v38 = vadd.f32 %v5334_v0, %v5333_v44 }
 0x75c   : > { %v5229_v27 = vpop.f32.mrf.mxu0 }
 0x75d   : > { %v5295_v41 = vadd.f32 %v5294_v36, %v5229_v27  ;;  %v13812_v27 = vld [vmem:[#allocation2_spill] sm:$0xff] }
 0x75e   : > { %v5309_v31 = vpop.f32.mrf.mxu1 }
 0x75f   : > { %v5336_v11 = vsel %vm419_vm1, %v5295_v41, 0.0 }
 0x760   : > { %v5337_v34 = vadd.f32 %v5336_v11, %v5335_v38 }
 0x764   : > { %v5232_v61 = vpop.f32.mrf.mxu0 }
 0x765   : > { %v5298_v42 = vadd.f32 %v5297_v10, %v5232_v61 }
 0x766   : > { %v5312_v39 = vpop.f32.mrf.mxu1 }
 0x767   : > { %v5338_v2 = vsel %vm419_vm1, %v5298_v42, 0.0 }
 0x768   : > { %v5339_v26 = vadd.f32 %v5338_v2, %v5337_v34 }
 0x76c   : > { %v5235_v37 = vpop.f32.mrf.mxu0 }
 0x76d   : > { %v5301_v62 = vadd.f32 %v5300_v47, %v5235_v37 }
 0x76e   : > { %v5315_v25 = vpop.f32.mrf.mxu1 }
 0x76f   : > { %v5340_v16 = vsel %vm419_vm1, %v5301_v62, 0.0 }
 0x770   : > { %v5341_v17 = vadd.f32 %v5340_v16, %v5339_v26 }
 0x774   : > { %v5238_v22 = vpop.f32.mrf.mxu0 }
 0x775   : > { %v5304_v13 = vadd.f32 %v5303_v45, %v5238_v22 }
 0x776   : > { %v5318_v52 = vpop.f32.mrf.mxu1 }
 0x777   : > { %v5342_v35 = vsel %vm419_vm1, %v5304_v13, 0.0 }
 0x778   : > { %v5343_v29 = vadd.f32 %v5342_v35, %v5341_v17 }
 0x77c   : > { %v5241_v20 = vpop.f32.mrf.mxu0 }
 0x77d   : > { %v5307_v18 = vadd.f32 %v5306_v32, %v5241_v20 }
 0x77e   : > { %v5321_v40 = vpop.f32.mrf.mxu1 }
 0x77f   : > { %v5344_v60 = vsel %vm419_vm1, %v5307_v18, 0.0 }
 0x780   : > { %v5345_v43 = vadd.f32 %v5344_v60, %v5343_v29 }
 0x786   : > { %v5324_v51 = vpop.f32.mrf.mxu1 }
 0x787   : > { %v5244_v33 = vpop.f32.mrf.mxu0 }
 0x788   : > { %v5310_v59 = vadd.f32 %v5309_v31, %v5244_v33 }
 0x78a   : > { %v5346_v8 = vsel %vm419_vm1, %v5310_v59, 0.0 }
 0x78b   : > { %v5347_v28 = vadd.f32 %v5346_v8, %v5345_v43 }
 0x78f   : > { %v5247_v21 = vpop.f32.mrf.mxu0 }
 0x790   : > { %v12765_v19 = vadd.f32 %v5312_v39, %v5247_v21 }
 0x792   : > { %v5348_v14 = vsel %vm419_vm1, %v12765_v19, 0.0 }
 0x793   : > { %v5349_v15 = vadd.f32 %v5348_v14, %v5347_v28 }
 0x797   : > { %v5250_v30 = vpop.f32.mrf.mxu0 }
 0x798   : > { %v12768_v58 = vadd.f32 %v5315_v25, %v5250_v30 }
 0x79a   : > { %v5350_v56 = vsel %vm419_vm1, %v12768_v58, 0.0 }
 0x79b   : > { %v5351_v54 = vadd.f32 %v5350_v56, %v5349_v15 }
 0x79f   : > { %v5253_v48 = vpop.f32.mrf.mxu0 }
 0x7a0   : > { %v12772_v53 = vadd.f32 %v5318_v52, %v5253_v48 }
 0x7a2   : > { %v5352_v46 = vsel %vm419_vm1, %v12772_v53, 0.0 }
 0x7a3   : > { %v5353_v9 = vadd.f32 %v5352_v46, %v5351_v54 }
 0x7a7   : > { %v5256_v24 = vpop.f32.mrf.mxu0 }
 0x7a8   : > { %v12776_v49 = vadd.f32 %v5321_v40, %v5256_v24 }
 0x7aa   : > { %v5354_v23 = vsel %vm419_vm1, %v12776_v49, 0.0 }
 0x7ab   : > { %v5355_v6 = vadd.f32 %v5354_v23, %v5353_v9 }
 0x7af   : > { %v5259_v5 = vpop.f32.mrf.mxu0 }
 0x7b0   : > { %v5325_v55 = vadd.f32 %v5324_v51, %v5259_v5 }
 0x7b2   : > { %v5356_v36 = vsel %vm419_vm1, %v5325_v55, 0.0 }
 0x7b3   : > { %v5357_v4 = vadd.f32 %v5356_v36, %v5355_v6 }
 0x7b5   : > { %v5358_v12 = vrot.slane %v5357_v4, 4 }
 0x7b7   : > { %v5359_v44 = vadd.f32 %v5358_v12, %v5357_v4 }
 0x7b9   : > { %v5360_v7 = vrot.slane %v5359_v44, 2 }
 0x7bb   : > { %v5361_v10 = vadd.f32 %v5360_v7, %v5359_v44 }
 0x7bd   : > { %v5362_v0 = vrot.slane %v5361_v10, 1 }
 0x7bf   : > { %v5363_v38 = vadd.f32 %v5362_v0, %v5361_v10 }
 0x7c1   : > { %v5364_v47 = vmul.f32 %v5363_v38, %v13812_v27 }
 0x7c3   : > { %v12785_v61 = vsub.f32 %v12740_v63, %v5364_v47  ;;  %v12788_v45 = vsub.f32 %v12742_v1, %v5364_v47  ;;  %v12791_v37 = vsub.f32 %v12748_v57, %v5364_v47  ;;  %v12794_v32 = vsub.f32 %v12752_v3, %v5364_v47 }
 0x7c4   : > { %v12797_v22 = vsub.f32 %v12756_v50, %v5364_v47  ;;  %v12805_v1 = vsub.f32 %v5295_v41, %v5364_v47  ;;  %v12811_v33 = vsub.f32 %v5298_v42, %v5364_v47  ;;  %v12816_v52 = vsub.f32 %v5301_v62, %v5364_v47 }
 0x7c5   : > { %v5381_v31 = vmul.f32 %v12785_v61, %v12785_v61  ;;  %v5382_v20 = vmul.f32 %v12788_v45, %v12788_v45  ;;  %v5383_v63 = vmul.f32 %v12791_v37, %v12791_v37  ;;  %v5384_v57 = vmul.f32 %v12794_v32, %v12794_v32 }
 0x7c6   : > { %v5385_v21 = vmul.f32 %v12797_v22, %v12797_v22  ;;  %v5386_v41 = vmul.f32 %v12805_v1, %v12805_v1  ;;  %v12821_v34 = vsub.f32 %v5304_v13, %v5364_v47  ;;  %v5387_v42 = vmul.f32 %v12811_v33, %v12811_v33 }
 0x7c7   : > { %v5397_v3 = vsel %vm419_vm1, %v5381_v31, 0.0  ;;  %v5398_v39 = vsel %vm419_vm1, %v5382_v20, 0.0  ;;  %v5400_v25 = vsel %vm419_vm1, %v5383_v63, 0.0  ;;  %v5402_v11 = vsel %vm419_vm1, %v5384_v57, 0.0 }
 0x7c8   : > { %v5399_v50 = vadd.f32 %v5398_v39, %v5397_v3  ;;  %v5404_v48 = vsel %vm419_vm1, %v5385_v21, 0.0  ;;  %v12826_v26 = vsub.f32 %v5307_v18, %v5364_v47  ;;  %v5388_v62 = vmul.f32 %v12816_v52, %v12816_v52 }
 0x7c9   : > { %v5406_v35 = vsel %vm419_vm1, %v5386_v41, 0.0  ;;  %v12831_v60 = vsub.f32 %v5310_v59, %v5364_v47  ;;  %v5389_v13 = vmul.f32 %v12821_v34, %v12821_v34  ;;  %v5408_v40 = vsel %vm419_vm1, %v5387_v42, 0.0 }
 0x7ca   : > { %v5401_v30 = vadd.f32 %v5400_v25, %v5399_v50  ;;  %v12837_v8 = vsub.f32 %v12765_v19, %v5364_v47  ;;  %v5390_v18 = vmul.f32 %v12826_v26, %v12826_v26  ;;  %v5410_v43 = vsel %vm419_vm1, %v5388_v62, 0.0 }
 0x7cb   : > { %v12843_v14 = vsub.f32 %v12768_v58, %v5364_v47  ;;  %v5391_v59 = vmul.f32 %v12831_v60, %v12831_v60  ;;  %v5412_v28 = vsel %vm419_vm1, %v5389_v13, 0.0  ;;  %v5378_v15 = vsub.f32 %v12772_v53, %v5364_v47  ;;  %v13816_v13 = vld [vmem:[#allocation13_spill] sm:$0xff] }
 0x7cc   : > { %v5403_v2 = vadd.f32 %v5402_v11, %v5401_v30  ;;  %v5392_v19 = vmul.f32 %v12837_v8, %v12837_v8  ;;  %v5414_v46 = vsel %vm419_vm1, %v5390_v18, 0.0  ;;  %v5379_v51 = vsub.f32 %v12776_v49, %v5364_v47  ;;  %v13818_v18 = vld [vmem:[#allocation106_spill] sm:$0xff] }
 0x7cd   : > { %v5393_v58 = vmul.f32 %v12843_v14, %v12843_v14  ;;  %v5416_v23 = vsel %vm419_vm1, %v5391_v59, 0.0  ;;  %v5380_v5 = vsub.f32 %v5325_v55, %v5364_v47  ;;  %v5394_v6 = vmul.f32 %v5378_v15, %v5378_v15 }
 0x7ce   : > { %v5405_v16 = vadd.f32 %v5404_v48, %v5403_v2  ;;  %v5418_v36 = vsel %vm419_vm1, %v5392_v19, 0.0  ;;  %v5395_v53 = vmul.f32 %v5379_v51, %v5379_v51  ;;  %v13813_v48 = vld [vmem:[#allocation36_spill] sm:$0xff] }
 0x7cf   : > { %v5420_v12 = vsel %vm419_vm1, %v5393_v58, 0.0  ;;  %v5396_v7 = vmul.f32 %v5380_v5, %v5380_v5  ;;  %v5422_v10 = vsel %vm419_vm1, %v5394_v6, 0.0 }
 0x7d0   : > { %v5407_v17 = vadd.f32 %v5406_v35, %v5405_v16  ;;  %v5424_v49 = vsel %vm419_vm1, %v5395_v53, 0.0  ;;  %v13814_v16 = vld [vmem:[#allocation76_spill] sm:$0xff] }
 0x7d1   : > { %v5426_v31 = vsel %vm419_vm1, %v5396_v7, 0.0  ;;  %v3192_v62 = vmul.f32 %v13814_v16, %v13813_v48  ;;  %v13815_v35 = vld [vmem:[#allocation104_spill] sm:$0xff]  ;;  %v13824_v7 = vld [vmem:[#allocation103_spill] sm:$0xff] }
 0x7d2   : > { %v5409_v29 = vadd.f32 %v5408_v40, %v5407_v17  ;;  %v3193_v17 = vmul.f32 %v13814_v16, %v13815_v35  ;;  %v13817_v40 = vld [vmem:[#allocation8_spill] sm:$0xff] }
 0x7d4   : > { %v5411_v24 = vadd.f32 %v5410_v43, %v5409_v29  ;;  %v3195_v29 = vmul.f32 %v13814_v16, %v13817_v40  ;;  %v3196_v43 = vmul.f32 %v13814_v16, %v13818_v18 }
 0x7d6   : > { %v5413_v56 = vadd.f32 %v5412_v28, %v5411_v24 }
 0x7d8   : > { %v5415_v54 = vadd.f32 %v5414_v46, %v5413_v56 }
 0x7da   : > { %v5417_v9 = vadd.f32 %v5416_v23, %v5415_v54 }
 0x7dc   : > { %v5419_v4 = vadd.f32 %v5418_v36, %v5417_v9 }
 0x7de   : > { %v5421_v44 = vadd.f32 %v5420_v12, %v5419_v4  ;;  %v13820_v4 = vld [vmem:[#allocation33_spill] sm:$0xff] }
 0x7df   : > { %v13821_v12 = vld [vmem:[#allocation9_spill] sm:$0xff] }
 0x7e0   : > { %v5423_v0 = vadd.f32 %v5422_v10, %v5421_v44 }
 0x7e2   : > { %v5425_v38 = vadd.f32 %v5424_v49, %v5423_v0  ;;  %v13825_v0 = vld [vmem:[#allocation75_spill] sm:$0xff] }
 0x7e4   : > { %v5427_v20 = vadd.f32 %v5426_v31, %v5425_v38  ;;  %v13826_v38 = vld [vmem:[#allocation87_spill] sm:$0xff] }
 0x7e6   : > { %v5428_v63 = vrot.slane %v5427_v20, 4 }
 0x7e8   : > { %v5429_v55 = vadd.f32 %v5428_v63, %v5427_v20  ;;  %v13827_v20 = vld [vmem:[#allocation16_spill] sm:$0xff] }
 0x7ea   : > { %v5430_v47 = vrot.slane %v5429_v55, 2 }
 0x7ec   : > { %v5431_v57 = vadd.f32 %v5430_v47, %v5429_v55  ;;  %v13828_v55 = vld [vmem:[#allocation97_spill] sm:$0xff] }
 0x7ee   : > { %v5432_v3 = vrot.slane %v5431_v57, 1 }
 0x7f0   : > { %v5433_v39 = vadd.f32 %v5432_v3, %v5431_v57  ;;  %v13829_v57 = vld [vmem:[#allocation95_spill] sm:$0xff] }
 0x7f2   : > { %v5434_v50 = vmul.f32 %v5433_v39, %v13812_v27  ;;  %v3194_v27 = vmul.f32 %v13814_v16, %v13816_v13 }
 0x7f4   : > { %v5435_v21 = vadd.f32 1e-05, %v5434_v50 }
 0x7f6   : > { %7041 = vrsqrt.f32 %v5435_v21  ;;  %vm5442_vm7 = vweird.f32 %v5435_v21 }
 0x7fc   : > { %v7042_v25 = vpop.eup %7041 }
 0x7fd   : > { %v5437_v30 = vmul.f32 %v7042_v25, %v5435_v21  ;;  %vm5443_vm6 = vweird.f32 %v7042_v25 }
 0x7fe   : > { %vm5444_vm11 = vmor %vm5442_vm7, %vm5443_vm6 }
 0x7ff   : > { %v5438_v41 = vmul.f32 %v7042_v25, %v5437_v30 }
 0x801   : > { %v5439_v11 = vmul.f32 0.5, %v5438_v41 }
 0x803   : > { %v5440_v2 = vsub.f32 1.5, %v5439_v11 }
 0x805   : > { %v5441_v42 = vmul.f32 %v7042_v25, %v5440_v2 }
 0x807   : > { %v5445_v24 = vsel %vm5444_vm11, %v7042_v25, %v5441_v42 }
 0x808   : > { %v5446_v59 = vmul.f32 %v5445_v24, %v12785_v61  ;;  %v5447_v28 = vmul.f32 %v5445_v24, %v12788_v45  ;;  %v5448_v56 = vmul.f32 %v5445_v24, %v12791_v37  ;;  %v5449_v19 = vmul.f32 %v5445_v24, %v12794_v32 }
 0x809   : > { %v5450_v46 = vmul.f32 %v5445_v24, %v12797_v22  ;;  %v5451_v54 = vmul.f32 %v5445_v24, %v12805_v1  ;;  %v5452_v58 = vmul.f32 %v5445_v24, %v12811_v33  ;;  %v5453_v23 = vmul.f32 %v5445_v24, %v12816_v52 }
 0x80a   : > { %v5454_v9 = vmul.f32 %v5445_v24, %v12821_v34  ;;  %v5455_v6 = vmul.f32 %v5445_v24, %v12826_v26  ;;  %v5456_v61 = vmul.f32 %v5445_v24, %v12831_v60  ;;  %v5457_v45 = vmul.f32 %v5445_v24, %v12837_v8  ;;  %v13819_v8 = vld [vmem:[#allocation105_spill] sm:$0xff] }
 0x80b   : > { %v5458_v37 = vmul.f32 %v5445_v24, %v12843_v14  ;;  %v5459_v32 = vmul.f32 %v5445_v24, %v5378_v15  ;;  %v5460_v22 = vmul.f32 %v5445_v24, %v5379_v51  ;;  %v5461_v1 = vmul.f32 %v5445_v24, %v5380_v5  ;;  %v13822_v15 = vld [vmem:[#allocation11_spill] sm:$0xff]  ;;  %v13823_v5 = vld [vmem:[#allocation10_spill] sm:$0xff] }
 0x80c   : > { %v5462_v33 = vadd.f32 %v5446_v59, %v3192_v62  ;;  %v5463_v52 = vadd.f32 %v5447_v28, %v3193_v17  ;;  %v5464_v34 = vadd.f32 %v5448_v56, %v3194_v27  ;;  %v5465_v26 = vadd.f32 %v5449_v19, %v3195_v29 }
 0x80d   : > { %v5466_v60 = vadd.f32 %v5450_v46, %v3196_v43  ;;  %v5467_v36 = vadd.f32 %v5451_v54, %v13819_v8  ;;  %v5468_v53 = vadd.f32 %v5452_v58, %v13820_v4  ;;  %v5469_v14 = vadd.f32 %v5453_v23, %v13821_v12 }
 0x80e   : > { %v5470_v51 = vadd.f32 %v5454_v9, %v13822_v15  ;;  %v5471_v44 = vadd.f32 %v5455_v6, %v13823_v5  ;;  %v5472_v10 = vadd.f32 %v5456_v61, %v13824_v7  ;;  %v5473_v49 = vadd.f32 %v5457_v45, %v13825_v0  ;;  %5478 = vst.msk [vmem:[%s12888_s17] sm:$0xff] %vm419_vm1, %v5462_v33 }
 0x80f   : > { %v5474_v31 = vadd.f32 %v5458_v37, %v13826_v38  ;;  %v5475_v63 = vadd.f32 %v5459_v32, %v13827_v20  ;;  %v5476_v47 = vadd.f32 %v5460_v22, %v13828_v55  ;;  %v5477_v3 = vadd.f32 %v5461_v1, %v13829_v57  ;;  %5479 = vst.msk [vmem:[%s12888_s17 + $0x8] sm:$0xff] %vm419_vm1, %v5463_v52 }
 0x810   : > { %5480 = vst.msk [vmem:[%s12888_s17 + $0x10] sm:$0xff] %vm419_vm1, %v5464_v34 }
 0x811   : > { %5481 = vst.msk [vmem:[%s12888_s17 + $0x18] sm:$0xff] %vm419_vm1, %v5465_v26 }
 0x812   : > { %5482 = vst.msk [vmem:[%s12888_s17 + $0x20] sm:$0xff] %vm419_vm1, %v5466_v60 }
 0x813   : > { %5483 = vst.msk [vmem:[%s12888_s17 + $0x28] sm:$0xff] %vm419_vm1, %v5467_v36 }
 0x814   : > { %5484 = vst.msk [vmem:[%s12888_s17 + $0x30] sm:$0xff] %vm419_vm1, %v5468_v53 }
 0x815   : > { %5485 = vst.msk [vmem:[%s12888_s17 + $0x38] sm:$0xff] %vm419_vm1, %v5469_v14 }
 0x816   : > { %5486 = vst.msk [vmem:[%s12888_s17 + $0x40] sm:$0xff] %vm419_vm1, %v5470_v51 }
 0x817   : > { %5487 = vst.msk [vmem:[%s12888_s17 + $0x48] sm:$0xff] %vm419_vm1, %v5471_v44 }
 0x818   : > { %5488 = vst.msk [vmem:[%s12888_s17 + $0x50] sm:$0xff] %vm419_vm1, %v5472_v10 }
 0x819   : > { %5489 = vst.msk [vmem:[%s12888_s17 + $0x58] sm:$0xff] %vm419_vm1, %v5473_v49 }
 0x81a   : > { %5490 = vst.msk [vmem:[%s12888_s17 + $0x60] sm:$0xff] %vm419_vm1, %v5474_v31 }
 0x81b   : > { %5491 = vst.msk [vmem:[%s12888_s17 + $0x68] sm:$0xff] %vm419_vm1, %v5475_v63 }
 0x81c   : > { %5492 = vst.msk [vmem:[%s12888_s17 + $0x70] sm:$0xff] %vm419_vm1, %v5476_v47 }
 0x81d   : > { %5493 = vst.msk [vmem:[%s12888_s17 + $0x78] sm:$0xff] %vm419_vm1, %v5477_v3 }
 0x81e PF: > { %s16_s21 = sadd.s32 1, %s7049_s21  }
 0x81f   : > { %p13_p4 = scmp.ge.s32.totalorder %s16_s21, 4  }
 0x821   :  { %15 = sbr.rel (!%p13_p4) target bundleno = 1 (0x1), region = 77 }

</bundles_post_ra>
